<compile_context>
chip_gen: v6e
topology: v6e:2x2x1
jax: 0.10.0
libtpu: 0.0.40
codegen_flags: <defaults>
</compile_context>

<pallas_src>
import jax
import jax.numpy as jnp
from jax.experimental import pallas as pl
from jax.experimental.pallas import tpu as pltpu


# ----------------------------------------------------------------------------
# helpers
# ----------------------------------------------------------------------------
def _round_up(x, m):
    return ((x + m - 1) // m) * m


def _pick_tile(mp, cap=512):
    for t in (cap, 256, 128):
        if mp % t == 0:
            return min(t, mp)
    return mp


def _cparams(arbitrary=False):
    return pltpu.CompilerParams(
        dimension_semantics=(("arbitrary",) if arbitrary else ("parallel",)),
        vmem_limit_bytes=32 * 1024 * 1024,
    )


def _apply_act(y, act):
    if act == "relu":
        return jnp.maximum(y, 0.0)
    if act == "leaky":
        return jnp.where(y > 0, y, 0.2 * y)
    return y


# ----------------------------------------------------------------------------
# Pallas kernels
# ----------------------------------------------------------------------------
def _make_gemm_kernel(act, has_bias, want_stats):
    """y(Cout, TM) = W(Cout, K)bf16 @ P(K, TM)bf16, f32 accumulate.
    Optional fused bias + activation epilogue; optionally accumulates the
    per-channel sum / sum-of-squares of the raw conv output across M tiles
    (feeds the following training-mode BatchNorm)."""

    def kernel(*refs):
        w_ref, p_ref = refs[0], refs[1]
        idx = 2
        bias_ref = None
        if has_bias:
            bias_ref = refs[idx]
            idx += 1
        y_ref = refs[idx]
        idx += 1
        if want_stats:
            sum_ref, sumsq_ref = refs[idx], refs[idx + 1]

        acc = jnp.dot(w_ref[...], p_ref[...].astype(jnp.bfloat16),
                      preferred_element_type=jnp.float32)

        if want_stats:
            i = pl.program_id(0)
            s = jnp.sum(acc, axis=1, keepdims=True)
            sq = jnp.sum(acc * acc, axis=1, keepdims=True)

            @pl.when(i == 0)
            def _():
                sum_ref[...] = s
                sumsq_ref[...] = sq

            @pl.when(i > 0)
            def _():
                sum_ref[...] = sum_ref[...] + s
                sumsq_ref[...] = sumsq_ref[...] + sq

        if has_bias:
            acc = acc + bias_ref[...]
        y_ref[...] = _apply_act(acc, act)

    return kernel


def _make_conv_s1_kernel(offsets, cin_p, off_l, act, has_bias, want_stats):
    """Fused stride-1 conv: build the (k*k*cin, TM) im2col patch in a VMEM
    scratch from shifted, masked lane-slices of the flattened activation
    (no HBM im2col), then one bf16 MXU GEMM + epilogue. Single M tile."""
    n_taps = len(offsets)

    def kernel(*refs):
        w_ref, x_ref, mask_ref = refs[0], refs[1], refs[2]
        idx = 3
        bias_ref = None
        if has_bias:
            bias_ref = refs[idx]
            idx += 1
        y_ref = refs[idx]
        idx += 1
        if want_stats:
            sum_ref, sumsq_ref = refs[idx], refs[idx + 1]
            idx += 2
        patch_ref = refs[idx]

        tm = y_ref.shape[1]
        for t in range(n_taps):
            start = off_l + offsets[t]                       # static offset
            src = x_ref[:, start:start + tm]                 # (cin_p, TM)
            msk = mask_ref[t:t + 1, :]                       # (1, TM)
            patch_ref[t * cin_p:(t + 1) * cin_p, :] = src * msk

        acc = jnp.dot(w_ref[...], patch_ref[...].astype(jnp.bfloat16),
                      preferred_element_type=jnp.float32)

        if want_stats:
            sum_ref[...] = jnp.sum(acc, axis=1, keepdims=True)
            sumsq_ref[...] = jnp.sum(acc * acc, axis=1, keepdims=True)
        if has_bias:
            acc = acc + bias_ref[...]
        y_ref[...] = _apply_act(acc, act)

    return kernel


def _make_bn_kernel(count, eps, act, has_res, res_scale):
    """Training-mode BatchNorm2d (per-channel batch sum / sumsq already
    reduced) + activation (+ optional fused residual: y*res_scale + res)."""
    inv = 1.0 / float(count)

    def kernel(*refs):
        y_ref, sum_ref, sumsq_ref, g_ref, b_ref = refs[:5]
        idx = 5
        r_ref = None
        if has_res:
            r_ref = refs[idx]
            idx += 1
        o_ref = refs[idx]

        mean = sum_ref[...] * inv                  # (C, 1)
        var = sumsq_ref[...] * inv - mean * mean   # biased batch variance
        scale = g_ref[...] * jax.lax.rsqrt(var + eps)
        shift = b_ref[...] - mean * scale
        y = _apply_act(y_ref[...] * scale + shift, act)
        if has_res:
            y = y * res_scale + r_ref[...]
        o_ref[...] = y

    return kernel


# ----------------------------------------------------------------------------
# pallas_call wrappers
# ----------------------------------------------------------------------------
def _gemm(w_mat_bf16, rhs, bias=None, act=None, want_stats=False):
    """(Cout, K)bf16 @ (K, M) -> (Cout, Mp) f32, tiled lane-dense over M."""
    Cout, K = w_mat_bf16.shape
    M = rhs.shape[1]
    Mp = _round_up(M, 128)
    TM = _pick_tile(Mp)
    if Mp != M:
        rhs = jnp.pad(rhs, ((0, 0), (0, Mp - M)))
    n_tiles = Mp // TM
    has_bias = bias is not None

    in_specs = [pl.BlockSpec((Cout, K), lambda i: (0, 0)),
                pl.BlockSpec((K, TM), lambda i: (0, i))]
    args = [w_mat_bf16, rhs]
    if has_bias:
        in_specs.append(pl.BlockSpec((Cout, 1), lambda i: (0, 0)))
        args.append(jnp.asarray(bias, jnp.float32).reshape(Cout, 1))

    out_shape = [jax.ShapeDtypeStruct((Cout, Mp), jnp.float32)]
    out_specs = [pl.BlockSpec((Cout, TM), lambda i: (0, i))]
    if want_stats:
        out_shape += [jax.ShapeDtypeStruct((Cout, 1), jnp.float32)] * 2
        out_specs += [pl.BlockSpec((Cout, 1), lambda i: (0, 0))] * 2

    outs = pl.pallas_call(
        _make_gemm_kernel(act, has_bias, want_stats),
        out_shape=out_shape,
        grid=(n_tiles,),
        in_specs=in_specs,
        out_specs=out_specs,
        compiler_params=_cparams(arbitrary=want_stats),
    )(*args)
    if want_stats:
        return outs[0], outs[1], outs[2]
    return outs[0], None, None


def _im2col_T(x4, k, stride, dilation, pads):
    """Materialized transposed im2col (k*k*C, N*Ho*Wo): used only for the
    stride-2 conv and as a large-image fallback."""
    pt, pb, pleft, pright = pads
    C, N, H, W = x4.shape
    Ho = (H + pt + pb - dilation * (k - 1) - 1) // stride + 1
    Wo = (W + pleft + pright - dilation * (k - 1) - 1) // stride + 1
    xp = jnp.pad(x4, ((0, 0), (0, 0), (pt, pb), (pleft, pright)))
    taps = []
    for ki in range(k):
        for kj in range(k):
            taps.append(
                xp[:, :,
                   ki * dilation: ki * dilation + (Ho - 1) * stride + 1: stride,
                   kj * dilation: kj * dilation + (Wo - 1) * stride + 1: stride])
    patch = jnp.stack(taps, 0).reshape(k * k * C, N * Ho * Wo)
    return patch, Ho, Wo


_MAX_FUSED_COLS = 4096  # single-tile in-kernel im2col; larger M falls back to
                        # a materialized, BlockSpec-tiled im2col GEMM.


def _conv2d_s1(x4, w_oihw, *, dilation=1, pad_top=None, pad_left=None,
               bias=None, act=None, want_stats=False):
    """Stride-1 conv whose output spatial size equals the input spatial size
    (pad_top + pad_bottom == dilation*(k-1)).  Returns (y2, sum, sumsq)."""
    C, N, H, W = x4.shape
    Cout, Cin, k, _ = w_oihw.shape
    if pad_top is None:
        pad_top = dilation * (k - 1) // 2
    if pad_left is None:
        pad_left = dilation * (k - 1) // 2
    M = N * H * W
    Mp = _round_up(M, 128)

    if Mp > _MAX_FUSED_COLS:
        pads = (pad_top, dilation * (k - 1) - pad_top,
                pad_left, dilation * (k - 1) - pad_left)
        patch, _, _ = _im2col_T(x4, k, 1, dilation, pads)
        w_mat = jnp.transpose(w_oihw, (0, 2, 3, 1)).reshape(
            Cout, k * k * Cin).astype(jnp.bfloat16)
        return _gemm(w_mat, patch.astype(jnp.bfloat16),
                     bias=bias, act=act, want_stats=want_stats)

    TM = Mp
    cin_p = _round_up(Cin, 8)   # sublane-aligned per-tap slabs in the scratch

    m_idx = jnp.arange(M, dtype=jnp.int32)
    ho = (m_idx // W) % H
    wo = m_idx % W
    offs, masks = [], []
    for ki in range(k):
        for kj in range(k):
            di = ki * dilation - pad_top
            dj = kj * dilation - pad_left
            offs.append(di * W + dj)
            valid = ((ho + di >= 0) & (ho + di < H) &
                     (wo + dj >= 0) & (wo + dj < W))
            masks.append(valid.astype(jnp.float32))
    mask = jnp.stack(masks, 0)
    if Mp > M:
        mask = jnp.pad(mask, ((0, 0), (0, Mp - M)))

    off_l = max(0, -min(offs))
    off_r = max(0, max(offs)) + (Mp - M)
    x2 = jnp.pad(x4.reshape(C, M), ((0, cin_p - C), (off_l, off_r)))
    L = x2.shape[1]

    K = k * k * cin_p
    w_pad = jnp.pad(w_oihw, ((0, 0), (0, cin_p - Cin), (0, 0), (0, 0)))
    w_mat = jnp.transpose(w_pad, (0, 2, 3, 1)).reshape(Cout, K).astype(jnp.bfloat16)

    has_bias = bias is not None
    in_specs = [pl.BlockSpec((Cout, K), lambda i: (0, 0)),
                pl.BlockSpec((cin_p, L), lambda i: (0, 0)),
                pl.BlockSpec((k * k, Mp), lambda i: (0, 0))]
    args = [w_mat, x2, mask]
    if has_bias:
        in_specs.append(pl.BlockSpec((Cout, 1), lambda i: (0, 0)))
        args.append(jnp.asarray(bias, jnp.float32).reshape(Cout, 1))

    out_shape = [jax.ShapeDtypeStruct((Cout, Mp), jnp.float32)]
    out_specs = [pl.BlockSpec((Cout, TM), lambda i: (0, i))]
    if want_stats:
        out_shape += [jax.ShapeDtypeStruct((Cout, 1), jnp.float32)] * 2
        out_specs += [pl.BlockSpec((Cout, 1), lambda i: (0, 0))] * 2

    outs = pl.pallas_call(
        _make_conv_s1_kernel(tuple(offs), cin_p, off_l, act, has_bias, want_stats),
        out_shape=out_shape,
        grid=(1,),
        in_specs=in_specs,
        out_specs=out_specs,
        scratch_shapes=[pltpu.VMEM((K, TM), jnp.float32)],
        compiler_params=_cparams(arbitrary=want_stats),
    )(*args)
    if want_stats:
        return outs[0], outs[1], outs[2]
    return outs[0], None, None


def _bn_act(y2, s, sq, gamma, beta, count, act, residual2=None, res_scale=1.0,
            eps=1e-5):
    """Tiled, lane-dense BN-apply + activation (+ fused residual)."""
    C, Mp = y2.shape
    TM = _pick_tile(Mp)
    n_tiles = Mp // TM
    has_res = residual2 is not None

    in_specs = [pl.BlockSpec((C, TM), lambda i: (0, i)),
                pl.BlockSpec((C, 1), lambda i: (0, 0)),
                pl.BlockSpec((C, 1), lambda i: (0, 0)),
                pl.BlockSpec((C, 1), lambda i: (0, 0)),
                pl.BlockSpec((C, 1), lambda i: (0, 0))]
    args = [y2, s, sq,
            jnp.asarray(gamma, jnp.float32).reshape(C, 1),
            jnp.asarray(beta, jnp.float32).reshape(C, 1)]
    if has_res:
        in_specs.append(pl.BlockSpec((C, TM), lambda i: (0, i)))
        args.append(residual2)

    return pl.pallas_call(
        _make_bn_kernel(count, eps, act, has_res, float(res_scale)),
        out_shape=jax.ShapeDtypeStruct((C, Mp), jnp.float32),
        grid=(n_tiles,),
        in_specs=in_specs,
        out_specs=pl.BlockSpec((C, TM), lambda i: (0, i)),
        compiler_params=_cparams(arbitrary=False),
    )(*args)


# ----------------------------------------------------------------------------
# layer glue
# ----------------------------------------------------------------------------
def _conv_act(x4, w, bias, act):
    """Conv (no norm): bias + activation fused into the GEMM epilogue."""
    C, N, H, W = x4.shape
    Cout, Cin, k, _ = w.shape
    M = N * H * W
    if k == 1:
        w_mat = w.reshape(Cout, Cin).astype(jnp.bfloat16)
        y2, _, _ = _gemm(w_mat, x4.reshape(Cin, M), bias=bias, act=act)
    else:
        y2, _, _ = _conv2d_s1(x4, w, bias=bias, act=act)
    return y2[:, :M].reshape(Cout, N, H, W)


def _conv_bn(x4, w, bn_p, act, dilation=1, residual4=None, res_scale=1.0):
    """Conv (bias dropped: cancelled by the batch mean) + training-mode BN +
    act, with optional fused residual (bn(conv(x))*res_scale + residual)."""
    C, N, H, W = x4.shape
    Cout, Cin, k, _ = w.shape
    M = N * H * W

    if k == 3 and dilation >= H and dilation >= W:
        # With padding == dilation >= feature-map size, every non-center tap
        # always lands in the zero padding -> exactly a 1x1 conv.
        w = w[:, :, 1:2, 1:2]
        k = 1
    if k == 1:
        w_mat = w.reshape(Cout, Cin).astype(jnp.bfloat16)
        y2, s, sq = _gemm(w_mat, x4.reshape(Cin, M), want_stats=True)
    else:
        y2, s, sq = _conv2d_s1(x4, w, dilation=dilation, want_stats=True)

    res2 = None
    if residual4 is not None:
        res2 = residual4.reshape(Cout, M)
        if y2.shape[1] > M:
            res2 = jnp.pad(res2, ((0, 0), (0, y2.shape[1] - M)))

    out2 = _bn_act(y2, s, sq, bn_p["gamma"], bn_p["beta"], M, act,
                   residual2=res2, res_scale=res_scale)
    return out2[:, :M].reshape(Cout, N, H, W)


def _conv_s2_bn(x4, w, bn_p, act):
    """3x3 stride-2 conv (small materialized im2col) + BN + act."""
    C, N, H, W = x4.shape
    Cout, Cin, k, _ = w.shape
    patch, Ho, Wo = _im2col_T(x4, k, 2, 1, (1, 1, 1, 1))
    w_mat = jnp.transpose(w, (0, 2, 3, 1)).reshape(
        Cout, k * k * Cin).astype(jnp.bfloat16)
    M = N * Ho * Wo
    y2, s, sq = _gemm(w_mat, patch.astype(jnp.bfloat16), want_stats=True)
    out2 = _bn_act(y2, s, sq, bn_p["gamma"], bn_p["beta"], M, act)
    return out2[:, :M].reshape(Cout, N, Ho, Wo)


def _deconv_bn(x4, w_iohw, bn_p, act):
    """ConvTranspose2d(k=4, s=2, p=1) + BN + act, decomposed into 4 stride-1
    2x2 parity sub-convolutions (no zero-insertion)."""
    C, N, H, W = x4.shape
    Cin, Cout, _, _ = w_iohw.shape
    w_t = jnp.transpose(w_iohw, (1, 0, 2, 3))          # (Cout, Cin, 4, 4)
    M_sub = N * H * W

    ys = {}
    s_tot = sq_tot = None
    for a in (0, 1):
        for b in (0, 1):
            # output pixel (2m+a, 2l+b) uses deconv kernel rows (3-a)-2r and
            # columns (3-b)-2s, with r, s in {0, 1}.
            w_sub = w_t[:, :, [3 - a, 1 - a], :][:, :, :, [3 - b, 1 - b]]
            y2, s, sq = _conv2d_s1(x4, w_sub, pad_top=1 - a, pad_left=1 - b,
                                   want_stats=True)
            ys[(a, b)] = y2[:, :M_sub].reshape(Cout, N, H, W)
            s_tot = s if s_tot is None else s_tot + s
            sq_tot = sq if sq_tot is None else sq_tot + sq

    stacked = jnp.stack([ys[(0, 0)], ys[(0, 1)], ys[(1, 0)], ys[(1, 1)]],
                        axis=0).reshape(2, 2, Cout, N, H, W)
    # interleave parities: out[c, n, 2m+a, 2l+b] = sub[a, b][c, n, m, l]
    # TODO(synk): fuse the parity interleave into the BN-apply kernel.
    y_full = jnp.transpose(stacked, (2, 3, 4, 0, 5, 1)).reshape(
        Cout, N * 2 * H * 2 * W)
    M = N * 2 * H * 2 * W
    Mp = _round_up(M, 128)
    if Mp > M:
        y_full = jnp.pad(y_full, ((0, 0), (0, Mp - M)))
    out2 = _bn_act(y_full, s_tot, sq_tot, bn_p["gamma"], bn_p["beta"], M, act)
    return out2[:, :M].reshape(Cout, N, 2 * H, 2 * W)


# ----------------------------------------------------------------------------
# DRNet parameters + forward
# ----------------------------------------------------------------------------
def init_params(key, in_ch, out_ch, nf, n_resblocks):
    keys = iter(jax.random.split(key, 128))

    def conv_w(cin, cout, k):
        return 0.05 * jax.random.normal(next(keys), (cout, cin, k, k), jnp.float32)

    def conv_wb(cin, cout, k):
        return {"w": conv_w(cin, cout, k),
                "b": 0.01 * jax.random.normal(next(keys), (cout,), jnp.float32)}

    def deconv_w(cin, cout, k):
        return 0.05 * jax.random.normal(next(keys), (cin, cout, k, k), jnp.float32)

    def bn_p(c):
        return {"gamma": 1.0 + 0.1 * jax.random.normal(next(keys), (c,), jnp.float32),
                "beta": 0.1 * jax.random.normal(next(keys), (c,), jnp.float32)}

    # NOTE: convs immediately followed by training-mode BatchNorm carry no bias
    # here -- the batch-mean subtraction cancels it exactly (numerically
    # identical to PyTorch's conv-with-bias + BN), so the add/DMA is dropped.
    p = {
        "conv1": conv_wb(in_ch, nf, 3),
        "conv2": {"w": conv_w(nf, nf, 3)}, "bn2": bn_p(nf),
        "conv3": {"w": conv_w(nf, nf, 3)}, "bn3": bn_p(nf),
        "res": [
            {"c1": {"w": conv_w(nf, nf, 3)}, "bn1": bn_p(nf),
             "c2": {"w": conv_w(nf, nf, 3)}, "bn2": bn_p(nf)}
            for _ in range(n_resblocks)
        ],
        "deconv1": {"w": deconv_w(nf, nf, 4)}, "bn_d1": bn_p(nf),
        "deconv2": {"w": conv_w(nf, nf, 3)}, "bn_d2": bn_p(nf),
    }
    nch = nf // 4
    dil = [1, 2, 4, 8, 16, 32]
    p["dil_convs"] = ([{"w": conv_w(nf, nch, 1)}]
                      + [{"w": conv_w(nch, nch, 3)} for _ in dil]
                      + [{"w": conv_w(nch, nch, 3)}])
    p["dil_bns"] = [bn_p(nch) for _ in range(len(p["dil_convs"]))]
    p["dil_bottleneck"] = conv_wb(nch, out_ch, 1)
    return p


def drnet_forward(x_nchw, p):
    res_scale = 1.0
    x = jnp.transpose(x_nchw, (1, 0, 2, 3)).astype(jnp.float32)   # (C, N, H, W)

    # conv1: Conv(3,1,1) + ReLU (bias + ReLU fused into the GEMM epilogue)
    x = _conv_act(x, p["conv1"]["w"], p["conv1"]["b"], act="relu")
    # conv2: Conv(3,1,1) + BN + ReLU
    x = _conv_bn(x, p["conv2"]["w"], p["bn2"], act="relu")
    # conv3: Conv(3,2,1) + BN + ReLU
    x = _conv_s2_bn(x, p["conv3"]["w"], p["bn3"], act="relu")

    # residual blocks (se_reduction=None -> no SE layer)
    for rb in p["res"]:
        residual = x
        y = _conv_bn(x, rb["c1"]["w"], rb["bn1"], act="relu")
        x = _conv_bn(y, rb["c2"]["w"], rb["bn2"], act=None,
                     residual4=residual, res_scale=res_scale)

    # deconv1: ConvTranspose(4,2,1) + BN + ReLU (4 parity sub-convolutions)
    x = _deconv_bn(x, p["deconv1"]["w"], p["bn_d1"], act="relu")
    # deconv2: Conv(3,1,1) + BN + ReLU
    x = _conv_bn(x, p["deconv2"]["w"], p["bn_d2"], act="relu")

    # DilatedConvolutions (pyramid=False branch)
    dilations = [1] + [1, 2, 4, 8, 16, 32] + [1]
    for d, cw, bn in zip(dilations, p["dil_convs"], p["dil_bns"]):
        x = _conv_bn(x, cw["w"], bn, act="leaky", dilation=d)
    x = _conv_act(x, p["dil_bottleneck"]["w"], p["dil_bottleneck"]["b"], act=None)

    return jnp.transpose(x, (1, 0, 2, 3))   # -> NCHW


# TODO(synk): pyramid=True branch (PyramidPooling) and SELayer are not
# exercised with the default DRNet config and are not implemented.

if __name__ == "__main__":
    key = jax.random.PRNGKey(0)
    in_channels, out_channels, n_feats, n_resblocks = 3, 3, 32, 2
    kx, kp = jax.random.split(key)
    x = jax.random.normal(kx, (2, in_channels, 16, 16), jnp.float32)  # NCHW
    params = init_params(kp, in_channels, out_channels, n_feats, n_resblocks)

    fwd = jax.jit(drnet_forward)
    out = jax.block_until_ready(fwd(x, params))
    assert out.shape == (2, out_channels, 16, 16), out.shape
    assert bool(jnp.all(jnp.isfinite(out)))
    print("KERNEL_OK")
</pallas_src>

<mosaic_0001>
module attributes {stable_mosaic.version = 11 : i64} {
  func.func @kernel(%arg0: i32, %arg1: memref<32x72xbf16, #tpu.memory_space<vmem>>, %arg2: memref<8x546xf32, #tpu.memory_space<vmem>>, %arg3: memref<9x512xf32, #tpu.memory_space<vmem>>, %arg4: memref<32x1xf32, #tpu.memory_space<vmem>>, %arg5: memref<32x512xf32, #tpu.memory_space<vmem>>, %arg6: memref<72x512xf32, #tpu.memory_space<vmem>>) attributes {dimension_semantics = [#tpu.dimension_semantics<parallel>], iteration_bounds = array<i64: 1>, scalar_prefetch = 0 : i64, scratch_operands = 1 : i64, tpu.core_type = #tpu.core_type<tc>, window_params = [{pipeline_mode = #tpu.pipeline_mode<synchronous>, transform_indices = @transform_0, window_bounds = array<i64: 32, 72>}, {pipeline_mode = #tpu.pipeline_mode<synchronous>, transform_indices = @transform_1, window_bounds = array<i64: 8, 546>}, {pipeline_mode = #tpu.pipeline_mode<synchronous>, transform_indices = @transform_2, window_bounds = array<i64: 9, 512>}, {pipeline_mode = #tpu.pipeline_mode<synchronous>, transform_indices = @transform_3, window_bounds = array<i64: 32, 1>}, {transform_indices = @transform_4, window_bounds = array<i64: 32, 512>}]} {
    %c0 = arith.constant 0 : index
    %c0_0 = arith.constant 0 : index
    %0 = vector.load %arg2[%c0, %c0_0] : memref<8x546xf32, #tpu.memory_space<vmem>>, vector<8x512xf32>
    %c0_1 = arith.constant 0 : index
    %c0_2 = arith.constant 0 : index
    %1 = vector.load %arg3[%c0_1, %c0_2] : memref<9x512xf32, #tpu.memory_space<vmem>>, vector<1x512xf32>
    %2 = vector.broadcast %1 : vector<1x512xf32> to vector<8x512xf32>
    %3 = arith.mulf %0, %2 : vector<8x512xf32>
    %c0_3 = arith.constant 0 : index
    %c0_4 = arith.constant 0 : index
    %4 = vector.load %arg6[%c0_3, %c0_4] : memref<72x512xf32, #tpu.memory_space<vmem>>, vector<8x512xf32>
    tpu.vector_store %arg6[%c0_3, %c0_4], %3 {strides = array<i32>} : memref<72x512xf32, #tpu.memory_space<vmem>>, vector<8x512xf32>,
    %c0_5 = arith.constant 0 : index
    %c1 = arith.constant 1 : index
    %5 = vector.load %arg2[%c0_5, %c1] : memref<8x546xf32, #tpu.memory_space<vmem>>, vector<8x512xf32>
    %c1_6 = arith.constant 1 : index
    %c0_7 = arith.constant 0 : index
    %6 = vector.load %arg3[%c1_6, %c0_7] : memref<9x512xf32, #tpu.memory_space<vmem>>, vector<1x512xf32>
    %7 = vector.broadcast %6 : vector<1x512xf32> to vector<8x512xf32>
    %8 = arith.mulf %5, %7 : vector<8x512xf32>
    %c8 = arith.constant 8 : index
    %c0_8 = arith.constant 0 : index
    %9 = vector.load %arg6[%c8, %c0_8] : memref<72x512xf32, #tpu.memory_space<vmem>>, vector<8x512xf32>
    tpu.vector_store %arg6[%c8, %c0_8], %8 {strides = array<i32>} : memref<72x512xf32, #tpu.memory_space<vmem>>, vector<8x512xf32>,
    %c0_9 = arith.constant 0 : index
    %c2 = arith.constant 2 : index
    %10 = vector.load %arg2[%c0_9, %c2] : memref<8x546xf32, #tpu.memory_space<vmem>>, vector<8x512xf32>
    %c2_10 = arith.constant 2 : index
    %c0_11 = arith.constant 0 : index
    %11 = vector.load %arg3[%c2_10, %c0_11] : memref<9x512xf32, #tpu.memory_space<vmem>>, vector<1x512xf32>
    %12 = vector.broadcast %11 : vector<1x512xf32> to vector<8x512xf32>
    %13 = arith.mulf %10, %12 : vector<8x512xf32>
    %c16 = arith.constant 16 : index
    %c0_12 = arith.constant 0 : index
    %14 = vector.load %arg6[%c16, %c0_12] : memref<72x512xf32, #tpu.memory_space<vmem>>, vector<8x512xf32>
    tpu.vector_store %arg6[%c16, %c0_12], %13 {strides = array<i32>} : memref<72x512xf32, #tpu.memory_space<vmem>>, vector<8x512xf32>,
    %c0_13 = arith.constant 0 : index
    %c16_14 = arith.constant 16 : index
    %15 = vector.load %arg2[%c0_13, %c16_14] : memref<8x546xf32, #tpu.memory_space<vmem>>, vector<8x512xf32>
    %c3 = arith.constant 3 : index
    %c0_15 = arith.constant 0 : index
    %16 = vector.load %arg3[%c3, %c0_15] : memref<9x512xf32, #tpu.memory_space<vmem>>, vector<1x512xf32>
    %17 = vector.broadcast %16 : vector<1x512xf32> to vector<8x512xf32>
    %18 = arith.mulf %15, %17 : vector<8x512xf32>
    %c24 = arith.constant 24 : index
    %c0_16 = arith.constant 0 : index
    %19 = vector.load %arg6[%c24, %c0_16] : memref<72x512xf32, #tpu.memory_space<vmem>>, vector<8x512xf32>
    tpu.vector_store %arg6[%c24, %c0_16], %18 {strides = array<i32>} : memref<72x512xf32, #tpu.memory_space<vmem>>, vector<8x512xf32>,
    %c0_17 = arith.constant 0 : index
    %c17 = arith.constant 17 : index
    %20 = vector.load %arg2[%c0_17, %c17] : memref<8x546xf32, #tpu.memory_space<vmem>>, vector<8x512xf32>
    %c4 = arith.constant 4 : index
    %c0_18 = arith.constant 0 : index
    %21 = vector.load %arg3[%c4, %c0_18] : memref<9x512xf32, #tpu.memory_space<vmem>>, vector<1x512xf32>
    %22 = vector.broadcast %21 : vector<1x512xf32> to vector<8x512xf32>
    %23 = arith.mulf %20, %22 : vector<8x512xf32>
    %c32 = arith.constant 32 : index
    %c0_19 = arith.constant 0 : index
    %24 = vector.load %arg6[%c32, %c0_19] : memref<72x512xf32, #tpu.memory_space<vmem>>, vector<8x512xf32>
    tpu.vector_store %arg6[%c32, %c0_19], %23 {strides = array<i32>} : memref<72x512xf32, #tpu.memory_space<vmem>>, vector<8x512xf32>,
    %c0_20 = arith.constant 0 : index
    %c18 = arith.constant 18 : index
    %25 = vector.load %arg2[%c0_20, %c18] : memref<8x546xf32, #tpu.memory_space<vmem>>, vector<8x512xf32>
    %c5 = arith.constant 5 : index
    %c0_21 = arith.constant 0 : index
    %26 = vector.load %arg3[%c5, %c0_21] : memref<9x512xf32, #tpu.memory_space<vmem>>, vector<1x512xf32>
    %27 = vector.broadcast %26 : vector<1x512xf32> to vector<8x512xf32>
    %28 = arith.mulf %25, %27 : vector<8x512xf32>
    %c40 = arith.constant 40 : index
    %c0_22 = arith.constant 0 : index
    %29 = vector.load %arg6[%c40, %c0_22] : memref<72x512xf32, #tpu.memory_space<vmem>>, vector<8x512xf32>
    tpu.vector_store %arg6[%c40, %c0_22], %28 {strides = array<i32>} : memref<72x512xf32, #tpu.memory_space<vmem>>, vector<8x512xf32>,
    %c0_23 = arith.constant 0 : index
    %c32_24 = arith.constant 32 : index
    %30 = vector.load %arg2[%c0_23, %c32_24] : memref<8x546xf32, #tpu.memory_space<vmem>>, vector<8x512xf32>
    %c6 = arith.constant 6 : index
    %c0_25 = arith.constant 0 : index
    %31 = vector.load %arg3[%c6, %c0_25] : memref<9x512xf32, #tpu.memory_space<vmem>>, vector<1x512xf32>
    %32 = vector.broadcast %31 : vector<1x512xf32> to vector<8x512xf32>
    %33 = arith.mulf %30, %32 : vector<8x512xf32>
    %c48 = arith.constant 48 : index
    %c0_26 = arith.constant 0 : index
    %34 = vector.load %arg6[%c48, %c0_26] : memref<72x512xf32, #tpu.memory_space<vmem>>, vector<8x512xf32>
    tpu.vector_store %arg6[%c48, %c0_26], %33 {strides = array<i32>} : memref<72x512xf32, #tpu.memory_space<vmem>>, vector<8x512xf32>,
    %c0_27 = arith.constant 0 : index
    %c33 = arith.constant 33 : index
    %35 = vector.load %arg2[%c0_27, %c33] : memref<8x546xf32, #tpu.memory_space<vmem>>, vector<8x512xf32>
    %c7 = arith.constant 7 : index
    %c0_28 = arith.constant 0 : index
    %36 = vector.load %arg3[%c7, %c0_28] : memref<9x512xf32, #tpu.memory_space<vmem>>, vector<1x512xf32>
    %37 = vector.broadcast %36 : vector<1x512xf32> to vector<8x512xf32>
    %38 = arith.mulf %35, %37 : vector<8x512xf32>
    %c56 = arith.constant 56 : index
    %c0_29 = arith.constant 0 : index
    %39 = vector.load %arg6[%c56, %c0_29] : memref<72x512xf32, #tpu.memory_space<vmem>>, vector<8x512xf32>
    tpu.vector_store %arg6[%c56, %c0_29], %38 {strides = array<i32>} : memref<72x512xf32, #tpu.memory_space<vmem>>, vector<8x512xf32>,
    %c0_30 = arith.constant 0 : index
    %c34 = arith.constant 34 : index
    %40 = vector.load %arg2[%c0_30, %c34] : memref<8x546xf32, #tpu.memory_space<vmem>>, vector<8x512xf32>
    %c8_31 = arith.constant 8 : index
    %c0_32 = arith.constant 0 : index
    %41 = vector.load %arg3[%c8_31, %c0_32] : memref<9x512xf32, #tpu.memory_space<vmem>>, vector<1x512xf32>
    %42 = vector.broadcast %41 : vector<1x512xf32> to vector<8x512xf32>
    %43 = arith.mulf %40, %42 : vector<8x512xf32>
    %c64 = arith.constant 64 : index
    %c0_33 = arith.constant 0 : index
    %44 = vector.load %arg6[%c64, %c0_33] : memref<72x512xf32, #tpu.memory_space<vmem>>, vector<8x512xf32>
    tpu.vector_store %arg6[%c64, %c0_33], %43 {strides = array<i32>} : memref<72x512xf32, #tpu.memory_space<vmem>>, vector<8x512xf32>,
    %c0_34 = arith.constant 0 : index
    %c0_35 = arith.constant 0 : index
    %45 = vector.load %arg1[%c0_34, %c0_35] : memref<32x72xbf16, #tpu.memory_space<vmem>>, vector<32x72xbf16>
    %c0_36 = arith.constant 0 : index
    %c0_37 = arith.constant 0 : index
    %46 = vector.load %arg6[%c0_36, %c0_37] : memref<72x512xf32, #tpu.memory_space<vmem>>, vector<72x512xf32>
    %47 = arith.truncf %46 : vector<72x512xf32> to vector<72x512xbf16>
    %cst = arith.constant dense<0.000000e+00> : vector<32x512xf32>
    %48 = tpu.matmul %45, %47, %cst {dimension_numbers = #tpu.dot_dimension_numbers<[1], [0], [0], [1], [0, 0, 1, 1], [], []>} : vector<32x72xbf16>, vector<72x512xbf16>, vector<32x512xf32> -> vector<32x512xf32>
    %c0_38 = arith.constant 0 : index
    %c0_39 = arith.constant 0 : index
    %49 = vector.load %arg4[%c0_38, %c0_39] : memref<32x1xf32, #tpu.memory_space<vmem>>, vector<32x1xf32>
    %50 = vector.broadcast %49 : vector<32x1xf32> to vector<32x512xf32>
    %51 = arith.addf %48, %50 : vector<32x512xf32>
    %cst_40 = arith.constant 0.000000e+00 : f32
    %52 = vector.broadcast %cst_40 : f32 to vector<32x512xf32>
    %53 = arith.maximumf %51, %52 : vector<32x512xf32>
    %c0_41 = arith.constant 0 : index
    %c0_42 = arith.constant 0 : index
    %54 = vector.load %arg5[%c0_41, %c0_42] : memref<32x512xf32, #tpu.memory_space<vmem>>, vector<32x512xf32>
    tpu.vector_store %arg5[%c0_41, %c0_42], %53 {strides = array<i32>} : memref<32x512xf32, #tpu.memory_space<vmem>>, vector<32x512xf32>,
    return
  }
  func.func @transform_0(%arg0: i32) -> (i32, i32) {
    %c0_i32 = arith.constant 0 : i32
    %c0_i32_0 = arith.constant 0 : i32
    %c0_i32_1 = arith.constant 0 : i32
    return %c0_i32, %c0_i32_0 : i32, i32
  }
  func.func @transform_1(%arg0: i32) -> (i32, i32) {
    %c0_i32 = arith.constant 0 : i32
    %c0_i32_0 = arith.constant 0 : i32
    %c0_i32_1 = arith.constant 0 : i32
    return %c0_i32, %c0_i32_0 : i32, i32
  }
  func.func @transform_2(%arg0: i32) -> (i32, i32) {
    %c0_i32 = arith.constant 0 : i32
    %c0_i32_0 = arith.constant 0 : i32
    %c0_i32_1 = arith.constant 0 : i32
    return %c0_i32, %c0_i32_0 : i32, i32
  }
  func.func @transform_3(%arg0: i32) -> (i32, i32) {
    %c0_i32 = arith.constant 0 : i32
    %c0_i32_0 = arith.constant 0 : i32
    %c0_i32_1 = arith.constant 0 : i32
    return %c0_i32, %c0_i32_0 : i32, i32
  }
  func.func @transform_4(%arg0: i32) -> (i32, i32) {
    %c0_i32 = arith.constant 0 : i32
    %c0_i32_0 = arith.constant 0 : i32
    return %c0_i32, %arg0 : i32, i32
  }
}

module attributes {stable_mosaic.version = 11 : i64} {
  func.func @kernel(%arg0: i32, %arg1: memref<32x288xbf16, #tpu.memory_space<vmem>>, %arg2: memref<32x546xf32, #tpu.memory_space<vmem>>, %arg3: memref<9x512xf32, #tpu.memory_space<vmem>>, %arg4: memref<32x512xf32, #tpu.memory_space<vmem>>, %arg5: memref<32x1xf32, #tpu.memory_space<vmem>>, %arg6: memref<32x1xf32, #tpu.memory_space<vmem>>, %arg7: memref<288x512xf32, #tpu.memory_space<vmem>>) attributes {dimension_semantics = [#tpu.dimension_semantics<arbitrary>], iteration_bounds = array<i64: 1>, scalar_prefetch = 0 : i64, scratch_operands = 1 : i64, tpu.core_type = #tpu.core_type<tc>, window_params = [{pipeline_mode = #tpu.pipeline_mode<synchronous>, transform_indices = @transform_0, window_bounds = array<i64: 32, 288>}, {pipeline_mode = #tpu.pipeline_mode<synchronous>, transform_indices = @transform_1, window_bounds = array<i64: 32, 546>}, {pipeline_mode = #tpu.pipeline_mode<synchronous>, transform_indices = @transform_2, window_bounds = array<i64: 9, 512>}, {transform_indices = @transform_3, window_bounds = array<i64: 32, 512>}, {pipeline_mode = #tpu.pipeline_mode<synchronous>, transform_indices = @transform_4, window_bounds = array<i64: 32, 1>}, {pipeline_mode = #tpu.pipeline_mode<synchronous>, transform_indices = @transform_5, window_bounds = array<i64: 32, 1>}]} {
    %c0 = arith.constant 0 : index
    %c0_0 = arith.constant 0 : index
    %0 = vector.load %arg2[%c0, %c0_0] : memref<32x546xf32, #tpu.memory_space<vmem>>, vector<32x512xf32>
    %c0_1 = arith.constant 0 : index
    %c0_2 = arith.constant 0 : index
    %1 = vector.load %arg3[%c0_1, %c0_2] : memref<9x512xf32, #tpu.memory_space<vmem>>, vector<1x512xf32>
    %2 = vector.broadcast %1 : vector<1x512xf32> to vector<32x512xf32>
    %3 = arith.mulf %0, %2 : vector<32x512xf32>
    %c0_3 = arith.constant 0 : index
    %c0_4 = arith.constant 0 : index
    %4 = vector.load %arg7[%c0_3, %c0_4] : memref<288x512xf32, #tpu.memory_space<vmem>>, vector<32x512xf32>
    tpu.vector_store %arg7[%c0_3, %c0_4], %3 {strides = array<i32>} : memref<288x512xf32, #tpu.memory_space<vmem>>, vector<32x512xf32>,
    %c0_5 = arith.constant 0 : index
    %c1 = arith.constant 1 : index
    %5 = vector.load %arg2[%c0_5, %c1] : memref<32x546xf32, #tpu.memory_space<vmem>>, vector<32x512xf32>
    %c1_6 = arith.constant 1 : index
    %c0_7 = arith.constant 0 : index
    %6 = vector.load %arg3[%c1_6, %c0_7] : memref<9x512xf32, #tpu.memory_space<vmem>>, vector<1x512xf32>
    %7 = vector.broadcast %6 : vector<1x512xf32> to vector<32x512xf32>
    %8 = arith.mulf %5, %7 : vector<32x512xf32>
    %c32 = arith.constant 32 : index
    %c0_8 = arith.constant 0 : index
    %9 = vector.load %arg7[%c32, %c0_8] : memref<288x512xf32, #tpu.memory_space<vmem>>, vector<32x512xf32>
    tpu.vector_store %arg7[%c32, %c0_8], %8 {strides = array<i32>} : memref<288x512xf32, #tpu.memory_space<vmem>>, vector<32x512xf32>,
    %c0_9 = arith.constant 0 : index
    %c2 = arith.constant 2 : index
    %10 = vector.load %arg2[%c0_9, %c2] : memref<32x546xf32, #tpu.memory_space<vmem>>, vector<32x512xf32>
    %c2_10 = arith.constant 2 : index
    %c0_11 = arith.constant 0 : index
    %11 = vector.load %arg3[%c2_10, %c0_11] : memref<9x512xf32, #tpu.memory_space<vmem>>, vector<1x512xf32>
    %12 = vector.broadcast %11 : vector<1x512xf32> to vector<32x512xf32>
    %13 = arith.mulf %10, %12 : vector<32x512xf32>
    %c64 = arith.constant 64 : index
    %c0_12 = arith.constant 0 : index
    %14 = vector.load %arg7[%c64, %c0_12] : memref<288x512xf32, #tpu.memory_space<vmem>>, vector<32x512xf32>
    tpu.vector_store %arg7[%c64, %c0_12], %13 {strides = array<i32>} : memref<288x512xf32, #tpu.memory_space<vmem>>, vector<32x512xf32>,
    %c0_13 = arith.constant 0 : index
    %c16 = arith.constant 16 : index
    %15 = vector.load %arg2[%c0_13, %c16] : memref<32x546xf32, #tpu.memory_space<vmem>>, vector<32x512xf32>
    %c3 = arith.constant 3 : index
    %c0_14 = arith.constant 0 : index
    %16 = vector.load %arg3[%c3, %c0_14] : memref<9x512xf32, #tpu.memory_space<vmem>>, vector<1x512xf32>
    %17 = vector.broadcast %16 : vector<1x512xf32> to vector<32x512xf32>
    %18 = arith.mulf %15, %17 : vector<32x512xf32>
    %c96 = arith.constant 96 : index
    %c0_15 = arith.constant 0 : index
    %19 = vector.load %arg7[%c96, %c0_15] : memref<288x512xf32, #tpu.memory_space<vmem>>, vector<32x512xf32>
    tpu.vector_store %arg7[%c96, %c0_15], %18 {strides = array<i32>} : memref<288x512xf32, #tpu.memory_space<vmem>>, vector<32x512xf32>,
    %c0_16 = arith.constant 0 : index
    %c17 = arith.constant 17 : index
    %20 = vector.load %arg2[%c0_16, %c17] : memref<32x546xf32, #tpu.memory_space<vmem>>, vector<32x512xf32>
    %c4 = arith.constant 4 : index
    %c0_17 = arith.constant 0 : index
    %21 = vector.load %arg3[%c4, %c0_17] : memref<9x512xf32, #tpu.memory_space<vmem>>, vector<1x512xf32>
    %22 = vector.broadcast %21 : vector<1x512xf32> to vector<32x512xf32>
    %23 = arith.mulf %20, %22 : vector<32x512xf32>
    %c128 = arith.constant 128 : index
    %c0_18 = arith.constant 0 : index
    %24 = vector.load %arg7[%c128, %c0_18] : memref<288x512xf32, #tpu.memory_space<vmem>>, vector<32x512xf32>
    tpu.vector_store %arg7[%c128, %c0_18], %23 {strides = array<i32>} : memref<288x512xf32, #tpu.memory_space<vmem>>, vector<32x512xf32>,
    %c0_19 = arith.constant 0 : index
    %c18 = arith.constant 18 : index
    %25 = vector.load %arg2[%c0_19, %c18] : memref<32x546xf32, #tpu.memory_space<vmem>>, vector<32x512xf32>
    %c5 = arith.constant 5 : index
    %c0_20 = arith.constant 0 : index
    %26 = vector.load %arg3[%c5, %c0_20] : memref<9x512xf32, #tpu.memory_space<vmem>>, vector<1x512xf32>
    %27 = vector.broadcast %26 : vector<1x512xf32> to vector<32x512xf32>
    %28 = arith.mulf %25, %27 : vector<32x512xf32>
    %c160 = arith.constant 160 : index
    %c0_21 = arith.constant 0 : index
    %29 = vector.load %arg7[%c160, %c0_21] : memref<288x512xf32, #tpu.memory_space<vmem>>, vector<32x512xf32>
    tpu.vector_store %arg7[%c160, %c0_21], %28 {strides = array<i32>} : memref<288x512xf32, #tpu.memory_space<vmem>>, vector<32x512xf32>,
    %c0_22 = arith.constant 0 : index
    %c32_23 = arith.constant 32 : index
    %30 = vector.load %arg2[%c0_22, %c32_23] : memref<32x546xf32, #tpu.memory_space<vmem>>, vector<32x512xf32>
    %c6 = arith.constant 6 : index
    %c0_24 = arith.constant 0 : index
    %31 = vector.load %arg3[%c6, %c0_24] : memref<9x512xf32, #tpu.memory_space<vmem>>, vector<1x512xf32>
    %32 = vector.broadcast %31 : vector<1x512xf32> to vector<32x512xf32>
    %33 = arith.mulf %30, %32 : vector<32x512xf32>
    %c192 = arith.constant 192 : index
    %c0_25 = arith.constant 0 : index
    %34 = vector.load %arg7[%c192, %c0_25] : memref<288x512xf32, #tpu.memory_space<vmem>>, vector<32x512xf32>
    tpu.vector_store %arg7[%c192, %c0_25], %33 {strides = array<i32>} : memref<288x512xf32, #tpu.memory_space<vmem>>, vector<32x512xf32>,
    %c0_26 = arith.constant 0 : index
    %c33 = arith.constant 33 : index
    %35 = vector.load %arg2[%c0_26, %c33] : memref<32x546xf32, #tpu.memory_space<vmem>>, vector<32x512xf32>
    %c7 = arith.constant 7 : index
    %c0_27 = arith.constant 0 : index
    %36 = vector.load %arg3[%c7, %c0_27] : memref<9x512xf32, #tpu.memory_space<vmem>>, vector<1x512xf32>
    %37 = vector.broadcast %36 : vector<1x512xf32> to vector<32x512xf32>
    %38 = arith.mulf %35, %37 : vector<32x512xf32>
    %c224 = arith.constant 224 : index
    %c0_28 = arith.constant 0 : index
    %39 = vector.load %arg7[%c224, %c0_28] : memref<288x512xf32, #tpu.memory_space<vmem>>, vector<32x512xf32>
    tpu.vector_store %arg7[%c224, %c0_28], %38 {strides = array<i32>} : memref<288x512xf32, #tpu.memory_space<vmem>>, vector<32x512xf32>,
    %c0_29 = arith.constant 0 : index
    %c34 = arith.constant 34 : index
    %40 = vector.load %arg2[%c0_29, %c34] : memref<32x546xf32, #tpu.memory_space<vmem>>, vector<32x512xf32>
    %c8 = arith.constant 8 : index
    %c0_30 = arith.constant 0 : index
    %41 = vector.load %arg3[%c8, %c0_30] : memref<9x512xf32, #tpu.memory_space<vmem>>, vector<1x512xf32>
    %42 = vector.broadcast %41 : vector<1x512xf32> to vector<32x512xf32>
    %43 = arith.mulf %40, %42 : vector<32x512xf32>
    %c256 = arith.constant 256 : index
    %c0_31 = arith.constant 0 : index
    %44 = vector.load %arg7[%c256, %c0_31] : memref<288x512xf32, #tpu.memory_space<vmem>>, vector<32x512xf32>
    tpu.vector_store %arg7[%c256, %c0_31], %43 {strides = array<i32>} : memref<288x512xf32, #tpu.memory_space<vmem>>, vector<32x512xf32>,
    %c0_32 = arith.constant 0 : index
    %c0_33 = arith.constant 0 : index
    %45 = vector.load %arg1[%c0_32, %c0_33] : memref<32x288xbf16, #tpu.memory_space<vmem>>, vector<32x288xbf16>
    %c0_34 = arith.constant 0 : index
    %c0_35 = arith.constant 0 : index
    %46 = vector.load %arg7[%c0_34, %c0_35] : memref<288x512xf32, #tpu.memory_space<vmem>>, vector<288x512xf32>
    %47 = arith.truncf %46 : vector<288x512xf32> to vector<288x512xbf16>
    %cst = arith.constant dense<0.000000e+00> : vector<32x512xf32>
    %48 = tpu.matmul %45, %47, %cst {dimension_numbers = #tpu.dot_dimension_numbers<[1], [0], [0], [1], [0, 0, 1, 1], [], []>} : vector<32x288xbf16>, vector<288x512xbf16>, vector<32x512xf32> -> vector<32x512xf32>
    %cst_36 = arith.constant dense<0.000000e+00> : vector<32xf32>
    %49 = vector.multi_reduction <add>, %48, %cst_36 [1] : vector<32x512xf32> to vector<32xf32>
    %50 = vector.shape_cast %49 : vector<32xf32> to vector<32x1xf32>
    %c0_37 = arith.constant 0 : index
    %c0_38 = arith.constant 0 : index
    %51 = vector.load %arg5[%c0_37, %c0_38] : memref<32x1xf32, #tpu.memory_space<vmem>>, vector<32x1xf32>
    tpu.vector_store %arg5[%c0_37, %c0_38], %50 {strides = array<i32>} : memref<32x1xf32, #tpu.memory_space<vmem>>, vector<32x1xf32>,
    %52 = arith.mulf %48, %48 : vector<32x512xf32>
    %cst_39 = arith.constant dense<0.000000e+00> : vector<32xf32>
    %53 = vector.multi_reduction <add>, %52, %cst_39 [1] : vector<32x512xf32> to vector<32xf32>
    %54 = vector.shape_cast %53 : vector<32xf32> to vector<32x1xf32>
    %c0_40 = arith.constant 0 : index
    %c0_41 = arith.constant 0 : index
    %55 = vector.load %arg6[%c0_40, %c0_41] : memref<32x1xf32, #tpu.memory_space<vmem>>, vector<32x1xf32>
    tpu.vector_store %arg6[%c0_40, %c0_41], %54 {strides = array<i32>} : memref<32x1xf32, #tpu.memory_space<vmem>>, vector<32x1xf32>,
    %c0_42 = arith.constant 0 : index
    %c0_43 = arith.constant 0 : index
    %56 = vector.load %arg4[%c0_42, %c0_43] : memref<32x512xf32, #tpu.memory_space<vmem>>, vector<32x512xf32>
    tpu.vector_store %arg4[%c0_42, %c0_43], %48 {strides = array<i32>} : memref<32x512xf32, #tpu.memory_space<vmem>>, vector<32x512xf32>,
    return
  }
  func.func @transform_0(%arg0: i32) -> (i32, i32) {
    %c0_i32 = arith.constant 0 : i32
    %c0_i32_0 = arith.constant 0 : i32
    %c0_i32_1 = arith.constant 0 : i32
    return %c0_i32, %c0_i32_0 : i32, i32
  }
  func.func @transform_1(%arg0: i32) -> (i32, i32) {
    %c0_i32 = arith.constant 0 : i32
    %c0_i32_0 = arith.constant 0 : i32
    %c0_i32_1 = arith.constant 0 : i32
    return %c0_i32, %c0_i32_0 : i32, i32
  }
  func.func @transform_2(%arg0: i32) -> (i32, i32) {
    %c0_i32 = arith.constant 0 : i32
    %c0_i32_0 = arith.constant 0 : i32
    %c0_i32_1 = arith.constant 0 : i32
    return %c0_i32, %c0_i32_0 : i32, i32
  }
  func.func @transform_3(%arg0: i32) -> (i32, i32) {
    %c0_i32 = arith.constant 0 : i32
    %c0_i32_0 = arith.constant 0 : i32
    return %c0_i32, %arg0 : i32, i32
  }
  func.func @transform_4(%arg0: i32) -> (i32, i32) {
    %c0_i32 = arith.constant 0 : i32
    %c0_i32_0 = arith.constant 0 : i32
    %c0_i32_1 = arith.constant 0 : i32
    return %c0_i32, %c0_i32_0 : i32, i32
  }
  func.func @transform_5(%arg0: i32) -> (i32, i32) {
    %c0_i32 = arith.constant 0 : i32
    %c0_i32_0 = arith.constant 0 : i32
    %c0_i32_1 = arith.constant 0 : i32
    return %c0_i32, %c0_i32_0 : i32, i32
  }
}

module attributes {stable_mosaic.version = 11 : i64} {
  func.func @kernel(%arg0: i32, %arg1: memref<32x512xf32, #tpu.memory_space<vmem>>, %arg2: memref<32x1xf32, #tpu.memory_space<vmem>>, %arg3: memref<32x1xf32, #tpu.memory_space<vmem>>, %arg4: memref<32x1xf32, #tpu.memory_space<vmem>>, %arg5: memref<32x1xf32, #tpu.memory_space<vmem>>, %arg6: memref<32x512xf32, #tpu.memory_space<vmem>>) attributes {dimension_semantics = [#tpu.dimension_semantics<parallel>], iteration_bounds = array<i64: 1>, scalar_prefetch = 0 : i64, scratch_operands = 0 : i64, tpu.core_type = #tpu.core_type<tc>, window_params = [{transform_indices = @transform_0, window_bounds = array<i64: 32, 512>}, {pipeline_mode = #tpu.pipeline_mode<synchronous>, transform_indices = @transform_1, window_bounds = array<i64: 32, 1>}, {pipeline_mode = #tpu.pipeline_mode<synchronous>, transform_indices = @transform_2, window_bounds = array<i64: 32, 1>}, {pipeline_mode = #tpu.pipeline_mode<synchronous>, transform_indices = @transform_3, window_bounds = array<i64: 32, 1>}, {pipeline_mode = #tpu.pipeline_mode<synchronous>, transform_indices = @transform_4, window_bounds = array<i64: 32, 1>}, {transform_indices = @transform_5, window_bounds = array<i64: 32, 512>}]} {
    %c0 = arith.constant 0 : index
    %c0_0 = arith.constant 0 : index
    %0 = vector.load %arg2[%c0, %c0_0] : memref<32x1xf32, #tpu.memory_space<vmem>>, vector<32x1xf32>
    %cst = arith.constant 0.001953125 : f32
    %1 = vector.broadcast %cst : f32 to vector<32x1xf32>
    %2 = arith.mulf %0, %1 : vector<32x1xf32>
    %c0_1 = arith.constant 0 : index
    %c0_2 = arith.constant 0 : index
    %3 = vector.load %arg3[%c0_1, %c0_2] : memref<32x1xf32, #tpu.memory_space<vmem>>, vector<32x1xf32>
    %cst_3 = arith.constant 0.001953125 : f32
    %4 = vector.broadcast %cst_3 : f32 to vector<32x1xf32>
    %5 = arith.mulf %3, %4 : vector<32x1xf32>
    %6 = arith.mulf %2, %2 : vector<32x1xf32>
    %7 = arith.subf %5, %6 : vector<32x1xf32>
    %c0_4 = arith.constant 0 : index
    %c0_5 = arith.constant 0 : index
    %8 = vector.load %arg4[%c0_4, %c0_5] : memref<32x1xf32, #tpu.memory_space<vmem>>, vector<32x1xf32>
    %cst_6 = arith.constant 9.99999974E-6 : f32
    %9 = vector.broadcast %cst_6 : f32 to vector<32x1xf32>
    %10 = arith.addf %7, %9 : vector<32x1xf32>
    %11 = math.rsqrt %10 : vector<32x1xf32>
    %12 = arith.mulf %8, %11 : vector<32x1xf32>
    %c0_7 = arith.constant 0 : index
    %c0_8 = arith.constant 0 : index
    %13 = vector.load %arg5[%c0_7, %c0_8] : memref<32x1xf32, #tpu.memory_space<vmem>>, vector<32x1xf32>
    %14 = arith.mulf %2, %12 : vector<32x1xf32>
    %15 = arith.subf %13, %14 : vector<32x1xf32>
    %c0_9 = arith.constant 0 : index
    %c0_10 = arith.constant 0 : index
    %16 = vector.load %arg1[%c0_9, %c0_10] : memref<32x512xf32, #tpu.memory_space<vmem>>, vector<32x512xf32>
    %17 = vector.broadcast %12 : vector<32x1xf32> to vector<32x512xf32>
    %18 = arith.mulf %16, %17 : vector<32x512xf32>
    %19 = vector.broadcast %15 : vector<32x1xf32> to vector<32x512xf32>
    %20 = arith.addf %18, %19 : vector<32x512xf32>
    %cst_11 = arith.constant 0.000000e+00 : f32
    %21 = vector.broadcast %cst_11 : f32 to vector<32x512xf32>
    %22 = arith.maximumf %20, %21 : vector<32x512xf32>
    %c0_12 = arith.constant 0 : index
    %c0_13 = arith.constant 0 : index
    %23 = vector.load %arg6[%c0_12, %c0_13] : memref<32x512xf32, #tpu.memory_space<vmem>>, vector<32x512xf32>
    tpu.vector_store %arg6[%c0_12, %c0_13], %22 {strides = array<i32>} : memref<32x512xf32, #tpu.memory_space<vmem>>, vector<32x512xf32>,
    return
  }
  func.func @transform_0(%arg0: i32) -> (i32, i32) {
    %c0_i32 = arith.constant 0 : i32
    %c0_i32_0 = arith.constant 0 : i32
    return %c0_i32, %arg0 : i32, i32
  }
  func.func @transform_1(%arg0: i32) -> (i32, i32) {
    %c0_i32 = arith.constant 0 : i32
    %c0_i32_0 = arith.constant 0 : i32
    %c0_i32_1 = arith.constant 0 : i32
    return %c0_i32, %c0_i32_0 : i32, i32
  }
  func.func @transform_2(%arg0: i32) -> (i32, i32) {
    %c0_i32 = arith.constant 0 : i32
    %c0_i32_0 = arith.constant 0 : i32
    %c0_i32_1 = arith.constant 0 : i32
    return %c0_i32, %c0_i32_0 : i32, i32
  }
  func.func @transform_3(%arg0: i32) -> (i32, i32) {
    %c0_i32 = arith.constant 0 : i32
    %c0_i32_0 = arith.constant 0 : i32
    %c0_i32_1 = arith.constant 0 : i32
    return %c0_i32, %c0_i32_0 : i32, i32
  }
  func.func @transform_4(%arg0: i32) -> (i32, i32) {
    %c0_i32 = arith.constant 0 : i32
    %c0_i32_0 = arith.constant 0 : i32
    %c0_i32_1 = arith.constant 0 : i32
    return %c0_i32, %c0_i32_0 : i32, i32
  }
  func.func @transform_5(%arg0: i32) -> (i32, i32) {
    %c0_i32 = arith.constant 0 : i32
    %c0_i32_0 = arith.constant 0 : i32
    return %c0_i32, %arg0 : i32, i32
  }
}

module attributes {stable_mosaic.version = 11 : i64} {
  func.func @kernel(%arg0: i32, %arg1: memref<32x288xbf16, #tpu.memory_space<vmem>>, %arg2: memref<288x128xbf16, #tpu.memory_space<vmem>>, %arg3: memref<32x128xf32, #tpu.memory_space<vmem>>, %arg4: memref<32x1xf32, #tpu.memory_space<vmem>>, %arg5: memref<32x1xf32, #tpu.memory_space<vmem>>) attributes {dimension_semantics = [#tpu.dimension_semantics<arbitrary>], iteration_bounds = array<i64: 1>, scalar_prefetch = 0 : i64, scratch_operands = 0 : i64, tpu.core_type = #tpu.core_type<tc>, window_params = [{pipeline_mode = #tpu.pipeline_mode<synchronous>, transform_indices = @transform_0, window_bounds = array<i64: 32, 288>}, {transform_indices = @transform_1, window_bounds = array<i64: 288, 128>}, {transform_indices = @transform_2, window_bounds = array<i64: 32, 128>}, {pipeline_mode = #tpu.pipeline_mode<synchronous>, transform_indices = @transform_3, window_bounds = array<i64: 32, 1>}, {pipeline_mode = #tpu.pipeline_mode<synchronous>, transform_indices = @transform_4, window_bounds = array<i64: 32, 1>}]} {
    %c0 = arith.constant 0 : index
    %c0_0 = arith.constant 0 : index
    %0 = vector.load %arg1[%c0, %c0_0] : memref<32x288xbf16, #tpu.memory_space<vmem>>, vector<32x288xbf16>
    %c0_1 = arith.constant 0 : index
    %c0_2 = arith.constant 0 : index
    %1 = vector.load %arg2[%c0_1, %c0_2] : memref<288x128xbf16, #tpu.memory_space<vmem>>, vector<288x128xbf16>
    %cst = arith.constant dense<0.000000e+00> : vector<32x128xf32>
    %2 = tpu.matmul %0, %1, %cst {dimension_numbers = #tpu.dot_dimension_numbers<[1], [0], [0], [1], [0, 0, 1, 1], [], []>} : vector<32x288xbf16>, vector<288x128xbf16>, vector<32x128xf32> -> vector<32x128xf32>
    %cst_3 = arith.constant dense<0.000000e+00> : vector<32xf32>
    %3 = vector.multi_reduction <add>, %2, %cst_3 [1] : vector<32x128xf32> to vector<32xf32>
    %4 = vector.shape_cast %3 : vector<32xf32> to vector<32x1xf32>
    %5 = arith.mulf %2, %2 : vector<32x128xf32>
    %cst_4 = arith.constant dense<0.000000e+00> : vector<32xf32>
    %6 = vector.multi_reduction <add>, %5, %cst_4 [1] : vector<32x128xf32> to vector<32xf32>
    %7 = vector.shape_cast %6 : vector<32xf32> to vector<32x1xf32>
    %c0_i32 = arith.constant 0 : i32
    %8 = arith.cmpi eq, %arg0, %c0_i32 : i32
    %9 = arith.extui %8 : i1 to i32
    %c0_i32_5 = arith.constant 0 : i32
    %10 = arith.cmpi ne, %9, %c0_i32_5 : i32
    scf.if %10 {
      %c0_10 = arith.constant 0 : index
      %c0_11 = arith.constant 0 : index
      %15 = vector.load %arg4[%c0_10, %c0_11] : memref<32x1xf32, #tpu.memory_space<vmem>>, vector<32x1xf32>
      tpu.vector_store %arg4[%c0_10, %c0_11], %4 {strides = array<i32>} : memref<32x1xf32, #tpu.memory_space<vmem>>, vector<32x1xf32>,
      %c0_12 = arith.constant 0 : index
      %c0_13 = arith.constant 0 : index
      %16 = vector.load %arg5[%c0_12, %c0_13] : memref<32x1xf32, #tpu.memory_space<vmem>>, vector<32x1xf32>
      tpu.vector_store %arg5[%c0_12, %c0_13], %7 {strides = array<i32>} : memref<32x1xf32, #tpu.memory_space<vmem>>, vector<32x1xf32>,
    } else {
    }
    %c0_i32_6 = arith.constant 0 : i32
    %11 = arith.cmpi sgt, %arg0, %c0_i32_6 : i32
    %12 = arith.extui %11 : i1 to i32
    %c0_i32_7 = arith.constant 0 : i32
    %13 = arith.cmpi ne, %12, %c0_i32_7 : i32
    scf.if %13 {
      %c0_10 = arith.constant 0 : index
      %c0_11 = arith.constant 0 : index
      %15 = vector.load %arg4[%c0_10, %c0_11] : memref<32x1xf32, #tpu.memory_space<vmem>>, vector<32x1xf32>
      %16 = arith.addf %15, %4 : vector<32x1xf32>
      %c0_12 = arith.constant 0 : index
      %c0_13 = arith.constant 0 : index
      %17 = vector.load %arg4[%c0_12, %c0_13] : memref<32x1xf32, #tpu.memory_space<vmem>>, vector<32x1xf32>
      tpu.vector_store %arg4[%c0_12, %c0_13], %16 {strides = array<i32>} : memref<32x1xf32, #tpu.memory_space<vmem>>, vector<32x1xf32>,
      %c0_14 = arith.constant 0 : index
      %c0_15 = arith.constant 0 : index
      %18 = vector.load %arg5[%c0_14, %c0_15] : memref<32x1xf32, #tpu.memory_space<vmem>>, vector<32x1xf32>
      %19 = arith.addf %18, %7 : vector<32x1xf32>
      %c0_16 = arith.constant 0 : index
      %c0_17 = arith.constant 0 : index
      %20 = vector.load %arg5[%c0_16, %c0_17] : memref<32x1xf32, #tpu.memory_space<vmem>>, vector<32x1xf32>
      tpu.vector_store %arg5[%c0_16, %c0_17], %19 {strides = array<i32>} : memref<32x1xf32, #tpu.memory_space<vmem>>, vector<32x1xf32>,
    } else {
    }
    %c0_8 = arith.constant 0 : index
    %c0_9 = arith.constant 0 : index
    %14 = vector.load %arg3[%c0_8, %c0_9] : memref<32x128xf32, #tpu.memory_space<vmem>>, vector<32x128xf32>
    tpu.vector_store %arg3[%c0_8, %c0_9], %2 {strides = array<i32>} : memref<32x128xf32, #tpu.memory_space<vmem>>, vector<32x128xf32>,
    return
  }
  func.func @transform_0(%arg0: i32) -> (i32, i32) {
    %c0_i32 = arith.constant 0 : i32
    %c0_i32_0 = arith.constant 0 : i32
    %c0_i32_1 = arith.constant 0 : i32
    return %c0_i32, %c0_i32_0 : i32, i32
  }
  func.func @transform_1(%arg0: i32) -> (i32, i32) {
    %c0_i32 = arith.constant 0 : i32
    %c0_i32_0 = arith.constant 0 : i32
    return %c0_i32, %arg0 : i32, i32
  }
  func.func @transform_2(%arg0: i32) -> (i32, i32) {
    %c0_i32 = arith.constant 0 : i32
    %c0_i32_0 = arith.constant 0 : i32
    return %c0_i32, %arg0 : i32, i32
  }
  func.func @transform_3(%arg0: i32) -> (i32, i32) {
    %c0_i32 = arith.constant 0 : i32
    %c0_i32_0 = arith.constant 0 : i32
    %c0_i32_1 = arith.constant 0 : i32
    return %c0_i32, %c0_i32_0 : i32, i32
  }
  func.func @transform_4(%arg0: i32) -> (i32, i32) {
    %c0_i32 = arith.constant 0 : i32
    %c0_i32_0 = arith.constant 0 : i32
    %c0_i32_1 = arith.constant 0 : i32
    return %c0_i32, %c0_i32_0 : i32, i32
  }
}

module attributes {stable_mosaic.version = 11 : i64} {
  func.func @kernel(%arg0: i32, %arg1: memref<32x128xf32, #tpu.memory_space<vmem>>, %arg2: memref<32x1xf32, #tpu.memory_space<vmem>>, %arg3: memref<32x1xf32, #tpu.memory_space<vmem>>, %arg4: memref<32x1xf32, #tpu.memory_space<vmem>>, %arg5: memref<32x1xf32, #tpu.memory_space<vmem>>, %arg6: memref<32x128xf32, #tpu.memory_space<vmem>>) attributes {dimension_semantics = [#tpu.dimension_semantics<parallel>], iteration_bounds = array<i64: 1>, scalar_prefetch = 0 : i64, scratch_operands = 0 : i64, tpu.core_type = #tpu.core_type<tc>, window_params = [{transform_indices = @transform_0, window_bounds = array<i64: 32, 128>}, {pipeline_mode = #tpu.pipeline_mode<synchronous>, transform_indices = @transform_1, window_bounds = array<i64: 32, 1>}, {pipeline_mode = #tpu.pipeline_mode<synchronous>, transform_indices = @transform_2, window_bounds = array<i64: 32, 1>}, {pipeline_mode = #tpu.pipeline_mode<synchronous>, transform_indices = @transform_3, window_bounds = array<i64: 32, 1>}, {pipeline_mode = #tpu.pipeline_mode<synchronous>, transform_indices = @transform_4, window_bounds = array<i64: 32, 1>}, {transform_indices = @transform_5, window_bounds = array<i64: 32, 128>}]} {
    %c0 = arith.constant 0 : index
    %c0_0 = arith.constant 0 : index
    %0 = vector.load %arg2[%c0, %c0_0] : memref<32x1xf32, #tpu.memory_space<vmem>>, vector<32x1xf32>
    %cst = arith.constant 7.812500e-03 : f32
    %1 = vector.broadcast %cst : f32 to vector<32x1xf32>
    %2 = arith.mulf %0, %1 : vector<32x1xf32>
    %c0_1 = arith.constant 0 : index
    %c0_2 = arith.constant 0 : index
    %3 = vector.load %arg3[%c0_1, %c0_2] : memref<32x1xf32, #tpu.memory_space<vmem>>, vector<32x1xf32>
    %cst_3 = arith.constant 7.812500e-03 : f32
    %4 = vector.broadcast %cst_3 : f32 to vector<32x1xf32>
    %5 = arith.mulf %3, %4 : vector<32x1xf32>
    %6 = arith.mulf %2, %2 : vector<32x1xf32>
    %7 = arith.subf %5, %6 : vector<32x1xf32>
    %c0_4 = arith.constant 0 : index
    %c0_5 = arith.constant 0 : index
    %8 = vector.load %arg4[%c0_4, %c0_5] : memref<32x1xf32, #tpu.memory_space<vmem>>, vector<32x1xf32>
    %cst_6 = arith.constant 9.99999974E-6 : f32
    %9 = vector.broadcast %cst_6 : f32 to vector<32x1xf32>
    %10 = arith.addf %7, %9 : vector<32x1xf32>
    %11 = math.rsqrt %10 : vector<32x1xf32>
    %12 = arith.mulf %8, %11 : vector<32x1xf32>
    %c0_7 = arith.constant 0 : index
    %c0_8 = arith.constant 0 : index
    %13 = vector.load %arg5[%c0_7, %c0_8] : memref<32x1xf32, #tpu.memory_space<vmem>>, vector<32x1xf32>
    %14 = arith.mulf %2, %12 : vector<32x1xf32>
    %15 = arith.subf %13, %14 : vector<32x1xf32>
    %c0_9 = arith.constant 0 : index
    %c0_10 = arith.constant 0 : index
    %16 = vector.load %arg1[%c0_9, %c0_10] : memref<32x128xf32, #tpu.memory_space<vmem>>, vector<32x128xf32>
    %17 = vector.broadcast %12 : vector<32x1xf32> to vector<32x128xf32>
    %18 = arith.mulf %16, %17 : vector<32x128xf32>
    %19 = vector.broadcast %15 : vector<32x1xf32> to vector<32x128xf32>
    %20 = arith.addf %18, %19 : vector<32x128xf32>
    %cst_11 = arith.constant 0.000000e+00 : f32
    %21 = vector.broadcast %cst_11 : f32 to vector<32x128xf32>
    %22 = arith.maximumf %20, %21 : vector<32x128xf32>
    %c0_12 = arith.constant 0 : index
    %c0_13 = arith.constant 0 : index
    %23 = vector.load %arg6[%c0_12, %c0_13] : memref<32x128xf32, #tpu.memory_space<vmem>>, vector<32x128xf32>
    tpu.vector_store %arg6[%c0_12, %c0_13], %22 {strides = array<i32>} : memref<32x128xf32, #tpu.memory_space<vmem>>, vector<32x128xf32>,
    return
  }
  func.func @transform_0(%arg0: i32) -> (i32, i32) {
    %c0_i32 = arith.constant 0 : i32
    %c0_i32_0 = arith.constant 0 : i32
    return %c0_i32, %arg0 : i32, i32
  }
  func.func @transform_1(%arg0: i32) -> (i32, i32) {
    %c0_i32 = arith.constant 0 : i32
    %c0_i32_0 = arith.constant 0 : i32
    %c0_i32_1 = arith.constant 0 : i32
    return %c0_i32, %c0_i32_0 : i32, i32
  }
  func.func @transform_2(%arg0: i32) -> (i32, i32) {
    %c0_i32 = arith.constant 0 : i32
    %c0_i32_0 = arith.constant 0 : i32
    %c0_i32_1 = arith.constant 0 : i32
    return %c0_i32, %c0_i32_0 : i32, i32
  }
  func.func @transform_3(%arg0: i32) -> (i32, i32) {
    %c0_i32 = arith.constant 0 : i32
    %c0_i32_0 = arith.constant 0 : i32
    %c0_i32_1 = arith.constant 0 : i32
    return %c0_i32, %c0_i32_0 : i32, i32
  }
  func.func @transform_4(%arg0: i32) -> (i32, i32) {
    %c0_i32 = arith.constant 0 : i32
    %c0_i32_0 = arith.constant 0 : i32
    %c0_i32_1 = arith.constant 0 : i32
    return %c0_i32, %c0_i32_0 : i32, i32
  }
  func.func @transform_5(%arg0: i32) -> (i32, i32) {
    %c0_i32 = arith.constant 0 : i32
    %c0_i32_0 = arith.constant 0 : i32
    return %c0_i32, %arg0 : i32, i32
  }
}

module attributes {stable_mosaic.version = 11 : i64} {
  func.func @kernel(%arg0: i32, %arg1: memref<32x288xbf16, #tpu.memory_space<vmem>>, %arg2: memref<32x146xf32, #tpu.memory_space<vmem>>, %arg3: memref<9x128xf32, #tpu.memory_space<vmem>>, %arg4: memref<32x128xf32, #tpu.memory_space<vmem>>, %arg5: memref<32x1xf32, #tpu.memory_space<vmem>>, %arg6: memref<32x1xf32, #tpu.memory_space<vmem>>, %arg7: memref<288x128xf32, #tpu.memory_space<vmem>>) attributes {dimension_semantics = [#tpu.dimension_semantics<arbitrary>], iteration_bounds = array<i64: 1>, scalar_prefetch = 0 : i64, scratch_operands = 1 : i64, tpu.core_type = #tpu.core_type<tc>, window_params = [{pipeline_mode = #tpu.pipeline_mode<synchronous>, transform_indices = @transform_0, window_bounds = array<i64: 32, 288>}, {pipeline_mode = #tpu.pipeline_mode<synchronous>, transform_indices = @transform_1, window_bounds = array<i64: 32, 146>}, {pipeline_mode = #tpu.pipeline_mode<synchronous>, transform_indices = @transform_2, window_bounds = array<i64: 9, 128>}, {transform_indices = @transform_3, window_bounds = array<i64: 32, 128>}, {pipeline_mode = #tpu.pipeline_mode<synchronous>, transform_indices = @transform_4, window_bounds = array<i64: 32, 1>}, {pipeline_mode = #tpu.pipeline_mode<synchronous>, transform_indices = @transform_5, window_bounds = array<i64: 32, 1>}]} {
    %c0 = arith.constant 0 : index
    %c0_0 = arith.constant 0 : index
    %0 = vector.load %arg2[%c0, %c0_0] : memref<32x146xf32, #tpu.memory_space<vmem>>, vector<32x128xf32>
    %c0_1 = arith.constant 0 : index
    %c0_2 = arith.constant 0 : index
    %1 = vector.load %arg3[%c0_1, %c0_2] : memref<9x128xf32, #tpu.memory_space<vmem>>, vector<1x128xf32>
    %2 = vector.broadcast %1 : vector<1x128xf32> to vector<32x128xf32>
    %3 = arith.mulf %0, %2 : vector<32x128xf32>
    %c0_3 = arith.constant 0 : index
    %c0_4 = arith.constant 0 : index
    %4 = vector.load %arg7[%c0_3, %c0_4] : memref<288x128xf32, #tpu.memory_space<vmem>>, vector<32x128xf32>
    tpu.vector_store %arg7[%c0_3, %c0_4], %3 {strides = array<i32>} : memref<288x128xf32, #tpu.memory_space<vmem>>, vector<32x128xf32>,
    %c0_5 = arith.constant 0 : index
    %c1 = arith.constant 1 : index
    %5 = vector.load %arg2[%c0_5, %c1] : memref<32x146xf32, #tpu.memory_space<vmem>>, vector<32x128xf32>
    %c1_6 = arith.constant 1 : index
    %c0_7 = arith.constant 0 : index
    %6 = vector.load %arg3[%c1_6, %c0_7] : memref<9x128xf32, #tpu.memory_space<vmem>>, vector<1x128xf32>
    %7 = vector.broadcast %6 : vector<1x128xf32> to vector<32x128xf32>
    %8 = arith.mulf %5, %7 : vector<32x128xf32>
    %c32 = arith.constant 32 : index
    %c0_8 = arith.constant 0 : index
    %9 = vector.load %arg7[%c32, %c0_8] : memref<288x128xf32, #tpu.memory_space<vmem>>, vector<32x128xf32>
    tpu.vector_store %arg7[%c32, %c0_8], %8 {strides = array<i32>} : memref<288x128xf32, #tpu.memory_space<vmem>>, vector<32x128xf32>,
    %c0_9 = arith.constant 0 : index
    %c2 = arith.constant 2 : index
    %10 = vector.load %arg2[%c0_9, %c2] : memref<32x146xf32, #tpu.memory_space<vmem>>, vector<32x128xf32>
    %c2_10 = arith.constant 2 : index
    %c0_11 = arith.constant 0 : index
    %11 = vector.load %arg3[%c2_10, %c0_11] : memref<9x128xf32, #tpu.memory_space<vmem>>, vector<1x128xf32>
    %12 = vector.broadcast %11 : vector<1x128xf32> to vector<32x128xf32>
    %13 = arith.mulf %10, %12 : vector<32x128xf32>
    %c64 = arith.constant 64 : index
    %c0_12 = arith.constant 0 : index
    %14 = vector.load %arg7[%c64, %c0_12] : memref<288x128xf32, #tpu.memory_space<vmem>>, vector<32x128xf32>
    tpu.vector_store %arg7[%c64, %c0_12], %13 {strides = array<i32>} : memref<288x128xf32, #tpu.memory_space<vmem>>, vector<32x128xf32>,
    %c0_13 = arith.constant 0 : index
    %c8 = arith.constant 8 : index
    %15 = vector.load %arg2[%c0_13, %c8] : memref<32x146xf32, #tpu.memory_space<vmem>>, vector<32x128xf32>
    %c3 = arith.constant 3 : index
    %c0_14 = arith.constant 0 : index
    %16 = vector.load %arg3[%c3, %c0_14] : memref<9x128xf32, #tpu.memory_space<vmem>>, vector<1x128xf32>
    %17 = vector.broadcast %16 : vector<1x128xf32> to vector<32x128xf32>
    %18 = arith.mulf %15, %17 : vector<32x128xf32>
    %c96 = arith.constant 96 : index
    %c0_15 = arith.constant 0 : index
    %19 = vector.load %arg7[%c96, %c0_15] : memref<288x128xf32, #tpu.memory_space<vmem>>, vector<32x128xf32>
    tpu.vector_store %arg7[%c96, %c0_15], %18 {strides = array<i32>} : memref<288x128xf32, #tpu.memory_space<vmem>>, vector<32x128xf32>,
    %c0_16 = arith.constant 0 : index
    %c9 = arith.constant 9 : index
    %20 = vector.load %arg2[%c0_16, %c9] : memref<32x146xf32, #tpu.memory_space<vmem>>, vector<32x128xf32>
    %c4 = arith.constant 4 : index
    %c0_17 = arith.constant 0 : index
    %21 = vector.load %arg3[%c4, %c0_17] : memref<9x128xf32, #tpu.memory_space<vmem>>, vector<1x128xf32>
    %22 = vector.broadcast %21 : vector<1x128xf32> to vector<32x128xf32>
    %23 = arith.mulf %20, %22 : vector<32x128xf32>
    %c128 = arith.constant 128 : index
    %c0_18 = arith.constant 0 : index
    %24 = vector.load %arg7[%c128, %c0_18] : memref<288x128xf32, #tpu.memory_space<vmem>>, vector<32x128xf32>
    tpu.vector_store %arg7[%c128, %c0_18], %23 {strides = array<i32>} : memref<288x128xf32, #tpu.memory_space<vmem>>, vector<32x128xf32>,
    %c0_19 = arith.constant 0 : index
    %c10 = arith.constant 10 : index
    %25 = vector.load %arg2[%c0_19, %c10] : memref<32x146xf32, #tpu.memory_space<vmem>>, vector<32x128xf32>
    %c5 = arith.constant 5 : index
    %c0_20 = arith.constant 0 : index
    %26 = vector.load %arg3[%c5, %c0_20] : memref<9x128xf32, #tpu.memory_space<vmem>>, vector<1x128xf32>
    %27 = vector.broadcast %26 : vector<1x128xf32> to vector<32x128xf32>
    %28 = arith.mulf %25, %27 : vector<32x128xf32>
    %c160 = arith.constant 160 : index
    %c0_21 = arith.constant 0 : index
    %29 = vector.load %arg7[%c160, %c0_21] : memref<288x128xf32, #tpu.memory_space<vmem>>, vector<32x128xf32>
    tpu.vector_store %arg7[%c160, %c0_21], %28 {strides = array<i32>} : memref<288x128xf32, #tpu.memory_space<vmem>>, vector<32x128xf32>,
    %c0_22 = arith.constant 0 : index
    %c16 = arith.constant 16 : index
    %30 = vector.load %arg2[%c0_22, %c16] : memref<32x146xf32, #tpu.memory_space<vmem>>, vector<32x128xf32>
    %c6 = arith.constant 6 : index
    %c0_23 = arith.constant 0 : index
    %31 = vector.load %arg3[%c6, %c0_23] : memref<9x128xf32, #tpu.memory_space<vmem>>, vector<1x128xf32>
    %32 = vector.broadcast %31 : vector<1x128xf32> to vector<32x128xf32>
    %33 = arith.mulf %30, %32 : vector<32x128xf32>
    %c192 = arith.constant 192 : index
    %c0_24 = arith.constant 0 : index
    %34 = vector.load %arg7[%c192, %c0_24] : memref<288x128xf32, #tpu.memory_space<vmem>>, vector<32x128xf32>
    tpu.vector_store %arg7[%c192, %c0_24], %33 {strides = array<i32>} : memref<288x128xf32, #tpu.memory_space<vmem>>, vector<32x128xf32>,
    %c0_25 = arith.constant 0 : index
    %c17 = arith.constant 17 : index
    %35 = vector.load %arg2[%c0_25, %c17] : memref<32x146xf32, #tpu.memory_space<vmem>>, vector<32x128xf32>
    %c7 = arith.constant 7 : index
    %c0_26 = arith.constant 0 : index
    %36 = vector.load %arg3[%c7, %c0_26] : memref<9x128xf32, #tpu.memory_space<vmem>>, vector<1x128xf32>
    %37 = vector.broadcast %36 : vector<1x128xf32> to vector<32x128xf32>
    %38 = arith.mulf %35, %37 : vector<32x128xf32>
    %c224 = arith.constant 224 : index
    %c0_27 = arith.constant 0 : index
    %39 = vector.load %arg7[%c224, %c0_27] : memref<288x128xf32, #tpu.memory_space<vmem>>, vector<32x128xf32>
    tpu.vector_store %arg7[%c224, %c0_27], %38 {strides = array<i32>} : memref<288x128xf32, #tpu.memory_space<vmem>>, vector<32x128xf32>,
    %c0_28 = arith.constant 0 : index
    %c18 = arith.constant 18 : index
    %40 = vector.load %arg2[%c0_28, %c18] : memref<32x146xf32, #tpu.memory_space<vmem>>, vector<32x128xf32>
    %c8_29 = arith.constant 8 : index
    %c0_30 = arith.constant 0 : index
    %41 = vector.load %arg3[%c8_29, %c0_30] : memref<9x128xf32, #tpu.memory_space<vmem>>, vector<1x128xf32>
    %42 = vector.broadcast %41 : vector<1x128xf32> to vector<32x128xf32>
    %43 = arith.mulf %40, %42 : vector<32x128xf32>
    %c256 = arith.constant 256 : index
    %c0_31 = arith.constant 0 : index
    %44 = vector.load %arg7[%c256, %c0_31] : memref<288x128xf32, #tpu.memory_space<vmem>>, vector<32x128xf32>
    tpu.vector_store %arg7[%c256, %c0_31], %43 {strides = array<i32>} : memref<288x128xf32, #tpu.memory_space<vmem>>, vector<32x128xf32>,
    %c0_32 = arith.constant 0 : index
    %c0_33 = arith.constant 0 : index
    %45 = vector.load %arg1[%c0_32, %c0_33] : memref<32x288xbf16, #tpu.memory_space<vmem>>, vector<32x288xbf16>
    %c0_34 = arith.constant 0 : index
    %c0_35 = arith.constant 0 : index
    %46 = vector.load %arg7[%c0_34, %c0_35] : memref<288x128xf32, #tpu.memory_space<vmem>>, vector<288x128xf32>
    %47 = arith.truncf %46 : vector<288x128xf32> to vector<288x128xbf16>
    %cst = arith.constant dense<0.000000e+00> : vector<32x128xf32>
    %48 = tpu.matmul %45, %47, %cst {dimension_numbers = #tpu.dot_dimension_numbers<[1], [0], [0], [1], [0, 0, 1, 1], [], []>} : vector<32x288xbf16>, vector<288x128xbf16>, vector<32x128xf32> -> vector<32x128xf32>
    %cst_36 = arith.constant dense<0.000000e+00> : vector<32xf32>
    %49 = vector.multi_reduction <add>, %48, %cst_36 [1] : vector<32x128xf32> to vector<32xf32>
    %50 = vector.shape_cast %49 : vector<32xf32> to vector<32x1xf32>
    %c0_37 = arith.constant 0 : index
    %c0_38 = arith.constant 0 : index
    %51 = vector.load %arg5[%c0_37, %c0_38] : memref<32x1xf32, #tpu.memory_space<vmem>>, vector<32x1xf32>
    tpu.vector_store %arg5[%c0_37, %c0_38], %50 {strides = array<i32>} : memref<32x1xf32, #tpu.memory_space<vmem>>, vector<32x1xf32>,
    %52 = arith.mulf %48, %48 : vector<32x128xf32>
    %cst_39 = arith.constant dense<0.000000e+00> : vector<32xf32>
    %53 = vector.multi_reduction <add>, %52, %cst_39 [1] : vector<32x128xf32> to vector<32xf32>
    %54 = vector.shape_cast %53 : vector<32xf32> to vector<32x1xf32>
    %c0_40 = arith.constant 0 : index
    %c0_41 = arith.constant 0 : index
    %55 = vector.load %arg6[%c0_40, %c0_41] : memref<32x1xf32, #tpu.memory_space<vmem>>, vector<32x1xf32>
    tpu.vector_store %arg6[%c0_40, %c0_41], %54 {strides = array<i32>} : memref<32x1xf32, #tpu.memory_space<vmem>>, vector<32x1xf32>,
    %c0_42 = arith.constant 0 : index
    %c0_43 = arith.constant 0 : index
    %56 = vector.load %arg4[%c0_42, %c0_43] : memref<32x128xf32, #tpu.memory_space<vmem>>, vector<32x128xf32>
    tpu.vector_store %arg4[%c0_42, %c0_43], %48 {strides = array<i32>} : memref<32x128xf32, #tpu.memory_space<vmem>>, vector<32x128xf32>,
    return
  }
  func.func @transform_0(%arg0: i32) -> (i32, i32) {
    %c0_i32 = arith.constant 0 : i32
    %c0_i32_0 = arith.constant 0 : i32
    %c0_i32_1 = arith.constant 0 : i32
    return %c0_i32, %c0_i32_0 : i32, i32
  }
  func.func @transform_1(%arg0: i32) -> (i32, i32) {
    %c0_i32 = arith.constant 0 : i32
    %c0_i32_0 = arith.constant 0 : i32
    %c0_i32_1 = arith.constant 0 : i32
    return %c0_i32, %c0_i32_0 : i32, i32
  }
  func.func @transform_2(%arg0: i32) -> (i32, i32) {
    %c0_i32 = arith.constant 0 : i32
    %c0_i32_0 = arith.constant 0 : i32
    %c0_i32_1 = arith.constant 0 : i32
    return %c0_i32, %c0_i32_0 : i32, i32
  }
  func.func @transform_3(%arg0: i32) -> (i32, i32) {
    %c0_i32 = arith.constant 0 : i32
    %c0_i32_0 = arith.constant 0 : i32
    return %c0_i32, %arg0 : i32, i32
  }
  func.func @transform_4(%arg0: i32) -> (i32, i32) {
    %c0_i32 = arith.constant 0 : i32
    %c0_i32_0 = arith.constant 0 : i32
    %c0_i32_1 = arith.constant 0 : i32
    return %c0_i32, %c0_i32_0 : i32, i32
  }
  func.func @transform_5(%arg0: i32) -> (i32, i32) {
    %c0_i32 = arith.constant 0 : i32
    %c0_i32_0 = arith.constant 0 : i32
    %c0_i32_1 = arith.constant 0 : i32
    return %c0_i32, %c0_i32_0 : i32, i32
  }
}

module attributes {stable_mosaic.version = 11 : i64} {
  func.func @kernel(%arg0: i32, %arg1: memref<32x128xf32, #tpu.memory_space<vmem>>, %arg2: memref<32x1xf32, #tpu.memory_space<vmem>>, %arg3: memref<32x1xf32, #tpu.memory_space<vmem>>, %arg4: memref<32x1xf32, #tpu.memory_space<vmem>>, %arg5: memref<32x1xf32, #tpu.memory_space<vmem>>, %arg6: memref<32x128xf32, #tpu.memory_space<vmem>>, %arg7: memref<32x128xf32, #tpu.memory_space<vmem>>) attributes {dimension_semantics = [#tpu.dimension_semantics<parallel>], iteration_bounds = array<i64: 1>, scalar_prefetch = 0 : i64, scratch_operands = 0 : i64, tpu.core_type = #tpu.core_type<tc>, window_params = [{transform_indices = @transform_0, window_bounds = array<i64: 32, 128>}, {pipeline_mode = #tpu.pipeline_mode<synchronous>, transform_indices = @transform_1, window_bounds = array<i64: 32, 1>}, {pipeline_mode = #tpu.pipeline_mode<synchronous>, transform_indices = @transform_2, window_bounds = array<i64: 32, 1>}, {pipeline_mode = #tpu.pipeline_mode<synchronous>, transform_indices = @transform_3, window_bounds = array<i64: 32, 1>}, {pipeline_mode = #tpu.pipeline_mode<synchronous>, transform_indices = @transform_4, window_bounds = array<i64: 32, 1>}, {transform_indices = @transform_5, window_bounds = array<i64: 32, 128>}, {transform_indices = @transform_6, window_bounds = array<i64: 32, 128>}]} {
    %c0 = arith.constant 0 : index
    %c0_0 = arith.constant 0 : index
    %0 = vector.load %arg2[%c0, %c0_0] : memref<32x1xf32, #tpu.memory_space<vmem>>, vector<32x1xf32>
    %cst = arith.constant 7.812500e-03 : f32
    %1 = vector.broadcast %cst : f32 to vector<32x1xf32>
    %2 = arith.mulf %0, %1 : vector<32x1xf32>
    %c0_1 = arith.constant 0 : index
    %c0_2 = arith.constant 0 : index
    %3 = vector.load %arg3[%c0_1, %c0_2] : memref<32x1xf32, #tpu.memory_space<vmem>>, vector<32x1xf32>
    %cst_3 = arith.constant 7.812500e-03 : f32
    %4 = vector.broadcast %cst_3 : f32 to vector<32x1xf32>
    %5 = arith.mulf %3, %4 : vector<32x1xf32>
    %6 = arith.mulf %2, %2 : vector<32x1xf32>
    %7 = arith.subf %5, %6 : vector<32x1xf32>
    %c0_4 = arith.constant 0 : index
    %c0_5 = arith.constant 0 : index
    %8 = vector.load %arg4[%c0_4, %c0_5] : memref<32x1xf32, #tpu.memory_space<vmem>>, vector<32x1xf32>
    %cst_6 = arith.constant 9.99999974E-6 : f32
    %9 = vector.broadcast %cst_6 : f32 to vector<32x1xf32>
    %10 = arith.addf %7, %9 : vector<32x1xf32>
    %11 = math.rsqrt %10 : vector<32x1xf32>
    %12 = arith.mulf %8, %11 : vector<32x1xf32>
    %c0_7 = arith.constant 0 : index
    %c0_8 = arith.constant 0 : index
    %13 = vector.load %arg5[%c0_7, %c0_8] : memref<32x1xf32, #tpu.memory_space<vmem>>, vector<32x1xf32>
    %14 = arith.mulf %2, %12 : vector<32x1xf32>
    %15 = arith.subf %13, %14 : vector<32x1xf32>
    %c0_9 = arith.constant 0 : index
    %c0_10 = arith.constant 0 : index
    %16 = vector.load %arg1[%c0_9, %c0_10] : memref<32x128xf32, #tpu.memory_space<vmem>>, vector<32x128xf32>
    %17 = vector.broadcast %12 : vector<32x1xf32> to vector<32x128xf32>
    %18 = arith.mulf %16, %17 : vector<32x128xf32>
    %19 = vector.broadcast %15 : vector<32x1xf32> to vector<32x128xf32>
    %20 = arith.addf %18, %19 : vector<32x128xf32>
    %cst_11 = arith.constant 1.000000e+00 : f32
    %21 = vector.broadcast %cst_11 : f32 to vector<32x128xf32>
    %22 = arith.mulf %20, %21 : vector<32x128xf32>
    %c0_12 = arith.constant 0 : index
    %c0_13 = arith.constant 0 : index
    %23 = vector.load %arg6[%c0_12, %c0_13] : memref<32x128xf32, #tpu.memory_space<vmem>>, vector<32x128xf32>
    %24 = arith.addf %22, %23 : vector<32x128xf32>
    %c0_14 = arith.constant 0 : index
    %c0_15 = arith.constant 0 : index
    %25 = vector.load %arg7[%c0_14, %c0_15] : memref<32x128xf32, #tpu.memory_space<vmem>>, vector<32x128xf32>
    tpu.vector_store %arg7[%c0_14, %c0_15], %24 {strides = array<i32>} : memref<32x128xf32, #tpu.memory_space<vmem>>, vector<32x128xf32>,
    return
  }
  func.func @transform_0(%arg0: i32) -> (i32, i32) {
    %c0_i32 = arith.constant 0 : i32
    %c0_i32_0 = arith.constant 0 : i32
    return %c0_i32, %arg0 : i32, i32
  }
  func.func @transform_1(%arg0: i32) -> (i32, i32) {
    %c0_i32 = arith.constant 0 : i32
    %c0_i32_0 = arith.constant 0 : i32
    %c0_i32_1 = arith.constant 0 : i32
    return %c0_i32, %c0_i32_0 : i32, i32
  }
  func.func @transform_2(%arg0: i32) -> (i32, i32) {
    %c0_i32 = arith.constant 0 : i32
    %c0_i32_0 = arith.constant 0 : i32
    %c0_i32_1 = arith.constant 0 : i32
    return %c0_i32, %c0_i32_0 : i32, i32
  }
  func.func @transform_3(%arg0: i32) -> (i32, i32) {
    %c0_i32 = arith.constant 0 : i32
    %c0_i32_0 = arith.constant 0 : i32
    %c0_i32_1 = arith.constant 0 : i32
    return %c0_i32, %c0_i32_0 : i32, i32
  }
  func.func @transform_4(%arg0: i32) -> (i32, i32) {
    %c0_i32 = arith.constant 0 : i32
    %c0_i32_0 = arith.constant 0 : i32
    %c0_i32_1 = arith.constant 0 : i32
    return %c0_i32, %c0_i32_0 : i32, i32
  }
  func.func @transform_5(%arg0: i32) -> (i32, i32) {
    %c0_i32 = arith.constant 0 : i32
    %c0_i32_0 = arith.constant 0 : i32
    return %c0_i32, %arg0 : i32, i32
  }
  func.func @transform_6(%arg0: i32) -> (i32, i32) {
    %c0_i32 = arith.constant 0 : i32
    %c0_i32_0 = arith.constant 0 : i32
    return %c0_i32, %arg0 : i32, i32
  }
}

module attributes {stable_mosaic.version = 11 : i64} {
  func.func @kernel(%arg0: i32, %arg1: memref<32x128xbf16, #tpu.memory_space<vmem>>, %arg2: memref<32x137xf32, #tpu.memory_space<vmem>>, %arg3: memref<4x128xf32, #tpu.memory_space<vmem>>, %arg4: memref<32x128xf32, #tpu.memory_space<vmem>>, %arg5: memref<32x1xf32, #tpu.memory_space<vmem>>, %arg6: memref<32x1xf32, #tpu.memory_space<vmem>>, %arg7: memref<128x128xf32, #tpu.memory_space<vmem>>) attributes {dimension_semantics = [#tpu.dimension_semantics<arbitrary>], iteration_bounds = array<i64: 1>, scalar_prefetch = 0 : i64, scratch_operands = 1 : i64, tpu.core_type = #tpu.core_type<tc>, window_params = [{pipeline_mode = #tpu.pipeline_mode<synchronous>, transform_indices = @transform_0, window_bounds = array<i64: 32, 128>}, {pipeline_mode = #tpu.pipeline_mode<synchronous>, transform_indices = @transform_1, window_bounds = array<i64: 32, 137>}, {pipeline_mode = #tpu.pipeline_mode<synchronous>, transform_indices = @transform_2, window_bounds = array<i64: 4, 128>}, {transform_indices = @transform_3, window_bounds = array<i64: 32, 128>}, {pipeline_mode = #tpu.pipeline_mode<synchronous>, transform_indices = @transform_4, window_bounds = array<i64: 32, 1>}, {pipeline_mode = #tpu.pipeline_mode<synchronous>, transform_indices = @transform_5, window_bounds = array<i64: 32, 1>}]} {
    %c0 = arith.constant 0 : index
    %c0_0 = arith.constant 0 : index
    %0 = vector.load %arg2[%c0, %c0_0] : memref<32x137xf32, #tpu.memory_space<vmem>>, vector<32x128xf32>
    %c0_1 = arith.constant 0 : index
    %c0_2 = arith.constant 0 : index
    %1 = vector.load %arg3[%c0_1, %c0_2] : memref<4x128xf32, #tpu.memory_space<vmem>>, vector<1x128xf32>
    %2 = vector.broadcast %1 : vector<1x128xf32> to vector<32x128xf32>
    %3 = arith.mulf %0, %2 : vector<32x128xf32>
    %c0_3 = arith.constant 0 : index
    %c0_4 = arith.constant 0 : index
    %4 = vector.load %arg7[%c0_3, %c0_4] : memref<128x128xf32, #tpu.memory_space<vmem>>, vector<32x128xf32>
    tpu.vector_store %arg7[%c0_3, %c0_4], %3 {strides = array<i32>} : memref<128x128xf32, #tpu.memory_space<vmem>>, vector<32x128xf32>,
    %c0_5 = arith.constant 0 : index
    %c1 = arith.constant 1 : index
    %5 = vector.load %arg2[%c0_5, %c1] : memref<32x137xf32, #tpu.memory_space<vmem>>, vector<32x128xf32>
    %c1_6 = arith.constant 1 : index
    %c0_7 = arith.constant 0 : index
    %6 = vector.load %arg3[%c1_6, %c0_7] : memref<4x128xf32, #tpu.memory_space<vmem>>, vector<1x128xf32>
    %7 = vector.broadcast %6 : vector<1x128xf32> to vector<32x128xf32>
    %8 = arith.mulf %5, %7 : vector<32x128xf32>
    %c32 = arith.constant 32 : index
    %c0_8 = arith.constant 0 : index
    %9 = vector.load %arg7[%c32, %c0_8] : memref<128x128xf32, #tpu.memory_space<vmem>>, vector<32x128xf32>
    tpu.vector_store %arg7[%c32, %c0_8], %8 {strides = array<i32>} : memref<128x128xf32, #tpu.memory_space<vmem>>, vector<32x128xf32>,
    %c0_9 = arith.constant 0 : index
    %c8 = arith.constant 8 : index
    %10 = vector.load %arg2[%c0_9, %c8] : memref<32x137xf32, #tpu.memory_space<vmem>>, vector<32x128xf32>
    %c2 = arith.constant 2 : index
    %c0_10 = arith.constant 0 : index
    %11 = vector.load %arg3[%c2, %c0_10] : memref<4x128xf32, #tpu.memory_space<vmem>>, vector<1x128xf32>
    %12 = vector.broadcast %11 : vector<1x128xf32> to vector<32x128xf32>
    %13 = arith.mulf %10, %12 : vector<32x128xf32>
    %c64 = arith.constant 64 : index
    %c0_11 = arith.constant 0 : index
    %14 = vector.load %arg7[%c64, %c0_11] : memref<128x128xf32, #tpu.memory_space<vmem>>, vector<32x128xf32>
    tpu.vector_store %arg7[%c64, %c0_11], %13 {strides = array<i32>} : memref<128x128xf32, #tpu.memory_space<vmem>>, vector<32x128xf32>,
    %c0_12 = arith.constant 0 : index
    %c9 = arith.constant 9 : index
    %15 = vector.load %arg2[%c0_12, %c9] : memref<32x137xf32, #tpu.memory_space<vmem>>, vector<32x128xf32>
    %c3 = arith.constant 3 : index
    %c0_13 = arith.constant 0 : index
    %16 = vector.load %arg3[%c3, %c0_13] : memref<4x128xf32, #tpu.memory_space<vmem>>, vector<1x128xf32>
    %17 = vector.broadcast %16 : vector<1x128xf32> to vector<32x128xf32>
    %18 = arith.mulf %15, %17 : vector<32x128xf32>
    %c96 = arith.constant 96 : index
    %c0_14 = arith.constant 0 : index
    %19 = vector.load %arg7[%c96, %c0_14] : memref<128x128xf32, #tpu.memory_space<vmem>>, vector<32x128xf32>
    tpu.vector_store %arg7[%c96, %c0_14], %18 {strides = array<i32>} : memref<128x128xf32, #tpu.memory_space<vmem>>, vector<32x128xf32>,
    %c0_15 = arith.constant 0 : index
    %c0_16 = arith.constant 0 : index
    %20 = vector.load %arg1[%c0_15, %c0_16] : memref<32x128xbf16, #tpu.memory_space<vmem>>, vector<32x128xbf16>
    %c0_17 = arith.constant 0 : index
    %c0_18 = arith.constant 0 : index
    %21 = vector.load %arg7[%c0_17, %c0_18] : memref<128x128xf32, #tpu.memory_space<vmem>>, vector<128x128xf32>
    %22 = arith.truncf %21 : vector<128x128xf32> to vector<128x128xbf16>
    %cst = arith.constant dense<0.000000e+00> : vector<32x128xf32>
    %23 = tpu.matmul %20, %22, %cst {dimension_numbers = #tpu.dot_dimension_numbers<[1], [0], [0], [1], [0, 0, 1, 1], [], []>} : vector<32x128xbf16>, vector<128x128xbf16>, vector<32x128xf32> -> vector<32x128xf32>
    %cst_19 = arith.constant dense<0.000000e+00> : vector<32xf32>
    %24 = vector.multi_reduction <add>, %23, %cst_19 [1] : vector<32x128xf32> to vector<32xf32>
    %25 = vector.shape_cast %24 : vector<32xf32> to vector<32x1xf32>
    %c0_20 = arith.constant 0 : index
    %c0_21 = arith.constant 0 : index
    %26 = vector.load %arg5[%c0_20, %c0_21] : memref<32x1xf32, #tpu.memory_space<vmem>>, vector<32x1xf32>
    tpu.vector_store %arg5[%c0_20, %c0_21], %25 {strides = array<i32>} : memref<32x1xf32, #tpu.memory_space<vmem>>, vector<32x1xf32>,
    %27 = arith.mulf %23, %23 : vector<32x128xf32>
    %cst_22 = arith.constant dense<0.000000e+00> : vector<32xf32>
    %28 = vector.multi_reduction <add>, %27, %cst_22 [1] : vector<32x128xf32> to vector<32xf32>
    %29 = vector.shape_cast %28 : vector<32xf32> to vector<32x1xf32>
    %c0_23 = arith.constant 0 : index
    %c0_24 = arith.constant 0 : index
    %30 = vector.load %arg6[%c0_23, %c0_24] : memref<32x1xf32, #tpu.memory_space<vmem>>, vector<32x1xf32>
    tpu.vector_store %arg6[%c0_23, %c0_24], %29 {strides = array<i32>} : memref<32x1xf32, #tpu.memory_space<vmem>>, vector<32x1xf32>,
    %c0_25 = arith.constant 0 : index
    %c0_26 = arith.constant 0 : index
    %31 = vector.load %arg4[%c0_25, %c0_26] : memref<32x128xf32, #tpu.memory_space<vmem>>, vector<32x128xf32>
    tpu.vector_store %arg4[%c0_25, %c0_26], %23 {strides = array<i32>} : memref<32x128xf32, #tpu.memory_space<vmem>>, vector<32x128xf32>,
    return
  }
  func.func @transform_0(%arg0: i32) -> (i32, i32) {
    %c0_i32 = arith.constant 0 : i32
    %c0_i32_0 = arith.constant 0 : i32
    %c0_i32_1 = arith.constant 0 : i32
    return %c0_i32, %c0_i32_0 : i32, i32
  }
  func.func @transform_1(%arg0: i32) -> (i32, i32) {
    %c0_i32 = arith.constant 0 : i32
    %c0_i32_0 = arith.constant 0 : i32
    %c0_i32_1 = arith.constant 0 : i32
    return %c0_i32, %c0_i32_0 : i32, i32
  }
  func.func @transform_2(%arg0: i32) -> (i32, i32) {
    %c0_i32 = arith.constant 0 : i32
    %c0_i32_0 = arith.constant 0 : i32
    %c0_i32_1 = arith.constant 0 : i32
    return %c0_i32, %c0_i32_0 : i32, i32
  }
  func.func @transform_3(%arg0: i32) -> (i32, i32) {
    %c0_i32 = arith.constant 0 : i32
    %c0_i32_0 = arith.constant 0 : i32
    return %c0_i32, %arg0 : i32, i32
  }
  func.func @transform_4(%arg0: i32) -> (i32, i32) {
    %c0_i32 = arith.constant 0 : i32
    %c0_i32_0 = arith.constant 0 : i32
    %c0_i32_1 = arith.constant 0 : i32
    return %c0_i32, %c0_i32_0 : i32, i32
  }
  func.func @transform_5(%arg0: i32) -> (i32, i32) {
    %c0_i32 = arith.constant 0 : i32
    %c0_i32_0 = arith.constant 0 : i32
    %c0_i32_1 = arith.constant 0 : i32
    return %c0_i32, %c0_i32_0 : i32, i32
  }
}

module attributes {stable_mosaic.version = 11 : i64} {
  func.func @kernel(%arg0: i32, %arg1: memref<8x32xbf16, #tpu.memory_space<vmem>>, %arg2: memref<32x512xf32, #tpu.memory_space<vmem>>, %arg3: memref<8x512xf32, #tpu.memory_space<vmem>>, %arg4: memref<8x1xf32, #tpu.memory_space<vmem>>, %arg5: memref<8x1xf32, #tpu.memory_space<vmem>>) attributes {dimension_semantics = [#tpu.dimension_semantics<arbitrary>], iteration_bounds = array<i64: 1>, scalar_prefetch = 0 : i64, scratch_operands = 0 : i64, tpu.core_type = #tpu.core_type<tc>, window_params = [{pipeline_mode = #tpu.pipeline_mode<synchronous>, transform_indices = @transform_0, window_bounds = array<i64: 8, 32>}, {transform_indices = @transform_1, window_bounds = array<i64: 32, 512>}, {transform_indices = @transform_2, window_bounds = array<i64: 8, 512>}, {pipeline_mode = #tpu.pipeline_mode<synchronous>, transform_indices = @transform_3, window_bounds = array<i64: 8, 1>}, {pipeline_mode = #tpu.pipeline_mode<synchronous>, transform_indices = @transform_4, window_bounds = array<i64: 8, 1>}]} {
    %c0 = arith.constant 0 : index
    %c0_0 = arith.constant 0 : index
    %0 = vector.load %arg1[%c0, %c0_0] : memref<8x32xbf16, #tpu.memory_space<vmem>>, vector<8x32xbf16>
    %c0_1 = arith.constant 0 : index
    %c0_2 = arith.constant 0 : index
    %1 = vector.load %arg2[%c0_1, %c0_2] : memref<32x512xf32, #tpu.memory_space<vmem>>, vector<32x512xf32>
    %2 = arith.truncf %1 : vector<32x512xf32> to vector<32x512xbf16>
    %cst = arith.constant dense<0.000000e+00> : vector<8x512xf32>
    %3 = tpu.matmul %0, %2, %cst {dimension_numbers = #tpu.dot_dimension_numbers<[1], [0], [0], [1], [0, 0, 1, 1], [], []>} : vector<8x32xbf16>, vector<32x512xbf16>, vector<8x512xf32> -> vector<8x512xf32>
    %cst_3 = arith.constant dense<0.000000e+00> : vector<8xf32>
    %4 = vector.multi_reduction <add>, %3, %cst_3 [1] : vector<8x512xf32> to vector<8xf32>
    %5 = vector.shape_cast %4 : vector<8xf32> to vector<8x1xf32>
    %6 = arith.mulf %3, %3 : vector<8x512xf32>
    %cst_4 = arith.constant dense<0.000000e+00> : vector<8xf32>
    %7 = vector.multi_reduction <add>, %6, %cst_4 [1] : vector<8x512xf32> to vector<8xf32>
    %8 = vector.shape_cast %7 : vector<8xf32> to vector<8x1xf32>
    %c0_i32 = arith.constant 0 : i32
    %9 = arith.cmpi eq, %arg0, %c0_i32 : i32
    %10 = arith.extui %9 : i1 to i32
    %c0_i32_5 = arith.constant 0 : i32
    %11 = arith.cmpi ne, %10, %c0_i32_5 : i32
    scf.if %11 {
      %c0_10 = arith.constant 0 : index
      %c0_11 = arith.constant 0 : index
      %16 = vector.load %arg4[%c0_10, %c0_11] : memref<8x1xf32, #tpu.memory_space<vmem>>, vector<8x1xf32>
      tpu.vector_store %arg4[%c0_10, %c0_11], %5 {strides = array<i32>} : memref<8x1xf32, #tpu.memory_space<vmem>>, vector<8x1xf32>,
      %c0_12 = arith.constant 0 : index
      %c0_13 = arith.constant 0 : index
      %17 = vector.load %arg5[%c0_12, %c0_13] : memref<8x1xf32, #tpu.memory_space<vmem>>, vector<8x1xf32>
      tpu.vector_store %arg5[%c0_12, %c0_13], %8 {strides = array<i32>} : memref<8x1xf32, #tpu.memory_space<vmem>>, vector<8x1xf32>,
    } else {
    }
    %c0_i32_6 = arith.constant 0 : i32
    %12 = arith.cmpi sgt, %arg0, %c0_i32_6 : i32
    %13 = arith.extui %12 : i1 to i32
    %c0_i32_7 = arith.constant 0 : i32
    %14 = arith.cmpi ne, %13, %c0_i32_7 : i32
    scf.if %14 {
      %c0_10 = arith.constant 0 : index
      %c0_11 = arith.constant 0 : index
      %16 = vector.load %arg4[%c0_10, %c0_11] : memref<8x1xf32, #tpu.memory_space<vmem>>, vector<8x1xf32>
      %17 = arith.addf %16, %5 : vector<8x1xf32>
      %c0_12 = arith.constant 0 : index
      %c0_13 = arith.constant 0 : index
      %18 = vector.load %arg4[%c0_12, %c0_13] : memref<8x1xf32, #tpu.memory_space<vmem>>, vector<8x1xf32>
      tpu.vector_store %arg4[%c0_12, %c0_13], %17 {strides = array<i32>} : memref<8x1xf32, #tpu.memory_space<vmem>>, vector<8x1xf32>,
      %c0_14 = arith.constant 0 : index
      %c0_15 = arith.constant 0 : index
      %19 = vector.load %arg5[%c0_14, %c0_15] : memref<8x1xf32, #tpu.memory_space<vmem>>, vector<8x1xf32>
      %20 = arith.addf %19, %8 : vector<8x1xf32>
      %c0_16 = arith.constant 0 : index
      %c0_17 = arith.constant 0 : index
      %21 = vector.load %arg5[%c0_16, %c0_17] : memref<8x1xf32, #tpu.memory_space<vmem>>, vector<8x1xf32>
      tpu.vector_store %arg5[%c0_16, %c0_17], %20 {strides = array<i32>} : memref<8x1xf32, #tpu.memory_space<vmem>>, vector<8x1xf32>,
    } else {
    }
    %c0_8 = arith.constant 0 : index
    %c0_9 = arith.constant 0 : index
    %15 = vector.load %arg3[%c0_8, %c0_9] : memref<8x512xf32, #tpu.memory_space<vmem>>, vector<8x512xf32>
    tpu.vector_store %arg3[%c0_8, %c0_9], %3 {strides = array<i32>} : memref<8x512xf32, #tpu.memory_space<vmem>>, vector<8x512xf32>,
    return
  }
  func.func @transform_0(%arg0: i32) -> (i32, i32) {
    %c0_i32 = arith.constant 0 : i32
    %c0_i32_0 = arith.constant 0 : i32
    %c0_i32_1 = arith.constant 0 : i32
    return %c0_i32, %c0_i32_0 : i32, i32
  }
  func.func @transform_1(%arg0: i32) -> (i32, i32) {
    %c0_i32 = arith.constant 0 : i32
    %c0_i32_0 = arith.constant 0 : i32
    return %c0_i32, %arg0 : i32, i32
  }
  func.func @transform_2(%arg0: i32) -> (i32, i32) {
    %c0_i32 = arith.constant 0 : i32
    %c0_i32_0 = arith.constant 0 : i32
    return %c0_i32, %arg0 : i32, i32
  }
  func.func @transform_3(%arg0: i32) -> (i32, i32) {
    %c0_i32 = arith.constant 0 : i32
    %c0_i32_0 = arith.constant 0 : i32
    %c0_i32_1 = arith.constant 0 : i32
    return %c0_i32, %c0_i32_0 : i32, i32
  }
  func.func @transform_4(%arg0: i32) -> (i32, i32) {
    %c0_i32 = arith.constant 0 : i32
    %c0_i32_0 = arith.constant 0 : i32
    %c0_i32_1 = arith.constant 0 : i32
    return %c0_i32, %c0_i32_0 : i32, i32
  }
}

module attributes {stable_mosaic.version = 11 : i64} {
  func.func @kernel(%arg0: i32, %arg1: memref<8x512xf32, #tpu.memory_space<vmem>>, %arg2: memref<8x1xf32, #tpu.memory_space<vmem>>, %arg3: memref<8x1xf32, #tpu.memory_space<vmem>>, %arg4: memref<8x1xf32, #tpu.memory_space<vmem>>, %arg5: memref<8x1xf32, #tpu.memory_space<vmem>>, %arg6: memref<8x512xf32, #tpu.memory_space<vmem>>) attributes {dimension_semantics = [#tpu.dimension_semantics<parallel>], iteration_bounds = array<i64: 1>, scalar_prefetch = 0 : i64, scratch_operands = 0 : i64, tpu.core_type = #tpu.core_type<tc>, window_params = [{transform_indices = @transform_0, window_bounds = array<i64: 8, 512>}, {pipeline_mode = #tpu.pipeline_mode<synchronous>, transform_indices = @transform_1, window_bounds = array<i64: 8, 1>}, {pipeline_mode = #tpu.pipeline_mode<synchronous>, transform_indices = @transform_2, window_bounds = array<i64: 8, 1>}, {pipeline_mode = #tpu.pipeline_mode<synchronous>, transform_indices = @transform_3, window_bounds = array<i64: 8, 1>}, {pipeline_mode = #tpu.pipeline_mode<synchronous>, transform_indices = @transform_4, window_bounds = array<i64: 8, 1>}, {transform_indices = @transform_5, window_bounds = array<i64: 8, 512>}]} {
    %c0 = arith.constant 0 : index
    %c0_0 = arith.constant 0 : index
    %0 = vector.load %arg2[%c0, %c0_0] : memref<8x1xf32, #tpu.memory_space<vmem>>, vector<8x1xf32>
    %cst = arith.constant 0.001953125 : f32
    %1 = vector.broadcast %cst : f32 to vector<8x1xf32>
    %2 = arith.mulf %0, %1 : vector<8x1xf32>
    %c0_1 = arith.constant 0 : index
    %c0_2 = arith.constant 0 : index
    %3 = vector.load %arg3[%c0_1, %c0_2] : memref<8x1xf32, #tpu.memory_space<vmem>>, vector<8x1xf32>
    %cst_3 = arith.constant 0.001953125 : f32
    %4 = vector.broadcast %cst_3 : f32 to vector<8x1xf32>
    %5 = arith.mulf %3, %4 : vector<8x1xf32>
    %6 = arith.mulf %2, %2 : vector<8x1xf32>
    %7 = arith.subf %5, %6 : vector<8x1xf32>
    %c0_4 = arith.constant 0 : index
    %c0_5 = arith.constant 0 : index
    %8 = vector.load %arg4[%c0_4, %c0_5] : memref<8x1xf32, #tpu.memory_space<vmem>>, vector<8x1xf32>
    %cst_6 = arith.constant 9.99999974E-6 : f32
    %9 = vector.broadcast %cst_6 : f32 to vector<8x1xf32>
    %10 = arith.addf %7, %9 : vector<8x1xf32>
    %11 = math.rsqrt %10 : vector<8x1xf32>
    %12 = arith.mulf %8, %11 : vector<8x1xf32>
    %c0_7 = arith.constant 0 : index
    %c0_8 = arith.constant 0 : index
    %13 = vector.load %arg5[%c0_7, %c0_8] : memref<8x1xf32, #tpu.memory_space<vmem>>, vector<8x1xf32>
    %14 = arith.mulf %2, %12 : vector<8x1xf32>
    %15 = arith.subf %13, %14 : vector<8x1xf32>
    %c0_9 = arith.constant 0 : index
    %c0_10 = arith.constant 0 : index
    %16 = vector.load %arg1[%c0_9, %c0_10] : memref<8x512xf32, #tpu.memory_space<vmem>>, vector<8x512xf32>
    %17 = vector.broadcast %12 : vector<8x1xf32> to vector<8x512xf32>
    %18 = arith.mulf %16, %17 : vector<8x512xf32>
    %19 = vector.broadcast %15 : vector<8x1xf32> to vector<8x512xf32>
    %20 = arith.addf %18, %19 : vector<8x512xf32>
    %cst_11 = arith.constant 0.000000e+00 : f32
    %21 = vector.broadcast %cst_11 : f32 to vector<8x512xf32>
    %22 = arith.cmpf ogt, %20, %21 : vector<8x512xf32>
    %cst_12 = arith.constant 2.000000e-01 : f32
    %23 = vector.broadcast %cst_12 : f32 to vector<8x512xf32>
    %24 = arith.mulf %23, %20 : vector<8x512xf32>
    %25 = arith.select %22, %20, %24 : vector<8x512xi1>, vector<8x512xf32>
    %c0_13 = arith.constant 0 : index
    %c0_14 = arith.constant 0 : index
    %26 = vector.load %arg6[%c0_13, %c0_14] : memref<8x512xf32, #tpu.memory_space<vmem>>, vector<8x512xf32>
    tpu.vector_store %arg6[%c0_13, %c0_14], %25 {strides = array<i32>} : memref<8x512xf32, #tpu.memory_space<vmem>>, vector<8x512xf32>,
    return
  }
  func.func @transform_0(%arg0: i32) -> (i32, i32) {
    %c0_i32 = arith.constant 0 : i32
    %c0_i32_0 = arith.constant 0 : i32
    return %c0_i32, %arg0 : i32, i32
  }
  func.func @transform_1(%arg0: i32) -> (i32, i32) {
    %c0_i32 = arith.constant 0 : i32
    %c0_i32_0 = arith.constant 0 : i32
    %c0_i32_1 = arith.constant 0 : i32
    return %c0_i32, %c0_i32_0 : i32, i32
  }
  func.func @transform_2(%arg0: i32) -> (i32, i32) {
    %c0_i32 = arith.constant 0 : i32
    %c0_i32_0 = arith.constant 0 : i32
    %c0_i32_1 = arith.constant 0 : i32
    return %c0_i32, %c0_i32_0 : i32, i32
  }
  func.func @transform_3(%arg0: i32) -> (i32, i32) {
    %c0_i32 = arith.constant 0 : i32
    %c0_i32_0 = arith.constant 0 : i32
    %c0_i32_1 = arith.constant 0 : i32
    return %c0_i32, %c0_i32_0 : i32, i32
  }
  func.func @transform_4(%arg0: i32) -> (i32, i32) {
    %c0_i32 = arith.constant 0 : i32
    %c0_i32_0 = arith.constant 0 : i32
    %c0_i32_1 = arith.constant 0 : i32
    return %c0_i32, %c0_i32_0 : i32, i32
  }
  func.func @transform_5(%arg0: i32) -> (i32, i32) {
    %c0_i32 = arith.constant 0 : i32
    %c0_i32_0 = arith.constant 0 : i32
    return %c0_i32, %arg0 : i32, i32
  }
}

module attributes {stable_mosaic.version = 11 : i64} {
  func.func @kernel(%arg0: i32, %arg1: memref<8x72xbf16, #tpu.memory_space<vmem>>, %arg2: memref<8x546xf32, #tpu.memory_space<vmem>>, %arg3: memref<9x512xf32, #tpu.memory_space<vmem>>, %arg4: memref<8x512xf32, #tpu.memory_space<vmem>>, %arg5: memref<8x1xf32, #tpu.memory_space<vmem>>, %arg6: memref<8x1xf32, #tpu.memory_space<vmem>>, %arg7: memref<72x512xf32, #tpu.memory_space<vmem>>) attributes {dimension_semantics = [#tpu.dimension_semantics<arbitrary>], iteration_bounds = array<i64: 1>, scalar_prefetch = 0 : i64, scratch_operands = 1 : i64, tpu.core_type = #tpu.core_type<tc>, window_params = [{pipeline_mode = #tpu.pipeline_mode<synchronous>, transform_indices = @transform_0, window_bounds = array<i64: 8, 72>}, {pipeline_mode = #tpu.pipeline_mode<synchronous>, transform_indices = @transform_1, window_bounds = array<i64: 8, 546>}, {pipeline_mode = #tpu.pipeline_mode<synchronous>, transform_indices = @transform_2, window_bounds = array<i64: 9, 512>}, {transform_indices = @transform_3, window_bounds = array<i64: 8, 512>}, {pipeline_mode = #tpu.pipeline_mode<synchronous>, transform_indices = @transform_4, window_bounds = array<i64: 8, 1>}, {pipeline_mode = #tpu.pipeline_mode<synchronous>, transform_indices = @transform_5, window_bounds = array<i64: 8, 1>}]} {
    %c0 = arith.constant 0 : index
    %c0_0 = arith.constant 0 : index
    %0 = vector.load %arg2[%c0, %c0_0] : memref<8x546xf32, #tpu.memory_space<vmem>>, vector<8x512xf32>
    %c0_1 = arith.constant 0 : index
    %c0_2 = arith.constant 0 : index
    %1 = vector.load %arg3[%c0_1, %c0_2] : memref<9x512xf32, #tpu.memory_space<vmem>>, vector<1x512xf32>
    %2 = vector.broadcast %1 : vector<1x512xf32> to vector<8x512xf32>
    %3 = arith.mulf %0, %2 : vector<8x512xf32>
    %c0_3 = arith.constant 0 : index
    %c0_4 = arith.constant 0 : index
    %4 = vector.load %arg7[%c0_3, %c0_4] : memref<72x512xf32, #tpu.memory_space<vmem>>, vector<8x512xf32>
    tpu.vector_store %arg7[%c0_3, %c0_4], %3 {strides = array<i32>} : memref<72x512xf32, #tpu.memory_space<vmem>>, vector<8x512xf32>,
    %c0_5 = arith.constant 0 : index
    %c1 = arith.constant 1 : index
    %5 = vector.load %arg2[%c0_5, %c1] : memref<8x546xf32, #tpu.memory_space<vmem>>, vector<8x512xf32>
    %c1_6 = arith.constant 1 : index
    %c0_7 = arith.constant 0 : index
    %6 = vector.load %arg3[%c1_6, %c0_7] : memref<9x512xf32, #tpu.memory_space<vmem>>, vector<1x512xf32>
    %7 = vector.broadcast %6 : vector<1x512xf32> to vector<8x512xf32>
    %8 = arith.mulf %5, %7 : vector<8x512xf32>
    %c8 = arith.constant 8 : index
    %c0_8 = arith.constant 0 : index
    %9 = vector.load %arg7[%c8, %c0_8] : memref<72x512xf32, #tpu.memory_space<vmem>>, vector<8x512xf32>
    tpu.vector_store %arg7[%c8, %c0_8], %8 {strides = array<i32>} : memref<72x512xf32, #tpu.memory_space<vmem>>, vector<8x512xf32>,
    %c0_9 = arith.constant 0 : index
    %c2 = arith.constant 2 : index
    %10 = vector.load %arg2[%c0_9, %c2] : memref<8x546xf32, #tpu.memory_space<vmem>>, vector<8x512xf32>
    %c2_10 = arith.constant 2 : index
    %c0_11 = arith.constant 0 : index
    %11 = vector.load %arg3[%c2_10, %c0_11] : memref<9x512xf32, #tpu.memory_space<vmem>>, vector<1x512xf32>
    %12 = vector.broadcast %11 : vector<1x512xf32> to vector<8x512xf32>
    %13 = arith.mulf %10, %12 : vector<8x512xf32>
    %c16 = arith.constant 16 : index
    %c0_12 = arith.constant 0 : index
    %14 = vector.load %arg7[%c16, %c0_12] : memref<72x512xf32, #tpu.memory_space<vmem>>, vector<8x512xf32>
    tpu.vector_store %arg7[%c16, %c0_12], %13 {strides = array<i32>} : memref<72x512xf32, #tpu.memory_space<vmem>>, vector<8x512xf32>,
    %c0_13 = arith.constant 0 : index
    %c16_14 = arith.constant 16 : index
    %15 = vector.load %arg2[%c0_13, %c16_14] : memref<8x546xf32, #tpu.memory_space<vmem>>, vector<8x512xf32>
    %c3 = arith.constant 3 : index
    %c0_15 = arith.constant 0 : index
    %16 = vector.load %arg3[%c3, %c0_15] : memref<9x512xf32, #tpu.memory_space<vmem>>, vector<1x512xf32>
    %17 = vector.broadcast %16 : vector<1x512xf32> to vector<8x512xf32>
    %18 = arith.mulf %15, %17 : vector<8x512xf32>
    %c24 = arith.constant 24 : index
    %c0_16 = arith.constant 0 : index
    %19 = vector.load %arg7[%c24, %c0_16] : memref<72x512xf32, #tpu.memory_space<vmem>>, vector<8x512xf32>
    tpu.vector_store %arg7[%c24, %c0_16], %18 {strides = array<i32>} : memref<72x512xf32, #tpu.memory_space<vmem>>, vector<8x512xf32>,
    %c0_17 = arith.constant 0 : index
    %c17 = arith.constant 17 : index
    %20 = vector.load %arg2[%c0_17, %c17] : memref<8x546xf32, #tpu.memory_space<vmem>>, vector<8x512xf32>
    %c4 = arith.constant 4 : index
    %c0_18 = arith.constant 0 : index
    %21 = vector.load %arg3[%c4, %c0_18] : memref<9x512xf32, #tpu.memory_space<vmem>>, vector<1x512xf32>
    %22 = vector.broadcast %21 : vector<1x512xf32> to vector<8x512xf32>
    %23 = arith.mulf %20, %22 : vector<8x512xf32>
    %c32 = arith.constant 32 : index
    %c0_19 = arith.constant 0 : index
    %24 = vector.load %arg7[%c32, %c0_19] : memref<72x512xf32, #tpu.memory_space<vmem>>, vector<8x512xf32>
    tpu.vector_store %arg7[%c32, %c0_19], %23 {strides = array<i32>} : memref<72x512xf32, #tpu.memory_space<vmem>>, vector<8x512xf32>,
    %c0_20 = arith.constant 0 : index
    %c18 = arith.constant 18 : index
    %25 = vector.load %arg2[%c0_20, %c18] : memref<8x546xf32, #tpu.memory_space<vmem>>, vector<8x512xf32>
    %c5 = arith.constant 5 : index
    %c0_21 = arith.constant 0 : index
    %26 = vector.load %arg3[%c5, %c0_21] : memref<9x512xf32, #tpu.memory_space<vmem>>, vector<1x512xf32>
    %27 = vector.broadcast %26 : vector<1x512xf32> to vector<8x512xf32>
    %28 = arith.mulf %25, %27 : vector<8x512xf32>
    %c40 = arith.constant 40 : index
    %c0_22 = arith.constant 0 : index
    %29 = vector.load %arg7[%c40, %c0_22] : memref<72x512xf32, #tpu.memory_space<vmem>>, vector<8x512xf32>
    tpu.vector_store %arg7[%c40, %c0_22], %28 {strides = array<i32>} : memref<72x512xf32, #tpu.memory_space<vmem>>, vector<8x512xf32>,
    %c0_23 = arith.constant 0 : index
    %c32_24 = arith.constant 32 : index
    %30 = vector.load %arg2[%c0_23, %c32_24] : memref<8x546xf32, #tpu.memory_space<vmem>>, vector<8x512xf32>
    %c6 = arith.constant 6 : index
    %c0_25 = arith.constant 0 : index
    %31 = vector.load %arg3[%c6, %c0_25] : memref<9x512xf32, #tpu.memory_space<vmem>>, vector<1x512xf32>
    %32 = vector.broadcast %31 : vector<1x512xf32> to vector<8x512xf32>
    %33 = arith.mulf %30, %32 : vector<8x512xf32>
    %c48 = arith.constant 48 : index
    %c0_26 = arith.constant 0 : index
    %34 = vector.load %arg7[%c48, %c0_26] : memref<72x512xf32, #tpu.memory_space<vmem>>, vector<8x512xf32>
    tpu.vector_store %arg7[%c48, %c0_26], %33 {strides = array<i32>} : memref<72x512xf32, #tpu.memory_space<vmem>>, vector<8x512xf32>,
    %c0_27 = arith.constant 0 : index
    %c33 = arith.constant 33 : index
    %35 = vector.load %arg2[%c0_27, %c33] : memref<8x546xf32, #tpu.memory_space<vmem>>, vector<8x512xf32>
    %c7 = arith.constant 7 : index
    %c0_28 = arith.constant 0 : index
    %36 = vector.load %arg3[%c7, %c0_28] : memref<9x512xf32, #tpu.memory_space<vmem>>, vector<1x512xf32>
    %37 = vector.broadcast %36 : vector<1x512xf32> to vector<8x512xf32>
    %38 = arith.mulf %35, %37 : vector<8x512xf32>
    %c56 = arith.constant 56 : index
    %c0_29 = arith.constant 0 : index
    %39 = vector.load %arg7[%c56, %c0_29] : memref<72x512xf32, #tpu.memory_space<vmem>>, vector<8x512xf32>
    tpu.vector_store %arg7[%c56, %c0_29], %38 {strides = array<i32>} : memref<72x512xf32, #tpu.memory_space<vmem>>, vector<8x512xf32>,
    %c0_30 = arith.constant 0 : index
    %c34 = arith.constant 34 : index
    %40 = vector.load %arg2[%c0_30, %c34] : memref<8x546xf32, #tpu.memory_space<vmem>>, vector<8x512xf32>
    %c8_31 = arith.constant 8 : index
    %c0_32 = arith.constant 0 : index
    %41 = vector.load %arg3[%c8_31, %c0_32] : memref<9x512xf32, #tpu.memory_space<vmem>>, vector<1x512xf32>
    %42 = vector.broadcast %41 : vector<1x512xf32> to vector<8x512xf32>
    %43 = arith.mulf %40, %42 : vector<8x512xf32>
    %c64 = arith.constant 64 : index
    %c0_33 = arith.constant 0 : index
    %44 = vector.load %arg7[%c64, %c0_33] : memref<72x512xf32, #tpu.memory_space<vmem>>, vector<8x512xf32>
    tpu.vector_store %arg7[%c64, %c0_33], %43 {strides = array<i32>} : memref<72x512xf32, #tpu.memory_space<vmem>>, vector<8x512xf32>,
    %c0_34 = arith.constant 0 : index
    %c0_35 = arith.constant 0 : index
    %45 = vector.load %arg1[%c0_34, %c0_35] : memref<8x72xbf16, #tpu.memory_space<vmem>>, vector<8x72xbf16>
    %c0_36 = arith.constant 0 : index
    %c0_37 = arith.constant 0 : index
    %46 = vector.load %arg7[%c0_36, %c0_37] : memref<72x512xf32, #tpu.memory_space<vmem>>, vector<72x512xf32>
    %47 = arith.truncf %46 : vector<72x512xf32> to vector<72x512xbf16>
    %cst = arith.constant dense<0.000000e+00> : vector<8x512xf32>
    %48 = tpu.matmul %45, %47, %cst {dimension_numbers = #tpu.dot_dimension_numbers<[1], [0], [0], [1], [0, 0, 1, 1], [], []>} : vector<8x72xbf16>, vector<72x512xbf16>, vector<8x512xf32> -> vector<8x512xf32>
    %cst_38 = arith.constant dense<0.000000e+00> : vector<8xf32>
    %49 = vector.multi_reduction <add>, %48, %cst_38 [1] : vector<8x512xf32> to vector<8xf32>
    %50 = vector.shape_cast %49 : vector<8xf32> to vector<8x1xf32>
    %c0_39 = arith.constant 0 : index
    %c0_40 = arith.constant 0 : index
    %51 = vector.load %arg5[%c0_39, %c0_40] : memref<8x1xf32, #tpu.memory_space<vmem>>, vector<8x1xf32>
    tpu.vector_store %arg5[%c0_39, %c0_40], %50 {strides = array<i32>} : memref<8x1xf32, #tpu.memory_space<vmem>>, vector<8x1xf32>,
    %52 = arith.mulf %48, %48 : vector<8x512xf32>
    %cst_41 = arith.constant dense<0.000000e+00> : vector<8xf32>
    %53 = vector.multi_reduction <add>, %52, %cst_41 [1] : vector<8x512xf32> to vector<8xf32>
    %54 = vector.shape_cast %53 : vector<8xf32> to vector<8x1xf32>
    %c0_42 = arith.constant 0 : index
    %c0_43 = arith.constant 0 : index
    %55 = vector.load %arg6[%c0_42, %c0_43] : memref<8x1xf32, #tpu.memory_space<vmem>>, vector<8x1xf32>
    tpu.vector_store %arg6[%c0_42, %c0_43], %54 {strides = array<i32>} : memref<8x1xf32, #tpu.memory_space<vmem>>, vector<8x1xf32>,
    %c0_44 = arith.constant 0 : index
    %c0_45 = arith.constant 0 : index
    %56 = vector.load %arg4[%c0_44, %c0_45] : memref<8x512xf32, #tpu.memory_space<vmem>>, vector<8x512xf32>
    tpu.vector_store %arg4[%c0_44, %c0_45], %48 {strides = array<i32>} : memref<8x512xf32, #tpu.memory_space<vmem>>, vector<8x512xf32>,
    return
  }
  func.func @transform_0(%arg0: i32) -> (i32, i32) {
    %c0_i32 = arith.constant 0 : i32
    %c0_i32_0 = arith.constant 0 : i32
    %c0_i32_1 = arith.constant 0 : i32
    return %c0_i32, %c0_i32_0 : i32, i32
  }
  func.func @transform_1(%arg0: i32) -> (i32, i32) {
    %c0_i32 = arith.constant 0 : i32
    %c0_i32_0 = arith.constant 0 : i32
    %c0_i32_1 = arith.constant 0 : i32
    return %c0_i32, %c0_i32_0 : i32, i32
  }
  func.func @transform_2(%arg0: i32) -> (i32, i32) {
    %c0_i32 = arith.constant 0 : i32
    %c0_i32_0 = arith.constant 0 : i32
    %c0_i32_1 = arith.constant 0 : i32
    return %c0_i32, %c0_i32_0 : i32, i32
  }
  func.func @transform_3(%arg0: i32) -> (i32, i32) {
    %c0_i32 = arith.constant 0 : i32
    %c0_i32_0 = arith.constant 0 : i32
    return %c0_i32, %arg0 : i32, i32
  }
  func.func @transform_4(%arg0: i32) -> (i32, i32) {
    %c0_i32 = arith.constant 0 : i32
    %c0_i32_0 = arith.constant 0 : i32
    %c0_i32_1 = arith.constant 0 : i32
    return %c0_i32, %c0_i32_0 : i32, i32
  }
  func.func @transform_5(%arg0: i32) -> (i32, i32) {
    %c0_i32 = arith.constant 0 : i32
    %c0_i32_0 = arith.constant 0 : i32
    %c0_i32_1 = arith.constant 0 : i32
    return %c0_i32, %c0_i32_0 : i32, i32
  }
}

module attributes {stable_mosaic.version = 11 : i64} {
  func.func @kernel(%arg0: i32, %arg1: memref<8x72xbf16, #tpu.memory_space<vmem>>, %arg2: memref<8x580xf32, #tpu.memory_space<vmem>>, %arg3: memref<9x512xf32, #tpu.memory_space<vmem>>, %arg4: memref<8x512xf32, #tpu.memory_space<vmem>>, %arg5: memref<8x1xf32, #tpu.memory_space<vmem>>, %arg6: memref<8x1xf32, #tpu.memory_space<vmem>>, %arg7: memref<72x512xf32, #tpu.memory_space<vmem>>) attributes {dimension_semantics = [#tpu.dimension_semantics<arbitrary>], iteration_bounds = array<i64: 1>, scalar_prefetch = 0 : i64, scratch_operands = 1 : i64, tpu.core_type = #tpu.core_type<tc>, window_params = [{pipeline_mode = #tpu.pipeline_mode<synchronous>, transform_indices = @transform_0, window_bounds = array<i64: 8, 72>}, {pipeline_mode = #tpu.pipeline_mode<synchronous>, transform_indices = @transform_1, window_bounds = array<i64: 8, 580>}, {pipeline_mode = #tpu.pipeline_mode<synchronous>, transform_indices = @transform_2, window_bounds = array<i64: 9, 512>}, {transform_indices = @transform_3, window_bounds = array<i64: 8, 512>}, {pipeline_mode = #tpu.pipeline_mode<synchronous>, transform_indices = @transform_4, window_bounds = array<i64: 8, 1>}, {pipeline_mode = #tpu.pipeline_mode<synchronous>, transform_indices = @transform_5, window_bounds = array<i64: 8, 1>}]} {
    %c0 = arith.constant 0 : index
    %c0_0 = arith.constant 0 : index
    %0 = vector.load %arg2[%c0, %c0_0] : memref<8x580xf32, #tpu.memory_space<vmem>>, vector<8x512xf32>
    %c0_1 = arith.constant 0 : index
    %c0_2 = arith.constant 0 : index
    %1 = vector.load %arg3[%c0_1, %c0_2] : memref<9x512xf32, #tpu.memory_space<vmem>>, vector<1x512xf32>
    %2 = vector.broadcast %1 : vector<1x512xf32> to vector<8x512xf32>
    %3 = arith.mulf %0, %2 : vector<8x512xf32>
    %c0_3 = arith.constant 0 : index
    %c0_4 = arith.constant 0 : index
    %4 = vector.load %arg7[%c0_3, %c0_4] : memref<72x512xf32, #tpu.memory_space<vmem>>, vector<8x512xf32>
    tpu.vector_store %arg7[%c0_3, %c0_4], %3 {strides = array<i32>} : memref<72x512xf32, #tpu.memory_space<vmem>>, vector<8x512xf32>,
    %c0_5 = arith.constant 0 : index
    %c2 = arith.constant 2 : index
    %5 = vector.load %arg2[%c0_5, %c2] : memref<8x580xf32, #tpu.memory_space<vmem>>, vector<8x512xf32>
    %c1 = arith.constant 1 : index
    %c0_6 = arith.constant 0 : index
    %6 = vector.load %arg3[%c1, %c0_6] : memref<9x512xf32, #tpu.memory_space<vmem>>, vector<1x512xf32>
    %7 = vector.broadcast %6 : vector<1x512xf32> to vector<8x512xf32>
    %8 = arith.mulf %5, %7 : vector<8x512xf32>
    %c8 = arith.constant 8 : index
    %c0_7 = arith.constant 0 : index
    %9 = vector.load %arg7[%c8, %c0_7] : memref<72x512xf32, #tpu.memory_space<vmem>>, vector<8x512xf32>
    tpu.vector_store %arg7[%c8, %c0_7], %8 {strides = array<i32>} : memref<72x512xf32, #tpu.memory_space<vmem>>, vector<8x512xf32>,
    %c0_8 = arith.constant 0 : index
    %c4 = arith.constant 4 : index
    %10 = vector.load %arg2[%c0_8, %c4] : memref<8x580xf32, #tpu.memory_space<vmem>>, vector<8x512xf32>
    %c2_9 = arith.constant 2 : index
    %c0_10 = arith.constant 0 : index
    %11 = vector.load %arg3[%c2_9, %c0_10] : memref<9x512xf32, #tpu.memory_space<vmem>>, vector<1x512xf32>
    %12 = vector.broadcast %11 : vector<1x512xf32> to vector<8x512xf32>
    %13 = arith.mulf %10, %12 : vector<8x512xf32>
    %c16 = arith.constant 16 : index
    %c0_11 = arith.constant 0 : index
    %14 = vector.load %arg7[%c16, %c0_11] : memref<72x512xf32, #tpu.memory_space<vmem>>, vector<8x512xf32>
    tpu.vector_store %arg7[%c16, %c0_11], %13 {strides = array<i32>} : memref<72x512xf32, #tpu.memory_space<vmem>>, vector<8x512xf32>,
    %c0_12 = arith.constant 0 : index
    %c32 = arith.constant 32 : index
    %15 = vector.load %arg2[%c0_12, %c32] : memref<8x580xf32, #tpu.memory_space<vmem>>, vector<8x512xf32>
    %c3 = arith.constant 3 : index
    %c0_13 = arith.constant 0 : index
    %16 = vector.load %arg3[%c3, %c0_13] : memref<9x512xf32, #tpu.memory_space<vmem>>, vector<1x512xf32>
    %17 = vector.broadcast %16 : vector<1x512xf32> to vector<8x512xf32>
    %18 = arith.mulf %15, %17 : vector<8x512xf32>
    %c24 = arith.constant 24 : index
    %c0_14 = arith.constant 0 : index
    %19 = vector.load %arg7[%c24, %c0_14] : memref<72x512xf32, #tpu.memory_space<vmem>>, vector<8x512xf32>
    tpu.vector_store %arg7[%c24, %c0_14], %18 {strides = array<i32>} : memref<72x512xf32, #tpu.memory_space<vmem>>, vector<8x512xf32>,
    %c0_15 = arith.constant 0 : index
    %c34 = arith.constant 34 : index
    %20 = vector.load %arg2[%c0_15, %c34] : memref<8x580xf32, #tpu.memory_space<vmem>>, vector<8x512xf32>
    %c4_16 = arith.constant 4 : index
    %c0_17 = arith.constant 0 : index
    %21 = vector.load %arg3[%c4_16, %c0_17] : memref<9x512xf32, #tpu.memory_space<vmem>>, vector<1x512xf32>
    %22 = vector.broadcast %21 : vector<1x512xf32> to vector<8x512xf32>
    %23 = arith.mulf %20, %22 : vector<8x512xf32>
    %c32_18 = arith.constant 32 : index
    %c0_19 = arith.constant 0 : index
    %24 = vector.load %arg7[%c32_18, %c0_19] : memref<72x512xf32, #tpu.memory_space<vmem>>, vector<8x512xf32>
    tpu.vector_store %arg7[%c32_18, %c0_19], %23 {strides = array<i32>} : memref<72x512xf32, #tpu.memory_space<vmem>>, vector<8x512xf32>,
    %c0_20 = arith.constant 0 : index
    %c36 = arith.constant 36 : index
    %25 = vector.load %arg2[%c0_20, %c36] : memref<8x580xf32, #tpu.memory_space<vmem>>, vector<8x512xf32>
    %c5 = arith.constant 5 : index
    %c0_21 = arith.constant 0 : index
    %26 = vector.load %arg3[%c5, %c0_21] : memref<9x512xf32, #tpu.memory_space<vmem>>, vector<1x512xf32>
    %27 = vector.broadcast %26 : vector<1x512xf32> to vector<8x512xf32>
    %28 = arith.mulf %25, %27 : vector<8x512xf32>
    %c40 = arith.constant 40 : index
    %c0_22 = arith.constant 0 : index
    %29 = vector.load %arg7[%c40, %c0_22] : memref<72x512xf32, #tpu.memory_space<vmem>>, vector<8x512xf32>
    tpu.vector_store %arg7[%c40, %c0_22], %28 {strides = array<i32>} : memref<72x512xf32, #tpu.memory_space<vmem>>, vector<8x512xf32>,
    %c0_23 = arith.constant 0 : index
    %c64 = arith.constant 64 : index
    %30 = vector.load %arg2[%c0_23, %c64] : memref<8x580xf32, #tpu.memory_space<vmem>>, vector<8x512xf32>
    %c6 = arith.constant 6 : index
    %c0_24 = arith.constant 0 : index
    %31 = vector.load %arg3[%c6, %c0_24] : memref<9x512xf32, #tpu.memory_space<vmem>>, vector<1x512xf32>
    %32 = vector.broadcast %31 : vector<1x512xf32> to vector<8x512xf32>
    %33 = arith.mulf %30, %32 : vector<8x512xf32>
    %c48 = arith.constant 48 : index
    %c0_25 = arith.constant 0 : index
    %34 = vector.load %arg7[%c48, %c0_25] : memref<72x512xf32, #tpu.memory_space<vmem>>, vector<8x512xf32>
    tpu.vector_store %arg7[%c48, %c0_25], %33 {strides = array<i32>} : memref<72x512xf32, #tpu.memory_space<vmem>>, vector<8x512xf32>,
    %c0_26 = arith.constant 0 : index
    %c66 = arith.constant 66 : index
    %35 = vector.load %arg2[%c0_26, %c66] : memref<8x580xf32, #tpu.memory_space<vmem>>, vector<8x512xf32>
    %c7 = arith.constant 7 : index
    %c0_27 = arith.constant 0 : index
    %36 = vector.load %arg3[%c7, %c0_27] : memref<9x512xf32, #tpu.memory_space<vmem>>, vector<1x512xf32>
    %37 = vector.broadcast %36 : vector<1x512xf32> to vector<8x512xf32>
    %38 = arith.mulf %35, %37 : vector<8x512xf32>
    %c56 = arith.constant 56 : index
    %c0_28 = arith.constant 0 : index
    %39 = vector.load %arg7[%c56, %c0_28] : memref<72x512xf32, #tpu.memory_space<vmem>>, vector<8x512xf32>
    tpu.vector_store %arg7[%c56, %c0_28], %38 {strides = array<i32>} : memref<72x512xf32, #tpu.memory_space<vmem>>, vector<8x512xf32>,
    %c0_29 = arith.constant 0 : index
    %c68 = arith.constant 68 : index
    %40 = vector.load %arg2[%c0_29, %c68] : memref<8x580xf32, #tpu.memory_space<vmem>>, vector<8x512xf32>
    %c8_30 = arith.constant 8 : index
    %c0_31 = arith.constant 0 : index
    %41 = vector.load %arg3[%c8_30, %c0_31] : memref<9x512xf32, #tpu.memory_space<vmem>>, vector<1x512xf32>
    %42 = vector.broadcast %41 : vector<1x512xf32> to vector<8x512xf32>
    %43 = arith.mulf %40, %42 : vector<8x512xf32>
    %c64_32 = arith.constant 64 : index
    %c0_33 = arith.constant 0 : index
    %44 = vector.load %arg7[%c64_32, %c0_33] : memref<72x512xf32, #tpu.memory_space<vmem>>, vector<8x512xf32>
    tpu.vector_store %arg7[%c64_32, %c0_33], %43 {strides = array<i32>} : memref<72x512xf32, #tpu.memory_space<vmem>>, vector<8x512xf32>,
    %c0_34 = arith.constant 0 : index
    %c0_35 = arith.constant 0 : index
    %45 = vector.load %arg1[%c0_34, %c0_35] : memref<8x72xbf16, #tpu.memory_space<vmem>>, vector<8x72xbf16>
    %c0_36 = arith.constant 0 : index
    %c0_37 = arith.constant 0 : index
    %46 = vector.load %arg7[%c0_36, %c0_37] : memref<72x512xf32, #tpu.memory_space<vmem>>, vector<72x512xf32>
    %47 = arith.truncf %46 : vector<72x512xf32> to vector<72x512xbf16>
    %cst = arith.constant dense<0.000000e+00> : vector<8x512xf32>
    %48 = tpu.matmul %45, %47, %cst {dimension_numbers = #tpu.dot_dimension_numbers<[1], [0], [0], [1], [0, 0, 1, 1], [], []>} : vector<8x72xbf16>, vector<72x512xbf16>, vector<8x512xf32> -> vector<8x512xf32>
    %cst_38 = arith.constant dense<0.000000e+00> : vector<8xf32>
    %49 = vector.multi_reduction <add>, %48, %cst_38 [1] : vector<8x512xf32> to vector<8xf32>
    %50 = vector.shape_cast %49 : vector<8xf32> to vector<8x1xf32>
    %c0_39 = arith.constant 0 : index
    %c0_40 = arith.constant 0 : index
    %51 = vector.load %arg5[%c0_39, %c0_40] : memref<8x1xf32, #tpu.memory_space<vmem>>, vector<8x1xf32>
    tpu.vector_store %arg5[%c0_39, %c0_40], %50 {strides = array<i32>} : memref<8x1xf32, #tpu.memory_space<vmem>>, vector<8x1xf32>,
    %52 = arith.mulf %48, %48 : vector<8x512xf32>
    %cst_41 = arith.constant dense<0.000000e+00> : vector<8xf32>
    %53 = vector.multi_reduction <add>, %52, %cst_41 [1] : vector<8x512xf32> to vector<8xf32>
    %54 = vector.shape_cast %53 : vector<8xf32> to vector<8x1xf32>
    %c0_42 = arith.constant 0 : index
    %c0_43 = arith.constant 0 : index
    %55 = vector.load %arg6[%c0_42, %c0_43] : memref<8x1xf32, #tpu.memory_space<vmem>>, vector<8x1xf32>
    tpu.vector_store %arg6[%c0_42, %c0_43], %54 {strides = array<i32>} : memref<8x1xf32, #tpu.memory_space<vmem>>, vector<8x1xf32>,
    %c0_44 = arith.constant 0 : index
    %c0_45 = arith.constant 0 : index
    %56 = vector.load %arg4[%c0_44, %c0_45] : memref<8x512xf32, #tpu.memory_space<vmem>>, vector<8x512xf32>
    tpu.vector_store %arg4[%c0_44, %c0_45], %48 {strides = array<i32>} : memref<8x512xf32, #tpu.memory_space<vmem>>, vector<8x512xf32>,
    return
  }
  func.func @transform_0(%arg0: i32) -> (i32, i32) {
    %c0_i32 = arith.constant 0 : i32
    %c0_i32_0 = arith.constant 0 : i32
    %c0_i32_1 = arith.constant 0 : i32
    return %c0_i32, %c0_i32_0 : i32, i32
  }
  func.func @transform_1(%arg0: i32) -> (i32, i32) {
    %c0_i32 = arith.constant 0 : i32
    %c0_i32_0 = arith.constant 0 : i32
    %c0_i32_1 = arith.constant 0 : i32
    return %c0_i32, %c0_i32_0 : i32, i32
  }
  func.func @transform_2(%arg0: i32) -> (i32, i32) {
    %c0_i32 = arith.constant 0 : i32
    %c0_i32_0 = arith.constant 0 : i32
    %c0_i32_1 = arith.constant 0 : i32
    return %c0_i32, %c0_i32_0 : i32, i32
  }
  func.func @transform_3(%arg0: i32) -> (i32, i32) {
    %c0_i32 = arith.constant 0 : i32
    %c0_i32_0 = arith.constant 0 : i32
    return %c0_i32, %arg0 : i32, i32
  }
  func.func @transform_4(%arg0: i32) -> (i32, i32) {
    %c0_i32 = arith.constant 0 : i32
    %c0_i32_0 = arith.constant 0 : i32
    %c0_i32_1 = arith.constant 0 : i32
    return %c0_i32, %c0_i32_0 : i32, i32
  }
  func.func @transform_5(%arg0: i32) -> (i32, i32) {
    %c0_i32 = arith.constant 0 : i32
    %c0_i32_0 = arith.constant 0 : i32
    %c0_i32_1 = arith.constant 0 : i32
    return %c0_i32, %c0_i32_0 : i32, i32
  }
}

module attributes {stable_mosaic.version = 11 : i64} {
  func.func @kernel(%arg0: i32, %arg1: memref<8x72xbf16, #tpu.memory_space<vmem>>, %arg2: memref<8x648xf32, #tpu.memory_space<vmem>>, %arg3: memref<9x512xf32, #tpu.memory_space<vmem>>, %arg4: memref<8x512xf32, #tpu.memory_space<vmem>>, %arg5: memref<8x1xf32, #tpu.memory_space<vmem>>, %arg6: memref<8x1xf32, #tpu.memory_space<vmem>>, %arg7: memref<72x512xf32, #tpu.memory_space<vmem>>) attributes {dimension_semantics = [#tpu.dimension_semantics<arbitrary>], iteration_bounds = array<i64: 1>, scalar_prefetch = 0 : i64, scratch_operands = 1 : i64, tpu.core_type = #tpu.core_type<tc>, window_params = [{pipeline_mode = #tpu.pipeline_mode<synchronous>, transform_indices = @transform_0, window_bounds = array<i64: 8, 72>}, {pipeline_mode = #tpu.pipeline_mode<synchronous>, transform_indices = @transform_1, window_bounds = array<i64: 8, 648>}, {pipeline_mode = #tpu.pipeline_mode<synchronous>, transform_indices = @transform_2, window_bounds = array<i64: 9, 512>}, {transform_indices = @transform_3, window_bounds = array<i64: 8, 512>}, {pipeline_mode = #tpu.pipeline_mode<synchronous>, transform_indices = @transform_4, window_bounds = array<i64: 8, 1>}, {pipeline_mode = #tpu.pipeline_mode<synchronous>, transform_indices = @transform_5, window_bounds = array<i64: 8, 1>}]} {
    %c0 = arith.constant 0 : index
    %c0_0 = arith.constant 0 : index
    %0 = vector.load %arg2[%c0, %c0_0] : memref<8x648xf32, #tpu.memory_space<vmem>>, vector<8x512xf32>
    %c0_1 = arith.constant 0 : index
    %c0_2 = arith.constant 0 : index
    %1 = vector.load %arg3[%c0_1, %c0_2] : memref<9x512xf32, #tpu.memory_space<vmem>>, vector<1x512xf32>
    %2 = vector.broadcast %1 : vector<1x512xf32> to vector<8x512xf32>
    %3 = arith.mulf %0, %2 : vector<8x512xf32>
    %c0_3 = arith.constant 0 : index
    %c0_4 = arith.constant 0 : index
    %4 = vector.load %arg7[%c0_3, %c0_4] : memref<72x512xf32, #tpu.memory_space<vmem>>, vector<8x512xf32>
    tpu.vector_store %arg7[%c0_3, %c0_4], %3 {strides = array<i32>} : memref<72x512xf32, #tpu.memory_space<vmem>>, vector<8x512xf32>,
    %c0_5 = arith.constant 0 : index
    %c4 = arith.constant 4 : index
    %5 = vector.load %arg2[%c0_5, %c4] : memref<8x648xf32, #tpu.memory_space<vmem>>, vector<8x512xf32>
    %c1 = arith.constant 1 : index
    %c0_6 = arith.constant 0 : index
    %6 = vector.load %arg3[%c1, %c0_6] : memref<9x512xf32, #tpu.memory_space<vmem>>, vector<1x512xf32>
    %7 = vector.broadcast %6 : vector<1x512xf32> to vector<8x512xf32>
    %8 = arith.mulf %5, %7 : vector<8x512xf32>
    %c8 = arith.constant 8 : index
    %c0_7 = arith.constant 0 : index
    %9 = vector.load %arg7[%c8, %c0_7] : memref<72x512xf32, #tpu.memory_space<vmem>>, vector<8x512xf32>
    tpu.vector_store %arg7[%c8, %c0_7], %8 {strides = array<i32>} : memref<72x512xf32, #tpu.memory_space<vmem>>, vector<8x512xf32>,
    %c0_8 = arith.constant 0 : index
    %c8_9 = arith.constant 8 : index
    %10 = vector.load %arg2[%c0_8, %c8_9] : memref<8x648xf32, #tpu.memory_space<vmem>>, vector<8x512xf32>
    %c2 = arith.constant 2 : index
    %c0_10 = arith.constant 0 : index
    %11 = vector.load %arg3[%c2, %c0_10] : memref<9x512xf32, #tpu.memory_space<vmem>>, vector<1x512xf32>
    %12 = vector.broadcast %11 : vector<1x512xf32> to vector<8x512xf32>
    %13 = arith.mulf %10, %12 : vector<8x512xf32>
    %c16 = arith.constant 16 : index
    %c0_11 = arith.constant 0 : index
    %14 = vector.load %arg7[%c16, %c0_11] : memref<72x512xf32, #tpu.memory_space<vmem>>, vector<8x512xf32>
    tpu.vector_store %arg7[%c16, %c0_11], %13 {strides = array<i32>} : memref<72x512xf32, #tpu.memory_space<vmem>>, vector<8x512xf32>,
    %c0_12 = arith.constant 0 : index
    %c64 = arith.constant 64 : index
    %15 = vector.load %arg2[%c0_12, %c64] : memref<8x648xf32, #tpu.memory_space<vmem>>, vector<8x512xf32>
    %c3 = arith.constant 3 : index
    %c0_13 = arith.constant 0 : index
    %16 = vector.load %arg3[%c3, %c0_13] : memref<9x512xf32, #tpu.memory_space<vmem>>, vector<1x512xf32>
    %17 = vector.broadcast %16 : vector<1x512xf32> to vector<8x512xf32>
    %18 = arith.mulf %15, %17 : vector<8x512xf32>
    %c24 = arith.constant 24 : index
    %c0_14 = arith.constant 0 : index
    %19 = vector.load %arg7[%c24, %c0_14] : memref<72x512xf32, #tpu.memory_space<vmem>>, vector<8x512xf32>
    tpu.vector_store %arg7[%c24, %c0_14], %18 {strides = array<i32>} : memref<72x512xf32, #tpu.memory_space<vmem>>, vector<8x512xf32>,
    %c0_15 = arith.constant 0 : index
    %c68 = arith.constant 68 : index
    %20 = vector.load %arg2[%c0_15, %c68] : memref<8x648xf32, #tpu.memory_space<vmem>>, vector<8x512xf32>
    %c4_16 = arith.constant 4 : index
    %c0_17 = arith.constant 0 : index
    %21 = vector.load %arg3[%c4_16, %c0_17] : memref<9x512xf32, #tpu.memory_space<vmem>>, vector<1x512xf32>
    %22 = vector.broadcast %21 : vector<1x512xf32> to vector<8x512xf32>
    %23 = arith.mulf %20, %22 : vector<8x512xf32>
    %c32 = arith.constant 32 : index
    %c0_18 = arith.constant 0 : index
    %24 = vector.load %arg7[%c32, %c0_18] : memref<72x512xf32, #tpu.memory_space<vmem>>, vector<8x512xf32>
    tpu.vector_store %arg7[%c32, %c0_18], %23 {strides = array<i32>} : memref<72x512xf32, #tpu.memory_space<vmem>>, vector<8x512xf32>,
    %c0_19 = arith.constant 0 : index
    %c72 = arith.constant 72 : index
    %25 = vector.load %arg2[%c0_19, %c72] : memref<8x648xf32, #tpu.memory_space<vmem>>, vector<8x512xf32>
    %c5 = arith.constant 5 : index
    %c0_20 = arith.constant 0 : index
    %26 = vector.load %arg3[%c5, %c0_20] : memref<9x512xf32, #tpu.memory_space<vmem>>, vector<1x512xf32>
    %27 = vector.broadcast %26 : vector<1x512xf32> to vector<8x512xf32>
    %28 = arith.mulf %25, %27 : vector<8x512xf32>
    %c40 = arith.constant 40 : index
    %c0_21 = arith.constant 0 : index
    %29 = vector.load %arg7[%c40, %c0_21] : memref<72x512xf32, #tpu.memory_space<vmem>>, vector<8x512xf32>
    tpu.vector_store %arg7[%c40, %c0_21], %28 {strides = array<i32>} : memref<72x512xf32, #tpu.memory_space<vmem>>, vector<8x512xf32>,
    %c0_22 = arith.constant 0 : index
    %c128 = arith.constant 128 : index
    %30 = vector.load %arg2[%c0_22, %c128] : memref<8x648xf32, #tpu.memory_space<vmem>>, vector<8x512xf32>
    %c6 = arith.constant 6 : index
    %c0_23 = arith.constant 0 : index
    %31 = vector.load %arg3[%c6, %c0_23] : memref<9x512xf32, #tpu.memory_space<vmem>>, vector<1x512xf32>
    %32 = vector.broadcast %31 : vector<1x512xf32> to vector<8x512xf32>
    %33 = arith.mulf %30, %32 : vector<8x512xf32>
    %c48 = arith.constant 48 : index
    %c0_24 = arith.constant 0 : index
    %34 = vector.load %arg7[%c48, %c0_24] : memref<72x512xf32, #tpu.memory_space<vmem>>, vector<8x512xf32>
    tpu.vector_store %arg7[%c48, %c0_24], %33 {strides = array<i32>} : memref<72x512xf32, #tpu.memory_space<vmem>>, vector<8x512xf32>,
    %c0_25 = arith.constant 0 : index
    %c132 = arith.constant 132 : index
    %35 = vector.load %arg2[%c0_25, %c132] : memref<8x648xf32, #tpu.memory_space<vmem>>, vector<8x512xf32>
    %c7 = arith.constant 7 : index
    %c0_26 = arith.constant 0 : index
    %36 = vector.load %arg3[%c7, %c0_26] : memref<9x512xf32, #tpu.memory_space<vmem>>, vector<1x512xf32>
    %37 = vector.broadcast %36 : vector<1x512xf32> to vector<8x512xf32>
    %38 = arith.mulf %35, %37 : vector<8x512xf32>
    %c56 = arith.constant 56 : index
    %c0_27 = arith.constant 0 : index
    %39 = vector.load %arg7[%c56, %c0_27] : memref<72x512xf32, #tpu.memory_space<vmem>>, vector<8x512xf32>
    tpu.vector_store %arg7[%c56, %c0_27], %38 {strides = array<i32>} : memref<72x512xf32, #tpu.memory_space<vmem>>, vector<8x512xf32>,
    %c0_28 = arith.constant 0 : index
    %c136 = arith.constant 136 : index
    %40 = vector.load %arg2[%c0_28, %c136] : memref<8x648xf32, #tpu.memory_space<vmem>>, vector<8x512xf32>
    %c8_29 = arith.constant 8 : index
    %c0_30 = arith.constant 0 : index
    %41 = vector.load %arg3[%c8_29, %c0_30] : memref<9x512xf32, #tpu.memory_space<vmem>>, vector<1x512xf32>
    %42 = vector.broadcast %41 : vector<1x512xf32> to vector<8x512xf32>
    %43 = arith.mulf %40, %42 : vector<8x512xf32>
    %c64_31 = arith.constant 64 : index
    %c0_32 = arith.constant 0 : index
    %44 = vector.load %arg7[%c64_31, %c0_32] : memref<72x512xf32, #tpu.memory_space<vmem>>, vector<8x512xf32>
    tpu.vector_store %arg7[%c64_31, %c0_32], %43 {strides = array<i32>} : memref<72x512xf32, #tpu.memory_space<vmem>>, vector<8x512xf32>,
    %c0_33 = arith.constant 0 : index
    %c0_34 = arith.constant 0 : index
    %45 = vector.load %arg1[%c0_33, %c0_34] : memref<8x72xbf16, #tpu.memory_space<vmem>>, vector<8x72xbf16>
    %c0_35 = arith.constant 0 : index
    %c0_36 = arith.constant 0 : index
    %46 = vector.load %arg7[%c0_35, %c0_36] : memref<72x512xf32, #tpu.memory_space<vmem>>, vector<72x512xf32>
    %47 = arith.truncf %46 : vector<72x512xf32> to vector<72x512xbf16>
    %cst = arith.constant dense<0.000000e+00> : vector<8x512xf32>
    %48 = tpu.matmul %45, %47, %cst {dimension_numbers = #tpu.dot_dimension_numbers<[1], [0], [0], [1], [0, 0, 1, 1], [], []>} : vector<8x72xbf16>, vector<72x512xbf16>, vector<8x512xf32> -> vector<8x512xf32>
    %cst_37 = arith.constant dense<0.000000e+00> : vector<8xf32>
    %49 = vector.multi_reduction <add>, %48, %cst_37 [1] : vector<8x512xf32> to vector<8xf32>
    %50 = vector.shape_cast %49 : vector<8xf32> to vector<8x1xf32>
    %c0_38 = arith.constant 0 : index
    %c0_39 = arith.constant 0 : index
    %51 = vector.load %arg5[%c0_38, %c0_39] : memref<8x1xf32, #tpu.memory_space<vmem>>, vector<8x1xf32>
    tpu.vector_store %arg5[%c0_38, %c0_39], %50 {strides = array<i32>} : memref<8x1xf32, #tpu.memory_space<vmem>>, vector<8x1xf32>,
    %52 = arith.mulf %48, %48 : vector<8x512xf32>
    %cst_40 = arith.constant dense<0.000000e+00> : vector<8xf32>
    %53 = vector.multi_reduction <add>, %52, %cst_40 [1] : vector<8x512xf32> to vector<8xf32>
    %54 = vector.shape_cast %53 : vector<8xf32> to vector<8x1xf32>
    %c0_41 = arith.constant 0 : index
    %c0_42 = arith.constant 0 : index
    %55 = vector.load %arg6[%c0_41, %c0_42] : memref<8x1xf32, #tpu.memory_space<vmem>>, vector<8x1xf32>
    tpu.vector_store %arg6[%c0_41, %c0_42], %54 {strides = array<i32>} : memref<8x1xf32, #tpu.memory_space<vmem>>, vector<8x1xf32>,
    %c0_43 = arith.constant 0 : index
    %c0_44 = arith.constant 0 : index
    %56 = vector.load %arg4[%c0_43, %c0_44] : memref<8x512xf32, #tpu.memory_space<vmem>>, vector<8x512xf32>
    tpu.vector_store %arg4[%c0_43, %c0_44], %48 {strides = array<i32>} : memref<8x512xf32, #tpu.memory_space<vmem>>, vector<8x512xf32>,
    return
  }
  func.func @transform_0(%arg0: i32) -> (i32, i32) {
    %c0_i32 = arith.constant 0 : i32
    %c0_i32_0 = arith.constant 0 : i32
    %c0_i32_1 = arith.constant 0 : i32
    return %c0_i32, %c0_i32_0 : i32, i32
  }
  func.func @transform_1(%arg0: i32) -> (i32, i32) {
    %c0_i32 = arith.constant 0 : i32
    %c0_i32_0 = arith.constant 0 : i32
    %c0_i32_1 = arith.constant 0 : i32
    return %c0_i32, %c0_i32_0 : i32, i32
  }
  func.func @transform_2(%arg0: i32) -> (i32, i32) {
    %c0_i32 = arith.constant 0 : i32
    %c0_i32_0 = arith.constant 0 : i32
    %c0_i32_1 = arith.constant 0 : i32
    return %c0_i32, %c0_i32_0 : i32, i32
  }
  func.func @transform_3(%arg0: i32) -> (i32, i32) {
    %c0_i32 = arith.constant 0 : i32
    %c0_i32_0 = arith.constant 0 : i32
    return %c0_i32, %arg0 : i32, i32
  }
  func.func @transform_4(%arg0: i32) -> (i32, i32) {
    %c0_i32 = arith.constant 0 : i32
    %c0_i32_0 = arith.constant 0 : i32
    %c0_i32_1 = arith.constant 0 : i32
    return %c0_i32, %c0_i32_0 : i32, i32
  }
  func.func @transform_5(%arg0: i32) -> (i32, i32) {
    %c0_i32 = arith.constant 0 : i32
    %c0_i32_0 = arith.constant 0 : i32
    %c0_i32_1 = arith.constant 0 : i32
    return %c0_i32, %c0_i32_0 : i32, i32
  }
}

module attributes {stable_mosaic.version = 11 : i64} {
  func.func @kernel(%arg0: i32, %arg1: memref<8x72xbf16, #tpu.memory_space<vmem>>, %arg2: memref<8x784xf32, #tpu.memory_space<vmem>>, %arg3: memref<9x512xf32, #tpu.memory_space<vmem>>, %arg4: memref<8x512xf32, #tpu.memory_space<vmem>>, %arg5: memref<8x1xf32, #tpu.memory_space<vmem>>, %arg6: memref<8x1xf32, #tpu.memory_space<vmem>>, %arg7: memref<72x512xf32, #tpu.memory_space<vmem>>) attributes {dimension_semantics = [#tpu.dimension_semantics<arbitrary>], iteration_bounds = array<i64: 1>, scalar_prefetch = 0 : i64, scratch_operands = 1 : i64, tpu.core_type = #tpu.core_type<tc>, window_params = [{pipeline_mode = #tpu.pipeline_mode<synchronous>, transform_indices = @transform_0, window_bounds = array<i64: 8, 72>}, {pipeline_mode = #tpu.pipeline_mode<synchronous>, transform_indices = @transform_1, window_bounds = array<i64: 8, 784>}, {pipeline_mode = #tpu.pipeline_mode<synchronous>, transform_indices = @transform_2, window_bounds = array<i64: 9, 512>}, {transform_indices = @transform_3, window_bounds = array<i64: 8, 512>}, {pipeline_mode = #tpu.pipeline_mode<synchronous>, transform_indices = @transform_4, window_bounds = array<i64: 8, 1>}, {pipeline_mode = #tpu.pipeline_mode<synchronous>, transform_indices = @transform_5, window_bounds = array<i64: 8, 1>}]} {
    %c0 = arith.constant 0 : index
    %c0_0 = arith.constant 0 : index
    %0 = vector.load %arg2[%c0, %c0_0] : memref<8x784xf32, #tpu.memory_space<vmem>>, vector<8x512xf32>
    %c0_1 = arith.constant 0 : index
    %c0_2 = arith.constant 0 : index
    %1 = vector.load %arg3[%c0_1, %c0_2] : memref<9x512xf32, #tpu.memory_space<vmem>>, vector<1x512xf32>
    %2 = vector.broadcast %1 : vector<1x512xf32> to vector<8x512xf32>
    %3 = arith.mulf %0, %2 : vector<8x512xf32>
    %c0_3 = arith.constant 0 : index
    %c0_4 = arith.constant 0 : index
    %4 = vector.load %arg7[%c0_3, %c0_4] : memref<72x512xf32, #tpu.memory_space<vmem>>, vector<8x512xf32>
    tpu.vector_store %arg7[%c0_3, %c0_4], %3 {strides = array<i32>} : memref<72x512xf32, #tpu.memory_space<vmem>>, vector<8x512xf32>,
    %c0_5 = arith.constant 0 : index
    %c8 = arith.constant 8 : index
    %5 = vector.load %arg2[%c0_5, %c8] : memref<8x784xf32, #tpu.memory_space<vmem>>, vector<8x512xf32>
    %c1 = arith.constant 1 : index
    %c0_6 = arith.constant 0 : index
    %6 = vector.load %arg3[%c1, %c0_6] : memref<9x512xf32, #tpu.memory_space<vmem>>, vector<1x512xf32>
    %7 = vector.broadcast %6 : vector<1x512xf32> to vector<8x512xf32>
    %8 = arith.mulf %5, %7 : vector<8x512xf32>
    %c8_7 = arith.constant 8 : index
    %c0_8 = arith.constant 0 : index
    %9 = vector.load %arg7[%c8_7, %c0_8] : memref<72x512xf32, #tpu.memory_space<vmem>>, vector<8x512xf32>
    tpu.vector_store %arg7[%c8_7, %c0_8], %8 {strides = array<i32>} : memref<72x512xf32, #tpu.memory_space<vmem>>, vector<8x512xf32>,
    %c0_9 = arith.constant 0 : index
    %c16 = arith.constant 16 : index
    %10 = vector.load %arg2[%c0_9, %c16] : memref<8x784xf32, #tpu.memory_space<vmem>>, vector<8x512xf32>
    %c2 = arith.constant 2 : index
    %c0_10 = arith.constant 0 : index
    %11 = vector.load %arg3[%c2, %c0_10] : memref<9x512xf32, #tpu.memory_space<vmem>>, vector<1x512xf32>
    %12 = vector.broadcast %11 : vector<1x512xf32> to vector<8x512xf32>
    %13 = arith.mulf %10, %12 : vector<8x512xf32>
    %c16_11 = arith.constant 16 : index
    %c0_12 = arith.constant 0 : index
    %14 = vector.load %arg7[%c16_11, %c0_12] : memref<72x512xf32, #tpu.memory_space<vmem>>, vector<8x512xf32>
    tpu.vector_store %arg7[%c16_11, %c0_12], %13 {strides = array<i32>} : memref<72x512xf32, #tpu.memory_space<vmem>>, vector<8x512xf32>,
    %c0_13 = arith.constant 0 : index
    %c128 = arith.constant 128 : index
    %15 = vector.load %arg2[%c0_13, %c128] : memref<8x784xf32, #tpu.memory_space<vmem>>, vector<8x512xf32>
    %c3 = arith.constant 3 : index
    %c0_14 = arith.constant 0 : index
    %16 = vector.load %arg3[%c3, %c0_14] : memref<9x512xf32, #tpu.memory_space<vmem>>, vector<1x512xf32>
    %17 = vector.broadcast %16 : vector<1x512xf32> to vector<8x512xf32>
    %18 = arith.mulf %15, %17 : vector<8x512xf32>
    %c24 = arith.constant 24 : index
    %c0_15 = arith.constant 0 : index
    %19 = vector.load %arg7[%c24, %c0_15] : memref<72x512xf32, #tpu.memory_space<vmem>>, vector<8x512xf32>
    tpu.vector_store %arg7[%c24, %c0_15], %18 {strides = array<i32>} : memref<72x512xf32, #tpu.memory_space<vmem>>, vector<8x512xf32>,
    %c0_16 = arith.constant 0 : index
    %c136 = arith.constant 136 : index
    %20 = vector.load %arg2[%c0_16, %c136] : memref<8x784xf32, #tpu.memory_space<vmem>>, vector<8x512xf32>
    %c4 = arith.constant 4 : index
    %c0_17 = arith.constant 0 : index
    %21 = vector.load %arg3[%c4, %c0_17] : memref<9x512xf32, #tpu.memory_space<vmem>>, vector<1x512xf32>
    %22 = vector.broadcast %21 : vector<1x512xf32> to vector<8x512xf32>
    %23 = arith.mulf %20, %22 : vector<8x512xf32>
    %c32 = arith.constant 32 : index
    %c0_18 = arith.constant 0 : index
    %24 = vector.load %arg7[%c32, %c0_18] : memref<72x512xf32, #tpu.memory_space<vmem>>, vector<8x512xf32>
    tpu.vector_store %arg7[%c32, %c0_18], %23 {strides = array<i32>} : memref<72x512xf32, #tpu.memory_space<vmem>>, vector<8x512xf32>,
    %c0_19 = arith.constant 0 : index
    %c144 = arith.constant 144 : index
    %25 = vector.load %arg2[%c0_19, %c144] : memref<8x784xf32, #tpu.memory_space<vmem>>, vector<8x512xf32>
    %c5 = arith.constant 5 : index
    %c0_20 = arith.constant 0 : index
    %26 = vector.load %arg3[%c5, %c0_20] : memref<9x512xf32, #tpu.memory_space<vmem>>, vector<1x512xf32>
    %27 = vector.broadcast %26 : vector<1x512xf32> to vector<8x512xf32>
    %28 = arith.mulf %25, %27 : vector<8x512xf32>
    %c40 = arith.constant 40 : index
    %c0_21 = arith.constant 0 : index
    %29 = vector.load %arg7[%c40, %c0_21] : memref<72x512xf32, #tpu.memory_space<vmem>>, vector<8x512xf32>
    tpu.vector_store %arg7[%c40, %c0_21], %28 {strides = array<i32>} : memref<72x512xf32, #tpu.memory_space<vmem>>, vector<8x512xf32>,
    %c0_22 = arith.constant 0 : index
    %c256 = arith.constant 256 : index
    %30 = vector.load %arg2[%c0_22, %c256] : memref<8x784xf32, #tpu.memory_space<vmem>>, vector<8x512xf32>
    %c6 = arith.constant 6 : index
    %c0_23 = arith.constant 0 : index
    %31 = vector.load %arg3[%c6, %c0_23] : memref<9x512xf32, #tpu.memory_space<vmem>>, vector<1x512xf32>
    %32 = vector.broadcast %31 : vector<1x512xf32> to vector<8x512xf32>
    %33 = arith.mulf %30, %32 : vector<8x512xf32>
    %c48 = arith.constant 48 : index
    %c0_24 = arith.constant 0 : index
    %34 = vector.load %arg7[%c48, %c0_24] : memref<72x512xf32, #tpu.memory_space<vmem>>, vector<8x512xf32>
    tpu.vector_store %arg7[%c48, %c0_24], %33 {strides = array<i32>} : memref<72x512xf32, #tpu.memory_space<vmem>>, vector<8x512xf32>,
    %c0_25 = arith.constant 0 : index
    %c264 = arith.constant 264 : index
    %35 = vector.load %arg2[%c0_25, %c264] : memref<8x784xf32, #tpu.memory_space<vmem>>, vector<8x512xf32>
    %c7 = arith.constant 7 : index
    %c0_26 = arith.constant 0 : index
    %36 = vector.load %arg3[%c7, %c0_26] : memref<9x512xf32, #tpu.memory_space<vmem>>, vector<1x512xf32>
    %37 = vector.broadcast %36 : vector<1x512xf32> to vector<8x512xf32>
    %38 = arith.mulf %35, %37 : vector<8x512xf32>
    %c56 = arith.constant 56 : index
    %c0_27 = arith.constant 0 : index
    %39 = vector.load %arg7[%c56, %c0_27] : memref<72x512xf32, #tpu.memory_space<vmem>>, vector<8x512xf32>
    tpu.vector_store %arg7[%c56, %c0_27], %38 {strides = array<i32>} : memref<72x512xf32, #tpu.memory_space<vmem>>, vector<8x512xf32>,
    %c0_28 = arith.constant 0 : index
    %c272 = arith.constant 272 : index
    %40 = vector.load %arg2[%c0_28, %c272] : memref<8x784xf32, #tpu.memory_space<vmem>>, vector<8x512xf32>
    %c8_29 = arith.constant 8 : index
    %c0_30 = arith.constant 0 : index
    %41 = vector.load %arg3[%c8_29, %c0_30] : memref<9x512xf32, #tpu.memory_space<vmem>>, vector<1x512xf32>
    %42 = vector.broadcast %41 : vector<1x512xf32> to vector<8x512xf32>
    %43 = arith.mulf %40, %42 : vector<8x512xf32>
    %c64 = arith.constant 64 : index
    %c0_31 = arith.constant 0 : index
    %44 = vector.load %arg7[%c64, %c0_31] : memref<72x512xf32, #tpu.memory_space<vmem>>, vector<8x512xf32>
    tpu.vector_store %arg7[%c64, %c0_31], %43 {strides = array<i32>} : memref<72x512xf32, #tpu.memory_space<vmem>>, vector<8x512xf32>,
    %c0_32 = arith.constant 0 : index
    %c0_33 = arith.constant 0 : index
    %45 = vector.load %arg1[%c0_32, %c0_33] : memref<8x72xbf16, #tpu.memory_space<vmem>>, vector<8x72xbf16>
    %c0_34 = arith.constant 0 : index
    %c0_35 = arith.constant 0 : index
    %46 = vector.load %arg7[%c0_34, %c0_35] : memref<72x512xf32, #tpu.memory_space<vmem>>, vector<72x512xf32>
    %47 = arith.truncf %46 : vector<72x512xf32> to vector<72x512xbf16>
    %cst = arith.constant dense<0.000000e+00> : vector<8x512xf32>
    %48 = tpu.matmul %45, %47, %cst {dimension_numbers = #tpu.dot_dimension_numbers<[1], [0], [0], [1], [0, 0, 1, 1], [], []>} : vector<8x72xbf16>, vector<72x512xbf16>, vector<8x512xf32> -> vector<8x512xf32>
    %cst_36 = arith.constant dense<0.000000e+00> : vector<8xf32>
    %49 = vector.multi_reduction <add>, %48, %cst_36 [1] : vector<8x512xf32> to vector<8xf32>
    %50 = vector.shape_cast %49 : vector<8xf32> to vector<8x1xf32>
    %c0_37 = arith.constant 0 : index
    %c0_38 = arith.constant 0 : index
    %51 = vector.load %arg5[%c0_37, %c0_38] : memref<8x1xf32, #tpu.memory_space<vmem>>, vector<8x1xf32>
    tpu.vector_store %arg5[%c0_37, %c0_38], %50 {strides = array<i32>} : memref<8x1xf32, #tpu.memory_space<vmem>>, vector<8x1xf32>,
    %52 = arith.mulf %48, %48 : vector<8x512xf32>
    %cst_39 = arith.constant dense<0.000000e+00> : vector<8xf32>
    %53 = vector.multi_reduction <add>, %52, %cst_39 [1] : vector<8x512xf32> to vector<8xf32>
    %54 = vector.shape_cast %53 : vector<8xf32> to vector<8x1xf32>
    %c0_40 = arith.constant 0 : index
    %c0_41 = arith.constant 0 : index
    %55 = vector.load %arg6[%c0_40, %c0_41] : memref<8x1xf32, #tpu.memory_space<vmem>>, vector<8x1xf32>
    tpu.vector_store %arg6[%c0_40, %c0_41], %54 {strides = array<i32>} : memref<8x1xf32, #tpu.memory_space<vmem>>, vector<8x1xf32>,
    %c0_42 = arith.constant 0 : index
    %c0_43 = arith.constant 0 : index
    %56 = vector.load %arg4[%c0_42, %c0_43] : memref<8x512xf32, #tpu.memory_space<vmem>>, vector<8x512xf32>
    tpu.vector_store %arg4[%c0_42, %c0_43], %48 {strides = array<i32>} : memref<8x512xf32, #tpu.memory_space<vmem>>, vector<8x512xf32>,
    return
  }
  func.func @transform_0(%arg0: i32) -> (i32, i32) {
    %c0_i32 = arith.constant 0 : i32
    %c0_i32_0 = arith.constant 0 : i32
    %c0_i32_1 = arith.constant 0 : i32
    return %c0_i32, %c0_i32_0 : i32, i32
  }
  func.func @transform_1(%arg0: i32) -> (i32, i32) {
    %c0_i32 = arith.constant 0 : i32
    %c0_i32_0 = arith.constant 0 : i32
    %c0_i32_1 = arith.constant 0 : i32
    return %c0_i32, %c0_i32_0 : i32, i32
  }
  func.func @transform_2(%arg0: i32) -> (i32, i32) {
    %c0_i32 = arith.constant 0 : i32
    %c0_i32_0 = arith.constant 0 : i32
    %c0_i32_1 = arith.constant 0 : i32
    return %c0_i32, %c0_i32_0 : i32, i32
  }
  func.func @transform_3(%arg0: i32) -> (i32, i32) {
    %c0_i32 = arith.constant 0 : i32
    %c0_i32_0 = arith.constant 0 : i32
    return %c0_i32, %arg0 : i32, i32
  }
  func.func @transform_4(%arg0: i32) -> (i32, i32) {
    %c0_i32 = arith.constant 0 : i32
    %c0_i32_0 = arith.constant 0 : i32
    %c0_i32_1 = arith.constant 0 : i32
    return %c0_i32, %c0_i32_0 : i32, i32
  }
  func.func @transform_5(%arg0: i32) -> (i32, i32) {
    %c0_i32 = arith.constant 0 : i32
    %c0_i32_0 = arith.constant 0 : i32
    %c0_i32_1 = arith.constant 0 : i32
    return %c0_i32, %c0_i32_0 : i32, i32
  }
}

module attributes {stable_mosaic.version = 11 : i64} {
  func.func @kernel(%arg0: i32, %arg1: memref<8x8xbf16, #tpu.memory_space<vmem>>, %arg2: memref<8x512xf32, #tpu.memory_space<vmem>>, %arg3: memref<8x512xf32, #tpu.memory_space<vmem>>, %arg4: memref<8x1xf32, #tpu.memory_space<vmem>>, %arg5: memref<8x1xf32, #tpu.memory_space<vmem>>) attributes {dimension_semantics = [#tpu.dimension_semantics<arbitrary>], iteration_bounds = array<i64: 1>, scalar_prefetch = 0 : i64, scratch_operands = 0 : i64, tpu.core_type = #tpu.core_type<tc>, window_params = [{pipeline_mode = #tpu.pipeline_mode<synchronous>, transform_indices = @transform_0, window_bounds = array<i64: 8, 8>}, {transform_indices = @transform_1, window_bounds = array<i64: 8, 512>}, {transform_indices = @transform_2, window_bounds = array<i64: 8, 512>}, {pipeline_mode = #tpu.pipeline_mode<synchronous>, transform_indices = @transform_3, window_bounds = array<i64: 8, 1>}, {pipeline_mode = #tpu.pipeline_mode<synchronous>, transform_indices = @transform_4, window_bounds = array<i64: 8, 1>}]} {
    %c0 = arith.constant 0 : index
    %c0_0 = arith.constant 0 : index
    %0 = vector.load %arg1[%c0, %c0_0] : memref<8x8xbf16, #tpu.memory_space<vmem>>, vector<8x8xbf16>
    %c0_1 = arith.constant 0 : index
    %c0_2 = arith.constant 0 : index
    %1 = vector.load %arg2[%c0_1, %c0_2] : memref<8x512xf32, #tpu.memory_space<vmem>>, vector<8x512xf32>
    %2 = arith.truncf %1 : vector<8x512xf32> to vector<8x512xbf16>
    %cst = arith.constant dense<0.000000e+00> : vector<8x512xf32>
    %3 = tpu.matmul %0, %2, %cst {dimension_numbers = #tpu.dot_dimension_numbers<[1], [0], [0], [1], [0, 0, 1, 1], [], []>} : vector<8x8xbf16>, vector<8x512xbf16>, vector<8x512xf32> -> vector<8x512xf32>
    %cst_3 = arith.constant dense<0.000000e+00> : vector<8xf32>
    %4 = vector.multi_reduction <add>, %3, %cst_3 [1] : vector<8x512xf32> to vector<8xf32>
    %5 = vector.shape_cast %4 : vector<8xf32> to vector<8x1xf32>
    %6 = arith.mulf %3, %3 : vector<8x512xf32>
    %cst_4 = arith.constant dense<0.000000e+00> : vector<8xf32>
    %7 = vector.multi_reduction <add>, %6, %cst_4 [1] : vector<8x512xf32> to vector<8xf32>
    %8 = vector.shape_cast %7 : vector<8xf32> to vector<8x1xf32>
    %c0_i32 = arith.constant 0 : i32
    %9 = arith.cmpi eq, %arg0, %c0_i32 : i32
    %10 = arith.extui %9 : i1 to i32
    %c0_i32_5 = arith.constant 0 : i32
    %11 = arith.cmpi ne, %10, %c0_i32_5 : i32
    scf.if %11 {
      %c0_10 = arith.constant 0 : index
      %c0_11 = arith.constant 0 : index
      %16 = vector.load %arg4[%c0_10, %c0_11] : memref<8x1xf32, #tpu.memory_space<vmem>>, vector<8x1xf32>
      tpu.vector_store %arg4[%c0_10, %c0_11], %5 {strides = array<i32>} : memref<8x1xf32, #tpu.memory_space<vmem>>, vector<8x1xf32>,
      %c0_12 = arith.constant 0 : index
      %c0_13 = arith.constant 0 : index
      %17 = vector.load %arg5[%c0_12, %c0_13] : memref<8x1xf32, #tpu.memory_space<vmem>>, vector<8x1xf32>
      tpu.vector_store %arg5[%c0_12, %c0_13], %8 {strides = array<i32>} : memref<8x1xf32, #tpu.memory_space<vmem>>, vector<8x1xf32>,
    } else {
    }
    %c0_i32_6 = arith.constant 0 : i32
    %12 = arith.cmpi sgt, %arg0, %c0_i32_6 : i32
    %13 = arith.extui %12 : i1 to i32
    %c0_i32_7 = arith.constant 0 : i32
    %14 = arith.cmpi ne, %13, %c0_i32_7 : i32
    scf.if %14 {
      %c0_10 = arith.constant 0 : index
      %c0_11 = arith.constant 0 : index
      %16 = vector.load %arg4[%c0_10, %c0_11] : memref<8x1xf32, #tpu.memory_space<vmem>>, vector<8x1xf32>
      %17 = arith.addf %16, %5 : vector<8x1xf32>
      %c0_12 = arith.constant 0 : index
      %c0_13 = arith.constant 0 : index
      %18 = vector.load %arg4[%c0_12, %c0_13] : memref<8x1xf32, #tpu.memory_space<vmem>>, vector<8x1xf32>
      tpu.vector_store %arg4[%c0_12, %c0_13], %17 {strides = array<i32>} : memref<8x1xf32, #tpu.memory_space<vmem>>, vector<8x1xf32>,
      %c0_14 = arith.constant 0 : index
      %c0_15 = arith.constant 0 : index
      %19 = vector.load %arg5[%c0_14, %c0_15] : memref<8x1xf32, #tpu.memory_space<vmem>>, vector<8x1xf32>
      %20 = arith.addf %19, %8 : vector<8x1xf32>
      %c0_16 = arith.constant 0 : index
      %c0_17 = arith.constant 0 : index
      %21 = vector.load %arg5[%c0_16, %c0_17] : memref<8x1xf32, #tpu.memory_space<vmem>>, vector<8x1xf32>
      tpu.vector_store %arg5[%c0_16, %c0_17], %20 {strides = array<i32>} : memref<8x1xf32, #tpu.memory_space<vmem>>, vector<8x1xf32>,
    } else {
    }
    %c0_8 = arith.constant 0 : index
    %c0_9 = arith.constant 0 : index
    %15 = vector.load %arg3[%c0_8, %c0_9] : memref<8x512xf32, #tpu.memory_space<vmem>>, vector<8x512xf32>
    tpu.vector_store %arg3[%c0_8, %c0_9], %3 {strides = array<i32>} : memref<8x512xf32, #tpu.memory_space<vmem>>, vector<8x512xf32>,
    return
  }
  func.func @transform_0(%arg0: i32) -> (i32, i32) {
    %c0_i32 = arith.constant 0 : i32
    %c0_i32_0 = arith.constant 0 : i32
    %c0_i32_1 = arith.constant 0 : i32
    return %c0_i32, %c0_i32_0 : i32, i32
  }
  func.func @transform_1(%arg0: i32) -> (i32, i32) {
    %c0_i32 = arith.constant 0 : i32
    %c0_i32_0 = arith.constant 0 : i32
    return %c0_i32, %arg0 : i32, i32
  }
  func.func @transform_2(%arg0: i32) -> (i32, i32) {
    %c0_i32 = arith.constant 0 : i32
    %c0_i32_0 = arith.constant 0 : i32
    return %c0_i32, %arg0 : i32, i32
  }
  func.func @transform_3(%arg0: i32) -> (i32, i32) {
    %c0_i32 = arith.constant 0 : i32
    %c0_i32_0 = arith.constant 0 : i32
    %c0_i32_1 = arith.constant 0 : i32
    return %c0_i32, %c0_i32_0 : i32, i32
  }
  func.func @transform_4(%arg0: i32) -> (i32, i32) {
    %c0_i32 = arith.constant 0 : i32
    %c0_i32_0 = arith.constant 0 : i32
    %c0_i32_1 = arith.constant 0 : i32
    return %c0_i32, %c0_i32_0 : i32, i32
  }
}

module attributes {stable_mosaic.version = 11 : i64} {
  func.func @kernel(%arg0: i32, %arg1: memref<3x8xbf16, #tpu.memory_space<vmem>>, %arg2: memref<8x512xf32, #tpu.memory_space<vmem>>, %arg3: memref<3x1xf32, #tpu.memory_space<vmem>>, %arg4: memref<3x512xf32, #tpu.memory_space<vmem>>) attributes {dimension_semantics = [#tpu.dimension_semantics<parallel>], iteration_bounds = array<i64: 1>, scalar_prefetch = 0 : i64, scratch_operands = 0 : i64, tpu.core_type = #tpu.core_type<tc>, window_params = [{pipeline_mode = #tpu.pipeline_mode<synchronous>, transform_indices = @transform_0, window_bounds = array<i64: 3, 8>}, {transform_indices = @transform_1, window_bounds = array<i64: 8, 512>}, {pipeline_mode = #tpu.pipeline_mode<synchronous>, transform_indices = @transform_2, window_bounds = array<i64: 3, 1>}, {transform_indices = @transform_3, window_bounds = array<i64: 3, 512>}]} {
    %c0 = arith.constant 0 : index
    %c0_0 = arith.constant 0 : index
    %0 = vector.load %arg1[%c0, %c0_0] : memref<3x8xbf16, #tpu.memory_space<vmem>>, vector<3x8xbf16>
    %c0_1 = arith.constant 0 : index
    %c0_2 = arith.constant 0 : index
    %1 = vector.load %arg2[%c0_1, %c0_2] : memref<8x512xf32, #tpu.memory_space<vmem>>, vector<8x512xf32>
    %2 = arith.truncf %1 : vector<8x512xf32> to vector<8x512xbf16>
    %cst = arith.constant dense<0.000000e+00> : vector<3x512xf32>
    %3 = tpu.matmul %0, %2, %cst {dimension_numbers = #tpu.dot_dimension_numbers<[1], [0], [0], [1], [0, 0, 1, 1], [], []>} : vector<3x8xbf16>, vector<8x512xbf16>, vector<3x512xf32> -> vector<3x512xf32>
    %c0_3 = arith.constant 0 : index
    %c0_4 = arith.constant 0 : index
    %4 = vector.load %arg3[%c0_3, %c0_4] : memref<3x1xf32, #tpu.memory_space<vmem>>, vector<3x1xf32>
    %5 = vector.broadcast %4 : vector<3x1xf32> to vector<3x512xf32>
    %6 = arith.addf %3, %5 : vector<3x512xf32>
    %c0_5 = arith.constant 0 : index
    %c0_6 = arith.constant 0 : index
    %7 = vector.load %arg4[%c0_5, %c0_6] : memref<3x512xf32, #tpu.memory_space<vmem>>, vector<3x512xf32>
    tpu.vector_store %arg4[%c0_5, %c0_6], %6 {strides = array<i32>} : memref<3x512xf32, #tpu.memory_space<vmem>>, vector<3x512xf32>,
    return
  }
  func.func @transform_0(%arg0: i32) -> (i32, i32) {
    %c0_i32 = arith.constant 0 : i32
    %c0_i32_0 = arith.constant 0 : i32
    %c0_i32_1 = arith.constant 0 : i32
    return %c0_i32, %c0_i32_0 : i32, i32
  }
  func.func @transform_1(%arg0: i32) -> (i32, i32) {
    %c0_i32 = arith.constant 0 : i32
    %c0_i32_0 = arith.constant 0 : i32
    return %c0_i32, %arg0 : i32, i32
  }
  func.func @transform_2(%arg0: i32) -> (i32, i32) {
    %c0_i32 = arith.constant 0 : i32
    %c0_i32_0 = arith.constant 0 : i32
    %c0_i32_1 = arith.constant 0 : i32
    return %c0_i32, %c0_i32_0 : i32, i32
  }
  func.func @transform_3(%arg0: i32) -> (i32, i32) {
    %c0_i32 = arith.constant 0 : i32
    %c0_i32_0 = arith.constant 0 : i32
    return %c0_i32, %arg0 : i32, i32
  }
}

</mosaic_0001>

<bundles_post_ra>
// kernel: drnet_forward.39
= control target key start
LH: loop header
LB: loop body
LE: loop exit
PB: predicated region body
PF: predicated region fallthrough
CT: control target
= control target key end

     0   :  { %v207_v0 = vmov 0   ;;  %s382_s1 = inlined_call_operand.vmem [shape: f32[32,1], index: 1, kind: input, shape index: {}]   ;;  %s383_s2 = inlined_call_operand.vmem [shape: f32[32,1], index: 2, kind: input, shape index: {}]   ;;  %s384_s3 = inlined_call_operand.vmem [shape: f32[32,1], index: 3, kind: input, shape index: {}]   ;;  %s385_s4 = inlined_call_operand.vmem [shape: f32[32,1], index: 4, kind: input, shape index: {}]   ;;  %s386_s0 = inlined_call_operand.vmem [shape: f32[32,512], index: 0, kind: input, shape index: {}]   ;;  %s387_s5 = inlined_call_operand.vmem [shape: f32[32,512], index: 5, kind: output, shape index: {}]  }
   0x1   :  { %198 = vset.pattern.permute.xlu1 %v207_v0  ;;  %197 = vset.pattern.permute.xlu0 %v207_v0  ;;  %v22_v1 = vld [vmem:[%s382_s1 + $0x10] sm:$0xff]  ;;  %v23_v2 = vld [vmem:[%s382_s1 + $0x18] sm:$0xff]  ;;  %v29_v3 = vld [vmem:[%s383_s2 + $0x8] sm:$0xff] }
   0x2   :  { %v26_v4 = vmul.f32 0.001953125, %v22_v1  ;;  %v27_v5 = vmul.f32 0.001953125, %v23_v2  ;;  %v30_v6 = vld [vmem:[%s383_s2 + $0x10] sm:$0xff]  ;;  %v31_v7 = vld [vmem:[%s383_s2 + $0x18] sm:$0xff]  ;;  %v33_v8 = vmul.f32 0.001953125, %v29_v3  ;;  %v21_v11 = vld [vmem:[%s382_s1 + $0x8] sm:$0xff] }
   0x3   :  { %v34_v9 = vmul.f32 0.001953125, %v30_v6  ;;  %v35_v10 = vmul.f32 0.001953125, %v31_v7  ;;  %v20_v12 = vld [vmem:[%s382_s1] sm:$0xff]  ;;  %v25_v16 = vmul.f32 0.001953125, %v21_v11  ;;  %v46_v29 = vld [vmem:[%s384_s3 + $0x10] sm:$0xff]  ;;  %v47_v32 = vld [vmem:[%s384_s3 + $0x18] sm:$0xff] }
   0x4   :  { %v28_v13 = vld [vmem:[%s383_s2] sm:$0xff]  ;;  %v38_v14 = vmul.f32 %v26_v4, %v26_v4  ;;  %v39_v15 = vmul.f32 %v27_v5, %v27_v5  ;;  %v24_v17 = vmul.f32 0.001953125, %v20_v12  ;;  %v45_v35 = vld [vmem:[%s384_s3 + $0x8] sm:$0xff]  ;;  %v63_v47 = vld [vmem:[%s385_s4 + $0x18] sm:$0xff] }
   0x5   :  { %v32_v18 = vmul.f32 0.001953125, %v28_v13  ;;  %v37_v21 = vmul.f32 %v25_v16, %v25_v16  ;;  %v44_v31 = vld [vmem:[%s384_s3] sm:$0xff]  ;;  %v61_v42 = vld [vmem:[%s385_s4 + $0x8] sm:$0xff]  ;;  %v62_v50 = vld [vmem:[%s385_s4 + $0x10] sm:$0xff] }
   0x6   :  { %v42_v19 = vsub.f32 %v34_v9, %v38_v14  ;;  %v43_v20 = vsub.f32 %v35_v10, %v39_v15  ;;  %v36_v22 = vmul.f32 %v24_v17, %v24_v17  ;;  %v60_v44 = vld [vmem:[%s385_s4] sm:$0xff]  ;;  %v81_v56 = vld [vmem:[%s386_s0 + $0x48] sm:$0xff]  ;;  %v82_v59 = vld [vmem:[%s386_s0 + $0x50] sm:$0xff] }
   0x7   :  { %v41_v24 = vsub.f32 %v33_v8, %v37_v21  ;;  %v80_v55 = vld [vmem:[%s386_s0 + $0x40] sm:$0xff]  ;;  %v83_v60 = vld [vmem:[%s386_s0 + $0x58] sm:$0xff]  ;;  %v77_v62 = vld [vmem:[%s386_s0 + $0x28] sm:$0xff] }
   0x8   :  { %v50_v23 = vadd.f32 1e-05, %v42_v19  ;;  %v40_v25 = vsub.f32 %v32_v18, %v36_v22  ;;  %v51_v26 = vadd.f32 1e-05, %v43_v20  ;;  %v72_v57 = vld [vmem:[%s386_s0] sm:$0xff]  ;;  %v78_v63 = vld [vmem:[%s386_s0 + $0x30] sm:$0xff] }
   0x9   :  { %v49_v28 = vadd.f32 1e-05, %v41_v24  ;;  %v76_v58 = vld [vmem:[%s386_s0 + $0x20] sm:$0xff]  ;;  %v79_v0 = vld [vmem:[%s386_s0 + $0x38] sm:$0xff]  ;;  %v73_v1 = vld [vmem:[%s386_s0 + $0x8] sm:$0xff] }
   0xa   :  { %199 = vrsqrt.f32 %v50_v23  ;;  %v48_v27 = vadd.f32 1e-05, %v40_v25  ;;  %v74_v2 = vld [vmem:[%s386_s0 + $0x10] sm:$0xff]  ;;  %v75_v3 = vld [vmem:[%s386_s0 + $0x18] sm:$0xff]  ;;  %v85_v14 = vld [vmem:[%s386_s0 + $0x68] sm:$0xff] }
   0xb   :  { %201 = vrsqrt.f32 %v51_v26  ;;  %v86_v15 = vld [vmem:[%s386_s0 + $0x70] sm:$0xff] }
   0xc   :  { %203 = vrsqrt.f32 %v48_v27 }
   0xd   :  { %205 = vrsqrt.f32 %v49_v28 }
  0x17   :  { %v200_v30 = vpop.eup %199 }
  0x18   :  { %v202_v33 = vpop.eup %201  ;;  %v58_v34 = vmul.f32 %v200_v30, %v46_v29 }
  0x19   :  { %v204_v36 = vpop.eup %203  ;;  %v59_v39 = vmul.f32 %v202_v33, %v47_v32 }
  0x1a   :  { %v206_v37 = vpop.eup %205  ;;  %100 = vperm.xlu1 %198, %v58_v34   ;;  %v56_v38 = vmul.f32 %v204_v36, %v44_v31  ;;  %v66_v48 = vmul.f32 %v58_v34, %v26_v4 }
  0x1b   :  { %v57_v40 = vmul.f32 %v206_v37, %v45_v35  ;;  %v67_v45 = vmul.f32 %v59_v39, %v27_v5  ;;  %v84_v5 = vld [vmem:[%s386_s0 + $0x60] sm:$0xff] }
  0x1c   :  { %90 = vperm.xlu0 %197, %v56_v38   ;;  %v64_v41 = vmul.f32 %v56_v38, %v24_v17  ;;  %v70_v52 = vsub.f32 %v62_v50, %v66_v48 }
  0x1d   :  { %v65_v43 = vmul.f32 %v57_v40, %v25_v16  ;;  %v71_v51 = vsub.f32 %v63_v47, %v67_v45  ;;  %v87_v16 = vld [vmem:[%s386_s0 + $0x78] sm:$0xff] }
  0x1e   :  { %105 = vperm.xlu1 %198, %v59_v39   ;;  %v68_v49 = vsub.f32 %v60_v44, %v64_v41 }
  0x1f   :  { %v69_v46 = vsub.f32 %v61_v42, %v65_v43 }
  0x20   :  { %95 = vperm.xlu0 %197, %v57_v40  }
  0x22   :  { %131 = vperm.xlu1 %198, %v69_v46  }
  0x24   :  { %126 = vperm.xlu0 %197, %v68_v49  }
  0x26   :  { %141 = vperm.xlu1 %198, %v71_v51  }
  0x28   :  { %136 = vperm.xlu0 %197, %v70_v52  }
  0x95   :  { %v101_v53 = vpop.permute.xlu1 %100 }
  0x96   :  { %v116_v6 = vmul.f32 %v101_v53, %v80_v55  ;;  %v117_v7 = vmul.f32 %v101_v53, %v81_v56  ;;  %v118_v8 = vmul.f32 %v101_v53, %v82_v59  ;;  %v119_v9 = vmul.f32 %v101_v53, %v83_v60 }
  0x97   :  { %v91_v54 = vpop.permute.xlu0 %90 }
  0x98   :  { %v108_v17 = vmul.f32 %v91_v54, %v72_v57  ;;  %v109_v18 = vmul.f32 %v91_v54, %v73_v1  ;;  %v110_v19 = vmul.f32 %v91_v54, %v74_v2  ;;  %v111_v20 = vmul.f32 %v91_v54, %v75_v3 }
  0x99   :  { %v106_v61 = vpop.permute.xlu1 %105 }
  0x9a   :  { %v120_v27 = vmul.f32 %v106_v61, %v84_v5  ;;  %v121_v28 = vmul.f32 %v106_v61, %v85_v14  ;;  %v122_v29 = vmul.f32 %v106_v61, %v86_v15  ;;  %v123_v30 = vmul.f32 %v106_v61, %v87_v16 }
  0x9b   :  { %v96_v4 = vpop.permute.xlu0 %95 }
  0x9c   :  { %v112_v10 = vmul.f32 %v96_v4, %v76_v58  ;;  %v113_v11 = vmul.f32 %v96_v4, %v77_v62  ;;  %v114_v12 = vmul.f32 %v96_v4, %v78_v63  ;;  %v115_v13 = vmul.f32 %v96_v4, %v79_v0 }
  0x9d   :  { %v132_v21 = vpop.permute.xlu1 %131 }
  0x9e   :  { %v148_v22 = vadd.f32 %v132_v21, %v112_v10  ;;  %v149_v23 = vadd.f32 %v132_v21, %v113_v11  ;;  %v150_v24 = vadd.f32 %v132_v21, %v114_v12  ;;  %v151_v25 = vadd.f32 %v132_v21, %v115_v13 }
  0x9f   :  { %v127_v26 = vpop.permute.xlu0 %126 }
  0xa0   :  { %v164_v31 = vmax.f32 %v148_v22, 0.0  ;;  %v165_v32 = vmax.f32 %v149_v23, 0.0  ;;  %v166_v33 = vmax.f32 %v150_v24, 0.0  ;;  %v167_v34 = vmax.f32 %v151_v25, 0.0 }
  0xa1   :  { %v144_v35 = vadd.f32 %v127_v26, %v108_v17  ;;  %v145_v36 = vadd.f32 %v127_v26, %v109_v18  ;;  %v146_v37 = vadd.f32 %v127_v26, %v110_v19  ;;  %v147_v38 = vadd.f32 %v127_v26, %v111_v20  ;;  %v142_v39 = vpop.permute.xlu1 %141 }
  0xa2   :  { %180 = vst [vmem:[%s387_s5 + $0x20] sm:$0xff] %v164_v31  ;;  %181 = vst [vmem:[%s387_s5 + $0x28] sm:$0xff] %v165_v32  ;;  %v156_v40 = vadd.f32 %v142_v39, %v120_v27  ;;  %v157_v41 = vadd.f32 %v142_v39, %v121_v28  ;;  %v158_v42 = vadd.f32 %v142_v39, %v122_v29 }
  0xa3   :  { %182 = vst [vmem:[%s387_s5 + $0x30] sm:$0xff] %v166_v33  ;;  %183 = vst [vmem:[%s387_s5 + $0x38] sm:$0xff] %v167_v34  ;;  %v159_v43 = vadd.f32 %v142_v39, %v123_v30  ;;  %v160_v44 = vmax.f32 %v144_v35, 0.0  ;;  %v161_v45 = vmax.f32 %v145_v36, 0.0  ;;  %v162_v46 = vmax.f32 %v146_v37, 0.0  ;;  %v137_v48 = vpop.permute.xlu0 %136 }
  0xa4   :  { %v163_v47 = vmax.f32 %v147_v38, 0.0  ;;  %v172_v49 = vmax.f32 %v156_v40, 0.0  ;;  %v173_v50 = vmax.f32 %v157_v41, 0.0  ;;  %v174_v51 = vmax.f32 %v158_v42, 0.0 }
  0xa5   :  { %v175_v52 = vmax.f32 %v159_v43, 0.0  ;;  %176 = vst [vmem:[%s387_s5] sm:$0xff] %v160_v44  ;;  %177 = vst [vmem:[%s387_s5 + $0x8] sm:$0xff] %v161_v45  ;;  %v152_v53 = vadd.f32 %v137_v48, %v116_v6  ;;  %v153_v54 = vadd.f32 %v137_v48, %v117_v7  ;;  %v154_v55 = vadd.f32 %v137_v48, %v118_v8 }
  0xa6   :  { %178 = vst [vmem:[%s387_s5 + $0x10] sm:$0xff] %v162_v46  ;;  %179 = vst [vmem:[%s387_s5 + $0x18] sm:$0xff] %v163_v47  ;;  %v155_v56 = vadd.f32 %v137_v48, %v119_v9 }
  0xa7   :  { %188 = vst [vmem:[%s387_s5 + $0x60] sm:$0xff] %v172_v49  ;;  %189 = vst [vmem:[%s387_s5 + $0x68] sm:$0xff] %v173_v50  ;;  %v168_v57 = vmax.f32 %v152_v53, 0.0  ;;  %v169_v58 = vmax.f32 %v153_v54, 0.0  ;;  %v170_v59 = vmax.f32 %v154_v55, 0.0 }
  0xa8   :  { %190 = vst [vmem:[%s387_s5 + $0x70] sm:$0xff] %v174_v51  ;;  %191 = vst [vmem:[%s387_s5 + $0x78] sm:$0xff] %v175_v52  ;;  %v171_v60 = vmax.f32 %v155_v56, 0.0 }
  0xa9   :  { %184 = vst [vmem:[%s387_s5 + $0x40] sm:$0xff] %v168_v57  ;;  %185 = vst [vmem:[%s387_s5 + $0x48] sm:$0xff] %v169_v58 }
  0xaa   :  { %186 = vst [vmem:[%s387_s5 + $0x50] sm:$0xff] %v170_v59  ;;  %187 = vst [vmem:[%s387_s5 + $0x58] sm:$0xff] %v171_v60 }

// kernel: drnet_forward.37
= control target key start
LH: loop header
LB: loop body
LE: loop exit
PB: predicated region body
PF: predicated region fallthrough
CT: control target
= control target key end

     0   :  { %v24_v0 = vlaneseq  ;;  %s1017_s17 = smov 34   ;;  %s1018_s20 = smov 32   ;;  %vm602_vm0 = vcmask 277504   ;;  %vm454_vm1 = vcmask 261120   ;;  %vm528_vm2 = vcmask 269312   ;;  %s1435_s2 = inlined_call_operand.vmem [shape: f32[9,512], index: 2, kind: input, shape index: {}]   ;;  %s1436_s1 = inlined_call_operand.vmem [shape: f32[8,546], index: 1, kind: input, shape index: {}]   ;;  %s1437_s0 = inlined_call_operand.vmem [shape: bf16[32,72], index: 0, kind: input, shape index: {}]   ;;  %s1438_s3 = inlined_call_operand.vmem [shape: f32[32,1], index: 3, kind: input, shape index: {}]   ;;  %s1439_s4 = inlined_call_operand.vmem [shape: f32[32,512], index: 4, kind: output, shape index: {}]  }
   0x1   :  { %v907_v2 = vld [vmem:[%s1435_s2 + $0x20] ss:$8 sm:$0xf]  ;;  %v905_v11 = vld [vmem:[%s1435_s2 + $0x6] ss:$8 sm:$0xf] }
   0x2   :  { %v25_v1 = vshrl.u32 %v24_v0, 7  ;;  %v906_v16 = vld [vmem:[%s1435_s2 + $0x7] ss:$8 sm:$0xf]  ;;  %s1019_s23 = smov 33   ;;  %s1020_s26 = smov 17  }
   0x3   :  { %v903_v21 = vld [vmem:[%s1435_s2 + $0x4] ss:$8 sm:$0xf]  ;;  %v904_v26 = vld [vmem:[%s1435_s2 + $0x5] ss:$8 sm:$0xf] }
   0x4   :  { %v1062_v3 = vsub.s32 2, %v25_v1  ;;  %v1064_v4 = vsub.s32 0, %v25_v1  ;;  %v1066_v5 = vsub.s32 3, %v25_v1  ;;  %v1068_v6 = vsub.s32 1, %v25_v1  ;;  %s1021_s29 = smov 18   ;;  %s1022_s6 = smov 2  }
   0x5   :  { %v901_v31 = vld [vmem:[%s1435_s2 + $0x2] ss:$8 sm:$0xf]  ;;  %v902_v36 = vld [vmem:[%s1435_s2 + $0x3] ss:$8 sm:$0xf] }
   0x6   :  { %v589_v7 = vrot.slane %v907_v2, %v1062_v3  ;;  %v581_v8 = vrot.slane %v907_v2, %v1064_v4  ;;  %v593_v9 = vrot.slane %v907_v2, %v1066_v5  ;;  %v585_v10 = vrot.slane %v907_v2, %v1068_v6  ;;  %s1023_s9 = smov 16   ;;  %v900_v41 = vld [vmem:[%s1435_s2 + $0x1] ss:$8 sm:$0xf]  ;;  %s1024_s12 = smov 1  }
   0x7   :  { %v437_v12 = vrot.slane %v905_v11, %v1068_v6  ;;  %v433_v13 = vrot.slane %v905_v11, %v1064_v4  ;;  %v445_v14 = vrot.slane %v905_v11, %v1066_v5  ;;  %v441_v15 = vrot.slane %v905_v11, %v1062_v3  ;;  %v1128_v48 = vld [vmem:[%s1436_s1 + $0x20] sm:$0xff]  ;;  %s1025_s15 = smov 94   ;;  %s1026_s18 = smov 96  }
   0x8   :  { %598 = vrot.lane.b32.xlu1 %v589_v7, %s1017_s17  ;;  %594 = vrot.lane.b32.xlu0 %v581_v8, %s1017_s17  ;;  %v511_v17 = vrot.slane %v906_v16, %v1068_v6  ;;  %v507_v18 = vrot.slane %v906_v16, %v1064_v4  ;;  %v519_v19 = vrot.slane %v906_v16, %v1066_v5  ;;  %v1135_v52 = vld [vmem:[%s1436_s1] sm:$0xff]  ;;  %s1027_s19 = smov 95   ;;  %s1029_s21 = smov 110   ;;  %vm306_vm3 = vcmask 138240  }
   0x9   :  { %v515_v20 = vrot.slane %v906_v16, %v1062_v3  ;;  %v289_v22 = vrot.slane %v903_v21, %v1068_v6  ;;  %v285_v23 = vrot.slane %v903_v21, %v1064_v4  ;;  %v297_v24 = vrot.slane %v903_v21, %v1066_v5 }
   0xa   :  { %v293_v25 = vrot.slane %v903_v21, %v1062_v3  ;;  %v363_v27 = vrot.slane %v904_v26, %v1068_v6  ;;  %v359_v28 = vrot.slane %v904_v26, %v1064_v4  ;;  %v371_v29 = vrot.slane %v904_v26, %v1066_v5 }
   0xb   :  { %v367_v30 = vrot.slane %v904_v26, %v1062_v3  ;;  %v141_v32 = vrot.slane %v901_v31, %v1068_v6  ;;  %v137_v33 = vrot.slane %v901_v31, %v1064_v4  ;;  %v149_v34 = vrot.slane %v901_v31, %v1066_v5 }
   0xc   :  { %600 = vrot.lane.b32.xlu1 %v593_v9, %s1017_s17  ;;  %596 = vrot.lane.b32.xlu0 %v585_v10, %s1017_s17  ;;  %v145_v35 = vrot.slane %v901_v31, %v1062_v3  ;;  %v215_v37 = vrot.slane %v902_v36, %v1068_v6  ;;  %v211_v38 = vrot.slane %v902_v36, %v1064_v4  ;;  %vm380_vm4 = vcmask 146432  }
   0xd   :  { %v219_v39 = vrot.slane %v902_v36, %v1062_v3  ;;  %v223_v40 = vrot.slane %v902_v36, %v1066_v5  ;;  %v63_v42 = vrot.slane %v900_v41, %v1064_v4  ;;  %v67_v43 = vrot.slane %v900_v41, %v1068_v6 }
   0xe   :  { %v71_v44 = vrot.slane %v900_v41, %v1062_v3  ;;  %v75_v45 = vrot.slane %v900_v41, %v1066_v5  ;;  %vm158_vm5 = vcmask 15360   ;;  %vm232_vm6 = vcmask 130048  }
   0xf   :  { %vm84_vm7 = vcmask 7168   ;;  %vm631_vm8 = vcmask 769024   ;;  %vm745_vm9 = vcmask 1043456   ;;  %vm483_vm10 = vcmask 785408  }
  0x10   :  { %448 = vrot.lane.b32.xlu1 %v437_v12, %s1018_s20  ;;  %446 = vrot.lane.b32.xlu0 %v433_v13, %s1018_s20  ;;  %v1164_v13 = vld [vmem:[%s1436_s1 + $0x18] sm:$0xff]  ;;  %vm557_vm11 = vcmask 777216   ;;  %vm335_vm12 = vcmask 908288   ;;  %vm409_vm13 = vcmask 900096   ;;  %vm187_vm14 = vcmask 1031168  }
  0x11   :  { %vm261_vm15 = vcmask 916480  }
  0x14   :  { %452 = vrot.lane.b32.xlu1 %v445_v14, %s1018_s20  ;;  %450 = vrot.lane.b32.xlu0 %v441_v15, %s1018_s20  ;;  %s1028_s20 = smov 111   ;;  %v1170_v15 = vld [vmem:[%s1436_s1 + $0x10] sm:$0xff] }
  0x18   :  { %522 = vrot.lane.b32.xlu1 %v511_v17, %s1019_s23  ;;  %520 = vrot.lane.b32.xlu0 %v507_v18, %s1019_s23 }
  0x1c   :  { %526 = vrot.lane.b32.xlu1 %v519_v19, %s1019_s23  ;;  %524 = vrot.lane.b32.xlu0 %v515_v20, %s1019_s23 }
  0x20   :  { %300 = vrot.lane.b32.xlu1 %v289_v22, %s1020_s26  ;;  %298 = vrot.lane.b32.xlu0 %v285_v23, %s1020_s26 }
  0x24   :  { %304 = vrot.lane.b32.xlu1 %v297_v24, %s1020_s26  ;;  %302 = vrot.lane.b32.xlu0 %v293_v25, %s1020_s26  ;;  %s1030_s26 = smov 126   ;;  %v1189_v25 = vld [vmem:[%s1436_s1 + $0x8] sm:$0xff]  ;;  %s1031_s1 = smov 112  }
  0x28   :  { %374 = vrot.lane.b32.xlu1 %v363_v27, %s1021_s29  ;;  %372 = vrot.lane.b32.xlu0 %v359_v28, %s1021_s29 }
  0x2c   :  { %378 = vrot.lane.b32.xlu1 %v371_v29, %s1021_s29  ;;  %376 = vrot.lane.b32.xlu0 %v367_v30, %s1021_s29  ;;  %s1033_s29 = smov 127  }
  0x30   :  { %152 = vrot.lane.b32.xlu1 %v141_v32, %s1022_s6  ;;  %150 = vrot.lane.b32.xlu0 %v137_v33, %s1022_s6 }
  0x34   :  { %156 = vrot.lane.b32.xlu1 %v149_v34, %s1022_s6  ;;  %154 = vrot.lane.b32.xlu0 %v145_v35, %s1022_s6 }
  0x38   :  { %226 = vrot.lane.b32.xlu1 %v215_v37, %s1023_s9  ;;  %224 = vrot.lane.b32.xlu0 %v211_v38, %s1023_s9 }
  0x3c   :  { %228 = vrot.lane.b32.xlu0 %v219_v39, %s1023_s9  ;;  %230 = vrot.lane.b32.xlu1 %v223_v40, %s1023_s9 }
  0x40   :  { %76 = vrot.lane.b32.xlu0 %v63_v42, %s1024_s12  ;;  %78 = vrot.lane.b32.xlu1 %v67_v43, %s1024_s12 }
  0x44   :  { %80 = vrot.lane.b32.xlu0 %v71_v44, %s1024_s12  ;;  %82 = vrot.lane.b32.xlu1 %v75_v45, %s1024_s12 }
  0x7a   :  { %v599_v46 = vpop.permute.xlu1 %598  ;;  %v1123_v47 = vpop.permute.xlu0 %594 }
  0x7b   :  { %v611_v40 = vmul.f32 %v1123_v47, %v1135_v52 }
  0x7e   :  { %v601_v49 = vpop.permute.xlu1 %600  ;;  %v597_v50 = vpop.permute.xlu0 %596 }
  0x7f   :  { %v615_v51 = vmul.f32 %v601_v49, %v1128_v48  ;;  %v605_v14 = vsel %vm602_vm0, %v599_v46, %v601_v49  ;;  %v604_v16 = vsel %vm602_vm0, %v597_v50, %v599_v46  ;;  %v603_v26 = vsel %vm602_vm0, %v1123_v47, %v597_v50 }
  0x80   :  { %v614_v19 = vmul.f32 %v605_v14, %v1164_v13  ;;  %v613_v20 = vmul.f32 %v604_v16, %v1170_v15  ;;  %v612_v32 = vmul.f32 %v603_v26, %v1189_v25  ;;  %vm113_vm0 = vcmask 1039360  }
  0x81   :  { %629 = vrot.lane.b32.xlu0 %v615_v51, %s1025_s15 }
  0x82   :  { %v449_v53 = vpop.permute.xlu1 %448  ;;  %v447_v54 = vpop.permute.xlu0 %446  ;;  %v938_v29 = vpack.i.bf16 %v614_v19, %v613_v20  ;;  %v933_v47 = vpack.i.bf16 %v612_v32, %v611_v40 }
  0x83   :  { %v463_v55 = vmul.f32 %v1135_v52, %v447_v54  ;;  %v455_v23 = vsel %vm454_vm1, %v447_v54, %v449_v53 }
  0x84   :  { %v464_v31 = vmul.f32 %v1189_v25, %v455_v23 }
  0x85   :  { %473 = vrot.lane.b32.xlu1 %v463_v55, %s1026_s18 }
  0x86   :  { %v1139_v56 = vpop.permute.xlu1 %452  ;;  %v451_v57 = vpop.permute.xlu0 %450 }
  0x87   :  { %v456_v22 = vsel %vm454_vm1, %v449_v53, %v451_v57  ;;  %v457_v35 = vsel %vm454_vm1, %v451_v57, %v1139_v56  ;;  %v467_v43 = vmul.f32 %v1128_v48, %v1139_v56  ;;  %vm738_vm1 = vcmask 588800  }
  0x88   :  { %v465_v27 = vmul.f32 %v1170_v15, %v456_v22  ;;  %v466_v44 = vmul.f32 %v1164_v13, %v457_v35 }
  0x8a   :  { %v523_v58 = vpop.permute.xlu1 %522  ;;  %v521_v59 = vpop.permute.xlu0 %520  ;;  %v943_v38 = vpack.i.bf16 %v465_v27, %v464_v31 }
  0x8b   :  { %v537_v60 = vmul.f32 %v1135_v52, %v521_v59  ;;  %v529_v33 = vsel %vm528_vm2, %v521_v59, %v523_v58 }
  0x8c   :  { %v538_v41 = vmul.f32 %v1189_v25, %v529_v33 }
  0x8d   :  { %547 = vrot.lane.b32.xlu0 %v537_v60, %s1027_s19 }
  0x8e   :  { %v1143_v61 = vpop.permute.xlu1 %526  ;;  %v1145_v62 = vpop.permute.xlu0 %524 }
  0x8f   :  { %v530_v30 = vsel %vm528_vm2, %v523_v58, %v1145_v62  ;;  %v531_v51 = vsel %vm528_vm2, %v1145_v62, %v1143_v61  ;;  %v541_v56 = vmul.f32 %v1128_v48, %v1143_v61  ;;  %v948_v58 = vpack.i.bf16 %v467_v43, %v466_v44 }
  0x90   :  { %v539_v36 = vmul.f32 %v1170_v15, %v530_v30  ;;  %v540_v60 = vmul.f32 %v1164_v13, %v531_v51  ;;  %v705_v51 = vld [vmem:[%s1438_s3 + $0x8] sm:$0xff] }
  0x92   :  { %v301_v63 = vpop.permute.xlu1 %300  ;;  %v299_v0 = vpop.permute.xlu0 %298  ;;  %v953_v50 = vpack.i.bf16 %v539_v36, %v538_v41  ;;  %v958_v14 = vpack.i.bf16 %v541_v56, %v540_v60  ;;  %v1032_v41 = vmov 0  }
  0x93   :  { %v315_v1 = vmul.f32 %v1135_v52, %v299_v0  ;;  %v307_v45 = vsel %vm306_vm3, %v299_v0, %v301_v63  ;;  %790 = vmatprep.mubr.bf16.mxu0 %v1032_v41  ;;  %843 = vmatprep.mubr.bf16.mxu1 %v1032_v41 }
  0x94   :  { %v316_v54 = vmul.f32 %v1189_v25, %v307_v45  ;;  %1014 = vset.pattern.permute.xlu1 %v1032_v41  ;;  %1013 = vset.pattern.permute.xlu0 %v1032_v41 }
  0x95   :  { %325 = vrot.lane.b32.xlu1 %v315_v1, %s1028_s20 }
  0x96   :  { %v1149_v2 = vpop.permute.xlu1 %304  ;;  %v1151_v7 = vpop.permute.xlu0 %302 }
  0x97   :  { %v308_v39 = vsel %vm306_vm3, %v301_v63, %v1151_v7  ;;  %v309_v62 = vsel %vm306_vm3, %v1151_v7, %v1149_v2 }
  0x98   :  { %v317_v49 = vmul.f32 %v1170_v15, %v308_v39 }
  0x9a   :  { %v1153_v8 = vpop.permute.xlu1 %374  ;;  %v373_v9 = vpop.permute.xlu0 %372  ;;  %v963_v0 = vpack.i.bf16 %v317_v49, %v316_v54 }
  0x9b   :  { %v389_v10 = vmul.f32 %v1135_v52, %v373_v9  ;;  %v381_v57 = vsel %vm380_vm4, %v373_v9, %v1153_v8  ;;  %v318_v9 = vmul.f32 %v1164_v13, %v309_v62 }
  0x9c   :  { %v390_v1 = vmul.f32 %v1189_v25, %v381_v57 }
  0x9d   :  { %399 = vrot.lane.b32.xlu0 %v389_v10, %s1029_s21 }
  0x9e   :  { %v1157_v11 = vpop.permute.xlu1 %378  ;;  %v1159_v12 = vpop.permute.xlu0 %376 }
  0x9f   :  { %v382_v53 = vsel %vm380_vm4, %v1153_v8, %v1159_v12  ;;  %v319_v8 = vmul.f32 %v1128_v48, %v1149_v2  ;;  %v393_v27 = vmul.f32 %v1128_v48, %v1157_v11 }
  0xa0   :  { %v391_v63 = vmul.f32 %v1170_v15, %v382_v53  ;;  %v706_v53 = vld [vmem:[%s1438_s3 + $0x10] sm:$0xff] }
  0xa2   :  { %v1173_v17 = vpop.permute.xlu1 %152  ;;  %v1175_v18 = vpop.permute.xlu0 %150  ;;  %v973_v16 = vpack.i.bf16 %v391_v63, %v390_v1 }
  0xa3   :  { %v167_v21 = vmul.f32 %v1135_v52, %v1175_v18  ;;  %v159_v7 = vsel %vm158_vm5, %v1175_v18, %v1173_v17  ;;  %v968_v18 = vpack.i.bf16 %v319_v8, %v318_v9 }
  0xa4   :  { %v168_v22 = vmul.f32 %v1189_v25, %v159_v7 }
  0xa5   :  { %177 = vrot.lane.b32.xlu1 %v167_v21, %s1030_s26  ;;  %v383_v21 = vsel %vm380_vm4, %v1159_v12, %v1157_v11 }
  0xa6   :  { %v1184_v24 = vpop.permute.xlu0 %154  ;;  %v1194_v28 = vpop.permute.xlu1 %156  ;;  %v392_v12 = vmul.f32 %v1164_v13, %v383_v21 }
  0xa7   :  { %v160_v61 = vsel %vm158_vm5, %v1173_v17, %v1184_v24  ;;  %v161_v31 = vsel %vm158_vm5, %v1184_v24, %v1194_v28  ;;  %v171_v11 = vmul.f32 %v1128_v48, %v1194_v28 }
  0xa8   :  { %v169_v10 = vmul.f32 %v1170_v15, %v160_v61  ;;  %v170_v35 = vmul.f32 %v1164_v13, %v161_v31  ;;  %v978_v36 = vpack.i.bf16 %v393_v27, %v392_v12 }
  0xa9   :  { %939 = vrot.lane.b32.xlu1 %v938_v29, %s1025_s15 }
  0xaa   :  { %v225_v34 = vpop.permute.xlu0 %224  ;;  %v227_v42 = vpop.permute.xlu1 %226  ;;  %v983_v30 = vpack.i.bf16 %v169_v10, %v168_v22  ;;  %v988_v43 = vpack.i.bf16 %v171_v11, %v170_v35  ;;  %v1325_v11 = vld [vmem:[%s1435_s2] ss:$8 sm:$0xf] }
  0xab   :  { %v241_v37 = vmul.f32 %v1135_v52, %v225_v34  ;;  %v233_v17 = vsel %vm232_vm6, %v225_v34, %v227_v42 }
  0xac   :  { %v242_v32 = vmul.f32 %v1189_v25, %v233_v17 }
  0xad   :  { %251 = vrot.lane.b32.xlu0 %v241_v37, %s1031_s1  ;;  %944 = vrot.lane.b32.xlu1 %v943_v38, %s1026_s18 }
  0xae   :  { %v229_v46 = vpop.permute.xlu0 %228  ;;  %v231_v55 = vpop.permute.xlu1 %230 }
  0xaf   :  { %v234_v2 = vsel %vm232_vm6, %v227_v42, %v229_v46  ;;  %v235_v24 = vsel %vm232_vm6, %v229_v46, %v231_v55  ;;  %v245_v42 = vmul.f32 %v1128_v48, %v231_v55 }
  0xb0   :  { %v243_v29 = vmul.f32 %v1170_v15, %v234_v2  ;;  %v244_v28 = vmul.f32 %v1164_v13, %v235_v24 }
  0xb1   :  { %934 = vrot.lane.b32.xlu0 %v933_v47, %s1025_s15  ;;  %954 = vrot.lane.b32.xlu1 %v953_v50, %s1027_s19  ;;  %v704_v50 = vld [vmem:[%s1438_s3] sm:$0xff] }
  0xb2   :  { %v1231_v59 = vpop.permute.xlu0 %76  ;;  %v79_v19 = vpop.permute.xlu1 %78  ;;  %v993_v37 = vpack.i.bf16 %v243_v29, %v242_v32  ;;  %v998_v46 = vpack.i.bf16 %v245_v42, %v244_v28  ;;  %v31_v42 = vrot.slane %v1325_v11, %v1068_v6 }
  0xb3   :  { %v85_v23 = vsel %vm84_vm7, %v1231_v59, %v79_v19  ;;  %v93_v49 = vmul.f32 %v1135_v52, %v1231_v59 }
  0xb4   :  { %v94_v33 = vmul.f32 %v1189_v25, %v85_v23 }
  0xb5   :  { %949 = vrot.lane.b32.xlu0 %v948_v58, %s1026_s18  ;;  %964 = vrot.lane.b32.xlu1 %v963_v0, %s1028_s20 }
  0xb6   :  { %v81_v20 = vpop.permute.xlu0 %80  ;;  %v83_v38 = vpop.permute.xlu1 %82 }
  0xb7   :  { %v86_v26 = vsel %vm84_vm7, %v79_v19, %v81_v20  ;;  %v87_v40 = vsel %vm84_vm7, %v81_v20, %v83_v38  ;;  %v97_v45 = vmul.f32 %v1128_v48, %v83_v38  ;;  %v707_v48 = vld [vmem:[%s1438_s3 + $0x18] sm:$0xff] }
  0xb8   :  { %v95_v34 = vmul.f32 %v1170_v15, %v86_v26  ;;  %v96_v44 = vmul.f32 %v1164_v13, %v87_v40 }
  0xb9   :  { %959 = vrot.lane.b32.xlu0 %v958_v14, %s1027_s19  ;;  %974 = vrot.lane.b32.xlu1 %v973_v16, %s1029_s21 }
  0xba   :  { %v1003_v39 = vpack.i.bf16 %v95_v34, %v94_v33  ;;  %v1008_v47 = vpack.i.bf16 %v97_v45, %v96_v44 }
  0xbd   :  { %969 = vrot.lane.b32.xlu0 %v968_v18, %s1028_s20  ;;  %984 = vrot.lane.b32.xlu1 %v983_v30, %s1030_s26 }
  0xc1   :  { %979 = vrot.lane.b32.xlu0 %v978_v36, %s1029_s21  ;;  %994 = vrot.lane.b32.xlu1 %v993_v37, %s1031_s1 }
  0xc5   :  { %989 = vrot.lane.b32.xlu0 %v988_v43, %s1030_s26  ;;  %1004 = vrot.lane.b32.xlu1 %v1003_v39, %s1033_s29 }
  0xc9   :  { %999 = vrot.lane.b32.xlu0 %v998_v46, %s1031_s1  ;;  %103 = vrot.lane.b32.xlu1 %v93_v49, %s1033_s29 }
  0xcd   :  { %1009 = vrot.lane.b32.xlu0 %v1008_v47, %s1033_s29  ;;  %715 = vperm.xlu1 %1014, %v705_v51  }
  0xd1   :  { %710 = vperm.xlu0 %1013, %v704_v50   ;;  %720 = vperm.xlu1 %1014, %v706_v53  }
  0xd5   :  { %725 = vperm.xlu0 %1013, %v707_v48  }
  0xf3   :  { %v630_v55 = vpop.permute.xlu0 %629 }
  0xf7   :  { %v474_v54 = vpop.permute.xlu1 %473 }
  0xff   :  { %v548_v57 = vpop.permute.xlu0 %547 }
 0x107   :  { %v326_v56 = vpop.permute.xlu1 %325 }
 0x10f   :  { %v1307_v59 = vpop.permute.xlu0 %399 }
 0x117   :  { %v1305_v58 = vpop.permute.xlu1 %177 }
 0x11b   :  { %v940_v60 = vpop.permute.xlu1 %939 }
 0x11c   :  { %v942_v62 = vunpack.i.h.bf16 %v940_v60  ;;  %v941_v63 = vunpack.i.l.bf16 %v940_v60 }
 0x11e   :  { %v635_v0 = vsel %vm631_vm8, %v942_v62, %v630_v55  ;;  %v634_v61 = vsel %vm631_vm8, %v941_v63, %v942_v62 }
 0x11f   :  { %v1311_v1 = vpop.permute.xlu0 %251  ;;  %v945_v8 = vpop.permute.xlu1 %944  ;;  %v703_v9 = vpack.c.bf16 %v635_v0, %v635_v0  ;;  %v702_v7 = vpack.c.bf16 %v634_v61, %v634_v61 }
 0x120   :  { %v947_v14 = vunpack.i.h.bf16 %v945_v8  ;;  %v946_v16 = vunpack.i.l.bf16 %v945_v8 }
 0x121   :  { %913 = vmatprep.subr.msk.bf16.mxu1 %vm745_vm9, %v703_v9  ;;  %v753_v10 = vsel %vm745_vm9, %v702_v7, 0 }
 0x122   :  { %818 = vmatpush1.bf16.msra.mxu1 %v753_v10  ;;  %v485_v31 = vsel %vm483_vm10, %v946_v16, %v947_v14  ;;  %v484_v24 = vsel %vm483_vm10, %v474_v54, %v946_v16  ;;  %v27_v10 = vrot.slane %v1325_v11, %v1064_v4 }
 0x123   :  { %v935_v19 = vpop.permute.xlu0 %934  ;;  %v955_v20 = vpop.permute.xlu1 %954 }
 0x124   :  { %v937_v21 = vunpack.i.h.bf16 %v935_v19  ;;  %v936_v2 = vunpack.i.l.bf16 %v935_v19  ;;  %v957_v22 = vunpack.i.h.bf16 %v955_v20  ;;  %v956_v17 = vunpack.i.l.bf16 %v955_v20 }
 0x126   :  { %v633_v18 = vsel %vm631_vm8, %v937_v21, %v941_v63  ;;  %v632_v23 = vsel %vm631_vm8, %v936_v2, %v937_v21  ;;  %v559_v26 = vsel %vm557_vm11, %v956_v17, %v957_v22  ;;  %v558_v34 = vsel %vm557_vm11, %v548_v57, %v956_v17 }
 0x127   :  { %v950_v27 = vpop.permute.xlu0 %949  ;;  %v1318_v12 = vpop.permute.xlu1 %964  ;;  %v701_v29 = vpack.c.bf16 %v633_v18, %v633_v18  ;;  %v700_v30 = vpack.c.bf16 %v632_v23, %v632_v23  ;;  %v697_v33 = vpack.c.bf16 %v559_v26, %v485_v31  ;;  %v696_v28 = vpack.c.bf16 %v558_v34, %v484_v24 }
 0x128   :  { %v952_v32 = vunpack.i.h.bf16 %v950_v27  ;;  %v951_v35 = vunpack.i.l.bf16 %v950_v27  ;;  %v967_v36 = vunpack.i.h.bf16 %v1318_v12  ;;  %v966_v37 = vunpack.i.l.bf16 %v1318_v12 }
 0x129   :  { %910 = vmatprep.subr.msk.bf16.mxu0 %vm745_vm9, %v701_v29  ;;  %v747_v38 = vsel %vm745_vm9, %v700_v30, 0 }
 0x12a   :  { %765 = vmatpush1.bf16.msra.mxu0 %v747_v38  ;;  %v337_v49 = vsel %vm335_vm12, %v966_v37, %v967_v36  ;;  %v487_v47 = vsel %vm483_vm10, %v951_v35, %v952_v32  ;;  %v336_v50 = vsel %vm335_vm12, %v326_v56, %v966_v37  ;;  %v486_v51 = vsel %vm483_vm10, %v947_v14, %v951_v35 }
 0x12b   :  { %v960_v39 = vpop.permute.xlu0 %959  ;;  %v975_v40 = vpop.permute.xlu1 %974  ;;  %766 = vmatprep.subr.bf16.mxu0 %v697_v33  ;;  %v45_v14 = vmul.f32 %v1189_v25, %v31_v42 }
 0x12c   :  { %v962_v43 = vunpack.i.h.bf16 %v960_v39  ;;  %v961_v44 = vunpack.i.l.bf16 %v960_v39  ;;  %v977_v45 = vunpack.i.h.bf16 %v975_v40  ;;  %v976_v46 = vunpack.i.l.bf16 %v975_v40 }
 0x12d   :  { %v39_v39 = vrot.slane %v1325_v11, %v1066_v5  ;;  %v35_v40 = vrot.slane %v1325_v11, %v1062_v3  ;;  %v1015_v5 = vld [vmem:[%s1437_s0] sm:$0xff]  }
 0x12e   :  { %767 = vmatpush1.bf16.msra.mxu0 %v696_v28  ;;  %v411_v48 = vsel %vm409_vm13, %v976_v46, %v977_v45  ;;  %v561_v53 = vsel %vm557_vm11, %v961_v44, %v962_v43  ;;  %v410_v6 = vsel %vm409_vm13, %v1307_v59, %v976_v46  ;;  %v560_v54 = vsel %vm557_vm11, %v957_v22, %v961_v44 }
 0x12f   :  { %v970_v55 = vpop.permute.xlu0 %969  ;;  %v1343_v57 = vpop.permute.xlu1 %984  ;;  %v693_v60 = vpack.c.bf16 %v411_v48, %v337_v49  ;;  %v699_v62 = vpack.c.bf16 %v561_v53, %v487_v47  ;;  %v692_v63 = vpack.c.bf16 %v410_v6, %v336_v50  ;;  %v698_v0 = vpack.c.bf16 %v560_v54, %v486_v51 }
 0x130   :  { %v972_v56 = vunpack.i.h.bf16 %v970_v55  ;;  %v971_v61 = vunpack.i.l.bf16 %v970_v55  ;;  %v987_v8 = vunpack.i.h.bf16 %v1343_v57  ;;  %v986_v9 = vunpack.i.l.bf16 %v1343_v57 }
 0x131   :  { %768 = vmatprep.subr.bf16.mxu0 %v693_v60  ;;  %819 = vmatprep.subr.bf16.mxu1 %v699_v62  ;;  %v47_v50 = vmul.f32 %v1164_v13, %v39_v39  ;;  %v46_v51 = vmul.f32 %v1170_v15, %v35_v40  ;;  %v1016_v13 = vld [vmem:[%s1437_s0 + $0x8] sm:$0xff]  }
 0x132   :  { %769 = vmatpush1.bf16.msra.mxu0 %v692_v63  ;;  %820 = vmatpush1.bf16.msra.mxu1 %v698_v0  ;;  %v189_v2 = vsel %vm187_vm14, %v986_v9, %v987_v8  ;;  %v339_v22 = vsel %vm335_vm12, %v971_v61, %v972_v56  ;;  %v188_v17 = vsel %vm187_vm14, %v1305_v58, %v986_v9 }
 0x133   :  { %v980_v59 = vpop.permute.xlu0 %979  ;;  %v995_v7 = vpop.permute.xlu1 %994  ;;  %v338_v18 = vsel %vm335_vm12, %v967_v36, %v971_v61  ;;  %v44_v58 = vmul.f32 %v1135_v52, %v27_v10 }
 0x134   :  { %v982_v16 = vunpack.i.h.bf16 %v980_v59  ;;  %v981_v19 = vunpack.i.l.bf16 %v980_v59  ;;  %v997_v20 = vunpack.i.h.bf16 %v995_v7  ;;  %v996_v21 = vunpack.i.l.bf16 %v995_v7 }
 0x136   :  { %v263_v23 = vsel %vm261_vm15, %v996_v21, %v997_v20  ;;  %v413_v4 = vsel %vm409_vm13, %v981_v19, %v982_v16  ;;  %v262_v25 = vsel %vm261_vm15, %v1311_v1, %v996_v21  ;;  %v412_v26 = vsel %vm409_vm13, %v977_v45, %v981_v19 }
 0x137   :  { %v990_v27 = vpop.permute.xlu0 %989  ;;  %v1005_v12 = vpop.permute.xlu1 %1004  ;;  %v689_v29 = vpack.c.bf16 %v263_v23, %v189_v2  ;;  %v695_v30 = vpack.c.bf16 %v413_v4, %v339_v22  ;;  %v688_v31 = vpack.c.bf16 %v262_v25, %v188_v17  ;;  %v694_v32 = vpack.c.bf16 %v412_v26, %v338_v18 }
 0x138   :  { %v1007_v33 = vunpack.i.h.bf16 %v1005_v12  ;;  %v1006_v34 = vunpack.i.l.bf16 %v1005_v12  ;;  %v992_v35 = vunpack.i.h.bf16 %v990_v27  ;;  %v991_v36 = vunpack.i.l.bf16 %v990_v27 }
 0x139   :  { %770 = vmatprep.subr.bf16.mxu0 %v689_v29  ;;  %821 = vmatprep.subr.bf16.mxu1 %v695_v30 }
 0x13a   :  { %771 = vmatpush1.bf16.msra.mxu0 %v688_v31  ;;  %822 = vmatpush1.bf16.msra.mxu1 %v694_v32  ;;  %v115_v1 = vsel %vm113_vm0, %v1006_v34, %v1007_v33  ;;  %v191_v44 = vsel %vm187_vm14, %v991_v36, %v992_v35  ;;  %v190_v46 = vsel %vm187_vm14, %v987_v8, %v991_v36 }
 0x13b   :  { %v1000_v37 = vpop.permute.xlu0 %999  ;;  %v104_v38 = vpop.permute.xlu1 %103  ;;  %v685_v24 = vpack.c.bf16 %v115_v1, %v45_v14 }
 0x13c   :  { %v1002_v28 = vunpack.i.h.bf16 %v1000_v37  ;;  %v1001_v42 = vunpack.i.l.bf16 %v1000_v37  ;;  %v114_v43 = vsel %vm113_vm0, %v104_v38, %v1006_v34 }
 0x13d   :  { %v684_v52 = vpack.c.bf16 %v114_v43, %v44_v58  ;;  %772 = vmatprep.subr.bf16.mxu0 %v685_v24 }
 0x13e   :  { %v265_v45 = vsel %vm261_vm15, %v1001_v42, %v1002_v28  ;;  %v264_v49 = vsel %vm261_vm15, %v997_v20, %v1001_v42 }
 0x13f   :  { %v1010_v3 = vpop.permute.xlu0 %1009  ;;  %773 = vmatpush1.bf16.msra.mxu0 %v684_v52  ;;  %v691_v11 = vpack.c.bf16 %v265_v45, %v191_v44  ;;  %v690_v47 = vpack.c.bf16 %v264_v49, %v190_v46 }
 0x140   :  { %v1012_v48 = vunpack.i.h.bf16 %v1010_v3  ;;  %v1011_v53 = vunpack.i.l.bf16 %v1010_v3 }
 0x141   :  { %823 = vmatprep.subr.bf16.mxu1 %v691_v11 }
 0x142   :  { %824 = vmatpush1.bf16.msra.mxu1 %v690_v47  ;;  %911 = vmatmul.mubr.msk.bf16.vlgmr.msra.gmra.mxu0 %vm738_vm1, %v1015_v5  ;;  %v117_v6 = vsel %vm113_vm0, %v1011_v53, %v1012_v48  ;;  %v116_v54 = vsel %vm113_vm0, %v1007_v33, %v1011_v53 }
 0x143   :  { %v687_v55 = vpack.c.bf16 %v117_v6, %v47_v50  ;;  %v686_v57 = vpack.c.bf16 %v116_v54, %v46_v51  ;;  %800 = vmatprep.mubr.bf16.mxu0 %v1032_v41 }
 0x145   :  { %825 = vmatprep.subr.bf16.mxu1 %v687_v55 }
 0x146   :  { %826 = vmatpush1.bf16.msra.mxu1 %v686_v57 }
 0x148   :  { %v716_v0 = vpop.permute.xlu1 %715 }
 0x149   :  { %914 = vmatmul.mubr.msk.bf16.vlgmr.msra.gmra.mxu1 %vm738_vm1, %v1015_v5 }
 0x14a   :  { %912 = vmatmul.mubr.msk.bf16.gmra.mxu0 %vm738_vm1, %v1016_v13  ;;  %853 = vmatprep.mubr.bf16.mxu1 %v1032_v41 }
 0x14c   :  { %v711_v15 = vpop.permute.xlu0 %710  ;;  %v721_v10 = vpop.permute.xlu1 %720 }
 0x150   :  { %v726_v4 = vpop.permute.xlu0 %725 }
 0x151   :  { %915 = vmatmul.mubr.msk.bf16.gmra.mxu1 %vm738_vm1, %v1016_v13 }
 0x202   :  { %v792_v60 = vpop.f32.mrf.mxu0 }
 0x203   :  { %v793_v62 = vadd.f32 %v792_v60, %v711_v15 }
 0x204   :  { %v794_v63 = vpop.f32.mrf.mxu0 }
 0x205   :  { %v795_v56 = vadd.f32 %v794_v63, %v711_v15  ;;  %v864_v61 = vmax.f32 %v793_v62, 0.0 }
 0x206   :  { %v796_v8 = vpop.f32.mrf.mxu0 }
 0x207   :  { %v865_v9 = vmax.f32 %v795_v56, 0.0  ;;  %880 = vst [vmem:[%s1439_s4] sm:$0xff] %v864_v61  ;;  %v797_v59 = vadd.f32 %v796_v8, %v716_v0 }
 0x208   :  { %v798_v7 = vpop.f32.mrf.mxu0 }
 0x209   :  { %881 = vst [vmem:[%s1439_s4 + $0x8] sm:$0xff] %v865_v9  ;;  %v868_v41 = vmax.f32 %v797_v59, 0.0  ;;  %v799_v14 = vadd.f32 %v798_v7, %v716_v0  ;;  %v845_v16 = vpop.f32.mrf.mxu1 }
 0x20a   :  { %v846_v19 = vadd.f32 %v845_v16, %v711_v15  ;;  %v802_v20 = vpop.f32.mrf.mxu0 }
 0x20b   :  { %884 = vst [vmem:[%s1439_s4 + $0x20] sm:$0xff] %v868_v41  ;;  %v869_v21 = vmax.f32 %v799_v14, 0.0  ;;  %v847_v2 = vpop.f32.mrf.mxu1  ;;  %v803_v22 = vadd.f32 %v802_v20, %v721_v10 }
 0x20c   :  { %v866_v17 = vmax.f32 %v846_v19, 0.0  ;;  %v848_v18 = vadd.f32 %v847_v2, %v711_v15  ;;  %v804_v23 = vpop.f32.mrf.mxu0 }
 0x20d   :  { %885 = vst [vmem:[%s1439_s4 + $0x28] sm:$0xff] %v869_v21  ;;  %v849_v25 = vpop.f32.mrf.mxu1  ;;  %v805_v26 = vadd.f32 %v804_v23, %v721_v10  ;;  %v872_v27 = vmax.f32 %v803_v22, 0.0 }
 0x20e   :  { %882 = vst [vmem:[%s1439_s4 + $0x10] sm:$0xff] %v866_v17  ;;  %v867_v12 = vmax.f32 %v848_v18, 0.0  ;;  %v850_v29 = vadd.f32 %v849_v25, %v716_v0  ;;  %v806_v30 = vpop.f32.mrf.mxu0 }
 0x20f   :  { %v851_v31 = vpop.f32.mrf.mxu1  ;;  %v807_v32 = vadd.f32 %v806_v30, %v726_v4  ;;  %v873_v33 = vmax.f32 %v805_v26, 0.0  ;;  %888 = vst [vmem:[%s1439_s4 + $0x40] sm:$0xff] %v872_v27 }
 0x210   :  { %883 = vst [vmem:[%s1439_s4 + $0x18] sm:$0xff] %v867_v12  ;;  %v870_v34 = vmax.f32 %v850_v29, 0.0  ;;  %v852_v58 = vadd.f32 %v851_v31, %v716_v0  ;;  %v808_v35 = vpop.f32.mrf.mxu0 }
 0x211   :  { %v876_v36 = vmax.f32 %v807_v32, 0.0  ;;  %889 = vst [vmem:[%s1439_s4 + $0x48] sm:$0xff] %v873_v33  ;;  %v809_v1 = vadd.f32 %v808_v35, %v726_v4  ;;  %v855_v37 = vpop.f32.mrf.mxu1 }
 0x212   :  { %886 = vst [vmem:[%s1439_s4 + $0x30] sm:$0xff] %v870_v34  ;;  %v871_v38 = vmax.f32 %v852_v58, 0.0  ;;  %v856_v24 = vadd.f32 %v855_v37, %v721_v10 }
 0x213   :  { %892 = vst [vmem:[%s1439_s4 + $0x60] sm:$0xff] %v876_v36  ;;  %v877_v39 = vmax.f32 %v809_v1, 0.0  ;;  %v857_v40 = vpop.f32.mrf.mxu1 }
 0x214   :  { %887 = vst [vmem:[%s1439_s4 + $0x38] sm:$0xff] %v871_v38  ;;  %v874_v28 = vmax.f32 %v856_v24, 0.0  ;;  %v858_v42 = vadd.f32 %v857_v40, %v721_v10 }
 0x215   :  { %893 = vst [vmem:[%s1439_s4 + $0x68] sm:$0xff] %v877_v39  ;;  %v859_v43 = vpop.f32.mrf.mxu1 }
 0x216   :  { %890 = vst [vmem:[%s1439_s4 + $0x50] sm:$0xff] %v874_v28  ;;  %v875_v52 = vmax.f32 %v858_v42, 0.0  ;;  %v860_v44 = vadd.f32 %v859_v43, %v726_v4 }
 0x217   :  { %v861_v45 = vpop.f32.mrf.mxu1 }
 0x218   :  { %891 = vst [vmem:[%s1439_s4 + $0x58] sm:$0xff] %v875_v52  ;;  %v878_v46 = vmax.f32 %v860_v44, 0.0  ;;  %v862_v49 = vadd.f32 %v861_v45, %v726_v4 }
 0x21a   :  { %894 = vst [vmem:[%s1439_s4 + $0x70] sm:$0xff] %v878_v46  ;;  %v879_v5 = vmax.f32 %v862_v49, 0.0 }
 0x21c   :  { %895 = vst [vmem:[%s1439_s4 + $0x78] sm:$0xff] %v879_v5 }

// kernel: drnet_forward.38
= control target key start
LH: loop header
LB: loop body
LE: loop exit
PB: predicated region body
PF: predicated region fallthrough
CT: control target
= control target key end

     0   :  { %v36_v0 = vlaneseq  ;;  %s2575_s22 = smov 16   ;;  %s2576_s23 = smov 2   ;;  %vm505_vm0 = vcmask 130048   ;;  %vm320_vm1 = vcmask 15360   ;;  %vm1430_vm2 = vcmask 277504   ;;  %s4263_s2 = inlined_call_operand.vmem [shape: f32[9,512], index: 2, kind: input, shape index: {}]   ;;  %s4264_s1 = inlined_call_operand.vmem [shape: f32[32,546], index: 1, kind: input, shape index: {}]   ;;  %s4265_s0 = inlined_call_operand.vmem [shape: bf16[32,288], index: 0, kind: input, shape index: {}]   ;;  %s4266_s3 = inlined_call_operand.vmem [shape: f32[32,512], index: 3, kind: output, shape index: {0}]   ;;  %s4267_s4 = inlined_call_operand.vmem [shape: f32[32,1], index: 4, kind: output, shape index: {1}]   ;;  %s4268_s5 = inlined_call_operand.vmem [shape: f32[32,1], index: 5, kind: output, shape index: {2}]  }
   0x1   :  { %v2134_v2 = vld [vmem:[%s4263_s2 + $0x3] ss:$8 sm:$0xf]  ;;  %v2133_v6 = vld [vmem:[%s4263_s2 + $0x2] ss:$8 sm:$0xf] }
   0x2   :  { %v37_v1 = vshrl.u32 %v36_v0, 7  ;;  %v2139_v13 = vld [vmem:[%s4263_s2 + $0x20] ss:$8 sm:$0xf]  ;;  %s2577_s28 = smov 34   ;;  %s2578_s29 = smov 1  }
   0x3   :  { %v2132_v16 = vld [vmem:[%s4263_s2 + $0x1] ss:$8 sm:$0xf]  ;;  %v2138_v24 = vld [vmem:[%s4263_s2 + $0x7] ss:$8 sm:$0xf] }
   0x4   :  { %v2625_v3 = vsub.s32 2, %v37_v1  ;;  %v2627_v4 = vsub.s32 0, %v37_v1  ;;  %v2629_v5 = vsub.s32 1, %v37_v1  ;;  %v2658_v21 = vsub.s32 3, %v37_v1  ;;  %s2579_s7 = smov 33   ;;  %s2580_s12 = smov 32  }
   0x5   :  { %v2137_v29 = vld [vmem:[%s4263_s2 + $0x6] ss:$8 sm:$0xf]  ;;  %v2136_v32 = vld [vmem:[%s4263_s2 + $0x5] ss:$8 sm:$0xf] }
   0x6   :  { %4333 = vst [vmem:[#allocation3_spill] sm:$0xff] %v2625_v3  ;;  %4334 = vst [vmem:[#allocation4_spill] sm:$0xff] %v2627_v4  ;;  %v492_v7 = vrot.slane %v2134_v2, %v2625_v3  ;;  %v484_v8 = vrot.slane %v2134_v2, %v2627_v4  ;;  %v488_v9 = vrot.slane %v2134_v2, %v2629_v5  ;;  %s2581_s13 = smov 18   ;;  %v2135_v37 = vld [vmem:[%s4263_s2 + $0x4] ss:$8 sm:$0xf] }
   0x7   :  { %4335 = vst [vmem:[#allocation5_spill] sm:$0xff] %v2629_v5  ;;  %v299_v10 = vrot.slane %v2133_v6, %v2627_v4  ;;  %v303_v11 = vrot.slane %v2133_v6, %v2629_v5  ;;  %v307_v12 = vrot.slane %v2133_v6, %v2625_v3  ;;  %v1409_v14 = vrot.slane %v2139_v13, %v2627_v4  ;;  %s2582_s16 = smov 17   ;;  %v2697_v46 = vld [vmem:[%s4264_s1 + $0x50] sm:$0xff]  ;;  %v2702_v47 = vld [vmem:[%s4264_s1 + $0x78] sm:$0xff]  ;;  %v2709_v50 = vld [vmem:[%s4264_s1] sm:$0xff]  ;;  %s2583_s25 = smov 112  }
   0x8   :  { %501 = vrot.lane.b32.xlu1 %v492_v7, %s2575_s22  ;;  %497 = vrot.lane.b32.xlu0 %v484_v8, %s2575_s22  ;;  %v1413_v15 = vrot.slane %v2139_v13, %v2629_v5  ;;  %v1417_v17 = vrot.slane %v2139_v13, %v2625_v3  ;;  %v114_v18 = vrot.slane %v2132_v16, %v2627_v4  ;;  %v2714_v51 = vld [vmem:[%s4264_s1 + $0x28] sm:$0xff]  ;;  %s2584_s26 = smov 126   ;;  %s2585_s6 = smov 94   ;;  %vm135_vm3 = vcmask 7168  }
   0x9   :  { %v118_v19 = vrot.slane %v2132_v16, %v2629_v5  ;;  %v122_v20 = vrot.slane %v2132_v16, %v2625_v3  ;;  %4336 = vst [vmem:[#allocation6_spill] sm:$0xff] %v2658_v21  ;;  %v496_v22 = vrot.slane %v2134_v2, %v2658_v21  ;;  %v311_v23 = vrot.slane %v2133_v6, %v2658_v21  ;;  %s2586_s19 = smov 127   ;;  %s2590_s14 = smov 110  }
   0xa   :  { %v1224_v25 = vrot.slane %v2138_v24, %v2627_v4  ;;  %v126_v26 = vrot.slane %v2132_v16, %v2658_v21  ;;  %v1232_v27 = vrot.slane %v2138_v24, %v2625_v3  ;;  %v1228_v28 = vrot.slane %v2138_v24, %v2629_v5  ;;  %s2591_s15 = smov 111  }
   0xb   :  { %v1043_v30 = vrot.slane %v2137_v29, %v2629_v5  ;;  %v1039_v31 = vrot.slane %v2137_v29, %v2627_v4  ;;  %v854_v33 = vrot.slane %v2136_v32, %v2627_v4  ;;  %v1047_v34 = vrot.slane %v2137_v29, %v2625_v3 }
   0xc   :  { %499 = vrot.lane.b32.xlu0 %v488_v9, %s2575_s22  ;;  %312 = vrot.lane.b32.xlu1 %v299_v10, %s2576_s23  ;;  %v862_v35 = vrot.slane %v2136_v32, %v2625_v3  ;;  %v858_v36 = vrot.slane %v2136_v32, %v2629_v5  ;;  %v669_v38 = vrot.slane %v2135_v37, %v2627_v4  ;;  %vm1060_vm4 = vcmask 261120  }
   0xd   :  { %v1236_v39 = vrot.slane %v2138_v24, %v2658_v21  ;;  %v677_v40 = vrot.slane %v2135_v37, %v2625_v3  ;;  %v673_v41 = vrot.slane %v2135_v37, %v2629_v5  ;;  %v1421_v42 = vrot.slane %v2139_v13, %v2658_v21  ;;  %v2738_v13 = vld [vmem:[%s4264_s1 + $0x80] sm:$0xff] }
   0xe   :  { %v1051_v43 = vrot.slane %v2137_v29, %v2658_v21  ;;  %v866_v44 = vrot.slane %v2136_v32, %v2658_v21  ;;  %v681_v45 = vrot.slane %v2135_v37, %v2658_v21  ;;  %vm875_vm5 = vcmask 146432  }
   0xf   :  { %vm1245_vm6 = vcmask 269312   ;;  %vm690_vm7 = vcmask 138240   ;;  %vm594_vm8 = vcmask 916480   ;;  %vm409_vm9 = vcmask 1031168  }
  0x10   :  { %314 = vrot.lane.b32.xlu0 %v303_v11, %s2576_s23  ;;  %316 = vrot.lane.b32.xlu1 %v307_v12, %s2576_s23  ;;  %vm1519_vm10 = vcmask 769024   ;;  %vm224_vm11 = vcmask 1039360   ;;  %vm1334_vm12 = vcmask 777216   ;;  %vm1149_vm13 = vcmask 785408  }
  0x11   :  { %vm964_vm14 = vcmask 900096   ;;  %vm779_vm15 = vcmask 908288  }
  0x14   :  { %1422 = vrot.lane.b32.xlu0 %v1409_v14, %s2577_s28  ;;  %1424 = vrot.lane.b32.xlu1 %v1413_v15, %s2577_s28  ;;  %v2743_v14 = vld [vmem:[%s4264_s1 + $0x88] sm:$0xff] }
  0x18   :  { %1426 = vrot.lane.b32.xlu0 %v1417_v17, %s2577_s28  ;;  %127 = vrot.lane.b32.xlu1 %v114_v18, %s2578_s29 }
  0x1c   :  { %129 = vrot.lane.b32.xlu0 %v118_v19, %s2578_s29  ;;  %131 = vrot.lane.b32.xlu1 %v122_v20, %s2578_s29 }
  0x20   :  { %503 = vrot.lane.b32.xlu0 %v496_v22, %s2575_s22  ;;  %318 = vrot.lane.b32.xlu1 %v311_v23, %s2576_s23 }
  0x24   :  { %1237 = vrot.lane.b32.xlu1 %v1224_v25, %s2579_s7  ;;  %133 = vrot.lane.b32.xlu0 %v126_v26, %s2578_s29  ;;  %v2758_v26 = vld [vmem:[%s4264_s1 + $0x30] sm:$0xff] }
  0x28   :  { %1241 = vrot.lane.b32.xlu1 %v1232_v27, %s2579_s7  ;;  %1239 = vrot.lane.b32.xlu0 %v1228_v28, %s2579_s7  ;;  %v2763_v27 = vld [vmem:[%s4264_s1 + $0x38] sm:$0xff] }
  0x29   :  { %v2768_v28 = vld [vmem:[%s4264_s1 + $0x58] sm:$0xff] }
  0x2c   :  { %1054 = vrot.lane.b32.xlu1 %v1043_v30, %s2580_s12  ;;  %1052 = vrot.lane.b32.xlu0 %v1039_v31, %s2580_s12  ;;  %v2774_v30 = vld [vmem:[%s4264_s1 + $0x60] sm:$0xff]  ;;  %v2779_v31 = vld [vmem:[%s4264_s1 + $0x8] sm:$0xff] }
  0x30   :  { %867 = vrot.lane.b32.xlu1 %v854_v33, %s2581_s13  ;;  %1056 = vrot.lane.b32.xlu0 %v1047_v34, %s2580_s12 }
  0x34   :  { %871 = vrot.lane.b32.xlu1 %v862_v35, %s2581_s13  ;;  %869 = vrot.lane.b32.xlu0 %v858_v36, %s2581_s13  ;;  %v2787_v36 = vld [vmem:[%s4264_s1 + $0x10] sm:$0xff] }
  0x35   :  { %4338 = vst [vmem:[#allocation8_spill] sm:$0xff] %v2787_v36 }
  0x38   :  { %682 = vrot.lane.b32.xlu1 %v669_v38, %s2582_s16  ;;  %1243 = vrot.lane.b32.xlu0 %v1236_v39, %s2579_s7 }
  0x3c   :  { %686 = vrot.lane.b32.xlu1 %v677_v40, %s2582_s16  ;;  %684 = vrot.lane.b32.xlu0 %v673_v41, %s2582_s16 }
  0x40   :  { %1428 = vrot.lane.b32.xlu1 %v1421_v42, %s2577_s28  ;;  %1058 = vrot.lane.b32.xlu0 %v1051_v43, %s2580_s12 }
  0x44   :  { %873 = vrot.lane.b32.xlu0 %v866_v44, %s2581_s13 }
  0x48   :  { %688 = vrot.lane.b32.xlu0 %v681_v45, %s2582_s16 }
  0x7a   :  { %v2704_v48 = vpop.permute.xlu1 %501  ;;  %v498_v49 = vpop.permute.xlu0 %497 }
  0x7b   :  { %v524_v52 = vmul.f32 %v498_v49, %v2697_v46  ;;  %v529_v53 = vmul.f32 %v498_v49, %v2702_v47  ;;  %v514_v55 = vmul.f32 %v498_v49, %v2709_v50  ;;  %v519_v56 = vmul.f32 %v498_v49, %v2714_v51 }
  0x7d   :  { %v2167_v54 = vpack.i.bf16 %v529_v53, %v524_v52  ;;  %v2172_v63 = vpack.i.bf16 %v519_v56, %v514_v55 }
  0x7e   :  { %v500_v57 = vpop.permute.xlu0 %499  ;;  %v313_v58 = vpop.permute.xlu1 %312 }
  0x7f   :  { %2168 = vrot.lane.b32.xlu1 %v2167_v54, %s2583_s25  ;;  %v339_v59 = vmul.f32 %v2697_v46, %v313_v58  ;;  %v344_v60 = vmul.f32 %v2702_v47, %v313_v58  ;;  %v329_v61 = vmul.f32 %v2709_v50, %v313_v58  ;;  %v334_v62 = vmul.f32 %v2714_v51, %v313_v58 }
  0x80   :  { %v506_v9 = vsel %vm505_vm0, %v498_v49, %v500_v57  ;;  %v507_v10 = vsel %vm505_vm0, %v500_v57, %v2704_v48 }
  0x81   :  { %v2177_v0 = vpack.i.bf16 %v344_v60, %v339_v59  ;;  %v2187_v6 = vpack.i.bf16 %v334_v62, %v329_v61  ;;  %v530_v20 = vmul.f32 %v506_v9, %v2738_v13  ;;  %v531_v22 = vmul.f32 %v507_v10, %v2743_v14 }
  0x82   :  { %v315_v1 = vpop.permute.xlu0 %314  ;;  %v2725_v2 = vpop.permute.xlu1 %316  ;;  %v520_v40 = vmul.f32 %v506_v9, %v2758_v26  ;;  %v521_v41 = vmul.f32 %v507_v10, %v2763_v27  ;;  %v525_v42 = vmul.f32 %v506_v9, %v2768_v28  ;;  %v526_v44 = vmul.f32 %v507_v10, %v2774_v30 }
  0x83   :  { %2173 = vrot.lane.b32.xlu1 %v2172_v63, %s2583_s25  ;;  %2178 = vrot.lane.b32.xlu0 %v2177_v0, %s2584_s26  ;;  %v321_v32 = vsel %vm320_vm1, %v313_v58, %v315_v1  ;;  %v322_v33 = vsel %vm320_vm1, %v315_v1, %v2725_v2  ;;  %v2212_v39 = vpack.i.bf16 %v531_v22, %v530_v20 }
  0x84   :  { %v515_v45 = vmul.f32 %v506_v9, %v2779_v31  ;;  %v340_v49 = vmul.f32 %v2768_v28, %v321_v32  ;;  %v341_v52 = vmul.f32 %v2774_v30, %v322_v33  ;;  %v516_v53 = vmul.f32 %v507_v10, %v2787_v36 }
  0x85   :  { %v2802_v54 = vmul.f32 %v2738_v13, %v321_v32  ;;  %v2807_v56 = vmul.f32 %v2743_v14, %v322_v33  ;;  %v2810_v57 = vmul.f32 %v2779_v31, %v321_v32  ;;  %v2813_v58 = vmul.f32 %v2787_v36, %v322_v33 }
  0x86   :  { %v1423_v7 = vpop.permute.xlu0 %1422  ;;  %v1425_v8 = vpop.permute.xlu1 %1424  ;;  %v2222_v62 = vpack.i.bf16 %v521_v41, %v520_v40  ;;  %v2207_v63 = vpack.i.bf16 %v526_v44, %v525_v42  ;;  %v2823_v0 = vmul.f32 %v2758_v26, %v321_v32  ;;  %v2826_v1 = vmul.f32 %v2763_v27, %v322_v33  ;;  %v2883_v40 = vld [vmem:[%s4264_s1 + $0x48] sm:$0xff] }
  0x87   :  { %2188 = vrot.lane.b32.xlu0 %v2187_v6, %s2584_s26  ;;  %v1449_v11 = vmul.f32 %v1423_v7, %v2697_v46  ;;  %v1454_v12 = vmul.f32 %v1423_v7, %v2702_v47  ;;  %v1439_v16 = vmul.f32 %v1423_v7, %v2709_v50  ;;  %v1444_v17 = vmul.f32 %v1423_v7, %v2714_v51 }
  0x88   :  { %v1431_v59 = vsel %vm1430_vm2, %v1423_v7, %v1425_v8  ;;  %v2227_v6 = vpack.i.bf16 %v341_v52, %v340_v49  ;;  %v2217_v10 = vpack.i.bf16 %v516_v53, %v515_v45  ;;  %4339 = vst [vmem:[#allocation9_spill] sm:$0xff] %v2883_v40  ;;  %v2905_v45 = vld [vmem:[%s4264_s1 + $0x90] sm:$0xff]  ;;  %v2910_v49 = vld [vmem:[%s4264_s1 + $0x40] sm:$0xff] }
  0x89   :  { %v2182_v15 = vpack.i.bf16 %v1454_v12, %v1449_v11  ;;  %v2192_v34 = vpack.i.bf16 %v1444_v17, %v1439_v16  ;;  %v1450_v11 = vmul.f32 %v1431_v59, %v2768_v28  ;;  %v2232_v12 = vpack.i.bf16 %v2807_v56, %v2802_v54 }
  0x8a   :  { %v2747_v18 = vpop.permute.xlu0 %1426  ;;  %v128_v19 = vpop.permute.xlu1 %127  ;;  %v2846_v22 = vmul.f32 %v1431_v59, %v2738_v13 }
  0x8b   :  { %4337 = vst [vmem:[#allocation7_spill] sm:$0xff] %v2747_v18  ;;  %2183 = vrot.lane.b32.xlu1 %v2182_v15, %s2585_s6  ;;  %v154_v23 = vmul.f32 %v2697_v46, %v128_v19  ;;  %v159_v24 = vmul.f32 %v2702_v47, %v128_v19  ;;  %v144_v25 = vmul.f32 %v2709_v50, %v128_v19 }
  0x8c   :  { %v149_v29 = vmul.f32 %v2714_v51, %v128_v19  ;;  %v1432_v55 = vsel %vm1430_vm2, %v1425_v8, %v2747_v18 }
  0x8d   :  { %v2197_v35 = vpack.i.bf16 %v159_v24, %v154_v23  ;;  %v1451_v7 = vmul.f32 %v1432_v55, %v2774_v30  ;;  %v2830_v8 = vmul.f32 %v1432_v55, %v2743_v14  ;;  %v2833_v9 = vmul.f32 %v1432_v55, %v2787_v36 }
  0x8e   :  { %v130_v37 = vpop.permute.xlu0 %129  ;;  %v2789_v38 = vpop.permute.xlu1 %131  ;;  %v2202_v43 = vpack.i.bf16 %v149_v29, %v144_v25  ;;  %v2849_v23 = vmul.f32 %v1431_v59, %v2779_v31  ;;  %v2858_v25 = vmul.f32 %v1431_v59, %v2758_v26  ;;  %v2861_v29 = vmul.f32 %v1432_v55, %v2763_v27 }
  0x8f   :  { %2193 = vrot.lane.b32.xlu1 %v2192_v34, %s2585_s6  ;;  %2198 = vrot.lane.b32.xlu0 %v2197_v35, %s2586_s19  ;;  %v136_v16 = vsel %vm135_vm3, %v128_v19, %v130_v37  ;;  %v137_v17 = vsel %vm135_vm3, %v130_v37, %v2789_v38  ;;  %v2237_v32 = vpack.i.bf16 %v1451_v7, %v1450_v11  ;;  %v2870_v35 = vld [vmem:[%s4264_s1 + $0x68] sm:$0xff]  ;;  %v2875_v37 = vld [vmem:[%s4264_s1 + $0x70] sm:$0xff] }
  0x90   :  { %v2242_v33 = vpack.i.bf16 %v2830_v8, %v2846_v22  ;;  %v2886_v41 = vmul.f32 %v2768_v28, %v136_v16  ;;  %v2889_v42 = vmul.f32 %v2774_v30, %v137_v17  ;;  %v2895_v44 = vmul.f32 %v2743_v14, %v137_v17  ;;  %v2959_v11 = vld [vmem:[%s4264_s1 + $0x20] sm:$0xff]  ;;  %v2972_v22 = vld [vmem:[%s4264_s1 + $0x18] sm:$0xff] }
  0x91   :  { %v2915_v53 = vmul.f32 %v2758_v26, %v136_v16  ;;  %v2918_v54 = vmul.f32 %v2763_v27, %v137_v17  ;;  %v2923_v56 = vmul.f32 %v2779_v31, %v136_v16  ;;  %v2940_v7 = vmul.f32 %v2787_v36, %v137_v17  ;;  %4350 = vst [vmem:[#allocation20_spill] sm:$0xff] %v2972_v22 }
  0x92   :  { %v2816_v60 = vpop.permute.xlu0 %503  ;;  %v2818_v61 = vpop.permute.xlu1 %318 }
  0x93   :  { %2213 = vrot.lane.b32.xlu0 %v2212_v39, %s2583_s25  ;;  %2203 = vrot.lane.b32.xlu1 %v2202_v43, %s2586_s19  ;;  %v508_v39 = vsel %vm505_vm0, %v2704_v48, %v2816_v60  ;;  %v2892_v43 = vmul.f32 %v2738_v13, %v136_v16  ;;  %v2900_v48 = vld [vmem:[%s4264_s1 + $0x98] sm:$0xff]  ;;  %4342 = vst [vmem:[#allocation12_spill] sm:$0xff] %v2915_v53  ;;  %4343 = vst [vmem:[#allocation13_spill] sm:$0xff] %v2923_v56 }
  0x94   :  { %4340 = vst [vmem:[#allocation10_spill] sm:$0xff] %v2900_v48  ;;  %v2928_v59 = vsel %vm320_vm1, %v2725_v2, %v2818_v61  ;;  %4344 = vst [vmem:[#allocation14_spill] sm:$0xff] %v2940_v7  ;;  %v2943_v8 = vmul.f32 %v508_v39, %v2905_v45  ;;  %v2947_v2 = vmul.f32 %v2900_v48, %v2816_v60 }
  0x95   :  { %v2963_v16 = vmul.f32 %v2870_v35, %v2928_v59  ;;  %v2967_v17 = vmul.f32 %v2875_v37, %v2818_v61  ;;  %v3003_v53 = vmul.f32 %v508_v39, %v2972_v22  ;;  %v3013_v3 = vmul.f32 %v2972_v22, %v2928_v59 }
  0x96   :  { %v2843_v20 = vpop.permute.xlu1 %1237  ;;  %v2851_v24 = vpop.permute.xlu0 %133  ;;  %4345 = vst [vmem:[#allocation15_spill] sm:$0xff] %v2943_v8  ;;  %v3017_v21 = vmul.f32 %v2959_v11, %v2818_v61  ;;  %v4368_v8 = vpack.i.bf16 %v2826_v1, %v2823_v0 }
  0x97   :  { %2223 = vrot.lane.b32.xlu0 %v2222_v62, %s2583_s25  ;;  %2208 = vrot.lane.b32.xlu1 %v2207_v63, %s2583_s25  ;;  %v2933_v62 = vmul.f32 %v508_v39, %v2870_v35  ;;  %v2937_v63 = vmul.f32 %v2816_v60, %v2875_v37  ;;  %4348 = vst [vmem:[#allocation18_spill] sm:$0xff] %v2963_v16  ;;  %4349 = vst [vmem:[#allocation19_spill] sm:$0xff] %v2967_v17 }
  0x98   :  { %v2976_v19 = vmul.f32 %v2843_v20, %v2697_v46  ;;  %v2980_v34 = vmul.f32 %v2843_v20, %v2702_v47  ;;  %v3048_v17 = vmul.f32 %v2900_v48, %v2818_v61  ;;  %v3053_v22 = vsel %vm135_vm3, %v2789_v38, %v2851_v24 }
  0x9a   :  { %v2912_v52 = vpop.permute.xlu1 %1241  ;;  %v2920_v55 = vpop.permute.xlu0 %1239  ;;  %4351 = vst [vmem:[#allocation21_spill] sm:$0xff] %v2976_v19  ;;  %4352 = vst [vmem:[#allocation22_spill] sm:$0xff] %v2980_v34  ;;  %v3037_v19 = vmul.f32 %v2843_v20, %v2714_v51  ;;  %v4357_v34 = vpack.i.bf16 %v2813_v58, %v2810_v57 }
  0x9b   :  { %4341 = vst [vmem:[#allocation11_spill] sm:$0xff] %v2912_v52  ;;  %2228 = vrot.lane.b32.xlu0 %v2227_v6, %s2584_s26  ;;  %2218 = vrot.lane.b32.xlu1 %v2217_v10, %s2583_s25  ;;  %v2950_v6 = vmul.f32 %v508_v39, %v2910_v49  ;;  %v2954_v10 = vmul.f32 %v2883_v40, %v2816_v60 }
  0x9c   :  { %v3033_v40 = vmul.f32 %v2843_v20, %v2709_v50  ;;  %4356 = vst [vmem:[#allocation26_spill] sm:$0xff] %v3037_v19 }
  0x9d   :  { %4346 = vst [vmem:[#allocation16_spill] sm:$0xff] %v2950_v6  ;;  %4347 = vst [vmem:[#allocation17_spill] sm:$0xff] %v2954_v10 }
  0x9e   :  { %v1055_v15 = vpop.permute.xlu1 %1054  ;;  %v1053_v18 = vpop.permute.xlu0 %1052  ;;  %4355 = vst [vmem:[#allocation25_spill] sm:$0xff] %v3033_v40 }
  0x9f   :  { %2238 = vrot.lane.b32.xlu0 %v2237_v32, %s2585_s6  ;;  %2233 = vrot.lane.b32.xlu1 %v2232_v12, %s2584_s26  ;;  %v3007_v12 = vmul.f32 %v2959_v11, %v2816_v60  ;;  %v1061_v5 = vsel %vm1060_vm4, %v1053_v18, %v1055_v15  ;;  %v3026_v60 = vmul.f32 %v2905_v45, %v2928_v59 }
  0xa0   :  { %v3029_v32 = vmul.f32 %v1061_v5, %v2768_v28  ;;  %v3061_v58 = vmul.f32 %v1053_v18, %v2697_v46  ;;  %v3073_v38 = vmul.f32 %v1061_v5, %v2758_v26  ;;  %v3085_v10 = vmul.f32 %v1061_v5, %v2779_v31 }
  0xa1   :  { %v3115_v1 = vmul.f32 %v1053_v18, %v2709_v50 }
  0xa2   :  { %v3020_v4 = vpop.permute.xlu1 %867  ;;  %v3022_v39 = vpop.permute.xlu0 %1056  ;;  %4354 = vst [vmem:[#allocation24_spill] sm:$0xff] %v3029_v32  ;;  %4359 = vst [vmem:[#allocation28_spill] sm:$0xff] %v3061_v58 }
  0xa3   :  { %4353 = vst [vmem:[#allocation23_spill] sm:$0xff] %v3022_v39  ;;  %2248 = vrot.lane.b32.xlu0 %v4357_v34, %s2584_s26  ;;  %2243 = vrot.lane.b32.xlu1 %v2242_v33, %s2585_s6  ;;  %v1062_v16 = vsel %vm1060_vm4, %v1055_v15, %v3022_v39  ;;  %v3064_v15 = vmul.f32 %v1053_v18, %v2702_v47  ;;  %4363 = vst [vmem:[#allocation32_spill] sm:$0xff] %v3073_v38 }
  0xa4   :  { %v3056_v56 = vmul.f32 %v1062_v16, %v2774_v30  ;;  %v3067_v33 = vmul.f32 %v1061_v5, %v2738_v13  ;;  %v3070_v34 = vmul.f32 %v1062_v16, %v2743_v14  ;;  %v3076_v7 = vmul.f32 %v1062_v16, %v2763_v27  ;;  %4365 = vst [vmem:[#allocation34_spill] sm:$0xff] %v3085_v10 }
  0xa5   :  { %4360 = vst [vmem:[#allocation29_spill] sm:$0xff] %v3064_v15  ;;  %v3088_v48 = vmul.f32 %v1062_v16, %v2787_v36  ;;  %v4367_v39 = vpack.i.bf16 %v2833_v9, %v2849_v23  ;;  %4371 = vst [vmem:[#allocation38_spill] sm:$0xff] %v3115_v1  ;;  %v4378_v38 = vpack.i.bf16 %v2889_v42, %v2886_v41 }
  0xa6   :  { %4358 = vst [vmem:[#allocation27_spill] sm:$0xff] %v3056_v56  ;;  %4361 = vst [vmem:[#allocation30_spill] sm:$0xff] %v3067_v33  ;;  %v3078_v6 = vpop.permute.xlu1 %871  ;;  %v870_v57 = vpop.permute.xlu0 %869  ;;  %v4379_v9 = vpack.i.bf16 %v2861_v29, %v2858_v25  ;;  %v3164_v42 = vmul.f32 %v2870_v35, %v3053_v22  ;;  %v4386_v25 = vpack.i.bf16 %v2895_v44, %v2892_v43  ;;  %v4394_v33 = vld [vmem:[#allocation7_spill] sm:$0xff] }
  0xa7   :  { %4362 = vst [vmem:[#allocation31_spill] sm:$0xff] %v3070_v34  ;;  %4364 = vst [vmem:[#allocation33_spill] sm:$0xff] %v3076_v7  ;;  %2258 = vrot.lane.b32.xlu0 %v4367_v39, %s2585_s6  ;;  %2253 = vrot.lane.b32.xlu1 %v4368_v8, %s2584_s26  ;;  %v876_v19 = vsel %vm875_vm5, %v3020_v4, %v870_v57  ;;  %v877_v5 = vsel %vm875_vm5, %v870_v57, %v3078_v6 }
  0xa8   :  { %4366 = vst [vmem:[#allocation35_spill] sm:$0xff] %v3088_v48  ;;  %v3109_v23 = vmul.f32 %v876_v19, %v2768_v28  ;;  %v3112_v0 = vmul.f32 %v877_v5, %v2774_v30  ;;  %v3118_v8 = vmul.f32 %v1053_v18, %v2714_v51  ;;  %v3121_v39 = vmul.f32 %v876_v19, %v2738_v13 }
  0xa9   :  { %v3124_v57 = vmul.f32 %v877_v5, %v2743_v14  ;;  %v3136_v18 = vmul.f32 %v3020_v4, %v2697_v46  ;;  %v3140_v48 = vmul.f32 %v3020_v4, %v2702_v47  ;;  %v3297_v32 = vmul.f32 %v3020_v4, %v2714_v51 }
  0xaa   :  { %4369 = vst [vmem:[#allocation36_spill] sm:$0xff] %v3109_v23  ;;  %4370 = vst [vmem:[#allocation37_spill] sm:$0xff] %v3112_v0  ;;  %v3126_v40 = vpop.permute.xlu1 %682  ;;  %v3130_v16 = vpop.permute.xlu0 %1243  ;;  %v3154_v23 = vmul.f32 %v2875_v37, %v2851_v24  ;;  %v3158_v0 = vmul.f32 %v2910_v49, %v2928_v59  ;;  %v3178_v59 = vsel %vm1245_vm6, %v2920_v55, %v2912_v52 }
  0xab   :  { %4372 = vst [vmem:[#allocation39_spill] sm:$0xff] %v3118_v8  ;;  %4373 = vst [vmem:[#allocation40_spill] sm:$0xff] %v3121_v39  ;;  %2268 = vrot.lane.b32.xlu0 %v4378_v38, %s2586_s19  ;;  %2263 = vrot.lane.b32.xlu1 %v4379_v9, %s2585_s6  ;;  %v3173_v38 = vsel %vm1245_vm6, %v2843_v20, %v2920_v55  ;;  %v4380_v9 = vld [vmem:[#allocation9_spill] sm:$0xff]  ;;  %v3189_v39 = vmul.f32 %v876_v19, %v2758_v26 }
  0xac   :  { %4374 = vst [vmem:[#allocation41_spill] sm:$0xff] %v3124_v57  ;;  %4375 = vst [vmem:[#allocation42_spill] sm:$0xff] %v3130_v16  ;;  %v3182_v41 = vmul.f32 %v4380_v9, %v2818_v61  ;;  %v3192_v20 = vmul.f32 %v877_v5, %v2763_v27  ;;  %v3195_v57 = vmul.f32 %v876_v19, %v2779_v31 }
  0xad   :  { %4376 = vst [vmem:[#allocation43_spill] sm:$0xff] %v3136_v18  ;;  %4377 = vst [vmem:[#allocation44_spill] sm:$0xff] %v3140_v48  ;;  %v3198_v55 = vmul.f32 %v877_v5, %v2787_v36  ;;  %v4385_v61 = vpack.i.bf16 %v2937_v63, %v2933_v62  ;;  %v3210_v18 = vmul.f32 %v2905_v45, %v3053_v22  ;;  %v4305_v63 = vmov 0  }
  0xae   :  { %v3186_v10 = vpop.permute.xlu1 %686  ;;  %v685_v29 = vpop.permute.xlu0 %684  ;;  %4381 = vst [vmem:[#allocation9_spill] sm:$0xff] %v3189_v39  ;;  %4382 = vst [vmem:[#allocation45_spill] sm:$0xff] %v3192_v20  ;;  %v3218_v48 = vmul.f32 %v3126_v40, %v2709_v50  ;;  %v3224_v43 = vmul.f32 %v3173_v38, %v2768_v28  ;;  %v3228_v44 = vmul.f32 %v3178_v59, %v2774_v30  ;;  %1913 = vmatprep.mubr.bf16.mxu1 %v4305_v63  ;;  %v4407_v39 = vld [vmem:[#allocation16_spill] sm:$0xff] }
  0xaf   :  { %4383 = vst [vmem:[#allocation46_spill] sm:$0xff] %v3195_v57  ;;  %4384 = vst [vmem:[#allocation47_spill] sm:$0xff] %v3198_v55  ;;  %2278 = vrot.lane.b32.xlu0 %v4385_v61, %s2583_s25  ;;  %2273 = vrot.lane.b32.xlu1 %v4386_v25, %s2586_s19  ;;  %v691_v19 = vsel %vm690_vm7, %v3126_v40, %v685_v29  ;;  %v692_v5 = vsel %vm690_vm7, %v685_v29, %v3186_v10  ;;  %v4402_v55 = vld [vmem:[#allocation10_spill] sm:$0xff] }
  0xb0   :  { %4387 = vst [vmem:[#allocation48_spill] sm:$0xff] %v3218_v48  ;;  %v3233_v25 = vmul.f32 %v3126_v40, %v2714_v51  ;;  %v3236_v29 = vmul.f32 %v691_v19, %v2779_v31  ;;  %v3239_v61 = vmul.f32 %v691_v19, %v2768_v28  ;;  %v3242_v62 = vmul.f32 %v692_v5, %v2774_v30  ;;  %v4395_v30 = vld [vmem:[#allocation12_spill] sm:$0xff] }
  0xb1   :  { %v3245_v8 = vmul.f32 %v691_v19, %v2738_v13  ;;  %v3248_v7 = vmul.f32 %v692_v5, %v2743_v14  ;;  %v4396_v34 = vpack.i.bf16 %v2918_v54, %v4395_v30  ;;  %v3263_v58 = vmul.f32 %v692_v5, %v2787_v36  ;;  %v4399_v54 = vld [vmem:[#allocation15_spill] sm:$0xff] }
  0xb2   :  { %4388 = vst [vmem:[#allocation49_spill] sm:$0xff] %v3233_v25  ;;  %4389 = vst [vmem:[#allocation50_spill] sm:$0xff] %v3236_v29  ;;  %v1429_v1 = vpop.permute.xlu1 %1428  ;;  %v1059_v63 = vpop.permute.xlu0 %1058  ;;  %v3266_v15 = vmul.f32 %v691_v19, %v2758_v26  ;;  %v3269_v52 = vmul.f32 %v692_v5, %v2763_v27  ;;  %v4401_v30 = vld [vmem:[#allocation23_spill] sm:$0xff]  ;;  %v3293_v20 = vmul.f32 %v3020_v4, %v2709_v50  ;;  %v4406_v50 = vld [vmem:[#allocation17_spill] sm:$0xff] }
  0xb3   :  { %4390 = vst [vmem:[#allocation51_spill] sm:$0xff] %v3239_v61  ;;  %4391 = vst [vmem:[#allocation52_spill] sm:$0xff] %v3242_v62  ;;  %v3256_v28 = vsel %vm1430_vm2, %v4394_v33, %v1429_v1  ;;  %2293 = vrot.lane.b32.xlu0 %v4396_v34, %s2586_s19  ;;  %v3272_v16 = vmul.f32 %v1429_v1, %v2959_v11  ;;  %v3275_v33 = vmul.f32 %v1429_v1, %v4380_v9 }
  0xb4   :  { %4392 = vst [vmem:[#allocation53_spill] sm:$0xff] %v3245_v8  ;;  %4393 = vst [vmem:[#allocation54_spill] sm:$0xff] %v3248_v7  ;;  %v3278_v57 = vmul.f32 %v1429_v1, %v2875_v37  ;;  %v4400_v34 = vpack.i.bf16 %v2947_v2, %v4399_v54  ;;  %v1063_v19 = vsel %vm1060_vm4, %v4401_v30, %v1059_v63  ;;  %v4409_v30 = vld [vmem:[#allocation14_spill] sm:$0xff]  ;;  %v4410_v8 = vld [vmem:[#allocation13_spill] sm:$0xff] }
  0xb5   :  { %4397 = vst [vmem:[#allocation7_spill] sm:$0xff] %v3263_v58  ;;  %4398 = vst [vmem:[#allocation12_spill] sm:$0xff] %v3266_v15  ;;  %v3287_v5 = vmul.f32 %v1429_v1, %v4402_v55  ;;  %v3300_v2 = vmul.f32 %v4380_v9, %v1059_v63  ;;  %v3306_v1 = vmul.f32 %v1059_v63, %v2875_v37 }
  0xb6   :  { %2283 = vrot.lane.b32.xlu1 %v4400_v34, %s2583_s25  ;;  %4403 = vst [vmem:[#allocation15_spill] sm:$0xff] %v3293_v20  ;;  %v874_v54 = vpop.permute.xlu0 %873  ;;  %v3303_v34 = vmul.f32 %v1063_v19, %v2870_v35  ;;  %v4408_v61 = vpack.i.bf16 %v4406_v50, %v4407_v39  ;;  %v3324_v56 = vmul.f32 %v3126_v40, %v2697_v46  ;;  %v4412_v50 = vld [vmem:[#allocation20_spill] sm:$0xff] }
  0xb7   :  { %4405 = vst [vmem:[#allocation10_spill] sm:$0xff] %v3306_v1  ;;  %v878_v4 = vsel %vm875_vm5, %v3078_v6, %v874_v54  ;;  %v3317_v51 = vmul.f32 %v2959_v11, %v874_v54  ;;  %v3320_v62 = vmul.f32 %v4380_v9, %v874_v54  ;;  %v4411_v7 = vpack.i.bf16 %v4409_v30, %v4410_v8  ;;  %v4414_v1 = vld [vmem:[#allocation18_spill] sm:$0xff] }
  0xb8   :  { %4404 = vst [vmem:[#allocation23_spill] sm:$0xff] %v3303_v34  ;;  %2303 = vrot.lane.b32.xlu0 %v4408_v61, %s2583_s25  ;;  %v3331_v39 = vmul.f32 %v874_v54, %v2875_v37  ;;  %v3334_v6 = vmul.f32 %v4402_v55, %v874_v54  ;;  %v3342_v46 = vmul.f32 %v3126_v40, %v2702_v47  ;;  %v4413_v40 = vld [vmem:[#allocation19_spill] sm:$0xff] }
  0xb9   :  { %v3345_v36 = vmul.f32 %v1063_v19, %v2905_v45  ;;  %v3355_v61 = vmul.f32 %v1063_v19, %v2910_v49  ;;  %v3358_v34 = vmul.f32 %v1063_v19, %v4412_v50  ;;  %v3361_v47 = vmul.f32 %v2959_v11, %v1059_v63 }
  0xba   :  { %2288 = vrot.lane.b32.xlu1 %v4411_v7, %s2586_s19  ;;  %v3348_v7 = vmul.f32 %v4402_v55, %v1059_v63  ;;  %v689_v54 = vpop.permute.xlu0 %688  ;;  %v4415_v20 = vpack.i.bf16 %v4413_v40, %v4414_v1  ;;  %v4416_v63 = vpack.i.bf16 %v3007_v12, %v3003_v53  ;;  %v3394_v58 = vmul.f32 %v878_v4, %v2870_v35 }
  0xbb   :  { %v693_v8 = vsel %vm690_vm7, %v3186_v10, %v689_v54  ;;  %v3370_v15 = vmul.f32 %v2959_v11, %v689_v54  ;;  %v3373_v30 = vmul.f32 %v4380_v9, %v689_v54  ;;  %v3376_v19 = vmul.f32 %v689_v54, %v2875_v37 }
  0xbc   :  { %2308 = vrot.lane.b32.xlu0 %v4415_v20, %s2584_s26  ;;  %v3383_v1 = vmul.f32 %v4402_v55, %v689_v54  ;;  %v3399_v12 = vmul.f32 %v878_v4, %v4412_v50  ;;  %v3402_v54 = vmul.f32 %v878_v4, %v2905_v45  ;;  %v3408_v40 = vmul.f32 %v878_v4, %v2910_v49 }
  0xbd   :  { %v3412_v29 = vmul.f32 %v3256_v28, %v2870_v35  ;;  %v4418_v53 = vpack.i.bf16 %v3017_v21, %v3013_v3  ;;  %v3423_v48 = vmul.f32 %v693_v8, %v2905_v45  ;;  %v3426_v4 = vmul.f32 %v693_v8, %v4412_v50 }
  0xbe   :  { %2298 = vrot.lane.b32.xlu1 %v4416_v63, %s2583_s25  ;;  %4417 = vst [vmem:[#allocation17_spill] sm:$0xff] %v3399_v12  ;;  %v3405_v63 = vmul.f32 %v693_v8, %v2870_v35  ;;  %v4419_v25 = vpack.i.bf16 %v3048_v17, %v3026_v60  ;;  %v2512_v3 = vpack.i.bf16 %v3334_v6, %v3402_v54  ;;  %s2588_s25 = smov 95  }
  0xbf   :  { %v3446_v17 = vmul.f32 %v3256_v28, %v2905_v45  ;;  %v3450_v60 = vmul.f32 %v3256_v28, %v4412_v50  ;;  %v163_v10 = vmul.f32 %v4402_v55, %v2851_v24  ;;  %v3461_v12 = vmul.f32 %v3256_v28, %v2910_v49  ;;  %v4424_v28 = vld [vmem:[#allocation8_spill] sm:$0xff] }
  0xc0   :  { %2318 = vrot.lane.b32.xlu0 %v4418_v53, %s2584_s26  ;;  %v3457_v53 = vmul.f32 %v693_v8, %v2910_v49  ;;  %v4420_v20 = vpack.i.bf16 %v3154_v23, %v3164_v42  ;;  %v2337_v21 = vpack.i.bf16 %v3228_v44, %v3224_v43  ;;  %v1270_v42 = vmul.f32 %v3173_v38, %v2738_v13 }
  0xc1   :  { %v2332_v23 = vpack.i.bf16 %v163_v10, %v3210_v18  ;;  %v1271_v43 = vmul.f32 %v3178_v59, %v2743_v14  ;;  %v152_v44 = vmul.f32 %v2910_v49, %v3053_v22  ;;  %v147_v18 = vmul.f32 %v4412_v50, %v3053_v22  ;;  %v4421_v14 = vld [vmem:[#allocation22_spill] sm:$0xff]  ;;  %v4422_v10 = vld [vmem:[#allocation21_spill] sm:$0xff] }
  0xc2   :  { %2313 = vrot.lane.b32.xlu1 %v4419_v25, %s2584_s26  ;;  %v2322_v25 = vpack.i.bf16 %v3182_v41, %v3158_v0  ;;  %v2542_v0 = vpack.i.bf16 %v3287_v5, %v3446_v17  ;;  %v2557_v41 = vpack.i.bf16 %v3272_v16, %v3450_v60  ;;  %v148_v13 = vmul.f32 %v2959_v11, %v2851_v24  ;;  %v3794_v60 = vld [vmem:[%s4263_s2] ss:$8 sm:$0xf] }
  0xc3   :  { %v4423_v8 = vpack.i.bf16 %v4421_v14, %v4422_v10  ;;  %v1255_v22 = vmul.f32 %v3173_v38, %v2779_v31  ;;  %v4428_v31 = vld [vmem:[#allocation26_spill] sm:$0xff] }
  0xc4   :  { %2328 = vrot.lane.b32.xlu0 %v4420_v20, %s2586_s19  ;;  %v153_v20 = vmul.f32 %v4380_v9, %v2851_v24  ;;  %v1256_v24 = vmul.f32 %v3178_v59, %v4424_v28  ;;  %v4431_v28 = vld [vmem:[#allocation29_spill] sm:$0xff]  ;;  %v4435_v14 = vld [vmem:[#allocation30_spill] sm:$0xff] }
  0xc6   :  { %2323 = vrot.lane.b32.xlu1 %v2322_v25, %s2584_s26  ;;  %v2342_v25 = vpack.i.bf16 %v1271_v43, %v1270_v42  ;;  %v1261_v42 = vmul.f32 %v3178_v59, %v2763_v27  ;;  %v2352_v43 = vpack.i.bf16 %v148_v13, %v147_v18  ;;  %s2589_s26 = smov 96   ;;  %v4426_v27 = vld [vmem:[#allocation24_spill] sm:$0xff]  ;;  %v4434_v13 = vld [vmem:[#allocation31_spill] sm:$0xff] }
  0xc7   :  { %v4436_v10 = vpack.i.bf16 %v4434_v13, %v4435_v14 }
  0xc8   :  { %2338 = vrot.lane.b32.xlu0 %v2337_v21, %s2588_s25  ;;  %v2357_v21 = vpack.i.bf16 %v153_v20, %v152_v44  ;;  %v4432_v20 = vld [vmem:[#allocation28_spill] sm:$0xff] }
  0xc9   :  { %v4433_v18 = vpack.i.bf16 %v4431_v28, %v4432_v20  ;;  %v4448_v28 = vld [vmem:[#allocation39_spill] sm:$0xff]  ;;  %v4449_v20 = vld [vmem:[#allocation38_spill] sm:$0xff] }
  0xca   :  { %2333 = vrot.lane.b32.xlu1 %v2332_v23, %s2586_s19  ;;  %v1260_v23 = vmul.f32 %v3173_v38, %v2758_v26  ;;  %v4425_v26 = vld [vmem:[#allocation27_spill] sm:$0xff]  ;;  %v4429_v38 = vld [vmem:[#allocation25_spill] sm:$0xff] }
  0xcb   :  { %v4427_v44 = vpack.i.bf16 %v4425_v26, %v4426_v27  ;;  %v4430_v59 = vpack.i.bf16 %v4428_v31, %v4429_v38  ;;  %v4445_v31 = vld [vmem:[#allocation37_spill] sm:$0xff]  ;;  %v4446_v38 = vld [vmem:[#allocation36_spill] sm:$0xff] }
  0xcc   :  { %2348 = vrot.lane.b32.xlu0 %v4423_v8, %s2588_s25  ;;  %v2367_v8 = vpack.i.bf16 %v1261_v42, %v1260_v23  ;;  %v4438_v23 = vld [vmem:[#allocation11_spill] sm:$0xff] }
  0xce   :  { %2343 = vrot.lane.b32.xlu1 %v2342_v25, %s2588_s25  ;;  %v2362_v25 = vpack.i.bf16 %v1256_v24, %v1255_v22  ;;  %v4440_v22 = vld [vmem:[#allocation32_spill] sm:$0xff] }
  0xd0   :  { %2358 = vrot.lane.b32.xlu0 %v2357_v21, %s2586_s19  ;;  %v4437_v21 = vld [vmem:[#allocation42_spill] sm:$0xff] }
  0xd1   :  { %v1248_v42 = vsel %vm1245_vm6, %v4438_v23, %v4437_v21 }
  0xd2   :  { %2353 = vrot.lane.b32.xlu1 %v2352_v43, %s2586_s19  ;;  %v4439_v43 = vld [vmem:[#allocation33_spill] sm:$0xff]  ;;  %v1267_v27 = vmul.f32 %v1248_v42, %v2870_v35  ;;  %v1272_v14 = vmul.f32 %v1248_v42, %v2905_v45  ;;  %v1273_v35 = vmul.f32 %v4402_v55, %v4437_v21  ;;  %v1262_v45 = vmul.f32 %v1248_v42, %v2910_v49 }
  0xd3   :  { %v4441_v24 = vpack.i.bf16 %v4439_v43, %v4440_v22  ;;  %v4454_v22 = vld [vmem:[#allocation44_spill] sm:$0xff]  ;;  %v1263_v55 = vmul.f32 %v4380_v9, %v4437_v21 }
  0xd4   :  { %2368 = vrot.lane.b32.xlu0 %v2367_v8, %s2588_s25  ;;  %v4442_v8 = vld [vmem:[#allocation35_spill] sm:$0xff]  ;;  %v2422_v43 = vpack.i.bf16 %v1273_v35, %v1272_v14  ;;  %v4468_v35 = vld [vmem:[#allocation10_spill] sm:$0xff] }
  0xd6   :  { %2363 = vrot.lane.b32.xlu1 %v2362_v25, %s2588_s25  ;;  %v4443_v25 = vld [vmem:[#allocation34_spill] sm:$0xff] }
  0xd7   :  { %v4444_v26 = vpack.i.bf16 %v4442_v8, %v4443_v25  ;;  %v1257_v25 = vmul.f32 %v1248_v42, %v4412_v50  ;;  %v4464_v50 = vld [vmem:[#allocation51_spill] sm:$0xff] }
  0xd8   :  { %2378 = vrot.lane.b32.xlu0 %v4427_v44, %s2589_s26  ;;  %v1268_v44 = vmul.f32 %v4437_v21, %v2875_v37  ;;  %v4451_v37 = vld [vmem:[#allocation41_spill] sm:$0xff]  ;;  %v4466_v42 = vld [vmem:[#allocation15_spill] sm:$0xff] }
  0xda   :  { %2373 = vrot.lane.b32.xlu1 %v4430_v59, %s2588_s25  ;;  %v4447_v59 = vpack.i.bf16 %v4445_v31, %v4446_v38  ;;  %v2417_v13 = vpack.i.bf16 %v1268_v44, %v1267_v27  ;;  %v4457_v27 = vld [vmem:[#allocation45_spill] sm:$0xff]  ;;  %v4460_v38 = vld [vmem:[#allocation47_spill] sm:$0xff] }
  0xdb   :  { %v4458_v44 = vld [vmem:[#allocation9_spill] sm:$0xff] }
  0xdc   :  { %2388 = vrot.lane.b32.xlu0 %v4433_v18, %s2589_s26  ;;  %v4450_v18 = vpack.i.bf16 %v4448_v28, %v4449_v20  ;;  %v4459_v31 = vpack.i.bf16 %v4457_v27, %v4458_v44  ;;  %v2447_v20 = vpack.i.bf16 %v1263_v55, %v1262_v45  ;;  %v4475_v45 = vpack.i.bf16 %v3348_v7, %v3345_v36  ;;  %v4478_v44 = vld [vmem:[#allocation7_spill] sm:$0xff] }
  0xdd   :  { %v4481_v36 = vpack.i.bf16 %v3300_v2, %v3355_v61  ;;  %v3642_v61 = vld [vmem:[%s4265_s0 + $0x4] ss:$12 sps:$4 sm:$0xff]  }
  0xde   :  { %2383 = vrot.lane.b32.xlu1 %v4436_v10, %s2589_s26  ;;  %v4452_v10 = vld [vmem:[#allocation40_spill] sm:$0xff]  ;;  %1860 = vmatprep.mubr.bf16.mxu0 %v3642_v61 }
  0xdf   :  { %v4453_v23 = vpack.i.bf16 %v4451_v37, %v4452_v10  ;;  %v4469_v37 = vld [vmem:[#allocation23_spill] sm:$0xff] }
  0xe0   :  { %2398 = vrot.lane.b32.xlu0 %v4441_v24, %s2589_s26  ;;  %v4455_v24 = vld [vmem:[#allocation43_spill] sm:$0xff]  ;;  %v4470_v10 = vpack.i.bf16 %v4468_v35, %v4469_v37 }
  0xe1   :  { %v4456_v8 = vpack.i.bf16 %v4454_v22, %v4455_v24 }
  0xe2   :  { %2393 = vrot.lane.b32.xlu1 %v4444_v26, %s2589_s26  ;;  %v1258_v26 = vmul.f32 %v2959_v11, %v4437_v21  ;;  %v4463_v11 = vld [vmem:[#allocation52_spill] sm:$0xff] }
  0xe3   :  { %v4465_v21 = vpack.i.bf16 %v4463_v11, %v4464_v50 }
  0xe4   :  { %2408 = vrot.lane.b32.xlu0 %v4447_v59, %s2590_s14  ;;  %v4461_v59 = vld [vmem:[#allocation46_spill] sm:$0xff]  ;;  %v2442_v49 = vpack.i.bf16 %v1258_v26, %v1257_v25  ;;  %v4476_v26 = vld [vmem:[#allocation12_spill] sm:$0xff] }
  0xe5   :  { %v4462_v28 = vpack.i.bf16 %v4460_v38, %v4461_v59  ;;  %v4477_v27 = vpack.i.bf16 %v3269_v52, %v4476_v26  ;;  %v4482_v52 = vpack.i.bf16 %v3361_v47, %v3358_v34  ;;  %v4483_v47 = vpack.i.bf16 %v3331_v39, %v3394_v58 }
  0xe6   :  { %2403 = vrot.lane.b32.xlu1 %v4450_v18, %s2589_s26 }
  0xe8   :  { %2418 = vrot.lane.b32.xlu0 %v2417_v13, %s2588_s25  ;;  %v4467_v13 = vpack.i.bf16 %v3297_v32, %v4466_v42  ;;  %v4474_v32 = vpack.i.bf16 %v3342_v46, %v3324_v56  ;;  %v4485_v42 = vld [vmem:[#allocation48_spill] sm:$0xff] }
  0xea   :  { %2413 = vrot.lane.b32.xlu1 %v4453_v23, %s2590_s14  ;;  %v4471_v23 = vld [vmem:[#allocation54_spill] sm:$0xff] }
  0xec   :  { %2428 = vrot.lane.b32.xlu0 %v4456_v8, %s2590_s14 }
  0xee   :  { %2423 = vrot.lane.b32.xlu1 %v2422_v43, %s2588_s25  ;;  %v4472_v43 = vld [vmem:[#allocation53_spill] sm:$0xff] }
  0xef   :  { %v4473_v22 = vpack.i.bf16 %v4471_v23, %v4472_v43 }
  0xf0   :  { %2438 = vrot.lane.b32.xlu0 %v4459_v31, %s2590_s14  ;;  %v4479_v31 = vld [vmem:[#allocation50_spill] sm:$0xff] }
  0xf1   :  { %v2169_v18 = vpop.permute.xlu1 %2168  ;;  %v4480_v38 = vpack.i.bf16 %v4478_v44, %v4479_v31 }
  0xf2   :  { %2433 = vrot.lane.b32.xlu1 %v4462_v28, %s2590_s14  ;;  %v2170_v11 = vunpack.i.l.bf16 %v2169_v18 }
  0xf4   :  { %2448 = vrot.lane.b32.xlu0 %v2447_v20, %s2588_s25 }
  0xf5   :  { %v3577_v9 = vpop.permute.xlu0 %2178  ;;  %v2174_v14 = vpop.permute.xlu1 %2173 }
  0xf6   :  { %2443 = vrot.lane.b32.xlu1 %v2442_v49, %s2588_s25  ;;  %v2171_v49 = vunpack.i.h.bf16 %v2169_v18  ;;  %v4484_v18 = vld [vmem:[#allocation49_spill] sm:$0xff]  ;;  %v2180_v6 = vunpack.i.l.bf16 %v3577_v9 }
  0xf8   :  { %2458 = vrot.lane.b32.xlu0 %v4465_v21, %s2591_s15 }
  0xf9   :  { %v3595_v24 = vpop.permute.xlu0 %2188 }
  0xfa   :  { %2453 = vrot.lane.b32.xlu1 %v4467_v13, %s2590_s14  ;;  %v4486_v13 = vpack.i.bf16 %v4484_v18, %v4485_v42  ;;  %v2181_v18 = vunpack.i.h.bf16 %v3577_v9  ;;  %v4490_v9 = vpack.i.bf16 %v3320_v62, %v3408_v40 }
  0xfc   :  { %2468 = vrot.lane.b32.xlu0 %v4470_v10, %s2589_s26 }
  0xfd   :  { %v3597_v8 = vpop.permute.xlu1 %2183 }
  0xfe   :  { %2463 = vrot.lane.b32.xlu1 %v4473_v22, %s2591_s15  ;;  %v2185_v62 = vunpack.i.l.bf16 %v3597_v8 }
 0x100   :  { %2478 = vrot.lane.b32.xlu0 %v4474_v32, %s2591_s15  ;;  %v2176_v32 = vunpack.i.h.bf16 %v2174_v14 }
 0x101   :  { %v3607_v55 = vpop.permute.xlu1 %2193  ;;  %v3609_v25 = vpop.permute.xlu0 %2198 }
 0x102   :  { %2473 = vrot.lane.b32.xlu1 %v4475_v45, %s2589_s26  ;;  %v2175_v45 = vunpack.i.l.bf16 %v2174_v14  ;;  %v2195_v5 = vunpack.i.l.bf16 %v3607_v55 }
 0x104   :  { %2488 = vrot.lane.b32.xlu0 %v4477_v27, %s2591_s15 }
 0x105   :  { %v3619_v56 = vpop.permute.xlu0 %2213  ;;  %v3621_v46 = vpop.permute.xlu1 %2203 }
 0x106   :  { %2483 = vrot.lane.b32.xlu1 %v4480_v38, %s2591_s15  ;;  %v2216_v7 = vunpack.i.h.bf16 %v3619_v56  ;;  %v2215_v59 = vunpack.i.l.bf16 %v3619_v56  ;;  %v4487_v38 = vld [vmem:[#allocation17_spill] sm:$0xff] }
 0x108   :  { %2498 = vrot.lane.b32.xlu0 %v4481_v36, %s2589_s26  ;;  %v608_v37 = vsel %vm594_vm8, %v2215_v59, %v2216_v7  ;;  %v607_v23 = vsel %vm594_vm8, %v2171_v49, %v2215_v59  ;;  %v4488_v36 = vpack.i.bf16 %v3317_v51, %v4487_v38  ;;  %v4491_v38 = vpack.i.bf16 %v3278_v57, %v3412_v29 }
 0x109   :  { %v3633_v28 = vpop.permute.xlu0 %2223  ;;  %v3635_v20 = vpop.permute.xlu1 %2208 }
 0x10a   :  { %2493 = vrot.lane.b32.xlu1 %v4482_v52, %s2589_s26  ;;  %v2211_v50 = vunpack.i.h.bf16 %v3635_v20  ;;  %v2210_v2 = vunpack.i.l.bf16 %v3635_v20  ;;  %v2226_v21 = vunpack.i.h.bf16 %v3633_v28  ;;  %v2225_v34 = vunpack.i.l.bf16 %v3633_v28 }
 0x10c   :  { %2508 = vrot.lane.b32.xlu0 %v4483_v47, %s2590_s14  ;;  %v604_v35 = vsel %vm594_vm8, %v2210_v2, %v2211_v50  ;;  %v603_v10 = vsel %vm594_vm8, %v2170_v11, %v2210_v2  ;;  %v600_v59 = vsel %vm594_vm8, %v2225_v34, %v2226_v21  ;;  %v599_v51 = vsel %vm594_vm8, %v2176_v32, %v2225_v34 }
 0x10d   :  { %v3662_v43 = vpop.permute.xlu0 %2228  ;;  %v3664_v58 = vpop.permute.xlu1 %2218  ;;  %v1749_v39 = vpack.c.bf16 %v608_v37, %v604_v35  ;;  %v1748_v22 = vpack.c.bf16 %v607_v23, %v603_v10  ;;  %v4489_v34 = vpack.i.bf16 %v3376_v19, %v3405_v63  ;;  %v2186_v32 = vunpack.i.h.bf16 %v3597_v8 }
 0x10e   :  { %2503 = vrot.lane.b32.xlu1 %v4486_v13, %s2591_s15  ;;  %v2221_v26 = vunpack.i.h.bf16 %v3664_v58  ;;  %v2220_v27 = vunpack.i.l.bf16 %v3664_v58  ;;  %v2231_v44 = vunpack.i.h.bf16 %v3662_v43  ;;  %v2230_v31 = vunpack.i.l.bf16 %v3662_v43 }
 0x10f   :  { %1828 = vmatprep.subr.bf16.mxu0 %v1749_v39  ;;  %v4492_v8 = vpack.i.bf16 %v3383_v1, %v3423_v48  ;;  %v2190_v48 = vunpack.i.l.bf16 %v3595_v24 }
 0x110   :  { %2518 = vrot.lane.b32.xlu0 %v4488_v36, %s2590_s14  ;;  %1829 = vmatpush1.bf16.msra.mxu0 %v1748_v22  ;;  %v596_v14 = vsel %vm594_vm8, %v2220_v27, %v2221_v26  ;;  %v595_v52 = vsel %vm594_vm8, %v2175_v45, %v2220_v27  ;;  %v419_v35 = vsel %vm409_vm9, %v2230_v31, %v2231_v44 }
 0x111   :  { %v3687_v49 = vpop.permute.xlu0 %2238  ;;  %v3689_v11 = vpop.permute.xlu1 %2233  ;;  %v1745_v2 = vpack.c.bf16 %v600_v59, %v596_v14  ;;  %v1744_v47 = vpack.c.bf16 %v599_v51, %v595_v52  ;;  %v418_v10 = vsel %vm409_vm9, %v2180_v6, %v2230_v31 }
 0x112   :  { %2513 = vrot.lane.b32.xlu1 %v2512_v3, %s2590_s14  ;;  %v2236_v54 = vunpack.i.h.bf16 %v3689_v11  ;;  %v2235_v3 = vunpack.i.l.bf16 %v3689_v11  ;;  %v2241_v42 = vunpack.i.h.bf16 %v3687_v49  ;;  %v2240_v13 = vunpack.i.l.bf16 %v3687_v49 }
 0x113   :  { %1830 = vmatprep.subr.bf16.mxu0 %v1745_v2 }
 0x114   :  { %2528 = vrot.lane.b32.xlu0 %v4489_v34, %s2591_s15  ;;  %1831 = vmatpush1.bf16.msra.mxu0 %v1744_v47  ;;  %v423_v37 = vsel %vm409_vm9, %v2235_v3, %v2236_v54  ;;  %v422_v19 = vsel %vm409_vm9, %v2181_v18, %v2235_v3  ;;  %v1529_v36 = vsel %vm1519_vm10, %v2240_v13, %v2241_v42  ;;  %v2191_v47 = vunpack.i.h.bf16 %v3595_v24 }
 0x115   :  { %v3713_v63 = vpop.permute.xlu0 %2248  ;;  %v3715_v23 = vpop.permute.xlu1 %2243  ;;  %v1741_v39 = vpack.c.bf16 %v423_v37, %v419_v35  ;;  %v1740_v22 = vpack.c.bf16 %v422_v19, %v418_v10  ;;  %v1528_v14 = vsel %vm1519_vm10, %v2185_v62, %v2240_v13  ;;  %v4493_v13 = vpack.i.bf16 %v3370_v15, %v3426_v4 }
 0x116   :  { %2523 = vrot.lane.b32.xlu1 %v4490_v9, %s2590_s14  ;;  %v2246_v40 = vunpack.i.h.bf16 %v3715_v23  ;;  %v2245_v45 = vunpack.i.l.bf16 %v3715_v23  ;;  %v2251_v27 = vunpack.i.h.bf16 %v3713_v63  ;;  %v2250_v31 = vunpack.i.l.bf16 %v3713_v63 }
 0x117   :  { %1832 = vmatprep.subr.bf16.mxu0 %v1741_v39  ;;  %v2196_v19 = vunpack.i.h.bf16 %v3607_v55  ;;  %v4494_v55 = vpack.i.bf16 %v3373_v30, %v3457_v53 }
 0x118   :  { %2538 = vrot.lane.b32.xlu0 %v4491_v38, %s2585_s6  ;;  %1833 = vmatpush1.bf16.msra.mxu0 %v1740_v22  ;;  %v1533_v59 = vsel %vm1519_vm10, %v2245_v45, %v2246_v40  ;;  %v1532_v57 = vsel %vm1519_vm10, %v2186_v32, %v2245_v45  ;;  %v411_v34 = vsel %vm409_vm9, %v2250_v31, %v2251_v27  ;;  %v2201_v38 = vunpack.i.h.bf16 %v3609_v25 }
 0x119   :  { %v3739_v29 = vpop.permute.xlu0 %2258  ;;  %v3741_v52 = vpop.permute.xlu1 %2253  ;;  %v1789_v51 = vpack.c.bf16 %v1533_v59, %v1529_v36  ;;  %v1788_v2 = vpack.c.bf16 %v1532_v57, %v1528_v14  ;;  %v410_v35 = vsel %vm409_vm9, %v2190_v48, %v2250_v31  ;;  %v2200_v36 = vunpack.i.l.bf16 %v3609_v25  ;;  %v3808_v57 = vld [vmem:[%s4265_s0 + $0x8] ss:$12 sps:$4 sm:$0xff]  }
 0x11a   :  { %2533 = vrot.lane.b32.xlu1 %v4492_v8, %s2591_s15  ;;  %v2256_v1 = vunpack.i.h.bf16 %v3741_v52  ;;  %v2255_v18 = vunpack.i.l.bf16 %v3741_v52  ;;  %v2261_v6 = vunpack.i.h.bf16 %v3739_v29  ;;  %v2260_v3 = vunpack.i.l.bf16 %v3739_v29 }
 0x11b   :  { %1893 = vmatprep.subr.bf16.mxu1 %v1789_v51  ;;  %v4495_v51 = vld [vmem:[#allocation5_spill] sm:$0xff]  ;;  %v4496_v25 = vpack.i.bf16 %v3275_v33, %v3461_v12  ;;  %v27_v33 = vld [vmem:[%s4264_s1 + $0x58] sm:$0xff] }
 0x11c   :  { %2548 = vrot.lane.b32.xlu0 %v4493_v13, %s2591_s15  ;;  %1894 = vmatpush1.bf16.msra.mxu1 %v1788_v2  ;;  %v415_v24 = vsel %vm409_vm9, %v2255_v18, %v2256_v1  ;;  %v414_v15 = vsel %vm409_vm9, %v2191_v47, %v2255_v18  ;;  %v1521_v32 = vsel %vm1519_vm10, %v2260_v3, %v2261_v6 }
 0x11d   :  { %v3765_v4 = vpop.permute.xlu0 %2268  ;;  %v3767_v9 = vpop.permute.xlu1 %2263  ;;  %v1737_v37 = vpack.c.bf16 %v415_v24, %v411_v34  ;;  %v1736_v10 = vpack.c.bf16 %v414_v15, %v410_v35  ;;  %v1520_v45 = vsel %vm1519_vm10, %v2195_v5, %v2260_v3  ;;  %v43_v2 = vrot.slane %v3794_v60, %v4495_v51  ;;  %v4497_v15 = vld [vmem:[#allocation4_spill] sm:$0xff]  ;;  %v31_v5 = vld [vmem:[%s4264_s1 + $0x80] sm:$0xff] }
 0x11e   :  { %2543 = vrot.lane.b32.xlu1 %v2542_v0, %s2585_s6  ;;  %v2266_v17 = vunpack.i.h.bf16 %v3767_v9  ;;  %v2265_v0 = vunpack.i.l.bf16 %v3767_v9  ;;  %v2271_v39 = vunpack.i.h.bf16 %v3765_v4  ;;  %v2270_v22 = vunpack.i.l.bf16 %v3765_v4 }
 0x11f   :  { %1834 = vmatprep.subr.bf16.mxu0 %v1737_v37  ;;  %v39_v37 = vrot.slane %v3794_v60, %v4497_v15  ;;  %v69_v56 = vmul.f32 %v43_v2, %v31_v5  ;;  %v2205_v51 = vunpack.i.l.bf16 %v3621_v46  ;;  %v22_v5 = vld [vmem:[%s4264_s1 + $0x28] sm:$0xff] }
 0x120   :  { %2558 = vrot.lane.b32.xlu0 %v2557_v41, %s2585_s6  ;;  %1835 = vmatpush1.bf16.msra.mxu0 %v1736_v10  ;;  %v1525_v62 = vsel %vm1519_vm10, %v2265_v0, %v2266_v17  ;;  %v1524_v16 = vsel %vm1519_vm10, %v2196_v19, %v2265_v0  ;;  %v234_v14 = vsel %vm224_vm11, %v2270_v22, %v2271_v39  ;;  %v26_v0 = vld [vmem:[%s4264_s1 + $0x50] sm:$0xff] }
 0x121   :  { %v2279_v41 = vpop.permute.xlu0 %2278  ;;  %v3796_v31 = vpop.permute.xlu1 %2273  ;;  %v1785_v30 = vpack.c.bf16 %v1525_v62, %v1521_v32  ;;  %v1784_v53 = vpack.c.bf16 %v1524_v16, %v1520_v45  ;;  %v233_v48 = vsel %vm224_vm11, %v2200_v36, %v2270_v22  ;;  %v4498_v62 = vmov 0   ;;  %v19_v36 = vld [vmem:[%s4264_s1 + $0x8] sm:$0xff] }
 0x122   :  { %2553 = vrot.lane.b32.xlu1 %v4494_v55, %s2591_s15  ;;  %v2276_v8 = vunpack.i.h.bf16 %v3796_v31  ;;  %v2275_v59 = vunpack.i.l.bf16 %v3796_v31  ;;  %v2281_v3 = vunpack.i.h.bf16 %v2279_v41  ;;  %v2280_v13 = vunpack.i.l.bf16 %v2279_v41 }
 0x123   :  { %1895 = vmatprep.subr.bf16.mxu1 %v1785_v30  ;;  %v65_v55 = vmul.f32 %v43_v2, %v27_v33 }
 0x124   :  { %1896 = vmatpush1.bf16.msra.mxu1 %v1784_v53  ;;  %v238_v47 = vsel %vm224_vm11, %v2275_v59, %v2276_v8  ;;  %v237_v18 = vsel %vm224_vm11, %v2201_v38, %v2275_v59  ;;  %v605_v45 = vsel %vm594_vm8, %v2211_v50, %v2280_v13  ;;  %v606_v30 = vsel %vm594_vm8, %v2280_v13, %v2281_v3  ;;  %v30_v38 = vld [vmem:[%s4264_s1 + $0x78] sm:$0xff] }
 0x125   :  { %v3821_v34 = vpop.permute.xlu0 %2293  ;;  %v1733_v24 = vpack.c.bf16 %v238_v47, %v234_v14  ;;  %v1732_v35 = vpack.c.bf16 %v237_v18, %v233_v48  ;;  %v64_v14 = vmul.f32 %v39_v37, %v26_v0  ;;  %v23_v48 = vld [vmem:[%s4264_s1 + $0x30] sm:$0xff]  ;;  %v3865_v18 = vld [vmem:[%s4265_s0 + $0x20] ss:$12 sps:$4 sm:$0xff]  }
 0x126   :  { %2563 = vrot.lane.b32.xlu1 %v4496_v25, %s2585_s6  ;;  %v2296_v22 = vunpack.i.h.bf16 %v3821_v34  ;;  %v2295_v32 = vunpack.i.l.bf16 %v3821_v34  ;;  %v20_v34 = vld [vmem:[%s4264_s1 + $0x10] sm:$0xff] }
 0x127   :  { %1836 = vmatprep.subr.bf16.mxu0 %v1733_v24  ;;  %2146 = vmatmul.mubr.msk.bf16.vlgmr.msra.gmra.mxu1 %vm1060_vm4, %v3808_v57  ;;  %v57_v24 = vmul.f32 %v43_v2, %v19_v36 }
 0x128   :  { %v2284_v12 = vpop.permute.xlu1 %2283  ;;  %1837 = vmatpush1.bf16.msra.mxu0 %v1732_v35  ;;  %1923 = vmatprep.mubr.bf16.mxu1 %v4498_v62  ;;  %v230_v13 = vsel %vm224_vm11, %v2295_v32, %v2296_v22  ;;  %v18_v35 = vld [vmem:[%s4264_s1] sm:$0xff] }
 0x129   :  { %v2286_v10 = vunpack.i.h.bf16 %v2284_v12  ;;  %v2285_v19 = vunpack.i.l.bf16 %v2284_v12  ;;  %v56_v36 = vmul.f32 %v39_v37, %v18_v35 }
 0x12a   :  { %v2304_v41 = vpop.permute.xlu0 %2303 }
 0x12b   :  { %v609_v16 = vsel %vm594_vm8, %v2216_v7, %v2285_v19  ;;  %v610_v53 = vsel %vm594_vm8, %v2285_v19, %v2286_v10  ;;  %v2206_v7 = vunpack.i.h.bf16 %v3621_v46  ;;  %v2305_v3 = vunpack.i.l.bf16 %v2304_v41 }
 0x12c   :  { %v1750_v20 = vpack.c.bf16 %v609_v16, %v605_v45  ;;  %v3853_v59 = vpop.permute.xlu1 %2288  ;;  %v1751_v50 = vpack.c.bf16 %v610_v53, %v606_v30  ;;  %v68_v46 = vmul.f32 %v39_v37, %v30_v38  ;;  %v2306_v33 = vunpack.i.h.bf16 %v2304_v41 }
 0x12d   :  { %v2291_v25 = vunpack.i.h.bf16 %v3853_v59  ;;  %v2290_v47 = vunpack.i.l.bf16 %v3853_v59  ;;  %v229_v19 = vsel %vm224_vm11, %v2206_v7, %v2295_v32  ;;  %v1725_v30 = vpack.c.bf16 %v69_v56, %v65_v55 }
 0x12e   :  { %1934 = vmatprep.subr.bf16.mxu1 %v1751_v50  ;;  %v2309_v12 = vpop.permute.xlu0 %2308  ;;  %v61_v53 = vmul.f32 %v43_v2, %v23_v48  ;;  %v1724_v50 = vpack.c.bf16 %v68_v46, %v64_v14  ;;  %v60_v7 = vmul.f32 %v39_v37, %v22_v5 }
 0x12f   :  { %1935 = vmatpush1.bf16.msra.mxu1 %v1750_v20  ;;  %v226_v15 = vsel %vm224_vm11, %v2290_v47, %v2291_v25  ;;  %v225_v10 = vsel %vm224_vm11, %v2205_v51, %v2290_v47  ;;  %v601_v20 = vsel %vm594_vm8, %v2226_v21, %v2305_v3  ;;  %v2310_v32 = vunpack.i.l.bf16 %v2309_v12 }
 0x130   :  { %v2299_v0 = vpop.permute.xlu1 %2298  ;;  %v1729_v45 = vpack.c.bf16 %v230_v13, %v226_v15  ;;  %v1728_v16 = vpack.c.bf16 %v229_v19, %v225_v10  ;;  %2147 = vmatmul.mubr.msk.bf16.gmra.mxu1 %vm1060_vm4, %v3865_v18  ;;  %v2311_v51 = vunpack.i.h.bf16 %v2309_v12  ;;  %v602_v47 = vsel %vm594_vm8, %v2305_v3, %v2306_v33 }
 0x131   :  { %v2301_v41 = vunpack.i.h.bf16 %v2299_v0  ;;  %v2300_v38 = vunpack.i.l.bf16 %v2299_v0  ;;  %1966 = vmatprep.mubr.bf16.mxu1 %v3642_v61  ;;  %v1721_v13 = vpack.c.bf16 %v61_v53, %v57_v24  ;;  %v420_v61 = vsel %vm409_vm9, %v2231_v44, %v2310_v32 }
 0x132   :  { %1838 = vmatprep.subr.bf16.mxu0 %v1729_v45  ;;  %v2319_v55 = vpop.permute.xlu0 %2318  ;;  %v421_v33 = vsel %vm409_vm9, %v2310_v32, %v2311_v51  ;;  %v33_v51 = vld [vmem:[%s4264_s1 + $0x90] sm:$0xff] }
 0x133   :  { %v597_v2 = vsel %vm594_vm8, %v2221_v26, %v2300_v38  ;;  %1839 = vmatpush1.bf16.msra.mxu0 %v1728_v16  ;;  %v598_v56 = vsel %vm594_vm8, %v2300_v38, %v2301_v41  ;;  %v2320_v58 = vunpack.i.l.bf16 %v2319_v55  ;;  %v1720_v26 = vpack.c.bf16 %v60_v7, %v56_v36 }
 0x134   :  { %v1746_v28 = vpack.c.bf16 %v601_v20, %v597_v2  ;;  %v2314_v48 = vpop.permute.xlu1 %2313  ;;  %v1747_v21 = vpack.c.bf16 %v602_v47, %v598_v56  ;;  %1840 = vmatprep.subr.bf16.mxu0 %v1725_v30  ;;  %v2321_v46 = vunpack.i.h.bf16 %v2319_v55 }
 0x135   :  { %v2316_v14 = vunpack.i.h.bf16 %v2314_v48  ;;  %v2315_v37 = vunpack.i.l.bf16 %v2314_v48  ;;  %v412_v19 = vsel %vm409_vm9, %v2251_v27, %v2320_v58  ;;  %v4500_v48 = vld [vmem:[#allocation3_spill] sm:$0xff] }
 0x136   :  { %1936 = vmatprep.subr.bf16.mxu1 %v1747_v21  ;;  %v2329_v3 = vpop.permute.xlu0 %2328  ;;  %v413_v45 = vsel %vm409_vm9, %v2320_v58, %v2321_v46  ;;  %v47_v21 = vrot.slane %v3794_v60, %v4500_v48 }
 0x137   :  { %v424_v35 = vsel %vm409_vm9, %v2236_v54, %v2315_v37  ;;  %1937 = vmatpush1.bf16.msra.mxu1 %v1746_v28  ;;  %v425_v24 = vsel %vm409_vm9, %v2315_v37, %v2316_v14  ;;  %1841 = vmatpush1.bf16.msra.mxu0 %v1724_v50  ;;  %v2331_v11 = vunpack.i.h.bf16 %v2329_v3  ;;  %v2330_v5 = vunpack.i.l.bf16 %v2329_v3 }
 0x138   :  { %v1742_v12 = vpack.c.bf16 %v424_v35, %v420_v61  ;;  %v2324_v15 = vpop.permute.xlu1 %2323  ;;  %v1743_v43 = vpack.c.bf16 %v425_v24, %v421_v33  ;;  %1842 = vmatprep.subr.bf16.mxu0 %v1721_v13  ;;  %v28_v61 = vld [vmem:[%s4264_s1 + $0x60] sm:$0xff]  ;;  %v32_v35 = vld [vmem:[%s4264_s1 + $0x88] sm:$0xff] }
 0x139   :  { %v2326_v44 = vunpack.i.h.bf16 %v2324_v15  ;;  %v2325_v10 = vunpack.i.l.bf16 %v2324_v15  ;;  %v235_v38 = vsel %vm224_vm11, %v2271_v39, %v2330_v5  ;;  %v236_v52 = vsel %vm224_vm11, %v2330_v5, %v2331_v11  ;;  %v29_v39 = vld [vmem:[%s4264_s1 + $0x68] sm:$0xff] }
 0x13a   :  { %1938 = vmatprep.subr.bf16.mxu1 %v1743_v43  ;;  %v3906_v0 = vpop.permute.xlu0 %2338  ;;  %v21_v43 = vld [vmem:[%s4264_s1 + $0x18] sm:$0xff]  ;;  %v66_v11 = vmul.f32 %v47_v21, %v28_v61 }
 0x13b   :  { %v416_v54 = vsel %vm409_vm9, %v2256_v1, %v2325_v10  ;;  %1939 = vmatpush1.bf16.msra.mxu1 %v1742_v12  ;;  %v417_v16 = vsel %vm409_vm9, %v2325_v10, %v2326_v44  ;;  %1843 = vmatpush1.bf16.msra.mxu0 %v1720_v26  ;;  %v4499_v1 = vld [vmem:[#allocation6_spill] sm:$0xff]  ;;  %v2341_v20 = vunpack.i.h.bf16 %v3906_v0  ;;  %v2340_v32 = vunpack.i.l.bf16 %v3906_v0  ;;  %v25_v44 = vld [vmem:[%s4264_s1 + $0x40] sm:$0xff] }
 0x13c   :  { %v1738_v30 = vpack.c.bf16 %v416_v54, %v412_v19  ;;  %v2334_v53 = vpop.permute.xlu1 %2333  ;;  %v1739_v63 = vpack.c.bf16 %v417_v16, %v413_v45  ;;  %v51_v36 = vrot.slane %v3794_v60, %v4499_v1  ;;  %v70_v16 = vmul.f32 %v47_v21, %v32_v35 }
 0x13d   :  { %v2336_v41 = vunpack.i.h.bf16 %v2334_v53  ;;  %v2335_v27 = vunpack.i.l.bf16 %v2334_v53  ;;  %v1344_v26 = vsel %vm1334_vm12, %v2340_v32, %v2341_v20 }
 0x13e   :  { %1940 = vmatprep.subr.bf16.mxu1 %v1739_v63  ;;  %v2349_v7 = vpop.permute.xlu0 %2348  ;;  %v67_v14 = vmul.f32 %v51_v36, %v29_v39  ;;  %v71_v37 = vmul.f32 %v51_v36, %v33_v51 }
 0x13f   :  { %v239_v50 = vsel %vm224_vm11, %v2276_v8, %v2335_v27  ;;  %1941 = vmatpush1.bf16.msra.mxu1 %v1738_v30  ;;  %v240_v4 = vsel %vm224_vm11, %v2335_v27, %v2336_v41  ;;  %v2351_v55 = vunpack.i.h.bf16 %v2349_v7  ;;  %v2350_v56 = vunpack.i.l.bf16 %v2349_v7 }
 0x140   :  { %v1734_v2 = vpack.c.bf16 %v239_v50, %v235_v38  ;;  %v3928_v47 = vpop.permute.xlu1 %2343  ;;  %v1735_v31 = vpack.c.bf16 %v240_v4, %v236_v52  ;;  %v1727_v45 = vpack.c.bf16 %v71_v37, %v67_v14  ;;  %v59_v41 = vmul.f32 %v51_v36, %v21_v43 }
 0x141   :  { %v2346_v8 = vunpack.i.h.bf16 %v3928_v47  ;;  %v2345_v28 = vunpack.i.l.bf16 %v3928_v47  ;;  %v1343_v13 = vsel %vm1334_vm12, %v2350_v56, %v2340_v32  ;;  %v63_v27 = vmul.f32 %v51_v36, %v25_v44 }
 0x142   :  { %1942 = vmatprep.subr.bf16.mxu1 %v1735_v31  ;;  %v2359_v58 = vpop.permute.xlu0 %2358  ;;  %v58_v7 = vmul.f32 %v47_v21, %v20_v34 }
 0x143   :  { %1943 = vmatpush1.bf16.msra.mxu1 %v1734_v2  ;;  %v1348_v46 = vsel %vm1334_vm12, %v2345_v28, %v2346_v8  ;;  %v1347_v60 = vsel %vm1334_vm12, %v2351_v55, %v2345_v28  ;;  %v2361_v3 = vunpack.i.h.bf16 %v2359_v58  ;;  %v2360_v33 = vunpack.i.l.bf16 %v2359_v58 }
 0x144   :  { %v2354_v24 = vpop.permute.xlu1 %2353  ;;  %v1781_v12 = vpack.c.bf16 %v1348_v46, %v1344_v26  ;;  %v1780_v15 = vpack.c.bf16 %v1347_v60, %v1343_v13  ;;  %v1726_v2 = vpack.c.bf16 %v70_v16, %v66_v11  ;;  %v1723_v31 = vpack.c.bf16 %v63_v27, %v59_v41 }
 0x145   :  { %v2356_v10 = vunpack.i.h.bf16 %v2354_v24  ;;  %v2355_v19 = vunpack.i.l.bf16 %v2354_v24  ;;  %v231_v5 = vsel %vm224_vm11, %v2296_v22, %v2360_v33  ;;  %v232_v54 = vsel %vm224_vm11, %v2360_v33, %v2361_v3  ;;  %v24_v22 = vld [vmem:[%s4264_s1 + $0x38] sm:$0xff] }
 0x146   :  { %1844 = vmatprep.subr.bf16.mxu0 %v1781_v12  ;;  %v3961_v53 = vpop.permute.xlu0 %2368  ;;  %v62_v4 = vmul.f32 %v47_v21, %v24_v22 }
 0x147   :  { %v227_v30 = vsel %vm224_vm11, %v2291_v25, %v2355_v19  ;;  %1845 = vmatpush2.bf16.msra.mxu0 %v1780_v15  ;;  %v228_v63 = vsel %vm224_vm11, %v2355_v19, %v2356_v10  ;;  %v2371_v59 = vunpack.i.h.bf16 %v3961_v53  ;;  %v2370_v25 = vunpack.i.l.bf16 %v3961_v53 }
 0x148   :  { %v1730_v38 = vpack.c.bf16 %v231_v5, %v227_v30  ;;  %v3972_v52 = vpop.permute.xlu1 %2363  ;;  %v1731_v1 = vpack.c.bf16 %v232_v54, %v228_v63  ;;  %v1722_v13 = vpack.c.bf16 %v62_v4, %v58_v7 }
 0x149   :  { %v2366_v32 = vunpack.i.h.bf16 %v3972_v52  ;;  %v2365_v36 = vunpack.i.l.bf16 %v3972_v52  ;;  %v1340_v50 = vsel %vm1334_vm12, %v2370_v25, %v2371_v59 }
 0x14a   :  { %1944 = vmatprep.subr.bf16.mxu1 %v1731_v1  ;;  %v3979_v39 = vpop.permute.xlu0 %2378 }
 0x14b   :  { %1945 = vmatpush1.bf16.msra.mxu1 %v1730_v38  ;;  %v1336_v51 = vsel %vm1334_vm12, %v2365_v36, %v2366_v32  ;;  %v2381_v14 = vunpack.i.h.bf16 %v3979_v39  ;;  %v2380_v21 = vunpack.i.l.bf16 %v3979_v39 }
 0x14c   :  { %v2374_v55 = vpop.permute.xlu1 %2373  ;;  %v1777_v56 = vpack.c.bf16 %v1340_v50, %v1336_v51  ;;  %1946 = vmatprep.subr.bf16.mxu1 %v1727_v45 }
 0x14d   :  { %v2376_v28 = vunpack.i.h.bf16 %v2374_v55  ;;  %v2375_v48 = vunpack.i.l.bf16 %v2374_v55  ;;  %v1159_v15 = vsel %vm1149_vm13, %v2380_v21, %v2381_v14 }
 0x14e   :  { %1846 = vmatprep.subr.bf16.mxu0 %v1777_v56  ;;  %v2389_v37 = vpop.permute.xlu0 %2388 }
 0x14f   :  { %v1335_v61 = vsel %vm1334_vm12, %v2375_v48, %v2365_v36  ;;  %v1339_v58 = vsel %vm1334_vm12, %v2376_v28, %v2370_v25  ;;  %1947 = vmatpush1.bf16.msra.mxu1 %v1726_v2  ;;  %v2391_v26 = vunpack.i.h.bf16 %v2389_v37  ;;  %v2390_v46 = vunpack.i.l.bf16 %v2389_v37 }
 0x150   :  { %v3988_v60 = vpop.permute.xlu1 %2383  ;;  %v1776_v35 = vpack.c.bf16 %v1339_v58, %v1335_v61  ;;  %1948 = vmatprep.subr.bf16.mxu1 %v1723_v31 }
 0x151   :  { %v2386_v3 = vunpack.i.h.bf16 %v3988_v60  ;;  %v2385_v33 = vunpack.i.l.bf16 %v3988_v60  ;;  %v1158_v24 = vsel %vm1149_vm13, %v2390_v46, %v2380_v21 }
 0x152   :  { %1847 = vmatpush2.bf16.msra.mxu0 %v1776_v35  ;;  %v3993_v12 = vpop.permute.xlu0 %2398 }
 0x153   :  { %v1163_v43 = vsel %vm1149_vm13, %v2385_v33, %v2386_v3  ;;  %v1162_v44 = vsel %vm1149_vm13, %v2391_v26, %v2385_v33  ;;  %1949 = vmatpush1.bf16.msra.mxu1 %v1722_v13  ;;  %v2401_v10 = vunpack.i.h.bf16 %v3993_v12  ;;  %v2400_v19 = vunpack.i.l.bf16 %v3993_v12 }
 0x154   :  { %v4004_v11 = vpop.permute.xlu1 %2393  ;;  %v1773_v5 = vpack.c.bf16 %v1163_v43, %v1159_v15  ;;  %v1772_v54 = vpack.c.bf16 %v1162_v44, %v1158_v24 }
 0x155   :  { %v2396_v45 = vunpack.i.h.bf16 %v4004_v11  ;;  %v2395_v16 = vunpack.i.l.bf16 %v4004_v11  ;;  %v1155_v30 = vsel %vm1149_vm13, %v2400_v19, %v2401_v10 }
 0x156   :  { %1848 = vmatprep.subr.bf16.mxu0 %v1773_v5  ;;  %v4011_v63 = vpop.permute.xlu0 %2408 }
 0x157   :  { %1849 = vmatpush2.bf16.msra.mxu0 %v1772_v54  ;;  %v1151_v41 = vsel %vm1149_vm13, %v2395_v16, %v2396_v45  ;;  %v2411_v25 = vunpack.i.h.bf16 %v4011_v63  ;;  %v2410_v1 = vunpack.i.l.bf16 %v4011_v63 }
 0x158   :  { %v2404_v27 = vpop.permute.xlu1 %2403  ;;  %v1769_v34 = vpack.c.bf16 %v1155_v30, %v1151_v41 }
 0x159   :  { %v2406_v22 = vunpack.i.h.bf16 %v2404_v27  ;;  %v2405_v38 = vunpack.i.l.bf16 %v2404_v27  ;;  %v974_v48 = vsel %vm964_vm14, %v2410_v1, %v2411_v25 }
 0x15a   :  { %1850 = vmatprep.subr.bf16.mxu0 %v1769_v34  ;;  %v2419_v36 = vpop.permute.xlu0 %2418 }
 0x15b   :  { %v1150_v50 = vsel %vm1149_vm13, %v2405_v38, %v2395_v16  ;;  %v1154_v7 = vsel %vm1149_vm13, %v2406_v22, %v2400_v19  ;;  %v2420_v56 = vunpack.i.l.bf16 %v2419_v36  ;;  %v2421_v31 = vunpack.i.h.bf16 %v2419_v36 }
 0x15c   :  { %v4020_v4 = vpop.permute.xlu1 %2413  ;;  %v1768_v51 = vpack.c.bf16 %v1154_v7, %v1150_v50 }
 0x15d   :  { %v2416_v2 = vunpack.i.h.bf16 %v4020_v4  ;;  %v2415_v55 = vunpack.i.l.bf16 %v4020_v4  ;;  %v1345_v35 = vsel %vm1334_vm12, %v2341_v20, %v2420_v56  ;;  %v1346_v19 = vsel %vm1334_vm12, %v2420_v56, %v2421_v31 }
 0x15e   :  { %1851 = vmatpush2.bf16.msra.mxu0 %v1768_v51  ;;  %v2429_v28 = vpop.permute.xlu0 %2428 }
 0x15f   :  { %v978_v13 = vsel %vm964_vm14, %v2415_v55, %v2416_v2  ;;  %v2431_v21 = vunpack.i.h.bf16 %v2429_v28  ;;  %v2430_v37 = vunpack.i.l.bf16 %v2429_v28 }
 0x160   :  { %v2424_v61 = vpop.permute.xlu1 %2423  ;;  %v1765_v58 = vpack.c.bf16 %v978_v13, %v974_v48 }
 0x161   :  { %v2426_v26 = vunpack.i.h.bf16 %v2424_v61  ;;  %v2425_v46 = vunpack.i.l.bf16 %v2424_v61  ;;  %v973_v33 = vsel %vm964_vm14, %v2430_v37, %v2410_v1  ;;  %v977_v24 = vsel %vm964_vm14, %v2431_v21, %v2415_v55 }
 0x162   :  { %1852 = vmatprep.subr.bf16.mxu0 %v1765_v58  ;;  %v4038_v43 = vpop.permute.xlu0 %2438  ;;  %v1764_v44 = vpack.c.bf16 %v977_v24, %v973_v33 }
 0x163   :  { %v1349_v15 = vsel %vm1334_vm12, %v2346_v8, %v2425_v46  ;;  %v1350_v5 = vsel %vm1334_vm12, %v2425_v46, %v2426_v26  ;;  %v2441_v0 = vunpack.i.h.bf16 %v4038_v43  ;;  %v2440_v20 = vunpack.i.l.bf16 %v4038_v43 }
 0x164   :  { %v1782_v54 = vpack.c.bf16 %v1349_v15, %v1345_v35  ;;  %v4044_v16 = vpop.permute.xlu1 %2433  ;;  %v1783_v30 = vpack.c.bf16 %v1350_v5, %v1346_v19  ;;  %1853 = vmatpush2.bf16.msra.mxu0 %v1764_v44 }
 0x165   :  { %v2436_v41 = vunpack.i.h.bf16 %v4044_v16  ;;  %v2435_v47 = vunpack.i.l.bf16 %v4044_v16  ;;  %v970_v8 = vsel %vm964_vm14, %v2440_v20, %v2441_v0  ;;  %v2573_v16 = vld [vmem:[%s4265_s0 + $0x18] ss:$12 sps:$4 sm:$0xff]  }
 0x166   :  { %1950 = vmatprep.subr.bf16.mxu1 %v1783_v30  ;;  %v2449_v27 = vpop.permute.xlu0 %2448 }
 0x167   :  { %1951 = vmatpush2.bf16.msra.mxu1 %v1782_v54  ;;  %v966_v34 = vsel %vm964_vm14, %v2435_v47, %v2436_v41  ;;  %v2451_v22 = vunpack.i.h.bf16 %v2449_v27  ;;  %v2450_v38 = vunpack.i.l.bf16 %v2449_v27 }
 0x168   :  { %v2444_v1 = vpop.permute.xlu1 %2443  ;;  %v1761_v36 = vpack.c.bf16 %v970_v8, %v966_v34 }
 0x169   :  { %v2446_v50 = vunpack.i.h.bf16 %v2444_v1  ;;  %v2445_v7 = vunpack.i.l.bf16 %v2444_v1  ;;  %v1341_v51 = vsel %vm1334_vm12, %v2371_v59, %v2450_v38  ;;  %v1342_v55 = vsel %vm1334_vm12, %v2450_v38, %v2451_v22 }
 0x16a   :  { %1854 = vmatprep.subr.bf16.mxu0 %v1761_v36  ;;  %v4061_v31 = vpop.permute.xlu0 %2458 }
 0x16b   :  { %v1337_v56 = vsel %vm1334_vm12, %v2366_v32, %v2445_v7  ;;  %v1338_v28 = vsel %vm1334_vm12, %v2445_v7, %v2446_v50  ;;  %v2461_v53 = vunpack.i.h.bf16 %v4061_v31  ;;  %v2460_v59 = vunpack.i.l.bf16 %v4061_v31 }
 0x16c   :  { %v1778_v48 = vpack.c.bf16 %v1341_v51, %v1337_v56  ;;  %v2454_v13 = vpop.permute.xlu1 %2453  ;;  %v1779_v21 = vpack.c.bf16 %v1342_v55, %v1338_v28 }
 0x16d   :  { %v2456_v37 = vunpack.i.h.bf16 %v2454_v13  ;;  %v2455_v61 = vunpack.i.l.bf16 %v2454_v13  ;;  %v789_v19 = vsel %vm779_vm15, %v2460_v59, %v2461_v53 }
 0x16e   :  { %1952 = vmatprep.subr.bf16.mxu1 %v1779_v21  ;;  %v2469_v58 = vpop.permute.xlu0 %2468 }
 0x16f   :  { %1953 = vmatpush2.bf16.msra.mxu1 %v1778_v48  ;;  %v965_v52 = vsel %vm964_vm14, %v2455_v61, %v2435_v47  ;;  %v969_v32 = vsel %vm964_vm14, %v2456_v37, %v2440_v20  ;;  %v2470_v24 = vunpack.i.l.bf16 %v2469_v58  ;;  %v2471_v15 = vunpack.i.h.bf16 %v2469_v58 }
 0x170   :  { %v4068_v26 = vpop.permute.xlu1 %2463  ;;  %v1760_v46 = vpack.c.bf16 %v969_v32, %v965_v52 }
 0x171   :  { %v2466_v35 = vunpack.i.h.bf16 %v4068_v26  ;;  %v2465_v33 = vunpack.i.l.bf16 %v4068_v26  ;;  %v1160_v34 = vsel %vm1149_vm13, %v2381_v14, %v2470_v24  ;;  %v1161_v7 = vsel %vm1149_vm13, %v2470_v24, %v2471_v15 }
 0x172   :  { %1855 = vmatpush2.bf16.msra.mxu0 %v1760_v46  ;;  %v2479_v44 = vpop.permute.xlu0 %2478 }
 0x173   :  { %v793_v5 = vsel %vm779_vm15, %v2465_v33, %v2466_v35  ;;  %v2481_v54 = vunpack.i.h.bf16 %v2479_v44  ;;  %v2480_v20 = vunpack.i.l.bf16 %v2479_v44 }
 0x174   :  { %v2474_v30 = vpop.permute.xlu1 %2473  ;;  %v1757_v47 = vpack.c.bf16 %v793_v5, %v789_v19 }
 0x175   :  { %v2476_v8 = vunpack.i.h.bf16 %v2474_v30  ;;  %v2475_v27 = vunpack.i.l.bf16 %v2474_v30  ;;  %v788_v22 = vsel %vm779_vm15, %v2480_v20, %v2460_v59  ;;  %v792_v38 = vsel %vm779_vm15, %v2481_v54, %v2465_v33 }
 0x176   :  { %1856 = vmatprep.subr.bf16.mxu0 %v1757_v47  ;;  %v4086_v36 = vpop.permute.xlu0 %2488  ;;  %v1756_v50 = vpack.c.bf16 %v792_v38, %v788_v22  ;;  %v4115_v38 = vld [vmem:[%s4265_s0] ss:$12 sps:$4 sm:$0xff]  }
 0x177   :  { %v1164_v1 = vsel %vm1149_vm13, %v2386_v3, %v2475_v27  ;;  %v1165_v51 = vsel %vm1149_vm13, %v2475_v27, %v2476_v8  ;;  %v2491_v39 = vunpack.i.h.bf16 %v4086_v36  ;;  %v2490_v14 = vunpack.i.l.bf16 %v4086_v36 }
 0x178   :  { %v1774_v55 = vpack.c.bf16 %v1164_v1, %v1160_v34  ;;  %v4092_v56 = vpop.permute.xlu1 %2483  ;;  %v1775_v28 = vpack.c.bf16 %v1165_v51, %v1161_v7  ;;  %1857 = vmatpush2.bf16.msra.mxu0 %v1756_v50  ;;  %v4124_v7 = vld [vmem:[%s4265_s0 + $0x1c] ss:$12 sps:$4 sm:$0xff]  }
 0x179   :  { %v2486_v48 = vunpack.i.h.bf16 %v4092_v56  ;;  %v2485_v60 = vunpack.i.l.bf16 %v4092_v56  ;;  %v785_v3 = vsel %vm779_vm15, %v2490_v14, %v2491_v39 }
 0x17a   :  { %1954 = vmatprep.subr.bf16.mxu1 %v1775_v28  ;;  %v2499_v13 = vpop.permute.xlu0 %2498 }
 0x17b   :  { %1955 = vmatpush2.bf16.msra.mxu1 %v1774_v55  ;;  %v781_v21 = vsel %vm779_vm15, %v2485_v60, %v2486_v48  ;;  %v2501_v37 = vunpack.i.h.bf16 %v2499_v13  ;;  %v2500_v61 = vunpack.i.l.bf16 %v2499_v13 }
 0x17c   :  { %v2494_v59 = vpop.permute.xlu1 %2493  ;;  %v1753_v58 = vpack.c.bf16 %v785_v3, %v781_v21 }
 0x17d   :  { %v2496_v52 = vunpack.i.h.bf16 %v2494_v59  ;;  %v2495_v32 = vunpack.i.l.bf16 %v2494_v59  ;;  %v1156_v46 = vsel %vm1149_vm13, %v2401_v10, %v2500_v61  ;;  %v1157_v33 = vsel %vm1149_vm13, %v2500_v61, %v2501_v37 }
 0x17e   :  { %1858 = vmatprep.subr.bf16.mxu0 %v1753_v58  ;;  %v2509_v15 = vpop.permute.xlu0 %2508 }
 0x17f   :  { %v1152_v24 = vsel %vm1149_vm13, %v2396_v45, %v2495_v32  ;;  %v1153_v44 = vsel %vm1149_vm13, %v2495_v32, %v2496_v52  ;;  %v2511_v47 = vunpack.i.h.bf16 %v2509_v15  ;;  %v2510_v8 = vunpack.i.l.bf16 %v2509_v15 }
 0x180   :  { %v1770_v19 = vpack.c.bf16 %v1156_v46, %v1152_v24  ;;  %v2504_v5 = vpop.permute.xlu1 %2503  ;;  %v1771_v54 = vpack.c.bf16 %v1157_v33, %v1153_v44 }
 0x181   :  { %v2506_v20 = vunpack.i.h.bf16 %v2504_v5  ;;  %v2505_v30 = vunpack.i.l.bf16 %v2504_v5  ;;  %v975_v1 = vsel %vm964_vm14, %v2411_v25, %v2510_v8  ;;  %v976_v50 = vsel %vm964_vm14, %v2510_v8, %v2511_v47 }
 0x182   :  { %1956 = vmatprep.subr.bf16.mxu1 %v1771_v54  ;;  %v2519_v12 = vpop.permute.xlu0 %2518 }
 0x183   :  { %1957 = vmatpush2.bf16.msra.mxu1 %v1770_v19  ;;  %v780_v10 = vsel %vm779_vm15, %v2505_v30, %v2485_v60  ;;  %v784_v27 = vsel %vm779_vm15, %v2506_v20, %v2490_v14  ;;  %v2521_v51 = vunpack.i.h.bf16 %v2519_v12  ;;  %v2520_v55 = vunpack.i.l.bf16 %v2519_v12 }
 0x184   :  { %v2514_v11 = vpop.permute.xlu1 %2513  ;;  %v1752_v34 = vpack.c.bf16 %v784_v27, %v780_v10 }
 0x185   :  { %v2516_v45 = vunpack.i.h.bf16 %v2514_v11  ;;  %v2515_v22 = vunpack.i.l.bf16 %v2514_v11  ;;  %v967_v4 = vsel %vm964_vm14, %v2436_v41, %v2520_v55  ;;  %v968_v58 = vsel %vm964_vm14, %v2520_v55, %v2521_v51 }
 0x186   :  { %1859 = vmatpush2.bf16.msra.mxu0 %v1752_v34  ;;  %v2529_v28 = vpop.permute.xlu0 %2528 }
 0x187   :  { %v979_v14 = vsel %vm964_vm14, %v2416_v2, %v2515_v22  ;;  %v980_v60 = vsel %vm964_vm14, %v2515_v22, %v2516_v45  ;;  %v2531_v37 = vunpack.i.h.bf16 %v2529_v28  ;;  %v2530_v61 = vunpack.i.l.bf16 %v2529_v28 }
 0x188   :  { %v1766_v63 = vpack.c.bf16 %v979_v14, %v975_v1  ;;  %v2524_v3 = vpop.permute.xlu1 %2523  ;;  %v1767_v25 = vpack.c.bf16 %v980_v60, %v976_v50 }
 0x189   :  { %v2526_v13 = vunpack.i.h.bf16 %v2524_v3  ;;  %v2525_v21 = vunpack.i.l.bf16 %v2524_v3  ;;  %1861 = vmatmul.mubr.bf16.vlgmr.msra.gmra.mxu0 %v4115_v38  ;;  %v790_v43 = vsel %vm779_vm15, %v2461_v53, %v2530_v61 }
 0x18a   :  { %1958 = vmatprep.subr.bf16.mxu1 %v1767_v25  ;;  %1870 = vmatprep.mubr.bf16.mxu0 %v4124_v7  ;;  %v2539_v59 = vpop.permute.xlu0 %2538 }
 0x18b   :  { %v971_v2 = vsel %vm964_vm14, %v2441_v0, %v2525_v21  ;;  %1959 = vmatpush2.bf16.msra.mxu1 %v1766_v63  ;;  %v972_v52 = vsel %vm964_vm14, %v2525_v21, %v2526_v13  ;;  %v791_v0 = vsel %vm779_vm15, %v2530_v61, %v2531_v37  ;;  %v2541_v41 = vunpack.i.h.bf16 %v2539_v59 }
 0x18c   :  { %v1762_v32 = vpack.c.bf16 %v971_v2, %v967_v4  ;;  %v2534_v46 = vpop.permute.xlu1 %2533  ;;  %v1763_v33 = vpack.c.bf16 %v972_v52, %v968_v58  ;;  %v2540_v44 = vunpack.i.l.bf16 %v2539_v59 }
 0x18d   :  { %v2536_v24 = vunpack.i.h.bf16 %v2534_v46  ;;  %v2535_v15 = vunpack.i.l.bf16 %v2534_v46 }
 0x18e   :  { %1960 = vmatprep.subr.bf16.mxu1 %v1763_v33  ;;  %v2549_v5 = vpop.permute.xlu0 %2548  ;;  %v1530_v26 = vsel %vm1519_vm10, %v2241_v42, %v2540_v44  ;;  %v1531_v10 = vsel %vm1519_vm10, %v2540_v44, %v2541_v41 }
 0x18f   :  { %v794_v19 = vsel %vm779_vm15, %v2466_v35, %v2535_v15  ;;  %1961 = vmatpush2.bf16.msra.mxu1 %v1762_v32  ;;  %v795_v54 = vsel %vm779_vm15, %v2535_v15, %v2536_v24  ;;  %v2551_v53 = vunpack.i.h.bf16 %v2549_v5  ;;  %v2550_v12 = vunpack.i.l.bf16 %v2549_v5 }
 0x190   :  { %v1758_v20 = vpack.c.bf16 %v794_v19, %v790_v43  ;;  %v2544_v30 = vpop.permute.xlu1 %2543  ;;  %v1759_v47 = vpack.c.bf16 %v795_v54, %v791_v0 }
 0x191   :  { %v2546_v8 = vunpack.i.h.bf16 %v2544_v30  ;;  %v2545_v31 = vunpack.i.l.bf16 %v2544_v30  ;;  %1871 = vmatmul.mubr.bf16.gmra.mxu0 %v2573_v16  ;;  %v782_v49 = vsel %vm779_vm15, %v2486_v48, %v2550_v12  ;;  %v783_v42 = vsel %vm779_vm15, %v2550_v12, %v2551_v53 }
 0x192   :  { %1962 = vmatprep.subr.bf16.mxu1 %v1759_v47  ;;  %2019 = vmatprep.mubr.bf16.mxu0 %v4498_v62  ;;  %v2559_v34 = vpop.permute.xlu0 %2558 }
 0x193   :  { %v1534_v35 = vsel %vm1519_vm10, %v2246_v40, %v2545_v31  ;;  %1963 = vmatpush2.bf16.msra.mxu1 %v1758_v20  ;;  %v1535_v27 = vsel %vm1519_vm10, %v2545_v31, %v2546_v8  ;;  %v2561_v23 = vunpack.i.h.bf16 %v2559_v34  ;;  %v2560_v40 = vunpack.i.l.bf16 %v2559_v34 }
 0x194   :  { %v1790_v11 = vpack.c.bf16 %v1534_v35, %v1530_v26  ;;  %v2554_v45 = vpop.permute.xlu1 %2553  ;;  %v1791_v22 = vpack.c.bf16 %v1535_v27, %v1531_v10 }
 0x195   :  { %v2556_v1 = vunpack.i.h.bf16 %v2554_v45  ;;  %v2555_v50 = vunpack.i.l.bf16 %v2554_v45  ;;  %v1522_v56 = vsel %vm1519_vm10, %v2261_v6, %v2560_v40  ;;  %v1523_v36 = vsel %vm1519_vm10, %v2560_v40, %v2561_v23 }
 0x196   :  { %1999 = vmatprep.subr.bf16.mxu0 %v1791_v22 }
 0x197   :  { %v786_v51 = vsel %vm779_vm15, %v2491_v39, %v2555_v50  ;;  %2000 = vmatpush1.bf16.msra.mxu0 %v1790_v11  ;;  %v787_v55 = vsel %vm779_vm15, %v2555_v50, %v2556_v1 }
 0x198   :  { %v1754_v14 = vpack.c.bf16 %v786_v51, %v782_v49  ;;  %v2564_v28 = vpop.permute.xlu1 %2563  ;;  %v1755_v60 = vpack.c.bf16 %v787_v55, %v783_v42 }
 0x199   :  { %v2566_v63 = vunpack.i.h.bf16 %v2564_v28  ;;  %v2565_v3 = vunpack.i.l.bf16 %v2564_v28 }
 0x19a   :  { %1964 = vmatprep.subr.bf16.mxu1 %v1755_v60 }
 0x19b   :  { %v1526_v48 = vsel %vm1519_vm10, %v2266_v17, %v2565_v3  ;;  %1965 = vmatpush2.bf16.msra.mxu1 %v1754_v14  ;;  %v1527_v39 = vsel %vm1519_vm10, %v2565_v3, %v2566_v63 }
 0x19c   :  { %v1786_v25 = vpack.c.bf16 %v1526_v48, %v1522_v56  ;;  %v1787_v13 = vpack.c.bf16 %v1527_v39, %v1523_v36 }
 0x19e   :  { %2001 = vmatprep.subr.bf16.mxu0 %v1787_v13  ;;  %1967 = vmatmul.mubr.bf16.vlgmr.msra.gmra.mxu1 %v4115_v38 }
 0x19f   :  { %2002 = vmatpush1.bf16.msra.mxu0 %v1786_v25  ;;  %1976 = vmatprep.mubr.bf16.mxu1 %v4124_v7 }
 0x1a2   :  { %2148 = vmatmul.mubr.msk.bf16.vlgmr.msra.gmra.mxu0 %vm1060_vm4, %v3808_v57 }
 0x1a3   :  { %2029 = vmatprep.mubr.bf16.mxu0 %v4498_v62 }
 0x1a6   :  { %1977 = vmatmul.mubr.bf16.gmra.mxu1 %v2573_v16 }
 0x1aa   :  { %2149 = vmatmul.mubr.msk.bf16.gmra.mxu0 %vm1060_vm4, %v3865_v18 }
 0x1e7   :  { %v1915_v29 = vpop.f32.mrf.mxu1 }
 0x1e9   :  { %v1917_v6 = vpop.f32.mrf.mxu1 }
 0x1eb   :  { %v1919_v9 = vpop.f32.mrf.mxu1 }
 0x1ed   :  { %v1921_v17 = vpop.f32.mrf.mxu1 }
 0x1f0   :  { %v1925_v37 = vpop.f32.mrf.mxu1 }
 0x1f2   :  { %v1927_v4 = vpop.f32.mrf.mxu1 }
 0x1f4   :  { %v1929_v58 = vpop.f32.mrf.mxu1 }
 0x1f6   :  { %v1931_v24 = vpop.f32.mrf.mxu1 }
 0x249   :  { %v1862_v21 = vpop.f32.mrf.mxu0 }
 0x24a   :  { %v1916_v61 = vadd.f32 %v1915_v29, %v1862_v21 }
 0x24b   :  { %v1864_v38 = vpop.f32.mrf.mxu0 }
 0x24c   :  { %2104 = vst [vmem:[%s4266_s3] sm:$0xff] %v1916_v61  ;;  %v1918_v7 = vadd.f32 %v1917_v6, %v1864_v38  ;;  %v2064_v54 = vmul.f32 %v1916_v61, %v1916_v61 }
 0x24d   :  { %v1866_v57 = vpop.f32.mrf.mxu0 }
 0x24e   :  { %2105 = vst [vmem:[%s4266_s3 + $0x8] sm:$0xff] %v1918_v7  ;;  %v1920_v62 = vadd.f32 %v1919_v9, %v1866_v57  ;;  %v2065_v44 = vmul.f32 %v1918_v7, %v1918_v7  ;;  %v2040_v20 = vadd.f32 %v1918_v7, %v1916_v61 }
 0x24f   :  { %v1868_v18 = vpop.f32.mrf.mxu0 }
 0x250   :  { %2108 = vst [vmem:[%s4266_s3 + $0x20] sm:$0xff] %v1920_v62  ;;  %v1922_v2 = vadd.f32 %v1921_v17, %v1868_v18  ;;  %v2080_v53 = vadd.f32 %v2065_v44, %v2064_v54  ;;  %v2068_v10 = vmul.f32 %v1920_v62, %v1920_v62 }
 0x251   :  { %v1872_v59 = vpop.f32.mrf.mxu0 }
 0x252   :  { %2109 = vst [vmem:[%s4266_s3 + $0x28] sm:$0xff] %v1922_v2  ;;  %v1926_v52 = vadd.f32 %v1925_v37, %v1872_v59  ;;  %v2069_v47 = vmul.f32 %v1922_v2, %v1922_v2  ;;  %v2045_v27 = vadd.f32 %v1922_v2, %v1920_v62 }
 0x253   :  { %v1874_v32 = vpop.f32.mrf.mxu0 }
 0x254   :  { %2112 = vst [vmem:[%s4266_s3 + $0x40] sm:$0xff] %v1926_v52  ;;  %v1928_v46 = vadd.f32 %v1927_v4, %v1874_v32  ;;  %v2085_v49 = vadd.f32 %v2069_v47, %v2068_v10  ;;  %v2072_v42 = vmul.f32 %v1926_v52, %v1926_v52 }
 0x255   :  { %v1876_v33 = vpop.f32.mrf.mxu0 }
 0x256   :  { %2113 = vst [vmem:[%s4266_s3 + $0x48] sm:$0xff] %v1928_v46  ;;  %v1930_v15 = vadd.f32 %v1929_v58, %v1876_v33  ;;  %v2073_v23 = vmul.f32 %v1928_v46, %v1928_v46  ;;  %v2050_v3 = vadd.f32 %v1928_v46, %v1926_v52 }
 0x257   :  { %v1878_v16 = vpop.f32.mrf.mxu0 }
 0x258   :  { %2116 = vst [vmem:[%s4266_s3 + $0x60] sm:$0xff] %v1930_v15  ;;  %v1932_v43 = vadd.f32 %v1931_v24, %v1878_v16  ;;  %v2090_v39 = vadd.f32 %v2073_v23, %v2072_v42  ;;  %v2076_v37 = vmul.f32 %v1930_v15, %v1930_v15 }
 0x25a   :  { %2117 = vst [vmem:[%s4266_s3 + $0x68] sm:$0xff] %v1932_v43  ;;  %v2055_v61 = vadd.f32 %v1932_v43, %v1930_v15  ;;  %v2077_v38 = vmul.f32 %v1932_v43, %v1932_v43 }
 0x25c   :  { %v2095_v33 = vadd.f32 %v2077_v38, %v2076_v37 }
 0x25e   :  { %v1968_v0 = vpop.f32.mrf.mxu1 }
 0x260   :  { %v1970_v41 = vpop.f32.mrf.mxu1 }
 0x262   :  { %v2021_v19 = vpop.f32.mrf.mxu0  ;;  %v1972_v5 = vpop.f32.mrf.mxu1 }
 0x263   :  { %v2022_v30 = vadd.f32 %v2021_v19, %v1968_v0 }
 0x264   :  { %v2023_v8 = vpop.f32.mrf.mxu0  ;;  %v1974_v31 = vpop.f32.mrf.mxu1 }
 0x265   :  { %v2041_v12 = vadd.f32 %v2040_v20, %v2022_v30  ;;  %v2066_v26 = vmul.f32 %v2022_v30, %v2022_v30  ;;  %2106 = vst [vmem:[%s4266_s3 + $0x10] sm:$0xff] %v2022_v30  ;;  %v2024_v35 = vadd.f32 %v2023_v8, %v1970_v41 }
 0x266   :  { %v2025_v11 = vpop.f32.mrf.mxu0  ;;  %v1978_v34 = vpop.f32.mrf.mxu1 }
 0x267   :  { %v2067_v45 = vmul.f32 %v2024_v35, %v2024_v35  ;;  %2107 = vst [vmem:[%s4266_s3 + $0x18] sm:$0xff] %v2024_v35  ;;  %v2026_v22 = vadd.f32 %v2025_v11, %v1972_v5  ;;  %v2042_v1 = vadd.f32 %v2041_v12, %v2024_v35  ;;  %v2081_v50 = vadd.f32 %v2080_v53, %v2066_v26 }
 0x268   :  { %v2027_v40 = vpop.f32.mrf.mxu0  ;;  %v1980_v51 = vpop.f32.mrf.mxu1 }
 0x269   :  { %v2046_v55 = vadd.f32 %v2045_v27, %v2026_v22  ;;  %v2070_v14 = vmul.f32 %v2026_v22, %v2026_v22  ;;  %2110 = vst [vmem:[%s4266_s3 + $0x30] sm:$0xff] %v2026_v22  ;;  %v2028_v28 = vadd.f32 %v2027_v40, %v1974_v31  ;;  %2043 = vadd.xlane.f32.xlu0 %v2042_v1 }
 0x26a   :  { %v2082_v60 = vadd.f32 %v2081_v50, %v2067_v45  ;;  %v2031_v63 = vpop.f32.mrf.mxu0  ;;  %v1982_v13 = vpop.f32.mrf.mxu1 }
 0x26b   :  { %v2071_v56 = vmul.f32 %v2028_v28, %v2028_v28  ;;  %2111 = vst [vmem:[%s4266_s3 + $0x38] sm:$0xff] %v2028_v28  ;;  %v2032_v48 = vadd.f32 %v2031_v63, %v1978_v34  ;;  %v2086_v36 = vadd.f32 %v2085_v49, %v2070_v14  ;;  %v2047_v29 = vadd.f32 %v2046_v55, %v2028_v28 }
 0x26c   :  { %2083 = vadd.xlane.f32.xlu1 %v2082_v60  ;;  %v2033_v25 = vpop.f32.mrf.mxu0  ;;  %v1984_v18 = vpop.f32.mrf.mxu1 }
 0x26d   :  { %v2051_v6 = vadd.f32 %v2050_v3, %v2032_v48  ;;  %v2074_v9 = vmul.f32 %v2032_v48, %v2032_v48  ;;  %2114 = vst [vmem:[%s4266_s3 + $0x50] sm:$0xff] %v2032_v48  ;;  %v2034_v17 = vadd.f32 %v2033_v25, %v1980_v51  ;;  %v2087_v21 = vadd.f32 %v2086_v36, %v2071_v56 }
 0x26e   :  { %v2035_v7 = vpop.f32.mrf.mxu0 }
 0x26f   :  { %v2075_v57 = vmul.f32 %v2034_v17, %v2034_v17  ;;  %2115 = vst [vmem:[%s4266_s3 + $0x58] sm:$0xff] %v2034_v17  ;;  %v2036_v4 = vadd.f32 %v2035_v7, %v1982_v13  ;;  %2088 = vadd.xlane.f32.xlu0 %v2087_v21  ;;  %v2091_v62 = vadd.f32 %v2090_v39, %v2074_v9 }
 0x270   :  { %2048 = vadd.xlane.f32.xlu1 %v2047_v29  ;;  %v2037_v2 = vpop.f32.mrf.mxu0  ;;  %v2052_v59 = vadd.f32 %v2051_v6, %v2034_v17 }
 0x271   :  { %v2056_v58 = vadd.f32 %v2055_v61, %v2036_v4  ;;  %v2078_v52 = vmul.f32 %v2036_v4, %v2036_v4  ;;  %2118 = vst [vmem:[%s4266_s3 + $0x70] sm:$0xff] %v2036_v4  ;;  %v2038_v32 = vadd.f32 %v2037_v2, %v1984_v18  ;;  %v2092_v46 = vadd.f32 %v2091_v62, %v2075_v57 }
 0x273   :  { %2119 = vst [vmem:[%s4266_s3 + $0x78] sm:$0xff] %v2038_v32  ;;  %2053 = vadd.xlane.f32.xlu0 %v2052_v59  ;;  %v2079_v24 = vmul.f32 %v2038_v32, %v2038_v32  ;;  %v2057_v15 = vadd.f32 %v2056_v58, %v2038_v32  ;;  %v2096_v16 = vadd.f32 %v2095_v33, %v2078_v52 }
 0x274   :  { %2093 = vadd.xlane.f32.xlu1 %v2092_v46 }
 0x275   :  { %v2097_v43 = vadd.f32 %v2096_v16, %v2079_v24 }
 0x277   :  { %2058 = vadd.xlane.f32.xlu0 %v2057_v15 }
 0x27b   :  { %2098 = vadd.xlane.f32.xlu0 %v2097_v43 }
 0x2f2   :  { %v2044_v0 = vpop.xlane.xlu0 %2043 }
 0x2f3   :  { %2060 = vst.msk [vmem:[%s4267_s4] sm:$0xff] %vm135_vm3, %v2044_v0 }
 0x2f5   :  { %v2084_v41 = vpop.xlane.xlu1 %2083 }
 0x2f6   :  { %2100 = vst.msk [vmem:[%s4268_s5] sm:$0xff] %vm135_vm3, %v2084_v41 }
 0x2f8   :  { %v2089_v19 = vpop.xlane.xlu0 %2088 }
 0x2f9   :  { %v2049_v44 = vpop.xlane.xlu1 %2048  ;;  %2101 = vst.msk [vmem:[%s4268_s5 + $0x8] sm:$0xff] %vm135_vm3, %v2089_v19 }
 0x2fa   :  { %2061 = vst.msk [vmem:[%s4267_s4 + $0x8] sm:$0xff] %vm135_vm3, %v2049_v44 }
 0x2fc   :  { %v2054_v54 = vpop.xlane.xlu0 %2053 }
 0x2fd   :  { %v2094_v5 = vpop.xlane.xlu1 %2093  ;;  %2062 = vst.msk [vmem:[%s4267_s4 + $0x10] sm:$0xff] %vm135_vm3, %v2054_v54 }
 0x2fe   :  { %2102 = vst.msk [vmem:[%s4268_s5 + $0x10] sm:$0xff] %vm135_vm3, %v2094_v5 }
 0x300   :  { %v2059_v20 = vpop.xlane.xlu0 %2058 }
 0x301   :  { %2063 = vst.msk [vmem:[%s4267_s4 + $0x18] sm:$0xff] %vm135_vm3, %v2059_v20 }
 0x304   :  { %v2099_v30 = vpop.xlane.xlu0 %2098 }
 0x305   :  { %2103 = vst.msk [vmem:[%s4268_s5 + $0x18] sm:$0xff] %vm135_vm3, %v2099_v30 }

// kernel: drnet_forward.41
= control target key start
LH: loop header
LB: loop body
LE: loop exit
PB: predicated region body
PF: predicated region fallthrough
CT: control target
= control target key end

     0   :  { %v147_v0 = vmov 0   ;;  %s250_s1 = inlined_call_operand.vmem [shape: f32[32,1], index: 1, kind: input, shape index: {}]   ;;  %s251_s2 = inlined_call_operand.vmem [shape: f32[32,1], index: 2, kind: input, shape index: {}]   ;;  %s252_s3 = inlined_call_operand.vmem [shape: f32[32,1], index: 3, kind: input, shape index: {}]   ;;  %s253_s4 = inlined_call_operand.vmem [shape: f32[32,1], index: 4, kind: input, shape index: {}]   ;;  %s254_s0 = inlined_call_operand.vmem [shape: f32[32,128], index: 0, kind: input, shape index: {}]   ;;  %s255_s5 = inlined_call_operand.vmem [shape: f32[32,128], index: 5, kind: output, shape index: {}]  }
   0x1   :  { %138 = vset.pattern.permute.xlu1 %v147_v0  ;;  %137 = vset.pattern.permute.xlu0 %v147_v0  ;;  %v22_v1 = vld [vmem:[%s250_s1 + $0x10] sm:$0xff]  ;;  %v23_v2 = vld [vmem:[%s250_s1 + $0x18] sm:$0xff]  ;;  %v29_v3 = vld [vmem:[%s251_s2 + $0x8] sm:$0xff] }
   0x2   :  { %v26_v4 = vmul.f32 0.0078125, %v22_v1  ;;  %v27_v5 = vmul.f32 0.0078125, %v23_v2  ;;  %v30_v6 = vld [vmem:[%s251_s2 + $0x10] sm:$0xff]  ;;  %v31_v7 = vld [vmem:[%s251_s2 + $0x18] sm:$0xff]  ;;  %v33_v8 = vmul.f32 0.0078125, %v29_v3  ;;  %v21_v11 = vld [vmem:[%s250_s1 + $0x8] sm:$0xff] }
   0x3   :  { %v34_v9 = vmul.f32 0.0078125, %v30_v6  ;;  %v35_v10 = vmul.f32 0.0078125, %v31_v7  ;;  %v20_v12 = vld [vmem:[%s250_s1] sm:$0xff]  ;;  %v25_v16 = vmul.f32 0.0078125, %v21_v11  ;;  %v46_v29 = vld [vmem:[%s252_s3 + $0x10] sm:$0xff]  ;;  %v47_v32 = vld [vmem:[%s252_s3 + $0x18] sm:$0xff] }
   0x4   :  { %v28_v13 = vld [vmem:[%s251_s2] sm:$0xff]  ;;  %v38_v14 = vmul.f32 %v26_v4, %v26_v4  ;;  %v39_v15 = vmul.f32 %v27_v5, %v27_v5  ;;  %v24_v17 = vmul.f32 0.0078125, %v20_v12  ;;  %v45_v35 = vld [vmem:[%s252_s3 + $0x8] sm:$0xff]  ;;  %v63_v47 = vld [vmem:[%s253_s4 + $0x18] sm:$0xff] }
   0x5   :  { %v32_v18 = vmul.f32 0.0078125, %v28_v13  ;;  %v37_v21 = vmul.f32 %v25_v16, %v25_v16  ;;  %v44_v31 = vld [vmem:[%s252_s3] sm:$0xff]  ;;  %v61_v42 = vld [vmem:[%s253_s4 + $0x8] sm:$0xff]  ;;  %v62_v50 = vld [vmem:[%s253_s4 + $0x10] sm:$0xff] }
   0x6   :  { %v42_v19 = vsub.f32 %v34_v9, %v38_v14  ;;  %v43_v20 = vsub.f32 %v35_v10, %v39_v15  ;;  %v36_v22 = vmul.f32 %v24_v17, %v24_v17  ;;  %v60_v44 = vld [vmem:[%s253_s4] sm:$0xff]  ;;  %v73_v56 = vld [vmem:[%s254_s0 + $0x8] sm:$0xff]  ;;  %v75_v60 = vld [vmem:[%s254_s0 + $0x18] sm:$0xff] }
   0x7   :  { %v41_v24 = vsub.f32 %v33_v8, %v37_v21  ;;  %v72_v57 = vld [vmem:[%s254_s0] sm:$0xff]  ;;  %v74_v0 = vld [vmem:[%s254_s0 + $0x10] sm:$0xff] }
   0x8   :  { %v50_v23 = vadd.f32 1e-05, %v42_v19  ;;  %v40_v25 = vsub.f32 %v32_v18, %v36_v22  ;;  %v51_v26 = vadd.f32 1e-05, %v43_v20 }
   0x9   :  { %v49_v28 = vadd.f32 1e-05, %v41_v24 }
   0xa   :  { %139 = vrsqrt.f32 %v50_v23  ;;  %v48_v27 = vadd.f32 1e-05, %v40_v25 }
   0xb   :  { %141 = vrsqrt.f32 %v51_v26 }
   0xc   :  { %143 = vrsqrt.f32 %v48_v27 }
   0xd   :  { %145 = vrsqrt.f32 %v49_v28 }
  0x17   :  { %v140_v30 = vpop.eup %139 }
  0x18   :  { %v142_v33 = vpop.eup %141  ;;  %v58_v34 = vmul.f32 %v140_v30, %v46_v29 }
  0x19   :  { %v144_v36 = vpop.eup %143  ;;  %v59_v39 = vmul.f32 %v142_v33, %v47_v32 }
  0x1a   :  { %v146_v37 = vpop.eup %145  ;;  %88 = vperm.xlu1 %138, %v58_v34   ;;  %v56_v38 = vmul.f32 %v144_v36, %v44_v31  ;;  %v66_v48 = vmul.f32 %v58_v34, %v26_v4 }
  0x1b   :  { %v57_v40 = vmul.f32 %v146_v37, %v45_v35  ;;  %v67_v45 = vmul.f32 %v59_v39, %v27_v5 }
  0x1c   :  { %78 = vperm.xlu0 %137, %v56_v38   ;;  %v64_v41 = vmul.f32 %v56_v38, %v24_v17  ;;  %v70_v52 = vsub.f32 %v62_v50, %v66_v48 }
  0x1d   :  { %v65_v43 = vmul.f32 %v57_v40, %v25_v16  ;;  %v71_v51 = vsub.f32 %v63_v47, %v67_v45 }
  0x1e   :  { %93 = vperm.xlu1 %138, %v59_v39   ;;  %v68_v49 = vsub.f32 %v60_v44, %v64_v41 }
  0x1f   :  { %v69_v46 = vsub.f32 %v61_v42, %v65_v43 }
  0x20   :  { %83 = vperm.xlu0 %137, %v57_v40  }
  0x22   :  { %107 = vperm.xlu1 %138, %v69_v46  }
  0x24   :  { %102 = vperm.xlu0 %137, %v68_v49  }
  0x26   :  { %117 = vperm.xlu1 %138, %v71_v51  }
  0x28   :  { %112 = vperm.xlu0 %137, %v70_v52  }
  0x95   :  { %v89_v53 = vpop.permute.xlu1 %88 }
  0x96   :  { %v98_v6 = vmul.f32 %v89_v53, %v74_v0 }
  0x97   :  { %v79_v54 = vpop.permute.xlu0 %78 }
  0x98   :  { %v96_v62 = vmul.f32 %v79_v54, %v72_v57 }
  0x99   :  { %v94_v55 = vpop.permute.xlu1 %93 }
  0x9a   :  { %v99_v2 = vmul.f32 %v94_v55, %v75_v60 }
  0x9b   :  { %v84_v58 = vpop.permute.xlu0 %83 }
  0x9c   :  { %v97_v59 = vmul.f32 %v84_v58, %v73_v56 }
  0x9d   :  { %v108_v61 = vpop.permute.xlu1 %107 }
  0x9e   :  { %v121_v63 = vadd.f32 %v108_v61, %v97_v59 }
  0x9f   :  { %v103_v1 = vpop.permute.xlu0 %102 }
  0xa0   :  { %v125_v3 = vmax.f32 %v121_v63, 0.0  ;;  %v120_v4 = vadd.f32 %v103_v1, %v96_v62 }
  0xa1   :  { %v118_v5 = vpop.permute.xlu1 %117 }
  0xa2   :  { %129 = vst [vmem:[%s255_s5 + $0x8] sm:$0xff] %v125_v3  ;;  %v124_v7 = vmax.f32 %v120_v4, 0.0  ;;  %v123_v8 = vadd.f32 %v118_v5, %v99_v2 }
  0xa3   :  { %v113_v9 = vpop.permute.xlu0 %112 }
  0xa4   :  { %128 = vst [vmem:[%s255_s5] sm:$0xff] %v124_v7  ;;  %v127_v10 = vmax.f32 %v123_v8, 0.0  ;;  %v122_v11 = vadd.f32 %v113_v9, %v98_v6 }
  0xa6   :  { %131 = vst [vmem:[%s255_s5 + $0x18] sm:$0xff] %v127_v10  ;;  %v126_v12 = vmax.f32 %v122_v11, 0.0 }
  0xa8   :  { %130 = vst [vmem:[%s255_s5 + $0x10] sm:$0xff] %v126_v12 }

// kernel: drnet_forward.40
= control target key start
LH: loop header
LB: loop body
LE: loop exit
PB: predicated region body
PF: predicated region fallthrough
CT: control target
= control target key end

     0   :  { %vm197_vm0 = vcmask 261120   ;;  %vm326_vm1 = vcmask 7168   ;;  %s613_s1 = inlined_call_operand.vmem [shape: bf16[288,128], index: 1, kind: input, shape index: {}]   ;;  %s614_s0 = inlined_call_operand.vmem [shape: bf16[32,288], index: 0, kind: input, shape index: {}]   ;;  %s615_s2 = inlined_call_operand.vmem [shape: f32[32,128], index: 2, kind: output, shape index: {0}]   ;;  %s616_s3 = inlined_call_operand.vmem [shape: f32[32,1], index: 3, kind: output, shape index: {1}]   ;;  %s617_s4 = inlined_call_operand.vmem [shape: f32[32,1], index: 4, kind: output, shape index: {2}]  }
   0x1   :  { %v446_v0 = vld [vmem:[%s613_s1 + $0x78] sm:$0xff]   ;;  %v448_v2 = vld [vmem:[%s613_s1 + $0x70] sm:$0xff]   ;;  %v450_v4 = vld [vmem:[%s613_s1 + $0x68] sm:$0xff]  }
   0x2   :  { %v447_v1 = vld [vmem:[%s613_s1 + $0x38] sm:$0xff]   ;;  %406 = vmatprep.subr.bf16.mxu0 %v446_v0  ;;  %v449_v3 = vld [vmem:[%s613_s1 + $0x30] sm:$0xff]   ;;  %v451_v5 = vld [vmem:[%s613_s1 + $0x28] sm:$0xff]  }
   0x3   :  { %407 = vmatpush3.bf16.msra.mxu0 %v447_v1  ;;  %v452_v6 = vld [vmem:[%s613_s1 + $0x60] sm:$0xff]   ;;  %v457_v8 = vld [vmem:[%s613_s1 + $0x88] sm:$0xff]   ;;  %v454_v9 = vld [vmem:[%s613_s1 + $0x58] sm:$0xff]  }
   0x4   :  { %408 = vmatprep.subr.bf16.mxu0 %v448_v2  ;;  %v453_v7 = vld [vmem:[%s613_s1 + $0x20] sm:$0xff]   ;;  %v455_v10 = vld [vmem:[%s613_s1 + $0x18] sm:$0xff]   ;;  %438 = vmatprep.subr.bf16.mxu1 %v457_v8  ;;  %v456_v12 = vld [vmem:[%s613_s1 + $0x50] sm:$0xff]  }
   0x5   :  { %439 = vmatpush3.bf16.msra.mxu1 %v457_v8  ;;  %v460_v11 = vld [vmem:[%s613_s1 + $0x80] sm:$0xff]   ;;  %v462_v13 = vld [vmem:[%s614_s0 + $0x8] ss:$12 sps:$4 sm:$0xff]  }
   0x6   :  { %440 = vmatprep.subr.bf16.mxu1 %v460_v11  ;;  %442 = vmatprep.mubr.msk.bf16.mxu1 %vm197_vm0, %v462_v13  ;;  %v464_v14 = vld [vmem:[%s614_s0 + $0x20] ss:$12 sps:$4 sm:$0xff]   ;;  %v458_v15 = vld [vmem:[%s613_s1 + $0x10] sm:$0xff]   ;;  %v469_v22 = vld [vmem:[%s614_s0 + $0x1c] ss:$12 sps:$4 sm:$0xff]  }
   0x7   :  { %409 = vmatpush3.bf16.msra.mxu0 %v449_v3  ;;  %v459_v16 = vld [vmem:[%s613_s1 + $0x48] sm:$0xff]   ;;  %v468_v17 = vld [vmem:[%s614_s0 + $0x4] ss:$12 sps:$4 sm:$0xff]  }
   0x8   :  { %410 = vmatprep.subr.bf16.mxu0 %v450_v4  ;;  %v461_v18 = vld [vmem:[%s613_s1 + $0x8] sm:$0xff]   ;;  %236 = vmatprep.mubr.bf16.mxu0 %v468_v17  ;;  %v463_v19 = vld [vmem:[%s613_s1 + $0x40] sm:$0xff]  }
   0x9   :  { %441 = vmatpush3.bf16.msra.mxu1 %v460_v11  ;;  %v465_v20 = vld [vmem:[%s613_s1] sm:$0xff]  }
   0xa   :  { %v466_v21 = vld [vmem:[%s614_s0] ss:$12 sps:$4 sm:$0xff]   ;;  %v471_v23 = vld [vmem:[%s614_s0 + $0x18] ss:$12 sps:$4 sm:$0xff]  }
   0xb   :  { %411 = vmatpush3.bf16.msra.mxu0 %v451_v5 }
   0xc   :  { %412 = vmatprep.subr.bf16.mxu0 %v452_v6  ;;  %443 = vmatmul.mubr.msk.bf16.vlgmr.msra.gmra.mxu1 %vm197_vm0, %v464_v14 }
   0xf   :  { %413 = vmatpush3.bf16.msra.mxu0 %v453_v7 }
  0x10   :  { %414 = vmatprep.subr.bf16.mxu0 %v454_v9 }
  0x13   :  { %415 = vmatpush3.bf16.msra.mxu0 %v455_v10 }
  0x14   :  { %416 = vmatprep.subr.bf16.mxu0 %v456_v12 }
  0x17   :  { %417 = vmatpush3.bf16.msra.mxu0 %v458_v15 }
  0x18   :  { %418 = vmatprep.subr.bf16.mxu0 %v459_v16 }
  0x1b   :  { %419 = vmatpush3.bf16.msra.mxu0 %v461_v18 }
  0x1c   :  { %420 = vmatprep.subr.bf16.mxu0 %v463_v19 }
  0x1f   :  { %421 = vmatpush3.bf16.msra.mxu0 %v465_v20 }
  0x22   :  { %237 = vmatmul.mubr.bf16.vlgmr.msra.gmra.mxu0 %v466_v21 }
  0x23   :  { %244 = vmatprep.mubr.bf16.mxu0 %v469_v22 }
  0x2a   :  { %245 = vmatmul.mubr.bf16.gmra.mxu0 %v471_v23 }
  0xcc   :  { %v444_v24 = vpop.f32.mrf.mxu1 }
  0xce   :  { %v287_v25 = vpop.f32.mrf.mxu1 }
  0xd0   :  { %v445_v29 = vpop.f32.mrf.mxu1 }
  0xd2   :  { %v290_v34 = vpop.f32.mrf.mxu1 }
  0xe2   :  { %v422_v26 = vpop.f32.mrf.mxu0 }
  0xe4   :  { %v423_v27 = vpop.f32.mrf.mxu0 }
  0xe5   :  { %v424_v28 = vadd.f32 %v423_v27, %v422_v26 }
  0xe6   :  { %v425_v30 = vpop.f32.mrf.mxu0 }
  0xe7   :  { %v288_v31 = vadd.f32 %v424_v28, %v287_v25 }
  0xe8   :  { %v426_v32 = vpop.f32.mrf.mxu0 }
  0xe9   :  { %364 = vst [vmem:[%s615_s2] sm:$0xff] %v288_v31  ;;  %v427_v33 = vadd.f32 %v426_v32, %v425_v30  ;;  %302 = vadd.xlane.f32.xlu0 %v288_v31  ;;  %v310_v37 = vmul.f32 %v288_v31, %v288_v31 }
  0xea   :  { %v428_v35 = vpop.f32.mrf.mxu0 }
  0xeb   :  { %v291_v36 = vadd.f32 %v427_v33, %v290_v34 }
  0xec   :  { %v429_v38 = vpop.f32.mrf.mxu0 }
  0xed   :  { %365 = vst [vmem:[%s615_s2 + $0x8] sm:$0xff] %v291_v36  ;;  %v430_v39 = vadd.f32 %v429_v38, %v428_v35  ;;  %314 = vadd.xlane.f32.xlu0 %v310_v37  ;;  %v311_v40 = vmul.f32 %v291_v36, %v291_v36 }
  0xee   :  { %v431_v41 = vpop.f32.mrf.mxu0 }
  0xef   :  { %v296_v42 = vadd.f32 %v444_v24, %v430_v39  ;;  %316 = vadd.xlane.f32.xlu1 %v311_v40 }
  0xf0   :  { %v432_v43 = vpop.f32.mrf.mxu0 }
  0xf1   :  { %366 = vst [vmem:[%s615_s2 + $0x10] sm:$0xff] %v296_v42  ;;  %v433_v44 = vadd.f32 %v432_v43, %v431_v41  ;;  %304 = vadd.xlane.f32.xlu0 %v291_v36  ;;  %v312_v46 = vmul.f32 %v296_v42, %v296_v42 }
  0xf3   :  { %v299_v45 = vadd.f32 %v445_v29, %v433_v44  ;;  %306 = vadd.xlane.f32.xlu1 %v296_v42 }
  0xf5   :  { %367 = vst [vmem:[%s615_s2 + $0x18] sm:$0xff] %v299_v45  ;;  %318 = vadd.xlane.f32.xlu0 %v312_v46  ;;  %v313_v47 = vmul.f32 %v299_v45, %v299_v45 }
  0xf7   :  { %308 = vadd.xlane.f32.xlu1 %v299_v45 }
  0xfb   :  { %320 = vadd.xlane.f32.xlu1 %v313_v47 }
 0x172   :  { %v303_v48 = vpop.xlane.xlu0 %302 }
 0x173   :  { %327 = vst.msk [vmem:[%s616_s3] sm:$0xff] %vm326_vm1, %v303_v48 }
 0x176   :  { %v315_v49 = vpop.xlane.xlu0 %314 }
 0x177   :  { %331 = vst.msk [vmem:[%s617_s4] sm:$0xff] %vm326_vm1, %v315_v49 }
 0x178   :  { %v317_v50 = vpop.xlane.xlu1 %316 }
 0x179   :  { %332 = vst.msk [vmem:[%s617_s4 + $0x8] sm:$0xff] %vm326_vm1, %v317_v50 }
 0x17a   :  { %v305_v51 = vpop.xlane.xlu0 %304 }
 0x17b   :  { %328 = vst.msk [vmem:[%s616_s3 + $0x8] sm:$0xff] %vm326_vm1, %v305_v51 }
 0x17c   :  { %v307_v52 = vpop.xlane.xlu1 %306 }
 0x17d   :  { %329 = vst.msk [vmem:[%s616_s3 + $0x10] sm:$0xff] %vm326_vm1, %v307_v52 }
 0x17e   :  { %v319_v53 = vpop.xlane.xlu0 %318 }
 0x17f   :  { %333 = vst.msk [vmem:[%s617_s4 + $0x10] sm:$0xff] %vm326_vm1, %v319_v53 }
 0x180   :  { %v309_v54 = vpop.xlane.xlu1 %308 }
 0x181   :  { %330 = vst.msk [vmem:[%s616_s3 + $0x18] sm:$0xff] %vm326_vm1, %v309_v54 }
 0x184   :  { %v321_v55 = vpop.xlane.xlu1 %320 }
 0x185   :  { %334 = vst.msk [vmem:[%s617_s4 + $0x18] sm:$0xff] %vm326_vm1, %v321_v55 }

// kernel: drnet_forward.45
= control target key start
LH: loop header
LB: loop body
LE: loop exit
PB: predicated region body
PF: predicated region fallthrough
CT: control target
= control target key end

     0   :  { %v154_v0 = vmov 0   ;;  %s274_s1 = inlined_call_operand.vmem [shape: f32[32,1], index: 1, kind: input, shape index: {}]   ;;  %s275_s2 = inlined_call_operand.vmem [shape: f32[32,1], index: 2, kind: input, shape index: {}]   ;;  %s276_s3 = inlined_call_operand.vmem [shape: f32[32,1], index: 3, kind: input, shape index: {}]   ;;  %s277_s4 = inlined_call_operand.vmem [shape: f32[32,1], index: 4, kind: input, shape index: {}]   ;;  %s278_s0 = inlined_call_operand.vmem [shape: f32[32,128], index: 0, kind: input, shape index: {}]   ;;  %s279_s5 = inlined_call_operand.vmem [shape: f32[32,128], index: 5, kind: input, shape index: {}]   ;;  %s280_s6 = inlined_call_operand.vmem [shape: f32[32,128], index: 6, kind: output, shape index: {}]  }
   0x1   :  { %145 = vset.pattern.permute.xlu1 %v154_v0  ;;  %144 = vset.pattern.permute.xlu0 %v154_v0  ;;  %v25_v1 = vld [vmem:[%s274_s1 + $0x10] sm:$0xff]  ;;  %v26_v2 = vld [vmem:[%s274_s1 + $0x18] sm:$0xff]  ;;  %v32_v3 = vld [vmem:[%s275_s2 + $0x8] sm:$0xff] }
   0x2   :  { %v29_v4 = vmul.f32 0.0078125, %v25_v1  ;;  %v30_v5 = vmul.f32 0.0078125, %v26_v2  ;;  %v33_v6 = vld [vmem:[%s275_s2 + $0x10] sm:$0xff]  ;;  %v34_v7 = vld [vmem:[%s275_s2 + $0x18] sm:$0xff]  ;;  %v36_v8 = vmul.f32 0.0078125, %v32_v3  ;;  %v24_v11 = vld [vmem:[%s274_s1 + $0x8] sm:$0xff] }
   0x3   :  { %v37_v9 = vmul.f32 0.0078125, %v33_v6  ;;  %v38_v10 = vmul.f32 0.0078125, %v34_v7  ;;  %v23_v12 = vld [vmem:[%s274_s1] sm:$0xff]  ;;  %v28_v16 = vmul.f32 0.0078125, %v24_v11  ;;  %v49_v29 = vld [vmem:[%s276_s3 + $0x10] sm:$0xff]  ;;  %v50_v32 = vld [vmem:[%s276_s3 + $0x18] sm:$0xff] }
   0x4   :  { %v31_v13 = vld [vmem:[%s275_s2] sm:$0xff]  ;;  %v41_v14 = vmul.f32 %v29_v4, %v29_v4  ;;  %v42_v15 = vmul.f32 %v30_v5, %v30_v5  ;;  %v27_v17 = vmul.f32 0.0078125, %v23_v12  ;;  %v48_v35 = vld [vmem:[%s276_s3 + $0x8] sm:$0xff]  ;;  %v66_v47 = vld [vmem:[%s277_s4 + $0x18] sm:$0xff] }
   0x5   :  { %v35_v18 = vmul.f32 0.0078125, %v31_v13  ;;  %v40_v21 = vmul.f32 %v28_v16, %v28_v16  ;;  %v47_v31 = vld [vmem:[%s276_s3] sm:$0xff]  ;;  %v64_v42 = vld [vmem:[%s277_s4 + $0x8] sm:$0xff]  ;;  %v65_v50 = vld [vmem:[%s277_s4 + $0x10] sm:$0xff] }
   0x6   :  { %v45_v19 = vsub.f32 %v37_v9, %v41_v14  ;;  %v46_v20 = vsub.f32 %v38_v10, %v42_v15  ;;  %v39_v22 = vmul.f32 %v27_v17, %v27_v17  ;;  %v63_v44 = vld [vmem:[%s277_s4] sm:$0xff]  ;;  %v76_v56 = vld [vmem:[%s278_s0 + $0x8] sm:$0xff]  ;;  %v78_v60 = vld [vmem:[%s278_s0 + $0x18] sm:$0xff] }
   0x7   :  { %v44_v24 = vsub.f32 %v36_v8, %v40_v21  ;;  %v75_v57 = vld [vmem:[%s278_s0] sm:$0xff]  ;;  %v128_v61 = vld [vmem:[%s279_s5 + $0x8] sm:$0xff]  ;;  %v77_v1 = vld [vmem:[%s278_s0 + $0x10] sm:$0xff] }
   0x8   :  { %v53_v23 = vadd.f32 1e-05, %v45_v19  ;;  %v43_v25 = vsub.f32 %v35_v18, %v39_v22  ;;  %v54_v26 = vadd.f32 1e-05, %v46_v20  ;;  %v127_v2 = vld [vmem:[%s279_s5] sm:$0xff]  ;;  %v130_v7 = vld [vmem:[%s279_s5 + $0x18] sm:$0xff] }
   0x9   :  { %v52_v28 = vadd.f32 1e-05, %v44_v24  ;;  %v129_v12 = vld [vmem:[%s279_s5 + $0x10] sm:$0xff] }
   0xa   :  { %146 = vrsqrt.f32 %v53_v23  ;;  %v51_v27 = vadd.f32 1e-05, %v43_v25 }
   0xb   :  { %148 = vrsqrt.f32 %v54_v26 }
   0xc   :  { %150 = vrsqrt.f32 %v51_v27 }
   0xd   :  { %152 = vrsqrt.f32 %v52_v28 }
  0x17   :  { %v147_v30 = vpop.eup %146 }
  0x18   :  { %v149_v33 = vpop.eup %148  ;;  %v61_v34 = vmul.f32 %v147_v30, %v49_v29 }
  0x19   :  { %v151_v36 = vpop.eup %150  ;;  %v62_v39 = vmul.f32 %v149_v33, %v50_v32 }
  0x1a   :  { %v153_v37 = vpop.eup %152  ;;  %91 = vperm.xlu1 %145, %v61_v34   ;;  %v59_v38 = vmul.f32 %v151_v36, %v47_v31  ;;  %v69_v48 = vmul.f32 %v61_v34, %v29_v4 }
  0x1b   :  { %v60_v40 = vmul.f32 %v153_v37, %v48_v35  ;;  %v70_v45 = vmul.f32 %v62_v39, %v30_v5 }
  0x1c   :  { %81 = vperm.xlu0 %144, %v59_v38   ;;  %v67_v41 = vmul.f32 %v59_v38, %v27_v17  ;;  %v73_v52 = vsub.f32 %v65_v50, %v69_v48 }
  0x1d   :  { %v68_v43 = vmul.f32 %v60_v40, %v28_v16  ;;  %v74_v51 = vsub.f32 %v66_v47, %v70_v45 }
  0x1e   :  { %96 = vperm.xlu1 %145, %v62_v39   ;;  %v71_v49 = vsub.f32 %v63_v44, %v67_v41 }
  0x1f   :  { %v72_v46 = vsub.f32 %v64_v42, %v68_v43 }
  0x20   :  { %86 = vperm.xlu0 %144, %v60_v40  }
  0x22   :  { %110 = vperm.xlu1 %145, %v72_v46  }
  0x24   :  { %105 = vperm.xlu0 %144, %v71_v49  }
  0x26   :  { %120 = vperm.xlu1 %145, %v74_v51  }
  0x28   :  { %115 = vperm.xlu0 %144, %v73_v52  }
  0x95   :  { %v92_v53 = vpop.permute.xlu1 %91 }
  0x96   :  { %v101_v9 = vmul.f32 %v92_v53, %v77_v1 }
  0x97   :  { %v82_v54 = vpop.permute.xlu0 %81 }
  0x98   :  { %v99_v63 = vmul.f32 %v82_v54, %v75_v57 }
  0x99   :  { %v97_v55 = vpop.permute.xlu1 %96 }
  0x9a   :  { %v102_v4 = vmul.f32 %v97_v55, %v78_v60 }
  0x9b   :  { %v87_v58 = vpop.permute.xlu0 %86 }
  0x9c   :  { %v100_v59 = vmul.f32 %v87_v58, %v76_v56 }
  0x9d   :  { %v111_v62 = vpop.permute.xlu1 %110 }
  0x9e   :  { %v124_v0 = vadd.f32 %v111_v62, %v100_v59 }
  0x9f   :  { %v106_v3 = vpop.permute.xlu0 %105 }
  0xa0   :  { %v132_v5 = vadd.f32 %v128_v61, %v124_v0  ;;  %v123_v6 = vadd.f32 %v106_v3, %v99_v63 }
  0xa1   :  { %v121_v8 = vpop.permute.xlu1 %120 }
  0xa2   :  { %136 = vst [vmem:[%s280_s6 + $0x8] sm:$0xff] %v132_v5  ;;  %v131_v10 = vadd.f32 %v127_v2, %v123_v6  ;;  %v126_v11 = vadd.f32 %v121_v8, %v102_v4 }
  0xa3   :  { %v116_v13 = vpop.permute.xlu0 %115 }
  0xa4   :  { %135 = vst [vmem:[%s280_s6] sm:$0xff] %v131_v10  ;;  %v134_v14 = vadd.f32 %v130_v7, %v126_v11  ;;  %v125_v15 = vadd.f32 %v116_v13, %v101_v9 }
  0xa6   :  { %138 = vst [vmem:[%s280_s6 + $0x18] sm:$0xff] %v134_v14  ;;  %v133_v16 = vadd.f32 %v129_v12, %v125_v15 }
  0xa8   :  { %137 = vst [vmem:[%s280_s6 + $0x10] sm:$0xff] %v133_v16 }

// kernel: drnet_forward.42
= control target key start
LH: loop header
LB: loop body
LE: loop exit
PB: predicated region body
PF: predicated region fallthrough
CT: control target
= control target key end

     0   :  { %s1014_s22 = smov 17   ;;  %s1015_s25 = smov 16   ;;  %vm623_vm0 = vcmask 261120   ;;  %vm456_vm1 = vcmask 908288   ;;  %vm208_vm2 = vcmask 982016   ;;  %vm394_vm3 = vcmask 916480   ;;  %s1309_s2 = inlined_call_operand.vmem [shape: f32[9,128], index: 2, kind: input, shape index: {}]   ;;  %s1310_s1 = inlined_call_operand.vmem [shape: f32[32,146], index: 1, kind: input, shape index: {}]   ;;  %s1311_s0 = inlined_call_operand.vmem [shape: bf16[32,288], index: 0, kind: input, shape index: {}]   ;;  %s1312_s3 = inlined_call_operand.vmem [shape: f32[32,128], index: 3, kind: output, shape index: {0}]   ;;  %s1313_s4 = inlined_call_operand.vmem [shape: f32[32,1], index: 4, kind: output, shape index: {1}]   ;;  %s1314_s5 = inlined_call_operand.vmem [shape: f32[32,1], index: 5, kind: output, shape index: {2}]  }
   0x1   :  { %v780_v0 = vld [vmem:[%s1309_s2 + $0x7] ss:$0 sm:$0xff]  ;;  %v779_v1 = vld [vmem:[%s1309_s2 + $0x6] ss:$0 sm:$0xff]  ;;  %v776_v2 = vld [vmem:[%s1309_s2 + $0x3] ss:$0 sm:$0xff] }
   0x2   :  { %421 = vrot.lane.b32.xlu0 %v780_v0, %s1014_s22  ;;  %359 = vrot.lane.b32.xlu1 %v779_v1, %s1015_s25  ;;  %v775_v3 = vld [vmem:[%s1309_s2 + $0x2] ss:$0 sm:$0xff]  ;;  %s1016_s28 = smov 8   ;;  %s1017_s29 = smov 2   ;;  %v778_v4 = vld [vmem:[%s1309_s2 + $0x5] ss:$0 sm:$0xff] }
   0x3   :  { %v774_v5 = vld [vmem:[%s1309_s2 + $0x1] ss:$0 sm:$0xff]  ;;  %s1018_s9 = smov 10   ;;  %s1019_s10 = smov 1   ;;  %v777_v6 = vld [vmem:[%s1309_s2 + $0x4] ss:$0 sm:$0xff] }
   0x4   :  { %v781_v7 = vld [vmem:[%s1309_s2 + $0x8] ss:$0 sm:$0xff]  ;;  %s1020_s15 = smov 9   ;;  %s1021_s16 = smov 18   ;;  %v1087_v8 = vld [vmem:[%s1310_s1 + $0x30] sm:$0xff]  ;;  %v1092_v9 = vld [vmem:[%s1310_s1 + $0x38] sm:$0xff] }
   0x5   :  { %v1097_v10 = vld [vmem:[%s1310_s1 + $0x20] sm:$0xff]  ;;  %v1102_v11 = vld [vmem:[%s1310_s1 + $0x28] sm:$0xff]  ;;  %v1111_v20 = vld [vmem:[%s1310_s1 + $0x10] sm:$0xff]  ;;  %s1026_s11 = smov 118   ;;  %s1027_s12 = smov 127   ;;  %vm146_vm4 = vcmask 1031168  }
   0x6   :  { %173 = vrot.lane.b32.xlu0 %v776_v2, %s1016_s28  ;;  %111 = vrot.lane.b32.xlu1 %v775_v3, %s1017_s29  ;;  %v1116_v21 = vld [vmem:[%s1310_s1 + $0x18] sm:$0xff]  ;;  %s1022_s29 = smov 111   ;;  %v1124_v25 = vld [vmem:[%s1310_s1] sm:$0xff]  ;;  %s1029_s19 = smov 110   ;;  %vm332_vm5 = vcmask 965632   ;;  %vm84_vm6 = vcmask 1039360  }
   0x7   :  { %v1129_v26 = vld [vmem:[%s1310_s1 + $0x8] sm:$0xff]  ;;  %s1024_s1 = smov 112   ;;  %vm270_vm7 = vcmask 973824   ;;  %vm518_vm8 = vcmask 900096   ;;  %vm736_vm9 = vcmask 7168  }
   0xa   :  { %297 = vrot.lane.b32.xlu0 %v778_v4, %s1018_s9  ;;  %49 = vrot.lane.b32.xlu1 %v774_v5, %s1019_s10  ;;  %s1023_s9 = smov 120   ;;  %s1025_s10 = smov 126  }
   0xe   :  { %235 = vrot.lane.b32.xlu0 %v777_v6, %s1020_s15  ;;  %483 = vrot.lane.b32.xlu1 %v781_v7, %s1021_s16  ;;  %s1028_s16 = smov 119  }
  0x74   :  { %v422_v12 = vpop.permute.xlu0 %421  ;;  %v360_v34 = vpop.permute.xlu1 %359 }
  0x75   :  { %v430_v13 = vmul.f32 %v422_v12, %v1087_v8  ;;  %v431_v14 = vmul.f32 %v422_v12, %v1092_v9  ;;  %v428_v15 = vmul.f32 %v422_v12, %v1097_v10  ;;  %v429_v16 = vmul.f32 %v422_v12, %v1102_v11 }
  0x76   :  { %v426_v29 = vmul.f32 %v422_v12, %v1111_v20  ;;  %v427_v30 = vmul.f32 %v422_v12, %v1116_v21  ;;  %v424_v32 = vmul.f32 %v422_v12, %v1124_v25  ;;  %v425_v33 = vmul.f32 %v422_v12, %v1129_v26 }
  0x77   :  { %v851_v17 = vpack.i.bf16 %v431_v14, %v430_v13  ;;  %v846_v18 = vpack.i.bf16 %v429_v16, %v428_v15  ;;  %v368_v41 = vmul.f32 %v1087_v8, %v360_v34  ;;  %v369_v42 = vmul.f32 %v1092_v9, %v360_v34 }
  0x78   :  { %v174_v19 = vpop.permute.xlu0 %173  ;;  %v871_v35 = vpack.i.bf16 %v427_v30, %v426_v29  ;;  %v866_v38 = vpack.i.bf16 %v425_v33, %v424_v32  ;;  %v112_v43 = vpop.permute.xlu1 %111  ;;  %v366_v44 = vmul.f32 %v1097_v10, %v360_v34  ;;  %v367_v45 = vmul.f32 %v1102_v11, %v360_v34 }
  0x79   :  { %852 = vrot.lane.b32.xlu1 %v851_v17, %s1022_s29  ;;  %847 = vrot.lane.b32.xlu0 %v846_v18, %s1022_s29  ;;  %v182_v22 = vmul.f32 %v1087_v8, %v174_v19  ;;  %v183_v23 = vmul.f32 %v1092_v9, %v174_v19  ;;  %v180_v24 = vmul.f32 %v1097_v10, %v174_v19 }
  0x7a   :  { %v181_v27 = vmul.f32 %v1102_v11, %v174_v19  ;;  %v178_v36 = vmul.f32 %v1111_v20, %v174_v19  ;;  %v179_v37 = vmul.f32 %v1116_v21, %v174_v19  ;;  %v176_v39 = vmul.f32 %v1124_v25, %v174_v19 }
  0x7b   :  { %v861_v28 = vpack.i.bf16 %v183_v23, %v182_v22  ;;  %v177_v40 = vmul.f32 %v1129_v26, %v174_v19  ;;  %v891_v48 = vpack.i.bf16 %v369_v42, %v368_v41  ;;  %v120_v49 = vmul.f32 %v1087_v8, %v112_v43 }
  0x7c   :  { %v856_v31 = vpack.i.bf16 %v181_v27, %v180_v24  ;;  %v881_v46 = vpack.i.bf16 %v179_v37, %v178_v36  ;;  %v121_v50 = vmul.f32 %v1092_v9, %v112_v43  ;;  %v886_v51 = vpack.i.bf16 %v367_v45, %v366_v44  ;;  %v298_v60 = vpop.permute.xlu0 %297  ;;  %v50_v5 = vpop.permute.xlu1 %49 }
  0x7d   :  { %862 = vrot.lane.b32.xlu1 %v861_v28, %s1023_s9  ;;  %v876_v47 = vpack.i.bf16 %v177_v40, %v176_v39  ;;  %v118_v52 = vmul.f32 %v1097_v10, %v112_v43  ;;  %v119_v53 = vmul.f32 %v1102_v11, %v112_v43  ;;  %v364_v56 = vmul.f32 %v1111_v20, %v360_v34 }
  0x7e   :  { %857 = vrot.lane.b32.xlu0 %v856_v31, %s1023_s9  ;;  %v901_v54 = vpack.i.bf16 %v121_v50, %v120_v49  ;;  %v365_v57 = vmul.f32 %v1116_v21, %v360_v34  ;;  %v362_v58 = vmul.f32 %v1124_v25, %v360_v34  ;;  %v363_v59 = vmul.f32 %v1129_v26, %v360_v34 }
  0x7f   :  { %v896_v55 = vpack.i.bf16 %v119_v53, %v118_v52  ;;  %v116_v62 = vmul.f32 %v1111_v20, %v112_v43  ;;  %v117_v63 = vmul.f32 %v1116_v21, %v112_v43  ;;  %v114_v1 = vmul.f32 %v1124_v25, %v112_v43 }
  0x80   :  { %v911_v61 = vpack.i.bf16 %v365_v57, %v364_v56  ;;  %v906_v0 = vpack.i.bf16 %v363_v59, %v362_v58  ;;  %v115_v2 = vmul.f32 %v1129_v26, %v112_v43  ;;  %v306_v3 = vmul.f32 %v1087_v8, %v298_v60  ;;  %v236_v30 = vpop.permute.xlu0 %235  ;;  %v1008_v57 = vld [vmem:[%s1311_s0 + $0x4] ss:$12 sps:$4 sm:$0xff]  }
  0x81   :  { %872 = vrot.lane.b32.xlu1 %v871_v35, %s1022_s29  ;;  %v307_v4 = vmul.f32 %v1092_v9, %v298_v60  ;;  %v304_v6 = vmul.f32 %v1097_v10, %v298_v60  ;;  %v305_v7 = vmul.f32 %v1102_v11, %v298_v60  ;;  %v921_v12 = vpack.i.bf16 %v117_v63, %v116_v62  ;;  %v773_v35 = vld [vmem:[%s1309_s2] ss:$0 sm:$0xff] }
  0x82   :  { %867 = vrot.lane.b32.xlu0 %v866_v38, %s1022_s29  ;;  %v916_v13 = vpack.i.bf16 %v115_v2, %v114_v1  ;;  %v58_v15 = vmul.f32 %v1087_v8, %v50_v5  ;;  %v59_v16 = vmul.f32 %v1092_v9, %v50_v5  ;;  %v56_v18 = vmul.f32 %v1097_v10, %v50_v5 }
  0x83   :  { %v931_v14 = vpack.i.bf16 %v307_v4, %v306_v3  ;;  %v926_v17 = vpack.i.bf16 %v305_v7, %v304_v6  ;;  %v57_v19 = vmul.f32 %v1102_v11, %v50_v5  ;;  %v302_v24 = vmul.f32 %v1111_v20, %v298_v60  ;;  %662 = vmatprep.mubr.bf16.mxu0 %v1008_v57 }
  0x84   :  { %v941_v22 = vpack.i.bf16 %v59_v16, %v58_v15  ;;  %v303_v27 = vmul.f32 %v1116_v21, %v298_v60  ;;  %v300_v28 = vmul.f32 %v1124_v25, %v298_v60  ;;  %v301_v29 = vmul.f32 %v1129_v26, %v298_v60 }
  0x85   :  { %882 = vrot.lane.b32.xlu1 %v881_v46, %s1023_s9  ;;  %v936_v23 = vpack.i.bf16 %v57_v19, %v56_v18  ;;  %v54_v32 = vmul.f32 %v1111_v20, %v50_v5  ;;  %v55_v33 = vmul.f32 %v1116_v21, %v50_v5  ;;  %v52_v34 = vmul.f32 %v1124_v25, %v50_v5 }
  0x86   :  { %877 = vrot.lane.b32.xlu0 %v876_v47, %s1023_s9  ;;  %v951_v31 = vpack.i.bf16 %v303_v27, %v302_v24  ;;  %v946_v36 = vpack.i.bf16 %v301_v29, %v300_v28  ;;  %v53_v37 = vmul.f32 %v1129_v26, %v50_v5  ;;  %v1176_v38 = vmul.f32 %v773_v35, %v1097_v10 }
  0x87   :  { %v1179_v39 = vmul.f32 %v773_v35, %v1087_v8  ;;  %v244_v40 = vmul.f32 %v1087_v8, %v236_v30  ;;  %v245_v41 = vmul.f32 %v1092_v9, %v236_v30  ;;  %v242_v42 = vmul.f32 %v1097_v10, %v236_v30 }
  0x88   :  { %v243_v43 = vmul.f32 %v1102_v11, %v236_v30  ;;  %v961_v45 = vpack.i.bf16 %v55_v33, %v54_v32  ;;  %v956_v46 = vpack.i.bf16 %v53_v37, %v52_v34  ;;  %v1188_v47 = vmul.f32 %v773_v35, %v1124_v25 }
  0x89   :  { %892 = vrot.lane.b32.xlu1 %v891_v48, %s1024_s1  ;;  %v576_v44 = vpack.c.bf16 %v1179_v39, %v1176_v38  ;;  %v1191_v48 = vmul.f32 %v773_v35, %v1111_v20  ;;  %v971_v49 = vpack.i.bf16 %v245_v41, %v244_v40  ;;  %v240_v53 = vmul.f32 %v1111_v20, %v236_v30 }
  0x8a   :  { %887 = vrot.lane.b32.xlu0 %v886_v51, %s1024_s1  ;;  %v966_v50 = vpack.i.bf16 %v243_v43, %v242_v42  ;;  %v484_v51 = vpop.permute.xlu1 %483  ;;  %v239_v56 = vmul.f32 %v1129_v26, %v236_v30 }
  0x8b   :  { %v575_v52 = vpack.c.bf16 %v1191_v48, %v1188_v47  ;;  %v492_v58 = vmul.f32 %v484_v51, %v1087_v8  ;;  %v493_v59 = vmul.f32 %v484_v51, %v1092_v9  ;;  %v490_v60 = vmul.f32 %v484_v51, %v1097_v10  ;;  %v1011_v8 = vld [vmem:[%s1311_s0 + $0x8] ss:$12 sps:$4 sm:$0xff]  }
  0x8c   :  { %v488_v2 = vmul.f32 %v484_v51, %v1111_v20  ;;  %v489_v3 = vmul.f32 %v484_v51, %v1116_v21  ;;  %v486_v9 = vmul.f32 %v484_v51, %v1124_v25  ;;  %v487_v10 = vmul.f32 %v484_v51, %v1129_v26  ;;  %826 = vmatprep.mubr.msk.bf16.mxu1 %vm623_vm0, %v1011_v8 }
  0x8d   :  { %902 = vrot.lane.b32.xlu1 %v901_v54, %s1025_s10  ;;  %v241_v54 = vmul.f32 %v1116_v21, %v236_v30 }
  0x8e   :  { %897 = vrot.lane.b32.xlu0 %v896_v55, %s1025_s10  ;;  %v238_v55 = vmul.f32 %v1124_v25, %v236_v30  ;;  %v996_v4 = vpack.i.bf16 %v487_v10, %v486_v9 }
  0x8f   :  { %v981_v62 = vpack.i.bf16 %v241_v54, %v240_v53 }
  0x90   :  { %v976_v63 = vpack.i.bf16 %v239_v56, %v238_v55 }
  0x91   :  { %912 = vrot.lane.b32.xlu1 %v911_v61, %s1024_s1  ;;  %v491_v61 = vmul.f32 %v484_v51, %v1102_v11  ;;  %v1001_v11 = vpack.i.bf16 %v489_v3, %v488_v2 }
  0x92   :  { %907 = vrot.lane.b32.xlu0 %v906_v0, %s1024_s1  ;;  %v991_v0 = vpack.i.bf16 %v493_v59, %v492_v58 }
  0x93   :  { %v986_v1 = vpack.i.bf16 %v491_v61, %v490_v60 }
  0x95   :  { %922 = vrot.lane.b32.xlu1 %v921_v12, %s1025_s10 }
  0x96   :  { %917 = vrot.lane.b32.xlu0 %v916_v13, %s1025_s10 }
  0x99   :  { %932 = vrot.lane.b32.xlu1 %v931_v14, %s1026_s11 }
  0x9a   :  { %927 = vrot.lane.b32.xlu0 %v926_v17, %s1026_s11 }
  0x9d   :  { %942 = vrot.lane.b32.xlu1 %v941_v22, %s1027_s12 }
  0x9e   :  { %937 = vrot.lane.b32.xlu0 %v936_v23, %s1027_s12 }
  0xa1   :  { %952 = vrot.lane.b32.xlu1 %v951_v31, %s1026_s11 }
  0xa2   :  { %947 = vrot.lane.b32.xlu0 %v946_v36, %s1026_s11 }
  0xa5   :  { %962 = vrot.lane.b32.xlu1 %v961_v45, %s1027_s12 }
  0xa6   :  { %957 = vrot.lane.b32.xlu0 %v956_v46, %s1027_s12 }
  0xa9   :  { %972 = vrot.lane.b32.xlu1 %v971_v49, %s1028_s16 }
  0xaa   :  { %967 = vrot.lane.b32.xlu0 %v966_v50, %s1028_s16 }
  0xad   :  { %982 = vrot.lane.b32.xlu1 %v981_v62, %s1028_s16 }
  0xae   :  { %977 = vrot.lane.b32.xlu0 %v976_v63, %s1028_s16 }
  0xb1   :  { %992 = vrot.lane.b32.xlu1 %v991_v0, %s1029_s19 }
  0xb2   :  { %987 = vrot.lane.b32.xlu0 %v986_v1, %s1029_s19 }
  0xb5   :  { %1002 = vrot.lane.b32.xlu1 %v1001_v11, %s1029_s19 }
  0xb6   :  { %997 = vrot.lane.b32.xlu0 %v996_v4, %s1029_s19 }
  0xeb   :  { %v853_v20 = vpop.permute.xlu1 %852  ;;  %v848_v21 = vpop.permute.xlu0 %847 }
  0xec   :  { %v855_v5 = vunpack.i.h.bf16 %v853_v20  ;;  %v854_v6 = vunpack.i.l.bf16 %v853_v20  ;;  %v850_v7 = vunpack.i.h.bf16 %v848_v21  ;;  %v849_v12 = vunpack.i.l.bf16 %v848_v21 }
  0xee   :  { %v459_v25 = vsel %vm456_vm1, %v849_v12, %v850_v7  ;;  %v460_v26 = vsel %vm456_vm1, %v854_v6, %v855_v5 }
  0xef   :  { %v863_v13 = vpop.permute.xlu1 %862  ;;  %v590_v14 = vpack.c.bf16 %v460_v26, %v459_v25 }
  0xf0   :  { %v865_v15 = vunpack.i.h.bf16 %v863_v13  ;;  %v864_v16 = vunpack.i.l.bf16 %v863_v13  ;;  %v858_v17 = vpop.permute.xlu0 %857 }
  0xf1   :  { %v860_v18 = vunpack.i.h.bf16 %v858_v17  ;;  %v859_v19 = vunpack.i.l.bf16 %v858_v17  ;;  %790 = vmatprep.subr.bf16.mxu0 %v590_v14 }
  0xf2   :  { %v212_v22 = vsel %vm208_vm2, %v864_v16, %v865_v15 }
  0xf3   :  { %v873_v23 = vpop.permute.xlu1 %872  ;;  %v211_v24 = vsel %vm208_vm2, %v859_v19, %v860_v18 }
  0xf4   :  { %v875_v27 = vunpack.i.h.bf16 %v873_v23  ;;  %v874_v28 = vunpack.i.l.bf16 %v873_v23  ;;  %v868_v29 = vpop.permute.xlu0 %867  ;;  %v582_v30 = vpack.c.bf16 %v212_v22, %v211_v24 }
  0xf5   :  { %v870_v31 = vunpack.i.h.bf16 %v868_v29  ;;  %v869_v32 = vunpack.i.l.bf16 %v868_v29 }
  0xf6   :  { %791 = vmatpush3.bf16.msra.mxu0 %v582_v30  ;;  %v458_v33 = vsel %vm456_vm1, %v874_v28, %v875_v27 }
  0xf7   :  { %v883_v34 = vpop.permute.xlu1 %882  ;;  %v457_v35 = vsel %vm456_vm1, %v869_v32, %v870_v31 }
  0xf8   :  { %v885_v36 = vunpack.i.h.bf16 %v883_v34  ;;  %v884_v37 = vunpack.i.l.bf16 %v883_v34  ;;  %v878_v40 = vpop.permute.xlu0 %877  ;;  %v589_v41 = vpack.c.bf16 %v458_v33, %v457_v35 }
  0xf9   :  { %v880_v42 = vunpack.i.h.bf16 %v878_v40  ;;  %v879_v43 = vunpack.i.l.bf16 %v878_v40 }
  0xfa   :  { %792 = vmatprep.subr.bf16.mxu0 %v589_v41  ;;  %v210_v45 = vsel %vm208_vm2, %v884_v37, %v885_v36 }
  0xfb   :  { %v893_v46 = vpop.permute.xlu1 %892  ;;  %v209_v49 = vsel %vm208_vm2, %v879_v43, %v880_v42 }
  0xfc   :  { %v895_v50 = vunpack.i.h.bf16 %v893_v46  ;;  %v894_v51 = vunpack.i.l.bf16 %v893_v46  ;;  %v888_v53 = vpop.permute.xlu0 %887  ;;  %v581_v54 = vpack.c.bf16 %v210_v45, %v209_v49 }
  0xfd   :  { %v890_v55 = vunpack.i.h.bf16 %v888_v53  ;;  %v889_v56 = vunpack.i.l.bf16 %v888_v53 }
  0xfe   :  { %793 = vmatpush3.bf16.msra.mxu0 %v581_v54  ;;  %v398_v57 = vsel %vm394_vm3, %v894_v51, %v895_v50 }
  0xff   :  { %v903_v58 = vpop.permute.xlu1 %902  ;;  %v397_v59 = vsel %vm394_vm3, %v889_v56, %v890_v55 }
 0x100   :  { %v905_v60 = vunpack.i.h.bf16 %v903_v58  ;;  %v904_v61 = vunpack.i.l.bf16 %v903_v58  ;;  %v898_v62 = vpop.permute.xlu0 %897  ;;  %v588_v63 = vpack.c.bf16 %v398_v57, %v397_v59 }
 0x101   :  { %v900_v0 = vunpack.i.h.bf16 %v898_v62  ;;  %v899_v1 = vunpack.i.l.bf16 %v898_v62 }
 0x102   :  { %794 = vmatprep.subr.bf16.mxu0 %v588_v63  ;;  %v150_v2 = vsel %vm146_vm4, %v904_v61, %v905_v60 }
 0x103   :  { %v913_v3 = vpop.permute.xlu1 %912  ;;  %v149_v8 = vsel %vm146_vm4, %v899_v1, %v900_v0 }
 0x104   :  { %v915_v9 = vunpack.i.h.bf16 %v913_v3  ;;  %v914_v10 = vunpack.i.l.bf16 %v913_v3  ;;  %v908_v11 = vpop.permute.xlu0 %907  ;;  %v580_v4 = vpack.c.bf16 %v150_v2, %v149_v8 }
 0x105   :  { %v910_v20 = vunpack.i.h.bf16 %v908_v11  ;;  %v909_v21 = vunpack.i.l.bf16 %v908_v11 }
 0x106   :  { %795 = vmatpush3.bf16.msra.mxu0 %v580_v4  ;;  %v396_v5 = vsel %vm394_vm3, %v914_v10, %v915_v9 }
 0x107   :  { %v923_v6 = vpop.permute.xlu1 %922  ;;  %v395_v7 = vsel %vm394_vm3, %v909_v21, %v910_v20 }
 0x108   :  { %v925_v12 = vunpack.i.h.bf16 %v923_v6  ;;  %v924_v25 = vunpack.i.l.bf16 %v923_v6  ;;  %v918_v26 = vpop.permute.xlu0 %917  ;;  %v587_v13 = vpack.c.bf16 %v396_v5, %v395_v7 }
 0x109   :  { %v920_v14 = vunpack.i.h.bf16 %v918_v26  ;;  %v919_v15 = vunpack.i.l.bf16 %v918_v26 }
 0x10a   :  { %796 = vmatprep.subr.bf16.mxu0 %v587_v13  ;;  %v148_v16 = vsel %vm146_vm4, %v924_v25, %v925_v12 }
 0x10b   :  { %v933_v17 = vpop.permute.xlu1 %932  ;;  %v147_v18 = vsel %vm146_vm4, %v919_v15, %v920_v14 }
 0x10c   :  { %v935_v19 = vunpack.i.h.bf16 %v933_v17  ;;  %v934_v22 = vunpack.i.l.bf16 %v933_v17  ;;  %v928_v23 = vpop.permute.xlu0 %927  ;;  %v579_v24 = vpack.c.bf16 %v148_v16, %v147_v18 }
 0x10d   :  { %v930_v27 = vunpack.i.h.bf16 %v928_v23  ;;  %v929_v28 = vunpack.i.l.bf16 %v928_v23  ;;  %v1006_v23 = vld [vmem:[%s1311_s0] ss:$12 sps:$4 sm:$0xff]  }
 0x10e   :  { %797 = vmatpush3.bf16.msra.mxu0 %v579_v24  ;;  %v336_v29 = vsel %vm332_vm5, %v934_v22, %v935_v19 }
 0x10f   :  { %v943_v30 = vpop.permute.xlu1 %942  ;;  %v335_v31 = vsel %vm332_vm5, %v929_v28, %v930_v27 }
 0x110   :  { %v945_v32 = vunpack.i.h.bf16 %v943_v30  ;;  %v944_v33 = vunpack.i.l.bf16 %v943_v30  ;;  %v938_v34 = vpop.permute.xlu0 %937  ;;  %v586_v35 = vpack.c.bf16 %v336_v29, %v335_v31 }
 0x111   :  { %v940_v36 = vunpack.i.h.bf16 %v938_v34  ;;  %v939_v37 = vunpack.i.l.bf16 %v938_v34  ;;  %v1013_v34 = vld [vmem:[%s1311_s0 + $0x20] ss:$12 sps:$4 sm:$0xff]  }
 0x112   :  { %798 = vmatprep.subr.bf16.mxu0 %v586_v35  ;;  %v88_v40 = vsel %vm84_vm6, %v944_v33, %v945_v32 }
 0x113   :  { %v953_v41 = vpop.permute.xlu1 %952  ;;  %v87_v42 = vsel %vm84_vm6, %v939_v37, %v940_v36 }
 0x114   :  { %v955_v43 = vunpack.i.h.bf16 %v953_v41  ;;  %v954_v45 = vunpack.i.l.bf16 %v953_v41  ;;  %v948_v46 = vpop.permute.xlu0 %947  ;;  %v578_v49 = vpack.c.bf16 %v88_v40, %v87_v42 }
 0x115   :  { %v950_v50 = vunpack.i.h.bf16 %v948_v46  ;;  %v949_v51 = vunpack.i.l.bf16 %v948_v46 }
 0x116   :  { %799 = vmatpush3.bf16.msra.mxu0 %v578_v49  ;;  %v334_v53 = vsel %vm332_vm5, %v954_v45, %v955_v43 }
 0x117   :  { %v963_v54 = vpop.permute.xlu1 %962  ;;  %v333_v55 = vsel %vm332_vm5, %v949_v51, %v950_v50 }
 0x118   :  { %v965_v56 = vunpack.i.h.bf16 %v963_v54  ;;  %v964_v57 = vunpack.i.l.bf16 %v963_v54  ;;  %v958_v58 = vpop.permute.xlu0 %957  ;;  %v585_v59 = vpack.c.bf16 %v334_v53, %v333_v55 }
 0x119   :  { %v960_v60 = vunpack.i.h.bf16 %v958_v58  ;;  %v959_v61 = vunpack.i.l.bf16 %v958_v58 }
 0x11a   :  { %800 = vmatprep.subr.bf16.mxu0 %v585_v59  ;;  %v86_v62 = vsel %vm84_vm6, %v964_v57, %v965_v56 }
 0x11b   :  { %v973_v63 = vpop.permute.xlu1 %972  ;;  %v85_v0 = vsel %vm84_vm6, %v959_v61, %v960_v60 }
 0x11c   :  { %v975_v1 = vunpack.i.h.bf16 %v973_v63  ;;  %v974_v2 = vunpack.i.l.bf16 %v973_v63  ;;  %v968_v3 = vpop.permute.xlu0 %967  ;;  %v577_v8 = vpack.c.bf16 %v86_v62, %v85_v0 }
 0x11d   :  { %v970_v9 = vunpack.i.h.bf16 %v968_v3  ;;  %v969_v10 = vunpack.i.l.bf16 %v968_v3 }
 0x11e   :  { %801 = vmatpush3.bf16.msra.mxu0 %v577_v8  ;;  %v274_v11 = vsel %vm270_vm7, %v974_v2, %v975_v1 }
 0x11f   :  { %v983_v4 = vpop.permute.xlu1 %982  ;;  %v273_v20 = vsel %vm270_vm7, %v969_v10, %v970_v9 }
 0x120   :  { %v985_v21 = vunpack.i.h.bf16 %v983_v4  ;;  %v984_v5 = vunpack.i.l.bf16 %v983_v4  ;;  %v978_v6 = vpop.permute.xlu0 %977  ;;  %v584_v7 = vpack.c.bf16 %v274_v11, %v273_v20 }
 0x121   :  { %v980_v12 = vunpack.i.h.bf16 %v978_v6  ;;  %v979_v25 = vunpack.i.l.bf16 %v978_v6 }
 0x122   :  { %802 = vmatprep.subr.bf16.mxu0 %v584_v7  ;;  %v272_v26 = vsel %vm270_vm7, %v984_v5, %v985_v21 }
 0x123   :  { %803 = vmatpush3.bf16.msra.mxu0 %v576_v44  ;;  %v993_v13 = vpop.permute.xlu1 %992  ;;  %v271_v14 = vsel %vm270_vm7, %v979_v25, %v980_v12  ;;  %v1009_v44 = vld [vmem:[%s1311_s0 + $0x1c] ss:$12 sps:$4 sm:$0xff]  }
 0x124   :  { %v995_v15 = vunpack.i.h.bf16 %v993_v13  ;;  %v994_v16 = vunpack.i.l.bf16 %v993_v13  ;;  %v988_v17 = vpop.permute.xlu0 %987  ;;  %v583_v18 = vpack.c.bf16 %v272_v26, %v271_v14 }
 0x125   :  { %v990_v19 = vunpack.i.h.bf16 %v988_v17  ;;  %v989_v22 = vunpack.i.l.bf16 %v988_v17 }
 0x126   :  { %804 = vmatprep.subr.bf16.mxu0 %v583_v18  ;;  %v522_v24 = vsel %vm518_vm8, %v994_v16, %v995_v15 }
 0x127   :  { %805 = vmatpush3.bf16.msra.mxu0 %v575_v52  ;;  %v1003_v38 = vpop.permute.xlu1 %1002  ;;  %v521_v39 = vsel %vm518_vm8, %v989_v22, %v990_v19  ;;  %v1012_v52 = vld [vmem:[%s1311_s0 + $0x18] ss:$12 sps:$4 sm:$0xff]  }
 0x128   :  { %v1005_v27 = vunpack.i.h.bf16 %v1003_v38  ;;  %v1004_v28 = vunpack.i.l.bf16 %v1003_v38  ;;  %v998_v29 = vpop.permute.xlu0 %997  ;;  %v592_v30 = vpack.c.bf16 %v522_v24, %v521_v39 }
 0x129   :  { %v1000_v31 = vunpack.i.h.bf16 %v998_v29  ;;  %v999_v32 = vunpack.i.l.bf16 %v998_v29 }
 0x12a   :  { %663 = vmatmul.mubr.bf16.vlgmr.msra.gmra.mxu0 %v1006_v23  ;;  %822 = vmatprep.subr.bf16.mxu1 %v592_v30  ;;  %v520_v33 = vsel %vm518_vm8, %v1004_v28, %v1005_v27 }
 0x12b   :  { %823 = vmatpush3.bf16.msra.mxu1 %v592_v30  ;;  %v519_v47 = vsel %vm518_vm8, %v999_v32, %v1000_v31  ;;  %670 = vmatprep.mubr.bf16.mxu0 %v1009_v44 }
 0x12c   :  { %v591_v48 = vpack.c.bf16 %v520_v33, %v519_v47 }
 0x12e   :  { %824 = vmatprep.subr.bf16.mxu1 %v591_v48 }
 0x12f   :  { %825 = vmatpush3.bf16.msra.mxu1 %v591_v48 }
 0x132   :  { %671 = vmatmul.mubr.bf16.gmra.mxu0 %v1012_v52  ;;  %827 = vmatmul.mubr.msk.bf16.vlgmr.msra.gmra.mxu1 %vm623_vm0, %v1013_v34 }
 0x1ea   :  { %v806_v35 = vpop.f32.mrf.mxu0 }
 0x1ec   :  { %v807_v36 = vpop.f32.mrf.mxu0 }
 0x1ed   :  { %v808_v43 = vadd.f32 %v807_v36, %v806_v35 }
 0x1ee   :  { %v809_v37 = vpop.f32.mrf.mxu0 }
 0x1f0   :  { %v810_v40 = vpop.f32.mrf.mxu0 }
 0x1f1   :  { %v811_v54 = vadd.f32 %v810_v40, %v809_v37 }
 0x1f2   :  { %v812_v41 = vpop.f32.mrf.mxu0  ;;  %v828_v42 = vpop.f32.mrf.mxu1 }
 0x1f4   :  { %v813_v45 = vpop.f32.mrf.mxu0  ;;  %v713_v46 = vpop.f32.mrf.mxu1 }
 0x1f5   :  { %v814_v49 = vadd.f32 %v813_v45, %v812_v41  ;;  %v714_v50 = vadd.f32 %v808_v43, %v713_v46 }
 0x1f6   :  { %v815_v51 = vpop.f32.mrf.mxu0  ;;  %v829_v53 = vpop.f32.mrf.mxu1 }
 0x1f7   :  { %v722_v55 = vadd.f32 %v828_v42, %v814_v49  ;;  %757 = vst [vmem:[%s1312_s3] sm:$0xff] %v714_v50  ;;  %728 = vadd.xlane.f32.xlu0 %v714_v50  ;;  %v741_v56 = vmul.f32 %v714_v50, %v714_v50 }
 0x1f8   :  { %v816_v57 = vpop.f32.mrf.mxu0  ;;  %v716_v58 = vpop.f32.mrf.mxu1 }
 0x1f9   :  { %759 = vst [vmem:[%s1312_s3 + $0x10] sm:$0xff] %v722_v55  ;;  %v817_v59 = vadd.f32 %v816_v57, %v815_v51  ;;  %v717_v60 = vadd.f32 %v811_v54, %v716_v58  ;;  %745 = vadd.xlane.f32.xlu1 %v741_v56  ;;  %v743_v63 = vmul.f32 %v722_v55, %v722_v55 }
 0x1fb   :  { %v725_v61 = vadd.f32 %v829_v53, %v817_v59  ;;  %758 = vst [vmem:[%s1312_s3 + $0x8] sm:$0xff] %v717_v60  ;;  %v742_v62 = vmul.f32 %v717_v60, %v717_v60 }
 0x1fd   :  { %760 = vst [vmem:[%s1312_s3 + $0x18] sm:$0xff] %v725_v61  ;;  %747 = vadd.xlane.f32.xlu0 %v742_v62  ;;  %730 = vadd.xlane.f32.xlu1 %v717_v60  ;;  %v744_v0 = vmul.f32 %v725_v61, %v725_v61 }
 0x201   :  { %732 = vadd.xlane.f32.xlu0 %v722_v55  ;;  %749 = vadd.xlane.f32.xlu1 %v743_v63 }
 0x205   :  { %734 = vadd.xlane.f32.xlu0 %v725_v61 }
 0x209   :  { %751 = vadd.xlane.f32.xlu0 %v744_v0 }
 0x280   :  { %v729_v1 = vpop.xlane.xlu0 %728 }
 0x281   :  { %737 = vst.msk [vmem:[%s1313_s4] sm:$0xff] %vm736_vm9, %v729_v1 }
 0x282   :  { %v746_v2 = vpop.xlane.xlu1 %745 }
 0x283   :  { %753 = vst.msk [vmem:[%s1314_s5] sm:$0xff] %vm736_vm9, %v746_v2 }
 0x286   :  { %v748_v3 = vpop.xlane.xlu0 %747  ;;  %v731_v8 = vpop.xlane.xlu1 %730 }
 0x287   :  { %754 = vst.msk [vmem:[%s1314_s5 + $0x8] sm:$0xff] %vm736_vm9, %v748_v3  ;;  %738 = vst.msk [vmem:[%s1313_s4 + $0x8] sm:$0xff] %vm736_vm9, %v731_v8 }
 0x28a   :  { %v733_v9 = vpop.xlane.xlu0 %732  ;;  %v750_v10 = vpop.xlane.xlu1 %749 }
 0x28b   :  { %739 = vst.msk [vmem:[%s1313_s4 + $0x10] sm:$0xff] %vm736_vm9, %v733_v9  ;;  %755 = vst.msk [vmem:[%s1314_s5 + $0x10] sm:$0xff] %vm736_vm9, %v750_v10 }
 0x28e   :  { %v735_v11 = vpop.xlane.xlu0 %734 }
 0x28f   :  { %740 = vst.msk [vmem:[%s1313_s4 + $0x18] sm:$0xff] %vm736_vm9, %v735_v11 }
 0x292   :  { %v752_v4 = vpop.xlane.xlu0 %751 }
 0x293   :  { %756 = vst.msk [vmem:[%s1314_s5 + $0x18] sm:$0xff] %vm736_vm9, %v752_v4 }

// kernel: drnet_forward.50
= control target key start
LH: loop header
LB: loop body
LE: loop exit
PB: predicated region body
PF: predicated region fallthrough
CT: control target
= control target key end

     0   :  { %s459_s20 = smov 9   ;;  %s460_s25 = smov 1   ;;  %vm208_vm0 = vcmask 973824   ;;  %vm146_vm1 = vcmask 982016   ;;  %vm84_vm2 = vcmask 1039360   ;;  %vm318_vm3 = vcmask 7168   ;;  %s601_s2 = inlined_call_operand.vmem [shape: f32[4,128], index: 2, kind: input, shape index: {}]   ;;  %s602_s1 = inlined_call_operand.vmem [shape: f32[32,137], index: 1, kind: input, shape index: {}]   ;;  %s603_s0 = inlined_call_operand.vmem [shape: bf16[32,128], index: 0, kind: input, shape index: {}]   ;;  %s604_s3 = inlined_call_operand.vmem [shape: f32[32,128], index: 3, kind: output, shape index: {0}]   ;;  %s605_s4 = inlined_call_operand.vmem [shape: f32[32,1], index: 4, kind: output, shape index: {1}]   ;;  %s606_s5 = inlined_call_operand.vmem [shape: f32[32,1], index: 5, kind: output, shape index: {2}]  }
   0x1   :  { %v358_v0 = vld [vmem:[%s601_s2 + $0x3] ss:$0 sm:$0xff]  ;;  %v356_v1 = vld [vmem:[%s601_s2 + $0x1] ss:$0 sm:$0xff]  ;;  %v357_v2 = vld [vmem:[%s601_s2 + $0x2] ss:$0 sm:$0xff] }
   0x2   :  { %173 = vrot.lane.b32.xlu0 %v358_v0, %s459_s20  ;;  %49 = vrot.lane.b32.xlu1 %v356_v1, %s460_s25  ;;  %s461_s26 = smov 8   ;;  %v165_v3 = vld [vmem:[%s602_s1 + $0x30] sm:$0xff]  ;;  %v166_v4 = vld [vmem:[%s602_s1 + $0x38] sm:$0xff]  ;;  %s462_s18 = smov 119  }
   0x3   :  { %v163_v5 = vld [vmem:[%s602_s1 + $0x20] sm:$0xff]  ;;  %v164_v6 = vld [vmem:[%s602_s1 + $0x28] sm:$0xff]  ;;  %v161_v7 = vld [vmem:[%s602_s1 + $0x10] sm:$0xff]  ;;  %s464_s21 = smov 127  }
   0x4   :  { %v162_v8 = vld [vmem:[%s602_s1 + $0x18] sm:$0xff]  ;;  %v159_v10 = vld [vmem:[%s602_s1] sm:$0xff]  ;;  %v160_v11 = vld [vmem:[%s602_s1 + $0x8] sm:$0xff]  ;;  %s463_s1 = smov 120  }
   0x5   :  { %v355_v40 = vld [vmem:[%s601_s2] ss:$0 sm:$0xff] }
   0x6   :  { %111 = vrot.lane.b32.xlu0 %v357_v2, %s461_s26  ;;  %v29_v45 = vmul.f32 %v355_v40, %v163_v5  ;;  %v30_v46 = vmul.f32 %v355_v40, %v165_v3  ;;  %v27_v52 = vmul.f32 %v355_v40, %v159_v10  ;;  %v28_v53 = vmul.f32 %v355_v40, %v161_v7  ;;  %v457_v57 = vld [vmem:[%s603_s0] sm:$0xff]  }
   0x7   :  { %387 = vmatprep.mubr.bf16.mxu0 %v457_v57 }
   0x8   :  { %v531_v51 = vpack.c.bf16 %v30_v46, %v29_v45  ;;  %v533_v56 = vpack.c.bf16 %v28_v53, %v27_v52 }
  0x74   :  { %v174_v9 = vpop.permute.xlu0 %173  ;;  %v50_v31 = vpop.permute.xlu1 %49 }
  0x75   :  { %v182_v12 = vmul.f32 %v174_v9, %v165_v3  ;;  %v183_v13 = vmul.f32 %v174_v9, %v166_v4  ;;  %v180_v14 = vmul.f32 %v174_v9, %v163_v5  ;;  %v181_v15 = vmul.f32 %v174_v9, %v164_v6 }
  0x76   :  { %v178_v16 = vmul.f32 %v174_v9, %v161_v7  ;;  %v179_v17 = vmul.f32 %v174_v9, %v162_v8  ;;  %v176_v20 = vmul.f32 %v174_v9, %v159_v10  ;;  %v177_v21 = vmul.f32 %v174_v9, %v160_v11 }
  0x77   :  { %v402_v18 = vpack.i.bf16 %v183_v13, %v182_v12  ;;  %v397_v19 = vpack.i.bf16 %v181_v15, %v180_v14  ;;  %v58_v36 = vmul.f32 %v165_v3, %v50_v31  ;;  %v59_v37 = vmul.f32 %v166_v4, %v50_v31 }
  0x78   :  { %v112_v22 = vpop.permute.xlu0 %111  ;;  %v412_v27 = vpack.i.bf16 %v179_v17, %v178_v16  ;;  %v407_v28 = vpack.i.bf16 %v177_v21, %v176_v20  ;;  %v56_v38 = vmul.f32 %v163_v5, %v50_v31  ;;  %v57_v39 = vmul.f32 %v164_v6, %v50_v31 }
  0x79   :  { %403 = vrot.lane.b32.xlu0 %v402_v18, %s462_s18  ;;  %398 = vrot.lane.b32.xlu1 %v397_v19, %s462_s18  ;;  %v120_v23 = vmul.f32 %v165_v3, %v112_v22  ;;  %v121_v24 = vmul.f32 %v166_v4, %v112_v22  ;;  %v118_v25 = vmul.f32 %v163_v5, %v112_v22 }
  0x7a   :  { %v119_v26 = vmul.f32 %v164_v6, %v112_v22  ;;  %v116_v32 = vmul.f32 %v161_v7, %v112_v22  ;;  %v117_v33 = vmul.f32 %v162_v8, %v112_v22  ;;  %v114_v34 = vmul.f32 %v159_v10, %v112_v22 }
  0x7b   :  { %v422_v29 = vpack.i.bf16 %v121_v24, %v120_v23  ;;  %v115_v35 = vmul.f32 %v160_v11, %v112_v22  ;;  %v442_v43 = vpack.i.bf16 %v59_v37, %v58_v36  ;;  %v437_v44 = vpack.i.bf16 %v57_v39, %v56_v38 }
  0x7c   :  { %v417_v30 = vpack.i.bf16 %v119_v26, %v118_v25  ;;  %v432_v41 = vpack.i.bf16 %v117_v33, %v116_v32  ;;  %v54_v47 = vmul.f32 %v161_v7, %v50_v31  ;;  %v55_v48 = vmul.f32 %v162_v8, %v50_v31 }
  0x7d   :  { %413 = vrot.lane.b32.xlu0 %v412_v27, %s462_s18  ;;  %408 = vrot.lane.b32.xlu1 %v407_v28, %s462_s18  ;;  %v427_v42 = vpack.i.bf16 %v115_v35, %v114_v34  ;;  %v52_v49 = vmul.f32 %v159_v10, %v50_v31  ;;  %v53_v50 = vmul.f32 %v160_v11, %v50_v31 }
  0x7e   :  { %v452_v54 = vpack.i.bf16 %v55_v48, %v54_v47  ;;  %v458_v48 = vld [vmem:[%s603_s0 + $0x8] sm:$0xff]  }
  0x7f   :  { %v447_v55 = vpack.i.bf16 %v53_v50, %v52_v49 }
  0x81   :  { %423 = vrot.lane.b32.xlu0 %v422_v29, %s463_s1  ;;  %418 = vrot.lane.b32.xlu1 %v417_v30, %s463_s1 }
  0x85   :  { %433 = vrot.lane.b32.xlu0 %v432_v41, %s463_s1  ;;  %428 = vrot.lane.b32.xlu1 %v427_v42, %s463_s1 }
  0x89   :  { %443 = vrot.lane.b32.xlu0 %v442_v43, %s464_s21  ;;  %438 = vrot.lane.b32.xlu1 %v437_v44, %s464_s21 }
  0x8d   :  { %453 = vrot.lane.b32.xlu0 %v452_v54, %s464_s21  ;;  %448 = vrot.lane.b32.xlu1 %v447_v55, %s464_s21 }
  0xeb   :  { %v404_v58 = vpop.permute.xlu0 %403  ;;  %v399_v59 = vpop.permute.xlu1 %398 }
  0xec   :  { %v406_v60 = vunpack.i.h.bf16 %v404_v58  ;;  %v405_v61 = vunpack.i.l.bf16 %v404_v58  ;;  %v401_v62 = vunpack.i.h.bf16 %v399_v59  ;;  %v400_v63 = vunpack.i.l.bf16 %v399_v59 }
  0xee   :  { %v211_v0 = vsel %vm208_vm0, %v400_v63, %v401_v62  ;;  %v212_v1 = vsel %vm208_vm0, %v405_v61, %v406_v60 }
  0xef   :  { %v414_v2 = vpop.permute.xlu0 %413  ;;  %v409_v3 = vpop.permute.xlu1 %408  ;;  %v248_v4 = vpack.c.bf16 %v212_v1, %v211_v0 }
  0xf0   :  { %v416_v5 = vunpack.i.h.bf16 %v414_v2  ;;  %v415_v6 = vunpack.i.l.bf16 %v414_v2  ;;  %v411_v7 = vunpack.i.h.bf16 %v409_v3  ;;  %v410_v8 = vunpack.i.l.bf16 %v409_v3 }
  0xf1   :  { %371 = vmatprep.subr.bf16.mxu0 %v248_v4 }
  0xf2   :  { %372 = vmatpush3.bf16.msra.mxu0 %v248_v4  ;;  %v209_v9 = vsel %vm208_vm0, %v410_v8, %v411_v7  ;;  %v210_v10 = vsel %vm208_vm0, %v415_v6, %v416_v5 }
  0xf3   :  { %v424_v11 = vpop.permute.xlu0 %423  ;;  %v419_v12 = vpop.permute.xlu1 %418  ;;  %v247_v13 = vpack.c.bf16 %v210_v10, %v209_v9 }
  0xf4   :  { %v426_v14 = vunpack.i.h.bf16 %v424_v11  ;;  %v425_v15 = vunpack.i.l.bf16 %v424_v11  ;;  %v421_v16 = vunpack.i.h.bf16 %v419_v12  ;;  %v420_v17 = vunpack.i.l.bf16 %v419_v12 }
  0xf5   :  { %373 = vmatprep.subr.bf16.mxu0 %v247_v13 }
  0xf6   :  { %374 = vmatpush3.bf16.msra.mxu0 %v247_v13  ;;  %v149_v18 = vsel %vm146_vm1, %v420_v17, %v421_v16  ;;  %v150_v19 = vsel %vm146_vm1, %v425_v15, %v426_v14 }
  0xf7   :  { %v434_v20 = vpop.permute.xlu0 %433  ;;  %v429_v21 = vpop.permute.xlu1 %428  ;;  %v246_v22 = vpack.c.bf16 %v150_v19, %v149_v18 }
  0xf8   :  { %v436_v23 = vunpack.i.h.bf16 %v434_v20  ;;  %v435_v24 = vunpack.i.l.bf16 %v434_v20  ;;  %v431_v25 = vunpack.i.h.bf16 %v429_v21  ;;  %v430_v26 = vunpack.i.l.bf16 %v429_v21 }
  0xf9   :  { %375 = vmatprep.subr.bf16.mxu0 %v246_v22 }
  0xfa   :  { %376 = vmatpush3.bf16.msra.mxu0 %v246_v22  ;;  %v147_v27 = vsel %vm146_vm1, %v430_v26, %v431_v25  ;;  %v148_v28 = vsel %vm146_vm1, %v435_v24, %v436_v23 }
  0xfb   :  { %v444_v29 = vpop.permute.xlu0 %443  ;;  %v439_v30 = vpop.permute.xlu1 %438  ;;  %v245_v31 = vpack.c.bf16 %v148_v28, %v147_v27 }
  0xfc   :  { %v446_v32 = vunpack.i.h.bf16 %v444_v29  ;;  %v445_v33 = vunpack.i.l.bf16 %v444_v29  ;;  %v441_v34 = vunpack.i.h.bf16 %v439_v30  ;;  %v440_v35 = vunpack.i.l.bf16 %v439_v30 }
  0xfd   :  { %377 = vmatprep.subr.bf16.mxu0 %v245_v31 }
  0xfe   :  { %378 = vmatpush3.bf16.msra.mxu0 %v245_v31  ;;  %v87_v36 = vsel %vm84_vm2, %v440_v35, %v441_v34  ;;  %v88_v37 = vsel %vm84_vm2, %v445_v33, %v446_v32 }
  0xff   :  { %v454_v38 = vpop.permute.xlu0 %453  ;;  %v449_v39 = vpop.permute.xlu1 %448  ;;  %v244_v40 = vpack.c.bf16 %v88_v37, %v87_v36 }
 0x100   :  { %v456_v41 = vunpack.i.h.bf16 %v454_v38  ;;  %v455_v42 = vunpack.i.l.bf16 %v454_v38  ;;  %v451_v43 = vunpack.i.h.bf16 %v449_v39  ;;  %v450_v44 = vunpack.i.l.bf16 %v449_v39 }
 0x101   :  { %379 = vmatprep.subr.bf16.mxu0 %v244_v40 }
 0x102   :  { %380 = vmatpush3.bf16.msra.mxu0 %v244_v40  ;;  %v85_v45 = vsel %vm84_vm2, %v450_v44, %v451_v43  ;;  %v86_v46 = vsel %vm84_vm2, %v455_v42, %v456_v41 }
 0x103   :  { %v243_v47 = vpack.c.bf16 %v86_v46, %v85_v45 }
 0x105   :  { %381 = vmatprep.subr.bf16.mxu0 %v243_v47 }
 0x106   :  { %382 = vmatpush3.bf16.msra.mxu0 %v243_v47 }
 0x107   :  { %383 = vmatprep.subr.bf16.mxu0 %v531_v51 }
 0x10a   :  { %384 = vmatpush3.bf16.msra.mxu0 %v531_v51 }
 0x10b   :  { %385 = vmatprep.subr.bf16.mxu0 %v533_v56 }
 0x10e   :  { %386 = vmatpush3.bf16.msra.mxu0 %v533_v56 }
 0x111   :  { %388 = vmatmul.mubr.bf16.vlgmr.msra.gmra.mxu0 %v458_v48 }
 0x1d1   :  { %v389_v49 = vpop.f32.mrf.mxu0 }
 0x1d2   :  { %341 = vst [vmem:[%s604_s3 + $0x10] sm:$0xff] %v389_v49  ;;  %314 = vadd.xlane.f32.xlu0 %v389_v49  ;;  %v325_v55 = vmul.f32 %v389_v49, %v389_v49 }
 0x1d3   :  { %v295_v50 = vpop.f32.mrf.mxu0 }
 0x1d4   :  { %339 = vst [vmem:[%s604_s3] sm:$0xff] %v295_v50  ;;  %310 = vadd.xlane.f32.xlu1 %v295_v50  ;;  %v323_v51 = vmul.f32 %v295_v50, %v295_v50 }
 0x1d5   :  { %v390_v52 = vpop.f32.mrf.mxu0 }
 0x1d6   :  { %342 = vst [vmem:[%s604_s3 + $0x18] sm:$0xff] %v390_v52  ;;  %327 = vadd.xlane.f32.xlu0 %v323_v51  ;;  %v326_v56 = vmul.f32 %v390_v52, %v390_v52 }
 0x1d7   :  { %v298_v53 = vpop.f32.mrf.mxu0 }
 0x1d8   :  { %340 = vst [vmem:[%s604_s3 + $0x8] sm:$0xff] %v298_v53  ;;  %316 = vadd.xlane.f32.xlu1 %v390_v52  ;;  %v324_v54 = vmul.f32 %v298_v53, %v298_v53 }
 0x1da   :  { %312 = vadd.xlane.f32.xlu0 %v298_v53 }
 0x1dc   :  { %329 = vadd.xlane.f32.xlu1 %v324_v54 }
 0x1de   :  { %331 = vadd.xlane.f32.xlu0 %v325_v55 }
 0x1e0   :  { %333 = vadd.xlane.f32.xlu1 %v326_v56 }
 0x25b   :  { %v315_v57 = vpop.xlane.xlu0 %314 }
 0x25c   :  { %321 = vst.msk [vmem:[%s605_s4 + $0x10] sm:$0xff] %vm318_vm3, %v315_v57 }
 0x25d   :  { %v311_v58 = vpop.xlane.xlu1 %310 }
 0x25e   :  { %319 = vst.msk [vmem:[%s605_s4] sm:$0xff] %vm318_vm3, %v311_v58 }
 0x25f   :  { %v328_v59 = vpop.xlane.xlu0 %327 }
 0x260   :  { %335 = vst.msk [vmem:[%s606_s5] sm:$0xff] %vm318_vm3, %v328_v59 }
 0x261   :  { %v317_v60 = vpop.xlane.xlu1 %316 }
 0x262   :  { %322 = vst.msk [vmem:[%s605_s4 + $0x18] sm:$0xff] %vm318_vm3, %v317_v60 }
 0x263   :  { %v313_v61 = vpop.xlane.xlu0 %312 }
 0x264   :  { %320 = vst.msk [vmem:[%s605_s4 + $0x8] sm:$0xff] %vm318_vm3, %v313_v61 }
 0x265   :  { %v330_v62 = vpop.xlane.xlu1 %329 }
 0x266   :  { %336 = vst.msk [vmem:[%s606_s5 + $0x8] sm:$0xff] %vm318_vm3, %v330_v62 }
 0x267   :  { %v332_v63 = vpop.xlane.xlu0 %331 }
 0x268   :  { %337 = vst.msk [vmem:[%s606_s5 + $0x10] sm:$0xff] %vm318_vm3, %v332_v63 }
 0x269   :  { %v334_v0 = vpop.xlane.xlu1 %333 }
 0x26a   :  { %338 = vst.msk [vmem:[%s606_s5 + $0x18] sm:$0xff] %vm318_vm3, %v334_v0 }

// kernel: drnet_forward.57
= control target key start
LH: loop header
LB: loop body
LE: loop exit
PB: predicated region body
PF: predicated region fallthrough
CT: control target
= control target key end

     0   :  { %v177_v3 = vmov 0   ;;  %vm40_vm0 = vcmask 261120   ;;  %vm144_vm1 = vcmask 7168   ;;  %s272_s1 = inlined_call_operand.vmem [shape: f32[32,512], index: 1, kind: input, shape index: {}]   ;;  %s273_s0 = inlined_call_operand.vmem [shape: bf16[8,32], index: 0, kind: input, shape index: {}]   ;;  %s274_s2 = inlined_call_operand.vmem [shape: f32[8,512], index: 2, kind: output, shape index: {0}]   ;;  %s275_s3 = inlined_call_operand.vmem [shape: f32[8,1], index: 3, kind: output, shape index: {1}]   ;;  %s276_s4 = inlined_call_operand.vmem [shape: f32[8,1], index: 4, kind: output, shape index: {2}]  }
   0x1   :  { %v25_v0 = vld [vmem:[%s272_s1 + $0x48] sm:$0xff]  ;;  %v27_v2 = vld [vmem:[%s272_s1 + $0x58] sm:$0xff]  ;;  %76 = vmatprep.mubr.bf16.mxu0 %v177_v3  ;;  %117 = vmatprep.mubr.bf16.mxu1 %v177_v3  ;;  %v24_v6 = vld [vmem:[%s272_s1 + $0x40] sm:$0xff] }
   0x2   :  { %v29_v1 = vld [vmem:[%s272_s1 + $0x68] sm:$0xff]  ;;  %v31_v5 = vld [vmem:[%s272_s1 + $0x78] sm:$0xff]  ;;  %v28_v7 = vld [vmem:[%s272_s1 + $0x60] sm:$0xff] }
   0x3   :  { %v37_v4 = vpack.c.bf16 %v29_v1, %v25_v0  ;;  %v39_v8 = vpack.c.bf16 %v31_v5, %v27_v2  ;;  %v36_v9 = vpack.c.bf16 %v28_v7, %v24_v6  ;;  %v26_v10 = vld [vmem:[%s272_s1 + $0x50] sm:$0xff]  ;;  %v17_v12 = vld [vmem:[%s272_s1 + $0x8] sm:$0xff]  ;;  %v19_v15 = vld [vmem:[%s272_s1 + $0x18] sm:$0xff] }
   0x4   :  { %v30_v11 = vld [vmem:[%s272_s1 + $0x70] sm:$0xff]  ;;  %v21_v14 = vld [vmem:[%s272_s1 + $0x28] sm:$0xff]  ;;  %v23_v16 = vld [vmem:[%s272_s1 + $0x38] sm:$0xff] }
   0x5   :  { %56 = vmatprep.subr.bf16.mxu0 %v37_v4  ;;  %v38_v13 = vpack.c.bf16 %v30_v11, %v26_v10  ;;  %97 = vmatprep.subr.bf16.mxu1 %v39_v8  ;;  %v33_v17 = vpack.c.bf16 %v21_v14, %v17_v12  ;;  %v35_v18 = vpack.c.bf16 %v23_v16, %v19_v15  ;;  %v16_v19 = vld [vmem:[%s272_s1] sm:$0xff]  ;;  %v18_v21 = vld [vmem:[%s272_s1 + $0x10] sm:$0xff] }
   0x6   :  { %57 = vmatpush1.bf16.msra.mxu0 %v36_v9  ;;  %v20_v20 = vld [vmem:[%s272_s1 + $0x20] sm:$0xff]  ;;  %v22_v23 = vld [vmem:[%s272_s1 + $0x30] sm:$0xff] }
   0x7   :  { %98 = vmatpush1.bf16.msra.mxu1 %v38_v13  ;;  %v32_v22 = vpack.c.bf16 %v20_v20, %v16_v19  ;;  %58 = vmatprep.subr.bf16.mxu0 %v33_v17  ;;  %v34_v24 = vpack.c.bf16 %v22_v23, %v18_v21  ;;  %v15_v25 = vld [vmem:[%s273_s0] sm:$0xf] }
   0x8   :  { %99 = vmatprep.subr.bf16.mxu1 %v35_v18 }
   0xa   :  { %59 = vmatpush1.bf16.msra.mxu0 %v32_v22 }
   0xb   :  { %100 = vmatpush1.bf16.msra.mxu1 %v34_v24 }
   0xd   :  { %174 = vmatmul.mubr.msk.bf16.vlgmr.msra.gmra.mxu0 %vm40_vm0, %v15_v25 }
   0xe   :  { %175 = vmatmul.mubr.msk.bf16.vlgmr.msra.gmra.mxu1 %vm40_vm0, %v15_v25 }
  0xcd   :  { %v78_v26 = vpop.f32.mrf.mxu0 }
  0xce   :  { %158 = vst [vmem:[%s274_s2] sm:$0xff] %v78_v26  ;;  %v119_v27 = vpop.f32.mrf.mxu1  ;;  %v131_v29 = vmul.f32 %v78_v26, %v78_v26 }
  0xcf   :  { %160 = vst [vmem:[%s274_s2 + $0x10] sm:$0xff] %v119_v27  ;;  %v80_v28 = vpop.f32.mrf.mxu0  ;;  %v133_v30 = vmul.f32 %v119_v27, %v119_v27 }
  0xd0   :  { %v126_v31 = vadd.f32 %v80_v28, %v78_v26  ;;  %v132_v32 = vmul.f32 %v80_v28, %v80_v28  ;;  %159 = vst [vmem:[%s274_s2 + $0x8] sm:$0xff] %v80_v28  ;;  %v121_v33 = vpop.f32.mrf.mxu1 }
  0xd1   :  { %161 = vst [vmem:[%s274_s2 + $0x18] sm:$0xff] %v121_v33  ;;  %v82_v34 = vpop.f32.mrf.mxu0  ;;  %v134_v42 = vmul.f32 %v121_v33, %v121_v33 }
  0xd2   :  { %v123_v35 = vpop.f32.mrf.mxu1  ;;  %v127_v36 = vadd.f32 %v126_v31, %v119_v27  ;;  %v135_v37 = vadd.f32 %v132_v32, %v131_v29 }
  0xd3   :  { %v83_v38 = vpop.f32.mrf.mxu0 }
  0xd4   :  { %v124_v39 = vpop.f32.mrf.mxu1  ;;  %v128_v40 = vadd.f32 %v127_v36, %v121_v33  ;;  %v136_v41 = vadd.f32 %v135_v37, %v133_v30 }
  0xd6   :  { %129 = vadd.xlane.f32.xlu0 %v128_v40  ;;  %v137_v43 = vadd.f32 %v136_v41, %v134_v42 }
  0xda   :  { %138 = vadd.xlane.f32.xlu0 %v137_v43 }
 0x15f   :  { %v130_v44 = vpop.xlane.xlu0 %129 }
 0x160   :  { %145 = vst.msk [vmem:[%s275_s3] sm:$0xff] %vm144_vm1, %v130_v44 }
 0x163   :  { %v139_v45 = vpop.xlane.xlu0 %138 }
 0x164   :  { %146 = vst.msk [vmem:[%s276_s4] sm:$0xff] %vm144_vm1, %v139_v45 }

// kernel: drnet_forward.58
= control target key start
LH: loop header
LB: loop body
LE: loop exit
PB: predicated region body
PF: predicated region fallthrough
CT: control target
= control target key end

     0   :  { %v79_v0 = vmov 0   ;;  %s146_s1 = inlined_call_operand.vmem [shape: f32[8,1], index: 1, kind: input, shape index: {}]   ;;  %s147_s2 = inlined_call_operand.vmem [shape: f32[8,1], index: 2, kind: input, shape index: {}]   ;;  %s148_s3 = inlined_call_operand.vmem [shape: f32[8,1], index: 3, kind: input, shape index: {}]   ;;  %s149_s4 = inlined_call_operand.vmem [shape: f32[8,1], index: 4, kind: input, shape index: {}]   ;;  %s150_s0 = inlined_call_operand.vmem [shape: f32[8,512], index: 0, kind: input, shape index: {}]   ;;  %s151_s5 = inlined_call_operand.vmem [shape: f32[8,512], index: 5, kind: output, shape index: {}]  }
   0x1   :  { %76 = vset.pattern.permute.xlu0 %v79_v0  ;;  %v20_v1 = vld [vmem:[%s146_s1] sm:$0xff]  ;;  %v34_v16 = vld [vmem:[%s150_s0 + $0x8] sm:$0xff]  ;;  %v35_v17 = vld [vmem:[%s150_s0 + $0x10] sm:$0xff] }
   0x2   :  { %v22_v2 = vld [vmem:[%s147_s2] sm:$0xff]  ;;  %v21_v3 = vmul.f32 0.001953125, %v20_v1  ;;  %v36_v18 = vld [vmem:[%s150_s0 + $0x18] sm:$0xff] }
   0x3   :  { %v23_v4 = vmul.f32 0.001953125, %v22_v2  ;;  %v26_v8 = vld [vmem:[%s148_s3] sm:$0xff] }
   0x4   :  { %v24_v5 = vmul.f32 %v21_v3, %v21_v3  ;;  %v30_v11 = vld [vmem:[%s149_s4] sm:$0xff] }
   0x5   :  { %v33_v14 = vld [vmem:[%s150_s0] sm:$0xff] }
   0x6   :  { %v25_v6 = vsub.f32 %v23_v4, %v24_v5 }
   0x8   :  { %v27_v7 = vadd.f32 1e-05, %v25_v6 }
   0xa   :  { %77 = vrsqrt.f32 %v27_v7 }
  0x17   :  { %v78_v9 = vpop.eup %77 }
  0x18   :  { %v29_v10 = vmul.f32 %v78_v9, %v26_v8 }
  0x1a   :  { %39 = vperm.xlu0 %76, %v29_v10   ;;  %v31_v12 = vmul.f32 %v29_v10, %v21_v3 }
  0x1c   :  { %v32_v13 = vsub.f32 %v30_v11, %v31_v12 }
  0x1e   :  { %48 = vperm.xlu0 %76, %v32_v13  }
  0x95   :  { %v40_v15 = vpop.permute.xlu0 %39 }
  0x96   :  { %v42_v19 = vmul.f32 %v40_v15, %v33_v14  ;;  %v43_v20 = vmul.f32 %v40_v15, %v34_v16  ;;  %v44_v21 = vmul.f32 %v40_v15, %v35_v17  ;;  %v45_v22 = vmul.f32 %v40_v15, %v36_v18 }
  0x99   :  { %v49_v23 = vpop.permute.xlu0 %48 }
  0x9a   :  { %v51_v24 = vadd.f32 %v49_v23, %v42_v19  ;;  %v52_v25 = vadd.f32 %v49_v23, %v43_v20  ;;  %v53_v26 = vadd.f32 %v49_v23, %v44_v21  ;;  %v54_v27 = vadd.f32 %v49_v23, %v45_v22 }
  0x9c   :  { %vm55_vm0 = vcmp.gt.f32.partialorder %v51_v24, 0.0  ;;  %vm56_vm1 = vcmp.gt.f32.partialorder %v52_v25, 0.0  ;;  %vm57_vm2 = vcmp.gt.f32.partialorder %v53_v26, 0.0  ;;  %vm58_vm3 = vcmp.gt.f32.partialorder %v54_v27, 0.0 }
  0x9d   :  { %v59_v28 = vmul.f32 0.2, %v51_v24  ;;  %v60_v29 = vmul.f32 0.2, %v52_v25  ;;  %v61_v30 = vmul.f32 0.2, %v53_v26 }
  0x9e   :  { %v62_v31 = vmul.f32 0.2, %v54_v27 }
  0x9f   :  { %v63_v32 = vsel %vm55_vm0, %v51_v24, %v59_v28  ;;  %v64_v33 = vsel %vm56_vm1, %v52_v25, %v60_v29  ;;  %v65_v34 = vsel %vm57_vm2, %v53_v26, %v61_v30 }
  0xa0   :  { %v66_v35 = vsel %vm58_vm3, %v54_v27, %v62_v31  ;;  %67 = vst [vmem:[%s151_s5] sm:$0xff] %v63_v32  ;;  %68 = vst [vmem:[%s151_s5 + $0x8] sm:$0xff] %v64_v33 }
  0xa1   :  { %69 = vst [vmem:[%s151_s5 + $0x10] sm:$0xff] %v65_v34  ;;  %70 = vst [vmem:[%s151_s5 + $0x18] sm:$0xff] %v66_v35 }

// kernel: drnet_forward.59
= control target key start
LH: loop header
LB: loop body
LE: loop exit
PB: predicated region body
PF: predicated region fallthrough
CT: control target
= control target key end

     0   :  { %v24_v0 = vlaneseq  ;;  %s941_s22 = smov 34   ;;  %s942_s23 = smov 32   ;;  %vm602_vm0 = vcmask 277504   ;;  %vm454_vm1 = vcmask 261120   ;;  %vm528_vm2 = vcmask 269312   ;;  %s1341_s2 = inlined_call_operand.vmem [shape: f32[9,512], index: 2, kind: input, shape index: {}]   ;;  %s1342_s1 = inlined_call_operand.vmem [shape: f32[8,546], index: 1, kind: input, shape index: {}]   ;;  %s1343_s0 = inlined_call_operand.vmem [shape: bf16[8,72], index: 0, kind: input, shape index: {}]   ;;  %s1344_s3 = inlined_call_operand.vmem [shape: f32[8,512], index: 3, kind: output, shape index: {0}]   ;;  %s1345_s4 = inlined_call_operand.vmem [shape: f32[8,1], index: 4, kind: output, shape index: {1}]   ;;  %s1346_s5 = inlined_call_operand.vmem [shape: f32[8,1], index: 5, kind: output, shape index: {2}]  }
   0x1   :  { %v839_v2 = vld [vmem:[%s1341_s2 + $0x20] ss:$8 sm:$0xf]  ;;  %v837_v6 = vld [vmem:[%s1341_s2 + $0x6] ss:$8 sm:$0xf] }
   0x2   :  { %v25_v1 = vshrl.u32 %v24_v0, 7  ;;  %v838_v13 = vld [vmem:[%s1341_s2 + $0x7] ss:$8 sm:$0xf]  ;;  %s943_s26 = smov 33   ;;  %s944_s6 = smov 17  }
   0x3   :  { %v835_v19 = vld [vmem:[%s1341_s2 + $0x4] ss:$8 sm:$0xf]  ;;  %v836_v22 = vld [vmem:[%s1341_s2 + $0x5] ss:$8 sm:$0xf] }
   0x4   :  { %v991_v3 = vsub.s32 2, %v25_v1  ;;  %v993_v4 = vsub.s32 0, %v25_v1  ;;  %v995_v5 = vsub.s32 1, %v25_v1  ;;  %v1014_v16 = vsub.s32 3, %v25_v1  ;;  %s945_s7 = smov 18   ;;  %s946_s12 = smov 2  }
   0x5   :  { %v833_v29 = vld [vmem:[%s1341_s2 + $0x2] ss:$8 sm:$0xf]  ;;  %v834_v32 = vld [vmem:[%s1341_s2 + $0x3] ss:$8 sm:$0xf] }
   0x6   :  { %v589_v7 = vrot.slane %v839_v2, %v991_v3  ;;  %v581_v8 = vrot.slane %v839_v2, %v993_v4  ;;  %v585_v9 = vrot.slane %v839_v2, %v995_v5  ;;  %v433_v10 = vrot.slane %v837_v6, %v993_v4  ;;  %s947_s13 = smov 16   ;;  %v832_v39 = vld [vmem:[%s1341_s2 + $0x1] ss:$8 sm:$0xf]  ;;  %s948_s16 = smov 1  }
   0x7   :  { %v437_v11 = vrot.slane %v837_v6, %v995_v5  ;;  %v441_v12 = vrot.slane %v837_v6, %v991_v3  ;;  %v507_v14 = vrot.slane %v838_v13, %v993_v4  ;;  %v511_v15 = vrot.slane %v838_v13, %v995_v5  ;;  %v1077_v54 = vld [vmem:[%s1342_s1 + $0x20] sm:$0xff]  ;;  %s949_s19 = smov 94   ;;  %s950_s20 = smov 96  }
   0x8   :  { %598 = vrot.lane.b32.xlu1 %v589_v7, %s941_s22  ;;  %594 = vrot.lane.b32.xlu0 %v581_v8, %s941_s22  ;;  %v515_v17 = vrot.slane %v838_v13, %v991_v3  ;;  %v593_v18 = vrot.slane %v839_v2, %v1014_v16  ;;  %v289_v20 = vrot.slane %v835_v19, %v995_v5  ;;  %s951_s21 = smov 95   ;;  %s954_s30 = smov 126   ;;  %vm380_vm3 = vcmask 146432  }
   0x9   :  { %v285_v21 = vrot.slane %v835_v19, %v993_v4  ;;  %v359_v23 = vrot.slane %v836_v22, %v993_v4  ;;  %v293_v24 = vrot.slane %v835_v19, %v991_v3  ;;  %v367_v25 = vrot.slane %v836_v22, %v991_v3  ;;  %s957_s8 = smov 127  }
   0xa   :  { %v363_v26 = vrot.slane %v836_v22, %v995_v5  ;;  %v519_v27 = vrot.slane %v838_v13, %v1014_v16  ;;  %v445_v28 = vrot.slane %v837_v6, %v1014_v16  ;;  %v141_v30 = vrot.slane %v833_v29, %v995_v5 }
   0xb   :  { %v137_v31 = vrot.slane %v833_v29, %v993_v4  ;;  %v211_v33 = vrot.slane %v834_v32, %v993_v4  ;;  %v145_v34 = vrot.slane %v833_v29, %v991_v3  ;;  %v219_v35 = vrot.slane %v834_v32, %v991_v3 }
   0xc   :  { %596 = vrot.lane.b32.xlu0 %v585_v9, %s941_s22  ;;  %446 = vrot.lane.b32.xlu1 %v433_v10, %s942_s23  ;;  %v215_v36 = vrot.slane %v834_v32, %v995_v5  ;;  %v371_v37 = vrot.slane %v836_v22, %v1014_v16  ;;  %v297_v38 = vrot.slane %v835_v19, %v1014_v16  ;;  %v1132_v22 = vld [vmem:[%s1342_s1] sm:$0xff]  ;;  %vm306_vm4 = vcmask 138240  }
   0xd   :  { %v67_v40 = vrot.slane %v832_v39, %v995_v5  ;;  %v63_v41 = vrot.slane %v832_v39, %v993_v4  ;;  %v149_v42 = vrot.slane %v833_v29, %v1014_v16  ;;  %v71_v43 = vrot.slane %v832_v39, %v991_v3 }
   0xe   :  { %v75_v44 = vrot.slane %v832_v39, %v1014_v16  ;;  %v223_v45 = vrot.slane %v834_v32, %v1014_v16  ;;  %v1157_v32 = vld [vmem:[%s1342_s1 + $0x10] sm:$0xff]  ;;  %vm232_vm5 = vcmask 130048   ;;  %vm158_vm6 = vcmask 15360  }
   0xf   :  { %vm84_vm7 = vcmask 7168   ;;  %vm631_vm8 = vcmask 769024   ;;  %vm705_vm9 = vcmask 1043456   ;;  %vm483_vm10 = vcmask 785408  }
  0x10   :  { %448 = vrot.lane.b32.xlu0 %v437_v11, %s942_s23  ;;  %450 = vrot.lane.b32.xlu1 %v441_v12, %s942_s23  ;;  %vm557_vm11 = vcmask 777216   ;;  %vm409_vm12 = vcmask 900096   ;;  %vm335_vm13 = vcmask 908288   ;;  %vm261_vm14 = vcmask 916480  }
  0x11   :  { %vm187_vm15 = vcmask 1031168  }
  0x14   :  { %520 = vrot.lane.b32.xlu0 %v507_v14, %s943_s26  ;;  %522 = vrot.lane.b32.xlu1 %v511_v15, %s943_s26 }
  0x18   :  { %524 = vrot.lane.b32.xlu0 %v515_v17, %s943_s26  ;;  %600 = vrot.lane.b32.xlu1 %v593_v18, %s941_s22  ;;  %s952_s22 = smov 111  }
  0x1c   :  { %300 = vrot.lane.b32.xlu1 %v289_v20, %s944_s6  ;;  %298 = vrot.lane.b32.xlu0 %v285_v21, %s944_s6  ;;  %v1126_v20 = vld [vmem:[%s1342_s1 + $0x8] sm:$0xff] }
  0x20   :  { %372 = vrot.lane.b32.xlu1 %v359_v23, %s945_s7  ;;  %302 = vrot.lane.b32.xlu0 %v293_v24, %s944_s6 }
  0x24   :  { %376 = vrot.lane.b32.xlu1 %v367_v25, %s945_s7  ;;  %374 = vrot.lane.b32.xlu0 %v363_v26, %s945_s7 }
  0x28   :  { %526 = vrot.lane.b32.xlu1 %v519_v27, %s943_s26  ;;  %452 = vrot.lane.b32.xlu0 %v445_v28, %s942_s23  ;;  %s953_s23 = smov 110  }
  0x2c   :  { %152 = vrot.lane.b32.xlu1 %v141_v30, %s946_s12  ;;  %150 = vrot.lane.b32.xlu0 %v137_v31, %s946_s12  ;;  %v1149_v30 = vld [vmem:[%s1342_s1 + $0x18] sm:$0xff]  ;;  %s955_s1 = smov 112  }
  0x30   :  { %224 = vrot.lane.b32.xlu1 %v211_v33, %s947_s13  ;;  %154 = vrot.lane.b32.xlu0 %v145_v34, %s946_s12 }
  0x34   :  { %228 = vrot.lane.b32.xlu1 %v219_v35, %s947_s13  ;;  %226 = vrot.lane.b32.xlu0 %v215_v36, %s947_s13 }
  0x38   :  { %378 = vrot.lane.b32.xlu1 %v371_v37, %s945_s7  ;;  %304 = vrot.lane.b32.xlu0 %v297_v38, %s944_s6 }
  0x3c   :  { %78 = vrot.lane.b32.xlu1 %v67_v40, %s948_s16  ;;  %76 = vrot.lane.b32.xlu0 %v63_v41, %s948_s16 }
  0x40   :  { %156 = vrot.lane.b32.xlu1 %v149_v42, %s946_s12  ;;  %80 = vrot.lane.b32.xlu0 %v71_v43, %s948_s16 }
  0x44   :  { %82 = vrot.lane.b32.xlu1 %v75_v44, %s948_s16  ;;  %230 = vrot.lane.b32.xlu0 %v223_v45, %s947_s13 }
  0x7a   :  { %v1064_v46 = vpop.permute.xlu1 %598  ;;  %v595_v47 = vpop.permute.xlu0 %594 }
  0x7b   :  { %v611_v28 = vmul.f32 %v595_v47, %v1132_v22 }
  0x7e   :  { %v597_v48 = vpop.permute.xlu0 %596  ;;  %v1066_v49 = vpop.permute.xlu1 %446 }
  0x7f   :  { %v603_v21 = vsel %vm602_vm0, %v595_v47, %v597_v48  ;;  %v604_v33 = vsel %vm602_vm0, %v597_v48, %v1064_v46 }
  0x80   :  { %v612_v23 = vmul.f32 %v603_v21, %v1126_v20  ;;  %v613_v42 = vmul.f32 %v604_v33, %v1157_v32 }
  0x82   :  { %v449_v50 = vpop.permute.xlu0 %448  ;;  %v1068_v51 = vpop.permute.xlu1 %450  ;;  %v861_v36 = vpack.i.bf16 %v612_v23, %v611_v28 }
  0x83   :  { %v455_v26 = vsel %vm454_vm1, %v1066_v49, %v449_v50  ;;  %v456_v29 = vsel %vm454_vm1, %v449_v50, %v1068_v51 }
  0x84   :  { %v464_v34 = vmul.f32 %v1126_v20, %v455_v26  ;;  %v465_v37 = vmul.f32 %v1157_v32, %v456_v29 }
  0x86   :  { %v1070_v52 = vpop.permute.xlu0 %520  ;;  %v1072_v53 = vpop.permute.xlu1 %522  ;;  %v871_v47 = vpack.i.bf16 %v465_v37, %v464_v34 }
  0x87   :  { %v529_v43 = vsel %vm528_vm2, %v1070_v52, %v1072_v53 }
  0x88   :  { %v538_v48 = vmul.f32 %v1126_v20, %v529_v43 }
  0x8a   :  { %v525_v55 = vpop.permute.xlu0 %524  ;;  %v601_v56 = vpop.permute.xlu1 %600 }
  0x8b   :  { %v615_v57 = vmul.f32 %v601_v56, %v1077_v54  ;;  %v605_v31 = vsel %vm602_vm0, %v1064_v46, %v601_v56  ;;  %v530_v38 = vsel %vm528_vm2, %v1072_v53, %v525_v55  ;;  %v537_v56 = vmul.f32 %v1132_v22, %v1070_v52 }
  0x8c   :  { %v614_v39 = vmul.f32 %v605_v31, %v1149_v30  ;;  %v539_v44 = vmul.f32 %v1157_v32, %v530_v38  ;;  %vm113_vm0 = vcmask 1039360  }
  0x8d   :  { %629 = vrot.lane.b32.xlu0 %v615_v57, %s949_s19 }
  0x8e   :  { %v1081_v58 = vpop.permute.xlu1 %300  ;;  %v1083_v59 = vpop.permute.xlu0 %298  ;;  %v866_v46 = vpack.i.bf16 %v614_v39, %v613_v42 }
  0x92   :  { %v1085_v60 = vpop.permute.xlu1 %372  ;;  %v1087_v61 = vpop.permute.xlu0 %302 }
  0x93   :  { %v308_v57 = vsel %vm306_vm4, %v1081_v58, %v1087_v61 }
  0x96   :  { %v1089_v62 = vpop.permute.xlu1 %376  ;;  %v1091_v63 = vpop.permute.xlu0 %374 }
  0x97   :  { %v381_v50 = vsel %vm380_vm3, %v1085_v60, %v1091_v63  ;;  %v382_v53 = vsel %vm380_vm3, %v1091_v63, %v1089_v62 }
  0x98   :  { %v391_v63 = vmul.f32 %v1157_v32, %v382_v53 }
  0x9a   :  { %v527_v0 = vpop.permute.xlu1 %526  ;;  %v1093_v1 = vpop.permute.xlu0 %452 }
  0x9b   :  { %v541_v2 = vmul.f32 %v1077_v54, %v527_v0  ;;  %v467_v6 = vmul.f32 %v1077_v54, %v1093_v1  ;;  %v531_v41 = vsel %vm528_vm2, %v525_v55, %v527_v0  ;;  %v457_v55 = vsel %vm454_vm1, %v1068_v51, %v1093_v1 }
  0x9c   :  { %v540_v45 = vmul.f32 %v1149_v30, %v531_v41  ;;  %v876_v0 = vpack.i.bf16 %v539_v44, %v538_v48  ;;  %v463_v1 = vmul.f32 %v1132_v22, %v1066_v49  ;;  %vm701_vm1 = vcmask 588800  }
  0x9d   :  { %481 = vrot.lane.b32.xlu1 %v467_v6, %s950_s20  ;;  %555 = vrot.lane.b32.xlu0 %v541_v2, %s951_s21  ;;  %v390_v2 = vmul.f32 %v1126_v20, %v381_v50  ;;  %v466_v6 = vmul.f32 %v1149_v30, %v457_v55  ;;  %v956_v50 = vmov 0  }
  0x9e   :  { %v1100_v7 = vpop.permute.xlu1 %152  ;;  %v1102_v8 = vpop.permute.xlu0 %150  ;;  %v886_v51 = vpack.i.bf16 %v540_v45, %v537_v56  ;;  %750 = vmatprep.mubr.bf16.mxu0 %v956_v50  ;;  %791 = vmatprep.mubr.bf16.mxu1 %v956_v50 }
  0x9f   :  { %v881_v23 = vpack.i.bf16 %v466_v6, %v463_v1  ;;  %v896_v26 = vpack.i.bf16 %v391_v63, %v390_v2 }
  0xa2   :  { %v1104_v9 = vpop.permute.xlu1 %224  ;;  %v1106_v10 = vpop.permute.xlu0 %154 }
  0xa3   :  { %v241_v41 = vmul.f32 %v1132_v22, %v1104_v9 }
  0xa6   :  { %v1108_v11 = vpop.permute.xlu1 %228  ;;  %v1110_v12 = vpop.permute.xlu0 %226 }
  0xa7   :  { %v233_v49 = vsel %vm232_vm5, %v1104_v9, %v1110_v12 }
  0xa8   :  { %v242_v29 = vmul.f32 %v1126_v20, %v233_v49 }
  0xaa   :  { %v379_v13 = vpop.permute.xlu1 %378  ;;  %v1112_v14 = vpop.permute.xlu0 %304 }
  0xab   :  { %v393_v15 = vmul.f32 %v1077_v54, %v379_v13  ;;  %v319_v17 = vmul.f32 %v1077_v54, %v1112_v14  ;;  %v383_v52 = vsel %vm380_vm3, %v1089_v62, %v379_v13  ;;  %v309_v13 = vsel %vm306_vm4, %v1087_v61, %v1112_v14 }
  0xac   :  { %v392_v21 = vmul.f32 %v1149_v30, %v383_v52  ;;  %v318_v33 = vmul.f32 %v1149_v30, %v309_v13  ;;  %v160_v61 = vsel %vm158_vm6, %v1100_v7, %v1106_v10  ;;  %v315_v14 = vmul.f32 %v1132_v22, %v1083_v59 }
  0xad   :  { %333 = vrot.lane.b32.xlu1 %v319_v17, %s952_s22  ;;  %407 = vrot.lane.b32.xlu0 %v393_v15, %s953_s23  ;;  %v307_v15 = vsel %vm306_vm4, %v1083_v59, %v1081_v58  ;;  %v317_v17 = vmul.f32 %v1157_v32, %v308_v57  ;;  %v234_v58 = vsel %vm232_vm5, %v1110_v12, %v1108_v11 }
  0xae   :  { %v1119_v18 = vpop.permute.xlu1 %78  ;;  %v1121_v19 = vpop.permute.xlu0 %76  ;;  %v316_v62 = vmul.f32 %v1126_v20, %v307_v15  ;;  %v243_v31 = vmul.f32 %v1157_v32, %v234_v58  ;;  %v169_v37 = vmul.f32 %v1157_v32, %v160_v61  ;;  %v901_v39 = vpack.i.bf16 %v318_v33, %v315_v14 }
  0xaf   :  { %v93_v9 = vmul.f32 %v1132_v22, %v1121_v19  ;;  %v85_v45 = vsel %vm84_vm7, %v1121_v19, %v1119_v18 }
  0xb0   :  { %v891_v28 = vpack.i.bf16 %v317_v17, %v316_v62 }
  0xb2   :  { %v1135_v24 = vpop.permute.xlu1 %156  ;;  %v1137_v25 = vpop.permute.xlu0 %80 }
  0xb3   :  { %v171_v27 = vmul.f32 %v1077_v54, %v1135_v24  ;;  %v161_v59 = vsel %vm158_vm6, %v1106_v10, %v1135_v24  ;;  %v86_v10 = vsel %vm84_vm7, %v1119_v18, %v1137_v25  ;;  %v167_v24 = vmul.f32 %v1132_v22, %v1102_v8 }
  0xb5   :  { %185 = vrot.lane.b32.xlu0 %v171_v27, %s954_s30  ;;  %v389_v27 = vmul.f32 %v1132_v22, %v1085_v60 }
  0xb6   :  { %v231_v35 = vpop.permute.xlu0 %230  ;;  %v83_v34 = vpop.permute.xlu1 %82 }
  0xb7   :  { %v245_v40 = vmul.f32 %v1077_v54, %v231_v35  ;;  %v906_v12 = vpack.i.bf16 %v392_v21, %v389_v27  ;;  %v235_v60 = vsel %vm232_vm5, %v1108_v11, %v231_v35  ;;  %v87_v11 = vsel %vm84_vm7, %v1137_v25, %v83_v34 }
  0xb8   :  { %v244_v38 = vmul.f32 %v1149_v30, %v235_v60  ;;  %v96_v42 = vmul.f32 %v1149_v30, %v87_v11  ;;  %v97_v53 = vmul.f32 %v1077_v54, %v83_v34 }
  0xb9   :  { %259 = vrot.lane.b32.xlu1 %v245_v40, %s955_s1  ;;  %862 = vrot.lane.b32.xlu0 %v861_v36, %s949_s19  ;;  %v159_v36 = vsel %vm158_vm6, %v1102_v8, %v1100_v7  ;;  %v916_v40 = vpack.i.bf16 %v243_v31, %v242_v29  ;;  %v170_v7 = vmul.f32 %v1149_v30, %v161_v59 }
  0xba   :  { %v168_v35 = vmul.f32 %v1126_v20, %v159_v36  ;;  %v926_v43 = vpack.i.bf16 %v244_v38, %v241_v41  ;;  %v936_v48 = vpack.i.bf16 %v96_v42, %v93_v9  ;;  %v94_v8 = vmul.f32 %v1126_v20, %v85_v45 }
  0xbc   :  { %v911_v44 = vpack.i.bf16 %v169_v37, %v168_v35 }
  0xbd   :  { %867 = vrot.lane.b32.xlu1 %v866_v46, %s949_s19  ;;  %872 = vrot.lane.b32.xlu0 %v871_v47, %s950_s20  ;;  %v95_v46 = vmul.f32 %v1157_v32, %v86_v10  ;;  %v921_v47 = vpack.i.bf16 %v170_v7, %v167_v24 }
  0xbf   :  { %v931_v25 = vpack.i.bf16 %v95_v46, %v94_v8 }
  0xc1   :  { %877 = vrot.lane.b32.xlu1 %v876_v0, %s951_s21  ;;  %887 = vrot.lane.b32.xlu0 %v886_v51, %s951_s21 }
  0xc5   :  { %882 = vrot.lane.b32.xlu1 %v881_v23, %s950_s20  ;;  %897 = vrot.lane.b32.xlu0 %v896_v26, %s953_s23 }
  0xc9   :  { %892 = vrot.lane.b32.xlu1 %v891_v28, %s952_s22  ;;  %907 = vrot.lane.b32.xlu0 %v906_v12, %s953_s23 }
  0xcd   :  { %902 = vrot.lane.b32.xlu1 %v901_v39, %s952_s22  ;;  %917 = vrot.lane.b32.xlu0 %v916_v40, %s955_s1 }
  0xd1   :  { %927 = vrot.lane.b32.xlu0 %v926_v43, %s955_s1  ;;  %912 = vrot.lane.b32.xlu1 %v911_v44, %s954_s30 }
  0xd5   :  { %922 = vrot.lane.b32.xlu1 %v921_v47, %s954_s30  ;;  %937 = vrot.lane.b32.xlu0 %v936_v48, %s957_s8 }
  0xd9   :  { %932 = vrot.lane.b32.xlu1 %v931_v25, %s957_s8 }
  0xdd   :  { %111 = vrot.lane.b32.xlu1 %v97_v53, %s957_s8 }
  0xff   :  { %v630_v55 = vpop.permute.xlu0 %629 }
 0x10f   :  { %v556_v18 = vpop.permute.xlu0 %555  ;;  %v482_v56 = vpop.permute.xlu1 %481 }
 0x11f   :  { %v1263_v19 = vpop.permute.xlu0 %407  ;;  %v1265_v57 = vpop.permute.xlu1 %333 }
 0x127   :  { %v1267_v0 = vpop.permute.xlu0 %185 }
 0x12b   :  { %v1269_v2 = vpop.permute.xlu1 %259  ;;  %v863_v63 = vpop.permute.xlu0 %862 }
 0x12c   :  { %v865_v6 = vunpack.i.h.bf16 %v863_v63  ;;  %v864_v51 = vunpack.i.l.bf16 %v863_v63 }
 0x12e   :  { %v632_v52 = vsel %vm631_vm8, %v864_v51, %v865_v6 }
 0x12f   :  { %v868_v1 = vpop.permute.xlu1 %867  ;;  %v873_v15 = vpop.permute.xlu0 %872  ;;  %v697_v23 = vpack.c.bf16 %v632_v52, %v632_v52 }
 0x130   :  { %v870_v54 = vunpack.i.h.bf16 %v868_v1  ;;  %v869_v17 = vunpack.i.l.bf16 %v868_v1  ;;  %v875_v21 = vunpack.i.h.bf16 %v873_v15  ;;  %v874_v26 = vunpack.i.l.bf16 %v873_v15 }
 0x131   :  { %v707_v14 = vsel %vm705_vm9, %v697_v23, 0 }
 0x132   :  { %v633_v62 = vsel %vm631_vm8, %v865_v6, %v869_v17  ;;  %v635_v49 = vsel %vm631_vm8, %v870_v54, %v630_v55  ;;  %v634_v58 = vsel %vm631_vm8, %v869_v17, %v870_v54  ;;  %v485_v36 = vsel %vm483_vm10, %v874_v26, %v875_v21 }
 0x133   :  { %v878_v13 = vpop.permute.xlu1 %877  ;;  %v888_v27 = vpop.permute.xlu0 %887  ;;  %v698_v28 = vpack.c.bf16 %v633_v62, %v633_v62  ;;  %v700_v29 = vpack.c.bf16 %v635_v49, %v635_v49  ;;  %v699_v31 = vpack.c.bf16 %v634_v58, %v634_v58  ;;  %v22_v49 = vld [vmem:[%s1341_s2] ss:$8 sm:$0xf] }
 0x134   :  { %v880_v33 = vunpack.i.h.bf16 %v878_v13  ;;  %v879_v12 = vunpack.i.l.bf16 %v878_v13  ;;  %v890_v61 = vunpack.i.h.bf16 %v888_v27  ;;  %v889_v60 = vunpack.i.l.bf16 %v888_v27 }
 0x135   :  { %840 = vmatprep.subr.msk.bf16.mxu0 %vm705_vm9, %v698_v28  ;;  %842 = vmatprep.subr.msk.bf16.mxu1 %vm705_vm9, %v700_v29  ;;  %v713_v34 = vsel %vm705_vm9, %v699_v31, 0 }
 0x136   :  { %725 = vmatpush1.bf16.msra.mxu0 %v707_v14  ;;  %766 = vmatpush1.bf16.msra.mxu1 %v713_v34  ;;  %v559_v37 = vsel %vm557_vm11, %v879_v12, %v880_v33  ;;  %v558_v41 = vsel %vm557_vm11, %v889_v60, %v879_v12  ;;  %v561_v7 = vsel %vm557_vm11, %v890_v61, %v556_v18 }
 0x137   :  { %v883_v38 = vpop.permute.xlu1 %882  ;;  %v898_v39 = vpop.permute.xlu0 %897  ;;  %v694_v40 = vpack.c.bf16 %v559_v37, %v485_v36  ;;  %v560_v42 = vsel %vm557_vm11, %v880_v33, %v890_v61  ;;  %v27_v36 = vrot.slane %v22_v49, %v993_v4 }
 0x138   :  { %v885_v59 = vunpack.i.h.bf16 %v883_v38  ;;  %v884_v11 = vunpack.i.l.bf16 %v883_v38  ;;  %v900_v35 = vunpack.i.h.bf16 %v898_v39  ;;  %v899_v43 = vunpack.i.l.bf16 %v898_v39 }
 0x139   :  { %726 = vmatprep.subr.bf16.mxu0 %v694_v40  ;;  %v39_v39 = vrot.slane %v22_v49, %v1014_v16  ;;  %v35_v40 = vrot.slane %v22_v49, %v991_v3 }
 0x13a   :  { %v484_v44 = vsel %vm483_vm10, %v884_v11, %v874_v26  ;;  %v487_v10 = vsel %vm483_vm10, %v885_v59, %v482_v56  ;;  %v486_v24 = vsel %vm483_vm10, %v875_v21, %v885_v59  ;;  %v411_v18 = vsel %vm409_vm12, %v899_v43, %v900_v35 }
 0x13b   :  { %v893_v9 = vpop.permute.xlu1 %892  ;;  %v908_v45 = vpop.permute.xlu0 %907  ;;  %v693_v46 = vpack.c.bf16 %v558_v41, %v484_v44  ;;  %v696_v47 = vpack.c.bf16 %v561_v7, %v487_v10  ;;  %v695_v48 = vpack.c.bf16 %v560_v42, %v486_v24  ;;  %v44_v10 = vmul.f32 %v1132_v22, %v27_v36 }
 0x13c   :  { %v895_v50 = vunpack.i.h.bf16 %v893_v9  ;;  %v894_v8 = vunpack.i.l.bf16 %v893_v9  ;;  %v910_v25 = vunpack.i.h.bf16 %v908_v45  ;;  %v909_v53 = vunpack.i.l.bf16 %v908_v45 }
 0x13d   :  { %727 = vmatpush1.bf16.msra.mxu0 %v693_v46  ;;  %767 = vmatprep.subr.bf16.mxu1 %v696_v47  ;;  %v46_v47 = vmul.f32 %v1157_v32, %v35_v40 }
 0x13e   :  { %768 = vmatpush1.bf16.msra.mxu1 %v695_v48  ;;  %v337_v55 = vsel %vm335_vm13, %v894_v8, %v895_v50  ;;  %v410_v15 = vsel %vm409_vm12, %v909_v53, %v899_v43  ;;  %v413_v54 = vsel %vm409_vm12, %v910_v25, %v1263_v19  ;;  %v412_v17 = vsel %vm409_vm12, %v900_v35, %v910_v25 }
 0x13f   :  { %v903_v56 = vpop.permute.xlu1 %902  ;;  %v918_v63 = vpop.permute.xlu0 %917  ;;  %v690_v6 = vpack.c.bf16 %v411_v18, %v337_v55 }
 0x140   :  { %v905_v51 = vunpack.i.h.bf16 %v903_v56  ;;  %v904_v52 = vunpack.i.l.bf16 %v903_v56  ;;  %v920_v1 = vunpack.i.h.bf16 %v918_v63  ;;  %v919_v21 = vunpack.i.l.bf16 %v918_v63 }
 0x141   :  { %728 = vmatprep.subr.bf16.mxu0 %v690_v6 }
 0x142   :  { %v336_v23 = vsel %vm335_vm13, %v904_v52, %v894_v8  ;;  %v339_v26 = vsel %vm335_vm13, %v905_v51, %v1265_v57  ;;  %v338_v62 = vsel %vm335_vm13, %v895_v50, %v905_v51  ;;  %v31_v57 = vrot.slane %v22_v49, %v995_v5 }
 0x143   :  { %v928_v58 = vpop.permute.xlu0 %927  ;;  %v913_v13 = vpop.permute.xlu1 %912  ;;  %v689_v27 = vpack.c.bf16 %v410_v15, %v336_v23  ;;  %v692_v28 = vpack.c.bf16 %v413_v54, %v339_v26  ;;  %v691_v29 = vpack.c.bf16 %v412_v17, %v338_v62  ;;  %v263_v60 = vsel %vm261_vm14, %v919_v21, %v920_v1 }
 0x144   :  { %v915_v19 = vunpack.i.h.bf16 %v913_v13  ;;  %v914_v31 = vunpack.i.l.bf16 %v913_v13  ;;  %v930_v33 = vunpack.i.h.bf16 %v928_v58  ;;  %v929_v12 = vunpack.i.l.bf16 %v928_v58 }
 0x145   :  { %729 = vmatpush1.bf16.msra.mxu0 %v689_v27  ;;  %769 = vmatprep.subr.bf16.mxu1 %v692_v28  ;;  %v45_v35 = vmul.f32 %v1126_v20, %v31_v57  ;;  %v47_v20 = vmul.f32 %v1149_v30, %v39_v39  ;;  %v644_v30 = vld [vmem:[%s1343_s0] sm:$0xf] }
 0x146   :  { %770 = vmatpush1.bf16.msra.mxu1 %v691_v29  ;;  %v189_v61 = vsel %vm187_vm15, %v914_v31, %v915_v19  ;;  %v262_v11 = vsel %vm261_vm14, %v929_v12, %v919_v21  ;;  %v265_v5 = vsel %vm261_vm14, %v930_v33, %v1269_v2  ;;  %v264_v16 = vsel %vm261_vm14, %v920_v1, %v930_v33 }
 0x147   :  { %v923_v14 = vpop.permute.xlu1 %922  ;;  %v686_v34 = vpack.c.bf16 %v263_v60, %v189_v61  ;;  %v938_v59 = vpop.permute.xlu0 %937 }
 0x148   :  { %v925_v37 = vunpack.i.h.bf16 %v923_v14  ;;  %v924_v38 = vunpack.i.l.bf16 %v923_v14  ;;  %v939_v24 = vunpack.i.l.bf16 %v938_v59  ;;  %v940_v45 = vunpack.i.h.bf16 %v938_v59 }
 0x149   :  { %730 = vmatprep.subr.bf16.mxu0 %v686_v34 }
 0x14a   :  { %v188_v41 = vsel %vm187_vm15, %v924_v38, %v914_v31  ;;  %v191_v4 = vsel %vm187_vm15, %v925_v37, %v1267_v0  ;;  %v190_v7 = vsel %vm187_vm15, %v915_v19, %v925_v37 }
 0x14b   :  { %v933_v3 = vpop.permute.xlu1 %932  ;;  %v685_v42 = vpack.c.bf16 %v262_v11, %v188_v41  ;;  %v688_v43 = vpack.c.bf16 %v265_v5, %v191_v4  ;;  %v687_v44 = vpack.c.bf16 %v264_v16, %v190_v7 }
 0x14c   :  { %v935_v2 = vunpack.i.h.bf16 %v933_v3  ;;  %v934_v9 = vunpack.i.l.bf16 %v933_v3 }
 0x14d   :  { %731 = vmatpush1.bf16.msra.mxu0 %v685_v42  ;;  %771 = vmatprep.subr.bf16.mxu1 %v688_v43 }
 0x14e   :  { %772 = vmatpush1.bf16.msra.mxu1 %v687_v44  ;;  %v115_v0 = vsel %vm113_vm0, %v934_v9, %v935_v2  ;;  %v114_v46 = vsel %vm113_vm0, %v939_v24, %v934_v9  ;;  %v116_v22 = vsel %vm113_vm0, %v935_v2, %v940_v45 }
 0x14f   :  { %v112_v48 = vpop.permute.xlu1 %111  ;;  %v682_v50 = vpack.c.bf16 %v115_v0, %v45_v35  ;;  %v681_v8 = vpack.c.bf16 %v114_v46, %v44_v10  ;;  %v683_v55 = vpack.c.bf16 %v116_v22, %v46_v47 }
 0x150   :  { %v117_v25 = vsel %vm113_vm0, %v940_v45, %v112_v48 }
 0x151   :  { %v684_v53 = vpack.c.bf16 %v117_v25, %v47_v20  ;;  %732 = vmatprep.subr.bf16.mxu0 %v682_v50 }
 0x152   :  { %733 = vmatpush1.bf16.msra.mxu0 %v681_v8 }
 0x153   :  { %773 = vmatprep.subr.bf16.mxu1 %v684_v53 }
 0x154   :  { %774 = vmatpush1.bf16.msra.mxu1 %v683_v55 }
 0x155   :  { %841 = vmatmul.mubr.msk.bf16.vlgmr.msra.gmra.mxu0 %vm701_vm1, %v644_v30 }
 0x157   :  { %843 = vmatmul.mubr.msk.bf16.vlgmr.msra.gmra.mxu1 %vm701_vm1, %v644_v30 }
 0x215   :  { %v752_v32 = vpop.f32.mrf.mxu0 }
 0x216   :  { %816 = vst [vmem:[%s1344_s3] sm:$0xff] %v752_v32  ;;  %v806_v63 = vmul.f32 %v752_v32, %v752_v32 }
 0x217   :  { %v754_v18 = vpop.f32.mrf.mxu0  ;;  %v793_v56 = vpop.f32.mrf.mxu1 }
 0x218   :  { %v800_v6 = vadd.f32 %v754_v18, %v752_v32  ;;  %v807_v51 = vmul.f32 %v754_v18, %v754_v18  ;;  %817 = vst [vmem:[%s1344_s3 + $0x8] sm:$0xff] %v754_v18  ;;  %v808_v52 = vmul.f32 %v793_v56, %v793_v56  ;;  %818 = vst [vmem:[%s1344_s3 + $0x10] sm:$0xff] %v793_v56 }
 0x219   :  { %v756_v1 = vpop.f32.mrf.mxu0  ;;  %v795_v15 = vpop.f32.mrf.mxu1 }
 0x21a   :  { %819 = vst [vmem:[%s1344_s3 + $0x18] sm:$0xff] %v795_v15  ;;  %v801_v54 = vadd.f32 %v800_v6, %v793_v56  ;;  %v810_v17 = vadd.f32 %v807_v51, %v806_v63  ;;  %v809_v62 = vmul.f32 %v795_v15, %v795_v15 }
 0x21b   :  { %v757_v21 = vpop.f32.mrf.mxu0  ;;  %v797_v23 = vpop.f32.mrf.mxu1 }
 0x21c   :  { %v802_v26 = vadd.f32 %v801_v54, %v795_v15  ;;  %v811_v49 = vadd.f32 %v810_v17, %v808_v52 }
 0x21d   :  { %v798_v58 = vpop.f32.mrf.mxu1 }
 0x21e   :  { %803 = vadd.xlane.f32.xlu0 %v802_v26  ;;  %v812_v13 = vadd.f32 %v811_v49, %v809_v62 }
 0x220   :  { %813 = vadd.xlane.f32.xlu1 %v812_v13 }
 0x2a7   :  { %v804_v27 = vpop.xlane.xlu0 %803 }
 0x2a8   :  { %805 = vst.msk [vmem:[%s1345_s4] sm:$0xff] %vm84_vm7, %v804_v27 }
 0x2a9   :  { %v814_v28 = vpop.xlane.xlu1 %813 }
 0x2aa   :  { %815 = vst.msk [vmem:[%s1346_s5] sm:$0xff] %vm84_vm7, %v814_v28 }

// kernel: drnet_forward.61
= control target key start
LH: loop header
LB: loop body
LE: loop exit
PB: predicated region body
PF: predicated region fallthrough
CT: control target
= control target key end

     0   :  { %v24_v0 = vlaneseq  ;;  %s940_s22 = smov 68   ;;  %s941_s23 = smov 64   ;;  %vm601_vm0 = vcmask 556032   ;;  %vm454_vm1 = vcmask 523264   ;;  %vm527_vm2 = vcmask 539648   ;;  %s1333_s2 = inlined_call_operand.vmem [shape: f32[9,512], index: 2, kind: input, shape index: {}]   ;;  %s1334_s1 = inlined_call_operand.vmem [shape: f32[8,580], index: 1, kind: input, shape index: {}]   ;;  %s1335_s0 = inlined_call_operand.vmem [shape: bf16[8,72], index: 0, kind: input, shape index: {}]   ;;  %s1336_s3 = inlined_call_operand.vmem [shape: f32[8,512], index: 3, kind: output, shape index: {0}]   ;;  %s1337_s4 = inlined_call_operand.vmem [shape: f32[8,1], index: 4, kind: output, shape index: {1}]   ;;  %s1338_s5 = inlined_call_operand.vmem [shape: f32[8,1], index: 5, kind: output, shape index: {2}]  }
   0x1   :  { %v839_v2 = vld [vmem:[%s1333_s2 + $0x20] ss:$8 sm:$0xf]  ;;  %v837_v6 = vld [vmem:[%s1333_s2 + $0x6] ss:$8 sm:$0xf] }
   0x2   :  { %v25_v1 = vshrl.u32 %v24_v0, 7  ;;  %v838_v13 = vld [vmem:[%s1333_s2 + $0x7] ss:$8 sm:$0xf]  ;;  %s942_s26 = smov 66   ;;  %s943_s6 = smov 34  }
   0x3   :  { %v835_v19 = vld [vmem:[%s1333_s2 + $0x4] ss:$8 sm:$0xf]  ;;  %v836_v22 = vld [vmem:[%s1333_s2 + $0x5] ss:$8 sm:$0xf] }
   0x4   :  { %v989_v3 = vsub.s32 2, %v25_v1  ;;  %v991_v4 = vsub.s32 0, %v25_v1  ;;  %v993_v5 = vsub.s32 1, %v25_v1  ;;  %v1012_v16 = vsub.s32 3, %v25_v1  ;;  %s944_s7 = smov 36   ;;  %s945_s12 = smov 4  }
   0x5   :  { %v833_v29 = vld [vmem:[%s1333_s2 + $0x2] ss:$8 sm:$0xf]  ;;  %v834_v32 = vld [vmem:[%s1333_s2 + $0x3] ss:$8 sm:$0xf] }
   0x6   :  { %v588_v7 = vrot.slane %v839_v2, %v989_v3  ;;  %v580_v8 = vrot.slane %v839_v2, %v991_v4  ;;  %v584_v9 = vrot.slane %v839_v2, %v993_v5  ;;  %v433_v10 = vrot.slane %v837_v6, %v991_v4  ;;  %s946_s13 = smov 32   ;;  %v832_v39 = vld [vmem:[%s1333_s2 + $0x1] ss:$8 sm:$0xf]  ;;  %s947_s16 = smov 2  }
   0x7   :  { %v437_v11 = vrot.slane %v837_v6, %v993_v5  ;;  %v441_v12 = vrot.slane %v837_v6, %v989_v3  ;;  %v506_v14 = vrot.slane %v838_v13, %v991_v4  ;;  %v510_v15 = vrot.slane %v838_v13, %v993_v5  ;;  %v1073_v54 = vld [vmem:[%s1334_s1 + $0x20] sm:$0xff]  ;;  %s948_s19 = smov 60   ;;  %s949_s20 = smov 62  }
   0x8   :  { %597 = vrot.lane.b32.xlu1 %v588_v7, %s940_s22  ;;  %593 = vrot.lane.b32.xlu0 %v580_v8, %s940_s22  ;;  %v514_v17 = vrot.slane %v838_v13, %v989_v3  ;;  %v592_v18 = vrot.slane %v839_v2, %v1012_v16  ;;  %v289_v20 = vrot.slane %v835_v19, %v993_v5  ;;  %s950_s21 = smov 94   ;;  %s952_s30 = smov 124   ;;  %vm380_vm3 = vcmask 293888  }
   0x9   :  { %v285_v21 = vrot.slane %v835_v19, %v991_v4  ;;  %v359_v23 = vrot.slane %v836_v22, %v991_v4  ;;  %v293_v24 = vrot.slane %v835_v19, %v989_v3  ;;  %v367_v25 = vrot.slane %v836_v22, %v989_v3 }
   0xa   :  { %v363_v26 = vrot.slane %v836_v22, %v993_v5  ;;  %v518_v27 = vrot.slane %v838_v13, %v1012_v16  ;;  %v445_v28 = vrot.slane %v837_v6, %v1012_v16  ;;  %v141_v30 = vrot.slane %v833_v29, %v993_v5 }
   0xb   :  { %v137_v31 = vrot.slane %v833_v29, %v991_v4  ;;  %v211_v33 = vrot.slane %v834_v32, %v991_v4  ;;  %v145_v34 = vrot.slane %v833_v29, %v989_v3  ;;  %v219_v35 = vrot.slane %v834_v32, %v989_v3 }
   0xc   :  { %595 = vrot.lane.b32.xlu0 %v584_v9, %s940_s22  ;;  %446 = vrot.lane.b32.xlu1 %v433_v10, %s941_s23  ;;  %v215_v36 = vrot.slane %v834_v32, %v993_v5  ;;  %v371_v37 = vrot.slane %v836_v22, %v1012_v16  ;;  %v297_v38 = vrot.slane %v835_v19, %v1012_v16  ;;  %v1128_v22 = vld [vmem:[%s1334_s1] sm:$0xff]  ;;  %vm306_vm4 = vcmask 277504  }
   0xd   :  { %v67_v40 = vrot.slane %v832_v39, %v993_v5  ;;  %v63_v41 = vrot.slane %v832_v39, %v991_v4  ;;  %v149_v42 = vrot.slane %v833_v29, %v1012_v16  ;;  %v71_v43 = vrot.slane %v832_v39, %v989_v3 }
   0xe   :  { %v75_v44 = vrot.slane %v832_v39, %v1012_v16  ;;  %v223_v45 = vrot.slane %v834_v32, %v1012_v16  ;;  %v1152_v32 = vld [vmem:[%s1334_s1 + $0x10] sm:$0xff]  ;;  %vm232_vm5 = vcmask 261120   ;;  %vm158_vm6 = vcmask 31744  }
   0xf   :  { %vm84_vm7 = vcmask 15360   ;;  %vm630_vm8 = vcmask 490496   ;;  %vm704_vm9 = vcmask 1043456   ;;  %vm556_vm10 = vcmask 506880  }
  0x10   :  { %448 = vrot.lane.b32.xlu0 %v437_v11, %s941_s23  ;;  %450 = vrot.lane.b32.xlu1 %v441_v12, %s941_s23  ;;  %vm409_vm11 = vcmask 752640   ;;  %vm335_vm12 = vcmask 769024   ;;  %vm261_vm13 = vcmask 785408   ;;  %vm187_vm14 = vcmask 1014784  }
  0x11   :  { %vm113_vm15 = vcmask 1031168  }
  0x14   :  { %519 = vrot.lane.b32.xlu0 %v506_v14, %s942_s26  ;;  %521 = vrot.lane.b32.xlu1 %v510_v15, %s942_s26 }
  0x18   :  { %523 = vrot.lane.b32.xlu0 %v514_v17, %s942_s26  ;;  %599 = vrot.lane.b32.xlu1 %v592_v18, %s940_s22  ;;  %s951_s22 = smov 92  }
  0x1c   :  { %300 = vrot.lane.b32.xlu1 %v289_v20, %s943_s6  ;;  %298 = vrot.lane.b32.xlu0 %v285_v21, %s943_s6  ;;  %v1122_v20 = vld [vmem:[%s1334_s1 + $0x8] sm:$0xff] }
  0x20   :  { %372 = vrot.lane.b32.xlu1 %v359_v23, %s944_s7  ;;  %302 = vrot.lane.b32.xlu0 %v293_v24, %s943_s6 }
  0x24   :  { %376 = vrot.lane.b32.xlu1 %v367_v25, %s944_s7  ;;  %374 = vrot.lane.b32.xlu0 %v363_v26, %s944_s7 }
  0x28   :  { %525 = vrot.lane.b32.xlu1 %v518_v27, %s942_s26  ;;  %452 = vrot.lane.b32.xlu0 %v445_v28, %s941_s23 }
  0x2c   :  { %152 = vrot.lane.b32.xlu1 %v141_v30, %s945_s12  ;;  %150 = vrot.lane.b32.xlu0 %v137_v31, %s945_s12  ;;  %v1145_v30 = vld [vmem:[%s1334_s1 + $0x18] sm:$0xff]  ;;  %s953_s1 = smov 96  }
  0x30   :  { %224 = vrot.lane.b32.xlu1 %v211_v33, %s946_s13  ;;  %154 = vrot.lane.b32.xlu0 %v145_v34, %s945_s12 }
  0x34   :  { %228 = vrot.lane.b32.xlu1 %v219_v35, %s946_s13  ;;  %226 = vrot.lane.b32.xlu0 %v215_v36, %s946_s13 }
  0x38   :  { %378 = vrot.lane.b32.xlu1 %v371_v37, %s944_s7  ;;  %304 = vrot.lane.b32.xlu0 %v297_v38, %s943_s6 }
  0x3c   :  { %78 = vrot.lane.b32.xlu1 %v67_v40, %s947_s16  ;;  %76 = vrot.lane.b32.xlu0 %v63_v41, %s947_s16 }
  0x40   :  { %156 = vrot.lane.b32.xlu1 %v149_v42, %s945_s12  ;;  %80 = vrot.lane.b32.xlu0 %v71_v43, %s947_s16 }
  0x44   :  { %82 = vrot.lane.b32.xlu1 %v75_v44, %s947_s16  ;;  %230 = vrot.lane.b32.xlu0 %v223_v45, %s946_s13 }
  0x7a   :  { %v598_v46 = vpop.permute.xlu1 %597  ;;  %v594_v47 = vpop.permute.xlu0 %593 }
  0x7b   :  { %v610_v28 = vmul.f32 %v594_v47, %v1128_v22 }
  0x7e   :  { %v596_v48 = vpop.permute.xlu0 %595  ;;  %v1062_v49 = vpop.permute.xlu1 %446 }
  0x7f   :  { %v602_v21 = vsel %vm601_vm0, %v594_v47, %v596_v48  ;;  %v603_v33 = vsel %vm601_vm0, %v596_v48, %v598_v46 }
  0x80   :  { %v611_v23 = vmul.f32 %v602_v21, %v1122_v20  ;;  %v612_v42 = vmul.f32 %v603_v33, %v1152_v32 }
  0x82   :  { %v449_v50 = vpop.permute.xlu0 %448  ;;  %v1064_v51 = vpop.permute.xlu1 %450  ;;  %v860_v36 = vpack.i.bf16 %v611_v23, %v610_v28 }
  0x83   :  { %v455_v26 = vsel %vm454_vm1, %v1062_v49, %v449_v50  ;;  %v456_v29 = vsel %vm454_vm1, %v449_v50, %v1064_v51 }
  0x84   :  { %v464_v34 = vmul.f32 %v1122_v20, %v455_v26  ;;  %v465_v37 = vmul.f32 %v1152_v32, %v456_v29 }
  0x86   :  { %v1066_v52 = vpop.permute.xlu0 %519  ;;  %v1068_v53 = vpop.permute.xlu1 %521  ;;  %v870_v47 = vpack.i.bf16 %v465_v37, %v464_v34 }
  0x87   :  { %v528_v43 = vsel %vm527_vm2, %v1066_v52, %v1068_v53 }
  0x88   :  { %v537_v48 = vmul.f32 %v1122_v20, %v528_v43 }
  0x8a   :  { %v524_v55 = vpop.permute.xlu0 %523  ;;  %v600_v56 = vpop.permute.xlu1 %599 }
  0x8b   :  { %v614_v57 = vmul.f32 %v600_v56, %v1073_v54  ;;  %v604_v31 = vsel %vm601_vm0, %v598_v46, %v600_v56  ;;  %v529_v38 = vsel %vm527_vm2, %v1068_v53, %v524_v55  ;;  %v536_v56 = vmul.f32 %v1128_v22, %v1066_v52 }
  0x8c   :  { %v613_v39 = vmul.f32 %v604_v31, %v1145_v30  ;;  %v538_v44 = vmul.f32 %v1152_v32, %v529_v38  ;;  %vm700_vm0 = vcmask 588800  }
  0x8d   :  { %628 = vrot.lane.b32.xlu0 %v614_v57, %s948_s19 }
  0x8e   :  { %v1077_v58 = vpop.permute.xlu1 %300  ;;  %v1079_v59 = vpop.permute.xlu0 %298  ;;  %v865_v46 = vpack.i.bf16 %v613_v39, %v612_v42 }
  0x92   :  { %v1081_v60 = vpop.permute.xlu1 %372  ;;  %v1083_v61 = vpop.permute.xlu0 %302 }
  0x93   :  { %v308_v57 = vsel %vm306_vm4, %v1077_v58, %v1083_v61 }
  0x96   :  { %v1085_v62 = vpop.permute.xlu1 %376  ;;  %v1087_v63 = vpop.permute.xlu0 %374 }
  0x97   :  { %v381_v50 = vsel %vm380_vm3, %v1081_v60, %v1087_v63  ;;  %v382_v53 = vsel %vm380_vm3, %v1087_v63, %v1085_v62 }
  0x98   :  { %v391_v63 = vmul.f32 %v1152_v32, %v382_v53 }
  0x9a   :  { %v526_v0 = vpop.permute.xlu1 %525  ;;  %v1089_v1 = vpop.permute.xlu0 %452 }
  0x9b   :  { %v540_v2 = vmul.f32 %v1073_v54, %v526_v0  ;;  %v467_v6 = vmul.f32 %v1073_v54, %v1089_v1  ;;  %v530_v41 = vsel %vm527_vm2, %v524_v55, %v526_v0  ;;  %v457_v55 = vsel %vm454_vm1, %v1064_v51, %v1089_v1 }
  0x9c   :  { %v539_v45 = vmul.f32 %v1145_v30, %v530_v41  ;;  %v875_v0 = vpack.i.bf16 %v538_v44, %v537_v48  ;;  %v463_v1 = vmul.f32 %v1128_v22, %v1062_v49 }
  0x9d   :  { %481 = vrot.lane.b32.xlu1 %v467_v6, %s941_s23  ;;  %554 = vrot.lane.b32.xlu0 %v540_v2, %s949_s20  ;;  %v390_v2 = vmul.f32 %v1122_v20, %v381_v50  ;;  %v466_v6 = vmul.f32 %v1145_v30, %v457_v55  ;;  %v954_v50 = vmov 0  }
  0x9e   :  { %v1096_v7 = vpop.permute.xlu1 %152  ;;  %v1098_v8 = vpop.permute.xlu0 %150  ;;  %v885_v51 = vpack.i.bf16 %v539_v45, %v536_v56  ;;  %749 = vmatprep.mubr.bf16.mxu0 %v954_v50  ;;  %790 = vmatprep.mubr.bf16.mxu1 %v954_v50 }
  0x9f   :  { %v880_v23 = vpack.i.bf16 %v466_v6, %v463_v1  ;;  %v895_v26 = vpack.i.bf16 %v391_v63, %v390_v2 }
  0xa2   :  { %v1100_v9 = vpop.permute.xlu1 %224  ;;  %v1102_v10 = vpop.permute.xlu0 %154 }
  0xa3   :  { %v241_v41 = vmul.f32 %v1128_v22, %v1100_v9 }
  0xa6   :  { %v1104_v11 = vpop.permute.xlu1 %228  ;;  %v1106_v12 = vpop.permute.xlu0 %226 }
  0xa7   :  { %v233_v49 = vsel %vm232_vm5, %v1100_v9, %v1106_v12 }
  0xa8   :  { %v242_v29 = vmul.f32 %v1122_v20, %v233_v49 }
  0xaa   :  { %v379_v13 = vpop.permute.xlu1 %378  ;;  %v1108_v14 = vpop.permute.xlu0 %304 }
  0xab   :  { %v393_v15 = vmul.f32 %v1073_v54, %v379_v13  ;;  %v319_v17 = vmul.f32 %v1073_v54, %v1108_v14  ;;  %v383_v52 = vsel %vm380_vm3, %v1085_v62, %v379_v13  ;;  %v309_v13 = vsel %vm306_vm4, %v1083_v61, %v1108_v14 }
  0xac   :  { %v392_v21 = vmul.f32 %v1145_v30, %v383_v52  ;;  %v318_v33 = vmul.f32 %v1145_v30, %v309_v13  ;;  %v160_v61 = vsel %vm158_vm6, %v1096_v7, %v1102_v10  ;;  %v315_v14 = vmul.f32 %v1128_v22, %v1079_v59 }
  0xad   :  { %333 = vrot.lane.b32.xlu1 %v319_v17, %s950_s21  ;;  %407 = vrot.lane.b32.xlu0 %v393_v15, %s951_s22  ;;  %v307_v15 = vsel %vm306_vm4, %v1079_v59, %v1077_v58  ;;  %v317_v17 = vmul.f32 %v1152_v32, %v308_v57  ;;  %v234_v58 = vsel %vm232_vm5, %v1106_v12, %v1104_v11 }
  0xae   :  { %v1115_v18 = vpop.permute.xlu1 %78  ;;  %v1117_v19 = vpop.permute.xlu0 %76  ;;  %v316_v62 = vmul.f32 %v1122_v20, %v307_v15  ;;  %v243_v31 = vmul.f32 %v1152_v32, %v234_v58  ;;  %v169_v37 = vmul.f32 %v1152_v32, %v160_v61  ;;  %v900_v39 = vpack.i.bf16 %v318_v33, %v315_v14 }
  0xaf   :  { %v93_v9 = vmul.f32 %v1128_v22, %v1117_v19  ;;  %v85_v45 = vsel %vm84_vm7, %v1117_v19, %v1115_v18 }
  0xb0   :  { %v890_v28 = vpack.i.bf16 %v317_v17, %v316_v62 }
  0xb2   :  { %v1131_v24 = vpop.permute.xlu1 %156  ;;  %v1133_v25 = vpop.permute.xlu0 %80 }
  0xb3   :  { %v171_v27 = vmul.f32 %v1073_v54, %v1131_v24  ;;  %v161_v59 = vsel %vm158_vm6, %v1102_v10, %v1131_v24  ;;  %v86_v10 = vsel %vm84_vm7, %v1115_v18, %v1133_v25  ;;  %v167_v24 = vmul.f32 %v1128_v22, %v1098_v8 }
  0xb5   :  { %185 = vrot.lane.b32.xlu0 %v171_v27, %s952_s30  ;;  %v389_v27 = vmul.f32 %v1128_v22, %v1081_v60 }
  0xb6   :  { %v231_v35 = vpop.permute.xlu0 %230  ;;  %v83_v34 = vpop.permute.xlu1 %82 }
  0xb7   :  { %v245_v40 = vmul.f32 %v1073_v54, %v231_v35  ;;  %v905_v12 = vpack.i.bf16 %v392_v21, %v389_v27  ;;  %v235_v60 = vsel %vm232_vm5, %v1104_v11, %v231_v35  ;;  %v87_v11 = vsel %vm84_vm7, %v1133_v25, %v83_v34 }
  0xb8   :  { %v244_v38 = vmul.f32 %v1145_v30, %v235_v60  ;;  %v96_v42 = vmul.f32 %v1145_v30, %v87_v11  ;;  %v97_v53 = vmul.f32 %v1073_v54, %v83_v34 }
  0xb9   :  { %259 = vrot.lane.b32.xlu1 %v245_v40, %s953_s1  ;;  %861 = vrot.lane.b32.xlu0 %v860_v36, %s948_s19  ;;  %v159_v36 = vsel %vm158_vm6, %v1098_v8, %v1096_v7  ;;  %v915_v40 = vpack.i.bf16 %v243_v31, %v242_v29  ;;  %v170_v7 = vmul.f32 %v1145_v30, %v161_v59 }
  0xba   :  { %v168_v35 = vmul.f32 %v1122_v20, %v159_v36  ;;  %v925_v43 = vpack.i.bf16 %v244_v38, %v241_v41  ;;  %v935_v48 = vpack.i.bf16 %v96_v42, %v93_v9  ;;  %v94_v8 = vmul.f32 %v1122_v20, %v85_v45 }
  0xbc   :  { %v910_v44 = vpack.i.bf16 %v169_v37, %v168_v35 }
  0xbd   :  { %866 = vrot.lane.b32.xlu1 %v865_v46, %s948_s19  ;;  %871 = vrot.lane.b32.xlu0 %v870_v47, %s941_s23  ;;  %v95_v46 = vmul.f32 %v1152_v32, %v86_v10  ;;  %v920_v47 = vpack.i.bf16 %v170_v7, %v167_v24 }
  0xbf   :  { %v930_v25 = vpack.i.bf16 %v95_v46, %v94_v8 }
  0xc1   :  { %876 = vrot.lane.b32.xlu1 %v875_v0, %s949_s20  ;;  %886 = vrot.lane.b32.xlu0 %v885_v51, %s949_s20 }
  0xc5   :  { %881 = vrot.lane.b32.xlu1 %v880_v23, %s941_s23  ;;  %896 = vrot.lane.b32.xlu0 %v895_v26, %s951_s22  ;;  %s955_s23 = smov 126  }
  0xc9   :  { %891 = vrot.lane.b32.xlu1 %v890_v28, %s950_s21  ;;  %906 = vrot.lane.b32.xlu0 %v905_v12, %s951_s22 }
  0xcd   :  { %901 = vrot.lane.b32.xlu1 %v900_v39, %s950_s21  ;;  %916 = vrot.lane.b32.xlu0 %v915_v40, %s953_s1 }
  0xd1   :  { %926 = vrot.lane.b32.xlu0 %v925_v43, %s953_s1  ;;  %911 = vrot.lane.b32.xlu1 %v910_v44, %s952_s30 }
  0xd5   :  { %921 = vrot.lane.b32.xlu1 %v920_v47, %s952_s30  ;;  %936 = vrot.lane.b32.xlu0 %v935_v48, %s955_s23 }
  0xd9   :  { %931 = vrot.lane.b32.xlu1 %v930_v25, %s955_s23 }
  0xdd   :  { %111 = vrot.lane.b32.xlu1 %v97_v53, %s955_s23 }
  0xff   :  { %v629_v55 = vpop.permute.xlu0 %628 }
 0x10f   :  { %v555_v18 = vpop.permute.xlu0 %554  ;;  %v482_v56 = vpop.permute.xlu1 %481 }
 0x11f   :  { %v1257_v19 = vpop.permute.xlu0 %407  ;;  %v1259_v57 = vpop.permute.xlu1 %333 }
 0x127   :  { %v1261_v0 = vpop.permute.xlu0 %185 }
 0x12b   :  { %v1263_v2 = vpop.permute.xlu1 %259  ;;  %v862_v63 = vpop.permute.xlu0 %861 }
 0x12c   :  { %v864_v6 = vunpack.i.h.bf16 %v862_v63  ;;  %v863_v51 = vunpack.i.l.bf16 %v862_v63 }
 0x12e   :  { %v631_v52 = vsel %vm630_vm8, %v863_v51, %v864_v6 }
 0x12f   :  { %v867_v1 = vpop.permute.xlu1 %866  ;;  %v872_v15 = vpop.permute.xlu0 %871  ;;  %v696_v23 = vpack.c.bf16 %v631_v52, %v631_v52 }
 0x130   :  { %v869_v54 = vunpack.i.h.bf16 %v867_v1  ;;  %v868_v17 = vunpack.i.l.bf16 %v867_v1  ;;  %v874_v21 = vunpack.i.h.bf16 %v872_v15  ;;  %v873_v26 = vunpack.i.l.bf16 %v872_v15 }
 0x131   :  { %v706_v14 = vsel %vm704_vm9, %v696_v23, 0 }
 0x132   :  { %v632_v62 = vsel %vm630_vm8, %v864_v6, %v868_v17  ;;  %v634_v49 = vsel %vm630_vm8, %v869_v54, %v629_v55  ;;  %v633_v58 = vsel %vm630_vm8, %v868_v17, %v869_v54  ;;  %v484_v36 = vsel %vm454_vm1, %v873_v26, %v874_v21 }
 0x133   :  { %v877_v13 = vpop.permute.xlu1 %876  ;;  %v887_v27 = vpop.permute.xlu0 %886  ;;  %v697_v28 = vpack.c.bf16 %v632_v62, %v632_v62  ;;  %v699_v29 = vpack.c.bf16 %v634_v49, %v634_v49  ;;  %v698_v31 = vpack.c.bf16 %v633_v58, %v633_v58  ;;  %v22_v49 = vld [vmem:[%s1333_s2] ss:$8 sm:$0xf] }
 0x134   :  { %v879_v33 = vunpack.i.h.bf16 %v877_v13  ;;  %v878_v12 = vunpack.i.l.bf16 %v877_v13  ;;  %v889_v61 = vunpack.i.h.bf16 %v887_v27  ;;  %v888_v60 = vunpack.i.l.bf16 %v887_v27 }
 0x135   :  { %840 = vmatprep.subr.msk.bf16.mxu0 %vm704_vm9, %v697_v28  ;;  %842 = vmatprep.subr.msk.bf16.mxu1 %vm704_vm9, %v699_v29  ;;  %v712_v34 = vsel %vm704_vm9, %v698_v31, 0 }
 0x136   :  { %724 = vmatpush1.bf16.msra.mxu0 %v706_v14  ;;  %765 = vmatpush1.bf16.msra.mxu1 %v712_v34  ;;  %v558_v37 = vsel %vm556_vm10, %v878_v12, %v879_v33  ;;  %v557_v41 = vsel %vm556_vm10, %v888_v60, %v878_v12  ;;  %v560_v7 = vsel %vm556_vm10, %v889_v61, %v555_v18 }
 0x137   :  { %v882_v38 = vpop.permute.xlu1 %881  ;;  %v897_v39 = vpop.permute.xlu0 %896  ;;  %v693_v40 = vpack.c.bf16 %v558_v37, %v484_v36  ;;  %v559_v42 = vsel %vm556_vm10, %v879_v33, %v889_v61  ;;  %v27_v36 = vrot.slane %v22_v49, %v991_v4 }
 0x138   :  { %v884_v59 = vunpack.i.h.bf16 %v882_v38  ;;  %v883_v11 = vunpack.i.l.bf16 %v882_v38  ;;  %v899_v35 = vunpack.i.h.bf16 %v897_v39  ;;  %v898_v43 = vunpack.i.l.bf16 %v897_v39 }
 0x139   :  { %725 = vmatprep.subr.bf16.mxu0 %v693_v40  ;;  %v39_v39 = vrot.slane %v22_v49, %v1012_v16  ;;  %v35_v40 = vrot.slane %v22_v49, %v989_v3 }
 0x13a   :  { %v483_v44 = vsel %vm454_vm1, %v883_v11, %v873_v26  ;;  %v486_v10 = vsel %vm454_vm1, %v884_v59, %v482_v56  ;;  %v485_v24 = vsel %vm454_vm1, %v874_v21, %v884_v59  ;;  %v411_v18 = vsel %vm409_vm11, %v898_v43, %v899_v35 }
 0x13b   :  { %v892_v9 = vpop.permute.xlu1 %891  ;;  %v907_v45 = vpop.permute.xlu0 %906  ;;  %v692_v46 = vpack.c.bf16 %v557_v41, %v483_v44  ;;  %v695_v47 = vpack.c.bf16 %v560_v7, %v486_v10  ;;  %v694_v48 = vpack.c.bf16 %v559_v42, %v485_v24  ;;  %v44_v10 = vmul.f32 %v1128_v22, %v27_v36 }
 0x13c   :  { %v894_v50 = vunpack.i.h.bf16 %v892_v9  ;;  %v893_v8 = vunpack.i.l.bf16 %v892_v9  ;;  %v909_v25 = vunpack.i.h.bf16 %v907_v45  ;;  %v908_v53 = vunpack.i.l.bf16 %v907_v45 }
 0x13d   :  { %726 = vmatpush1.bf16.msra.mxu0 %v692_v46  ;;  %766 = vmatprep.subr.bf16.mxu1 %v695_v47  ;;  %v46_v47 = vmul.f32 %v1152_v32, %v35_v40  ;;  %vm804_vm1 = vcmask 7168  }
 0x13e   :  { %767 = vmatpush1.bf16.msra.mxu1 %v694_v48  ;;  %v337_v55 = vsel %vm335_vm12, %v893_v8, %v894_v50  ;;  %v410_v15 = vsel %vm409_vm11, %v908_v53, %v898_v43  ;;  %v413_v54 = vsel %vm409_vm11, %v909_v25, %v1257_v19  ;;  %v412_v17 = vsel %vm409_vm11, %v899_v35, %v909_v25 }
 0x13f   :  { %v902_v56 = vpop.permute.xlu1 %901  ;;  %v917_v63 = vpop.permute.xlu0 %916  ;;  %v689_v6 = vpack.c.bf16 %v411_v18, %v337_v55 }
 0x140   :  { %v904_v51 = vunpack.i.h.bf16 %v902_v56  ;;  %v903_v52 = vunpack.i.l.bf16 %v902_v56  ;;  %v919_v1 = vunpack.i.h.bf16 %v917_v63  ;;  %v918_v21 = vunpack.i.l.bf16 %v917_v63 }
 0x141   :  { %727 = vmatprep.subr.bf16.mxu0 %v689_v6 }
 0x142   :  { %v336_v23 = vsel %vm335_vm12, %v903_v52, %v893_v8  ;;  %v339_v26 = vsel %vm335_vm12, %v904_v51, %v1259_v57  ;;  %v338_v62 = vsel %vm335_vm12, %v894_v50, %v904_v51  ;;  %v31_v57 = vrot.slane %v22_v49, %v993_v5 }
 0x143   :  { %v927_v58 = vpop.permute.xlu0 %926  ;;  %v912_v13 = vpop.permute.xlu1 %911  ;;  %v688_v27 = vpack.c.bf16 %v410_v15, %v336_v23  ;;  %v691_v28 = vpack.c.bf16 %v413_v54, %v339_v26  ;;  %v690_v29 = vpack.c.bf16 %v412_v17, %v338_v62  ;;  %v263_v60 = vsel %vm261_vm13, %v918_v21, %v919_v1 }
 0x144   :  { %v914_v19 = vunpack.i.h.bf16 %v912_v13  ;;  %v913_v31 = vunpack.i.l.bf16 %v912_v13  ;;  %v929_v33 = vunpack.i.h.bf16 %v927_v58  ;;  %v928_v12 = vunpack.i.l.bf16 %v927_v58 }
 0x145   :  { %728 = vmatpush1.bf16.msra.mxu0 %v688_v27  ;;  %768 = vmatprep.subr.bf16.mxu1 %v691_v28  ;;  %v45_v35 = vmul.f32 %v1122_v20, %v31_v57  ;;  %v47_v20 = vmul.f32 %v1145_v30, %v39_v39  ;;  %v643_v30 = vld [vmem:[%s1335_s0] sm:$0xf] }
 0x146   :  { %769 = vmatpush1.bf16.msra.mxu1 %v690_v29  ;;  %v189_v61 = vsel %vm187_vm14, %v913_v31, %v914_v19  ;;  %v262_v11 = vsel %vm261_vm13, %v928_v12, %v918_v21  ;;  %v265_v5 = vsel %vm261_vm13, %v929_v33, %v1263_v2  ;;  %v264_v16 = vsel %vm261_vm13, %v919_v1, %v929_v33 }
 0x147   :  { %v922_v14 = vpop.permute.xlu1 %921  ;;  %v685_v34 = vpack.c.bf16 %v263_v60, %v189_v61  ;;  %v937_v59 = vpop.permute.xlu0 %936 }
 0x148   :  { %v924_v37 = vunpack.i.h.bf16 %v922_v14  ;;  %v923_v38 = vunpack.i.l.bf16 %v922_v14  ;;  %v938_v24 = vunpack.i.l.bf16 %v937_v59  ;;  %v939_v45 = vunpack.i.h.bf16 %v937_v59 }
 0x149   :  { %729 = vmatprep.subr.bf16.mxu0 %v685_v34 }
 0x14a   :  { %v188_v41 = vsel %vm187_vm14, %v923_v38, %v913_v31  ;;  %v191_v4 = vsel %vm187_vm14, %v924_v37, %v1261_v0  ;;  %v190_v7 = vsel %vm187_vm14, %v914_v19, %v924_v37 }
 0x14b   :  { %v932_v3 = vpop.permute.xlu1 %931  ;;  %v684_v42 = vpack.c.bf16 %v262_v11, %v188_v41  ;;  %v687_v43 = vpack.c.bf16 %v265_v5, %v191_v4  ;;  %v686_v44 = vpack.c.bf16 %v264_v16, %v190_v7 }
 0x14c   :  { %v934_v2 = vunpack.i.h.bf16 %v932_v3  ;;  %v933_v9 = vunpack.i.l.bf16 %v932_v3 }
 0x14d   :  { %730 = vmatpush1.bf16.msra.mxu0 %v684_v42  ;;  %770 = vmatprep.subr.bf16.mxu1 %v687_v43 }
 0x14e   :  { %771 = vmatpush1.bf16.msra.mxu1 %v686_v44  ;;  %v115_v0 = vsel %vm113_vm15, %v933_v9, %v934_v2  ;;  %v114_v46 = vsel %vm113_vm15, %v938_v24, %v933_v9  ;;  %v116_v22 = vsel %vm113_vm15, %v934_v2, %v939_v45 }
 0x14f   :  { %v112_v48 = vpop.permute.xlu1 %111  ;;  %v681_v50 = vpack.c.bf16 %v115_v0, %v45_v35  ;;  %v680_v8 = vpack.c.bf16 %v114_v46, %v44_v10  ;;  %v682_v55 = vpack.c.bf16 %v116_v22, %v46_v47 }
 0x150   :  { %v117_v25 = vsel %vm113_vm15, %v939_v45, %v112_v48 }
 0x151   :  { %v683_v53 = vpack.c.bf16 %v117_v25, %v47_v20  ;;  %731 = vmatprep.subr.bf16.mxu0 %v681_v50 }
 0x152   :  { %732 = vmatpush1.bf16.msra.mxu0 %v680_v8 }
 0x153   :  { %772 = vmatprep.subr.bf16.mxu1 %v683_v53 }
 0x154   :  { %773 = vmatpush1.bf16.msra.mxu1 %v682_v55 }
 0x155   :  { %841 = vmatmul.mubr.msk.bf16.vlgmr.msra.gmra.mxu0 %vm700_vm0, %v643_v30 }
 0x157   :  { %843 = vmatmul.mubr.msk.bf16.vlgmr.msra.gmra.mxu1 %vm700_vm0, %v643_v30 }
 0x215   :  { %v751_v32 = vpop.f32.mrf.mxu0 }
 0x216   :  { %816 = vst [vmem:[%s1336_s3] sm:$0xff] %v751_v32  ;;  %v806_v63 = vmul.f32 %v751_v32, %v751_v32 }
 0x217   :  { %v753_v18 = vpop.f32.mrf.mxu0  ;;  %v792_v56 = vpop.f32.mrf.mxu1 }
 0x218   :  { %v799_v6 = vadd.f32 %v753_v18, %v751_v32  ;;  %v807_v51 = vmul.f32 %v753_v18, %v753_v18  ;;  %817 = vst [vmem:[%s1336_s3 + $0x8] sm:$0xff] %v753_v18  ;;  %v808_v52 = vmul.f32 %v792_v56, %v792_v56  ;;  %818 = vst [vmem:[%s1336_s3 + $0x10] sm:$0xff] %v792_v56 }
 0x219   :  { %v755_v1 = vpop.f32.mrf.mxu0  ;;  %v794_v15 = vpop.f32.mrf.mxu1 }
 0x21a   :  { %819 = vst [vmem:[%s1336_s3 + $0x18] sm:$0xff] %v794_v15  ;;  %v800_v54 = vadd.f32 %v799_v6, %v792_v56  ;;  %v810_v17 = vadd.f32 %v807_v51, %v806_v63  ;;  %v809_v62 = vmul.f32 %v794_v15, %v794_v15 }
 0x21b   :  { %v756_v21 = vpop.f32.mrf.mxu0  ;;  %v796_v23 = vpop.f32.mrf.mxu1 }
 0x21c   :  { %v801_v26 = vadd.f32 %v800_v54, %v794_v15  ;;  %v811_v49 = vadd.f32 %v810_v17, %v808_v52 }
 0x21d   :  { %v797_v58 = vpop.f32.mrf.mxu1 }
 0x21e   :  { %802 = vadd.xlane.f32.xlu0 %v801_v26  ;;  %v812_v13 = vadd.f32 %v811_v49, %v809_v62 }
 0x220   :  { %813 = vadd.xlane.f32.xlu1 %v812_v13 }
 0x2a7   :  { %v803_v27 = vpop.xlane.xlu0 %802 }
 0x2a8   :  { %805 = vst.msk [vmem:[%s1337_s4] sm:$0xff] %vm804_vm1, %v803_v27 }
 0x2a9   :  { %v814_v28 = vpop.xlane.xlu1 %813 }
 0x2aa   :  { %815 = vst.msk [vmem:[%s1338_s5] sm:$0xff] %vm804_vm1, %v814_v28 }

// kernel: drnet_forward.63
= control target key start
LH: loop header
LB: loop body
LE: loop exit
PB: predicated region body
PF: predicated region fallthrough
CT: control target
= control target key end

     0   :  { %v24_v0 = vlaneseq  ;;  %s890_s22 = smov 8   ;;  %s891_s23 = smov 4   ;;  %vm158_vm0 = vcmask 64512   ;;  %vm84_vm1 = vcmask 31744   ;;  %vm305_vm2 = vcmask 556032   ;;  %s1257_s2 = inlined_call_operand.vmem [shape: f32[9,512], index: 2, kind: input, shape index: {}]   ;;  %s1258_s1 = inlined_call_operand.vmem [shape: f32[8,648], index: 1, kind: input, shape index: {}]   ;;  %s1259_s0 = inlined_call_operand.vmem [shape: bf16[8,72], index: 0, kind: input, shape index: {}]   ;;  %s1260_s3 = inlined_call_operand.vmem [shape: f32[8,512], index: 3, kind: output, shape index: {0}]   ;;  %s1261_s4 = inlined_call_operand.vmem [shape: f32[8,1], index: 4, kind: output, shape index: {1}]   ;;  %s1262_s5 = inlined_call_operand.vmem [shape: f32[8,1], index: 5, kind: output, shape index: {2}]  }
   0x1   :  { %v795_v2 = vld [vmem:[%s1257_s2 + $0x20] ss:$8 sm:$0xf]  ;;  %v794_v6 = vld [vmem:[%s1257_s2 + $0x7] ss:$8 sm:$0xf] }
   0x2   :  { %v25_v1 = vshrl.u32 %v24_v0, 7  ;;  %v791_v14 = vld [vmem:[%s1257_s2 + $0x4] ss:$8 sm:$0xf]  ;;  %s892_s26 = smov 68   ;;  %s893_s29 = smov 72  }
   0x3   :  { %v792_v19 = vld [vmem:[%s1257_s2 + $0x5] ss:$8 sm:$0xf]  ;;  %v789_v24 = vld [vmem:[%s1257_s2 + $0x2] ss:$8 sm:$0xf] }
   0x4   :  { %v933_v3 = vsub.s32 2, %v25_v1  ;;  %v935_v4 = vsub.s32 0, %v25_v1  ;;  %v937_v5 = vsub.s32 1, %v25_v1  ;;  %v952_v13 = vsub.s32 3, %v25_v1  ;;  %s894_s9 = smov 64   ;;  %v1038_v61 = vld [vmem:[%s1258_s1 + $0x10] sm:$0xff] }
   0x5   :  { %v790_v27 = vld [vmem:[%s1257_s2 + $0x3] ss:$8 sm:$0xf]  ;;  %v788_v34 = vld [vmem:[%s1257_s2 + $0x1] ss:$8 sm:$0xf] }
   0x6   :  { %v547_v7 = vrot.slane %v795_v2, %v933_v3  ;;  %v539_v8 = vrot.slane %v795_v2, %v935_v4  ;;  %v543_v9 = vrot.slane %v795_v2, %v937_v5  ;;  %v467_v10 = vrot.slane %v794_v6, %v935_v4  ;;  %v1044_v63 = vld [vmem:[%s1258_s1 + $0x20] sm:$0xff]  ;;  %v1050_v1 = vld [vmem:[%s1258_s1 + $0x8] sm:$0xff]  ;;  %s895_s20 = smov 56   ;;  %s896_s21 = smov 60  }
   0x7   :  { %v471_v11 = vrot.slane %v794_v6, %v937_v5  ;;  %v475_v12 = vrot.slane %v794_v6, %v933_v3  ;;  %v551_v15 = vrot.slane %v795_v2, %v952_v13  ;;  %v284_v16 = vrot.slane %v791_v14, %v935_v4  ;;  %v1055_v2 = vld [vmem:[%s1258_s1 + $0x18] sm:$0xff]  ;;  %s897_s24 = smov 120   ;;  %s898_s25 = smov 124  }
   0x8   :  { %556 = vrot.lane.b32.xlu1 %v547_v7, %s890_s22  ;;  %552 = vrot.lane.b32.xlu0 %v539_v8, %s890_s22  ;;  %v288_v17 = vrot.slane %v791_v14, %v937_v5  ;;  %v292_v18 = vrot.slane %v791_v14, %v933_v3  ;;  %v358_v20 = vrot.slane %v792_v19, %v935_v4  ;;  %vm379_vm3 = vcmask 588800  }
   0x9   :  { %v362_v21 = vrot.slane %v792_v19, %v937_v5  ;;  %v366_v22 = vrot.slane %v792_v19, %v933_v3  ;;  %v479_v23 = vrot.slane %v794_v6, %v952_v13  ;;  %v141_v25 = vrot.slane %v789_v24, %v937_v5 }
   0xa   :  { %v137_v26 = vrot.slane %v789_v24, %v935_v4  ;;  %v211_v28 = vrot.slane %v790_v27, %v935_v4  ;;  %v145_v29 = vrot.slane %v789_v24, %v933_v3  ;;  %v219_v30 = vrot.slane %v790_v27, %v933_v3 }
   0xb   :  { %v215_v31 = vrot.slane %v790_v27, %v937_v5  ;;  %v370_v32 = vrot.slane %v792_v19, %v952_v13  ;;  %v296_v33 = vrot.slane %v791_v14, %v952_v13  ;;  %v67_v35 = vrot.slane %v788_v34, %v937_v5 }
   0xc   :  { %554 = vrot.lane.b32.xlu0 %v543_v9, %s890_s22  ;;  %480 = vrot.lane.b32.xlu1 %v467_v10, %s891_s23  ;;  %v63_v36 = vrot.slane %v788_v34, %v935_v4  ;;  %v149_v37 = vrot.slane %v789_v24, %v952_v13  ;;  %v71_v38 = vrot.slane %v788_v34, %v933_v3  ;;  %vm232_vm4 = vcmask 523264  }
   0xd   :  { %v223_v39 = vrot.slane %v790_v27, %v952_v13  ;;  %v75_v40 = vrot.slane %v788_v34, %v952_v13  ;;  %vm187_vm5 = vcmask 982016   ;;  %vm660_vm6 = vcmask 1043456  }
   0xe   :  { %vm113_vm7 = vcmask 1014784   ;;  %vm334_vm8 = vcmask 490496   ;;  %vm408_vm9 = vcmask 457728   ;;  %vm760_vm10 = vcmask 7168  }
  0x10   :  { %482 = vrot.lane.b32.xlu0 %v471_v11, %s891_s23  ;;  %484 = vrot.lane.b32.xlu1 %v475_v12, %s891_s23 }
  0x14   :  { %558 = vrot.lane.b32.xlu0 %v551_v15, %s890_s22  ;;  %297 = vrot.lane.b32.xlu1 %v284_v16, %s892_s26 }
  0x18   :  { %299 = vrot.lane.b32.xlu0 %v288_v17, %s892_s26  ;;  %301 = vrot.lane.b32.xlu1 %v292_v18, %s892_s26 }
  0x1c   :  { %371 = vrot.lane.b32.xlu0 %v358_v20, %s893_s29  ;;  %373 = vrot.lane.b32.xlu1 %v362_v21, %s893_s29  ;;  %v532_v21 = vld [vmem:[%s1258_s1 + $0x28] sm:$0xff] }
  0x20   :  { %375 = vrot.lane.b32.xlu0 %v366_v22, %s893_s29  ;;  %486 = vrot.lane.b32.xlu1 %v479_v23, %s891_s23 }
  0x24   :  { %152 = vrot.lane.b32.xlu1 %v141_v25, %s890_s22  ;;  %150 = vrot.lane.b32.xlu0 %v137_v26, %s890_s22 }
  0x28   :  { %224 = vrot.lane.b32.xlu1 %v211_v28, %s894_s9  ;;  %154 = vrot.lane.b32.xlu0 %v145_v29, %s890_s22 }
  0x2c   :  { %228 = vrot.lane.b32.xlu1 %v219_v30, %s894_s9  ;;  %226 = vrot.lane.b32.xlu0 %v215_v31, %s894_s9 }
  0x30   :  { %377 = vrot.lane.b32.xlu1 %v370_v32, %s893_s29  ;;  %303 = vrot.lane.b32.xlu0 %v296_v33, %s892_s26 }
  0x34   :  { %78 = vrot.lane.b32.xlu1 %v67_v35, %s891_s23  ;;  %76 = vrot.lane.b32.xlu0 %v63_v36, %s891_s23 }
  0x38   :  { %156 = vrot.lane.b32.xlu1 %v149_v37, %s890_s22  ;;  %80 = vrot.lane.b32.xlu0 %v71_v38, %s891_s23 }
  0x3c   :  { %230 = vrot.lane.b32.xlu0 %v223_v39, %s894_s9  ;;  %82 = vrot.lane.b32.xlu1 %v75_v40, %s891_s23 }
  0x7a   :  { %v557_v41 = vpop.permute.xlu1 %556  ;;  %v553_v42 = vpop.permute.xlu0 %552 }
  0x7b   :  { %v568_v17 = vmul.f32 %v553_v42, %v1050_v1 }
  0x7e   :  { %v555_v43 = vpop.permute.xlu0 %554  ;;  %v1011_v44 = vpop.permute.xlu1 %480 }
  0x7f   :  { %v560_v62 = vsel %vm158_vm0, %v553_v42, %v555_v43  ;;  %v561_v6 = vsel %vm158_vm0, %v555_v43, %v557_v41  ;;  %v496_v38 = vmul.f32 %v1050_v1, %v1011_v44 }
  0x80   :  { %v569_v7 = vmul.f32 %v560_v62, %v1038_v61  ;;  %v570_v18 = vmul.f32 %v561_v6, %v1055_v2 }
  0x82   :  { %v483_v45 = vpop.permute.xlu0 %482  ;;  %v485_v46 = vpop.permute.xlu1 %484  ;;  %v810_v25 = vpack.i.bf16 %v569_v7, %v568_v17 }
  0x83   :  { %v488_v8 = vsel %vm84_vm1, %v1011_v44, %v483_v45  ;;  %v489_v11 = vsel %vm84_vm1, %v483_v45, %v485_v46 }
  0x84   :  { %v497_v19 = vmul.f32 %v1038_v61, %v488_v8  ;;  %v498_v20 = vmul.f32 %v1055_v2, %v489_v11 }
  0x86   :  { %v559_v47 = vpop.permute.xlu0 %558  ;;  %v1013_v48 = vpop.permute.xlu1 %297  ;;  %v820_v32 = vpack.i.bf16 %v498_v20, %v497_v19 }
  0x87   :  { %v562_v0 = vsel %vm158_vm0, %v557_v41, %v559_v47  ;;  %v572_v28 = vmul.f32 %v559_v47, %v532_v21 }
  0x88   :  { %v571_v12 = vmul.f32 %v562_v0, %v1044_v63 }
  0x8a   :  { %v300_v49 = vpop.permute.xlu0 %299  ;;  %v1015_v50 = vpop.permute.xlu1 %301  ;;  %v815_v24 = vpack.i.bf16 %v571_v12, %v570_v18 }
  0x8b   :  { %v306_v22 = vsel %vm305_vm2, %v1013_v48, %v300_v49  ;;  %v307_v26 = vsel %vm305_vm2, %v300_v49, %v1015_v50 }
  0x8c   :  { %v315_v31 = vmul.f32 %v1050_v1, %v306_v22  ;;  %v316_v33 = vmul.f32 %v1038_v61, %v307_v26 }
  0x8e   :  { %v1017_v51 = vpop.permute.xlu0 %371  ;;  %v374_v52 = vpop.permute.xlu1 %373  ;;  %v835_v45 = vpack.i.bf16 %v316_v33, %v315_v31 }
  0x8f   :  { %v380_v39 = vsel %vm379_vm3, %v1017_v51, %v374_v52 }
  0x92   :  { %v1019_v53 = vpop.permute.xlu0 %375  ;;  %v1021_v54 = vpop.permute.xlu1 %486 }
  0x93   :  { %v490_v27 = vsel %vm84_vm1, %v485_v46, %v1021_v54  ;;  %v381_v34 = vsel %vm379_vm3, %v374_v52, %v1019_v53  ;;  %v389_v46 = vmul.f32 %v1050_v1, %v380_v39  ;;  %v500_v49 = vmul.f32 %v532_v21, %v1021_v54  ;;  %v1111_v52 = vld [vmem:[%s1258_s1] sm:$0xff] }
  0x94   :  { %v499_v35 = vmul.f32 %v1044_v63, %v490_v27  ;;  %v390_v40 = vmul.f32 %v1038_v61, %v381_v34  ;;  %v314_v8 = vmul.f32 %v1013_v48, %v1111_v52  ;;  %v899_v27 = vmov 0   ;;  %v793_v34 = vld [vmem:[%s1257_s2 + $0x6] ss:$8 sm:$0xf] }
  0x95   :  { %705 = vmatprep.mubr.bf16.mxu0 %v899_v27  ;;  %746 = vmatprep.mubr.bf16.mxu1 %v899_v27 }
  0x96   :  { %v1023_v55 = vpop.permute.xlu1 %152  ;;  %v1025_v56 = vpop.permute.xlu0 %150  ;;  %v830_v43 = vpack.i.bf16 %v499_v35, %v496_v38  ;;  %v840_v62 = vpack.i.bf16 %v390_v40, %v389_v46 }
  0x97   :  { %v159_v16 = vsel %vm158_vm0, %v1025_v56, %v1023_v55 }
  0x98   :  { %v168_v23 = vmul.f32 %v1050_v1, %v159_v16 }
  0x9a   :  { %v1027_v57 = vpop.permute.xlu1 %224  ;;  %v1029_v58 = vpop.permute.xlu0 %154  ;;  %v825_v36 = vpack.i.bf16 %v168_v23, %v572_v28 }
  0x9b   :  { %v241_v22 = vmul.f32 %v1111_v52, %v1027_v57 }
  0x9e   :  { %v1031_v59 = vpop.permute.xlu1 %228  ;;  %v1033_v60 = vpop.permute.xlu0 %226 }
  0x9f   :  { %v233_v6 = vsel %vm232_vm4, %v1027_v57, %v1033_v60  ;;  %v234_v7 = vsel %vm232_vm4, %v1033_v60, %v1031_v59  ;;  %v167_v60 = vmul.f32 %v1111_v52, %v1025_v56 }
  0xa0   :  { %v242_v11 = vmul.f32 %v1050_v1, %v233_v6  ;;  %v243_v12 = vmul.f32 %v1038_v61, %v234_v7 }
  0xa2   :  { %v378_v9 = vpop.permute.xlu1 %377  ;;  %v304_v10 = vpop.permute.xlu0 %303  ;;  %v865_v21 = vpack.i.bf16 %v243_v12, %v242_v11 }
  0xa3   :  { %v392_v14 = vmul.f32 %v1044_v63, %v378_v9  ;;  %v318_v15 = vmul.f32 %v1044_v63, %v304_v10  ;;  %v382_v44 = vsel %vm379_vm3, %v1019_v53, %v378_v9  ;;  %v308_v47 = vsel %vm305_vm2, %v1015_v50, %v304_v10 }
  0xa4   :  { %v160_v53 = vsel %vm158_vm0, %v1023_v55, %v1029_v58  ;;  %v391_v0 = vmul.f32 %v1055_v2, %v382_v44  ;;  %v317_v50 = vmul.f32 %v1055_v2, %v308_v47  ;;  %v388_v9 = vmul.f32 %v1017_v51, %v1111_v52 }
  0xa5   :  { %406 = vrot.lane.b32.xlu1 %v392_v14, %s895_s20  ;;  %332 = vrot.lane.b32.xlu0 %v318_v15, %s896_s21  ;;  %v169_v10 = vmul.f32 %v1038_v61, %v160_v53  ;;  %v431_v53 = vrot.slane %v793_v34, %v935_v4 }
  0xa6   :  { %v79_v29 = vpop.permute.xlu1 %78  ;;  %v77_v30 = vpop.permute.xlu0 %76  ;;  %v850_v14 = vpack.i.bf16 %v317_v50, %v314_v8  ;;  %v855_v15 = vpack.i.bf16 %v391_v0, %v388_v9 }
  0xa7   :  { %v85_v37 = vsel %vm84_vm1, %v77_v30, %v79_v29  ;;  %v860_v17 = vpack.i.bf16 %v167_v60, %v169_v10  ;;  %v93_v18 = vmul.f32 %v1111_v52, %v77_v30  ;;  %v443_v60 = vrot.slane %v793_v34, %v952_v13 }
  0xa8   :  { %v94_v41 = vmul.f32 %v1050_v1, %v85_v37  ;;  %v435_v37 = vrot.slane %v793_v34, %v937_v5 }
  0xa9   :  { %816 = vrot.lane.b32.xlu1 %v815_v24, %s897_s24  ;;  %811 = vrot.lane.b32.xlu0 %v810_v25, %s897_s24 }
  0xaa   :  { %v81_v42 = vpop.permute.xlu0 %80  ;;  %v845_v54 = vpack.i.bf16 %v94_v41, %v500_v49  ;;  %v157_v16 = vpop.permute.xlu1 %156 }
  0xab   :  { %v86_v48 = vsel %vm84_vm1, %v79_v29, %v81_v42  ;;  %v161_v56 = vsel %vm158_vm0, %v1029_v58, %v157_v16  ;;  %v171_v23 = vmul.f32 %v1044_v63, %v157_v16 }
  0xac   :  { %v95_v19 = vmul.f32 %v1038_v61, %v86_v48  ;;  %v170_v24 = vmul.f32 %v1055_v2, %v161_v56 }
  0xad   :  { %821 = vrot.lane.b32.xlu0 %v820_v32, %s898_s25  ;;  %826 = vrot.lane.b32.xlu1 %v825_v36, %s897_s24 }
  0xae   :  { %v231_v55 = vpop.permute.xlu0 %230  ;;  %v875_v26 = vpack.i.bf16 %v93_v18, %v95_v19  ;;  %v880_v57 = vpack.i.bf16 %v171_v23, %v170_v24 }
  0xaf   :  { %v235_v51 = vsel %vm232_vm4, %v1031_v59, %v231_v55  ;;  %v83_v59 = vpop.permute.xlu1 %82  ;;  %v245_v58 = vmul.f32 %v1044_v63, %v231_v55  ;;  %v439_v55 = vrot.slane %v793_v34, %v933_v3 }
  0xb0   :  { %v244_v20 = vmul.f32 %v1055_v2, %v235_v51  ;;  %v87_v28 = vsel %vm84_vm1, %v81_v42, %v83_v59  ;;  %v97_v30 = vmul.f32 %v1044_v63, %v83_v59 }
  0xb1   :  { %831 = vrot.lane.b32.xlu0 %v830_v43, %s898_s25  ;;  %836 = vrot.lane.b32.xlu1 %v835_v45, %s896_s21  ;;  %v96_v29 = vmul.f32 %v1055_v2, %v87_v28  ;;  %v450_v59 = vmul.f32 %v1055_v2, %v439_v55 }
  0xb2   :  { %v870_v25 = vpack.i.bf16 %v244_v20, %v241_v22  ;;  %v451_v22 = vmul.f32 %v1044_v63, %v443_v60 }
  0xb3   :  { %v885_v31 = vpack.i.bf16 %v97_v30, %v96_v29 }
  0xb5   :  { %841 = vrot.lane.b32.xlu0 %v840_v62, %s895_s20  ;;  %846 = vrot.lane.b32.xlu1 %v845_v54, %s898_s25  ;;  %v449_v62 = vmul.f32 %v1038_v61, %v435_v37 }
  0xb9   :  { %851 = vrot.lane.b32.xlu0 %v850_v14, %s896_s21  ;;  %856 = vrot.lane.b32.xlu1 %v855_v15, %s895_s20  ;;  %v448_v15 = vmul.f32 %v1050_v1, %v431_v53 }
  0xbd   :  { %861 = vrot.lane.b32.xlu0 %v860_v17, %s897_s24  ;;  %866 = vrot.lane.b32.xlu1 %v865_v21, %s894_s9 }
  0xc1   :  { %871 = vrot.lane.b32.xlu0 %v870_v25, %s894_s9  ;;  %876 = vrot.lane.b32.xlu1 %v875_v26, %s898_s25 }
  0xc5   :  { %881 = vrot.lane.b32.xlu0 %v880_v57, %s897_s24  ;;  %259 = vrot.lane.b32.xlu1 %v245_v58, %s894_s9  ;;  %v1198_v58 = vld [vmem:[%s1257_s2] ss:$8 sm:$0xf] }
  0xc6   :  { %v39_v60 = vrot.slane %v1198_v58, %v952_v13 }
  0xc9   :  { %886 = vrot.lane.b32.xlu0 %v885_v31, %s898_s25 }
 0x117   :  { %v1160_v32 = vpop.permute.xlu1 %406  ;;  %v1162_v33 = vpop.permute.xlu0 %332 }
 0x11b   :  { %v817_v35 = vpop.permute.xlu1 %816  ;;  %v812_v36 = vpop.permute.xlu0 %811 }
 0x11c   :  { %v819_v38 = vunpack.i.h.bf16 %v817_v35  ;;  %v818_v39 = vunpack.i.l.bf16 %v817_v35  ;;  %v814_v40 = vunpack.i.h.bf16 %v812_v36  ;;  %v813_v41 = vunpack.i.l.bf16 %v812_v36 }
 0x11e   :  { %v589_v42 = vsel %vm187_vm5, %v814_v40, %v818_v39  ;;  %v588_v43 = vsel %vm187_vm5, %v813_v41, %v814_v40  ;;  %v590_v45 = vsel %vm187_vm5, %v818_v39, %v819_v38  ;;  %v31_v39 = vrot.slane %v1198_v58, %v937_v5 }
 0x11f   :  { %v822_v46 = vpop.permute.xlu0 %821  ;;  %v1171_v44 = vpop.permute.xlu1 %826  ;;  %v654_v47 = vpack.c.bf16 %v589_v42, %v589_v42  ;;  %v653_v49 = vpack.c.bf16 %v588_v43, %v588_v43  ;;  %v655_v7 = vpack.c.bf16 %v590_v45, %v590_v45 }
 0x120   :  { %v824_v0 = vunpack.i.h.bf16 %v822_v46  ;;  %v823_v50 = vunpack.i.l.bf16 %v822_v46  ;;  %v828_v54 = vunpack.i.l.bf16 %v1171_v44  ;;  %v829_v5 = vunpack.i.h.bf16 %v1171_v44 }
 0x121   :  { %796 = vmatprep.subr.msk.bf16.mxu0 %vm660_vm6, %v654_v47  ;;  %v662_v6 = vsel %vm660_vm6, %v653_v49, 0  ;;  %v668_v16 = vsel %vm660_vm6, %v655_v7, 0  ;;  %v27_v44 = vrot.slane %v1198_v58, %v935_v4 }
 0x122   :  { %680 = vmatpush1.bf16.msra.mxu0 %v662_v6  ;;  %v517_v8 = vsel %vm113_vm7, %v823_v50, %v824_v0  ;;  %v591_v9 = vsel %vm187_vm5, %v819_v38, %v828_v54 }
 0x123   :  { %v832_v10 = vpop.permute.xlu0 %831  ;;  %v837_v11 = vpop.permute.xlu1 %836  ;;  %v650_v12 = vpack.c.bf16 %v517_v8, %v449_v62  ;;  %v656_v14 = vpack.c.bf16 %v591_v9, %v591_v9 }
 0x124   :  { %v834_v48 = vunpack.i.h.bf16 %v832_v10  ;;  %v833_v51 = vunpack.i.l.bf16 %v832_v10  ;;  %v839_v17 = vunpack.i.h.bf16 %v837_v11  ;;  %v838_v18 = vunpack.i.l.bf16 %v837_v11 }
 0x125   :  { %681 = vmatprep.subr.bf16.mxu0 %v650_v12  ;;  %798 = vmatprep.subr.msk.bf16.mxu1 %vm660_vm6, %v656_v14  ;;  %v45_v10 = vmul.f32 %v1050_v1, %v31_v39 }
 0x126   :  { %721 = vmatpush1.bf16.msra.mxu1 %v668_v16  ;;  %v516_v19 = vsel %vm113_vm7, %v833_v51, %v823_v50  ;;  %v518_v26 = vsel %vm113_vm7, %v824_v0, %v834_v48  ;;  %v336_v27 = vsel %vm334_vm8, %v838_v18, %v839_v17 }
 0x127   :  { %v842_v20 = vpop.permute.xlu0 %841  ;;  %v1186_v21 = vpop.permute.xlu1 %846  ;;  %v649_v56 = vpack.c.bf16 %v516_v19, %v448_v15  ;;  %v651_v34 = vpack.c.bf16 %v518_v26, %v450_v59  ;;  %v47_v59 = vmul.f32 %v1055_v2, %v39_v60  ;;  %v600_v2 = vld [vmem:[%s1259_s0] sm:$0xf] }
 0x128   :  { %v844_v23 = vunpack.i.h.bf16 %v842_v20  ;;  %v843_v24 = vunpack.i.l.bf16 %v842_v20  ;;  %v848_v25 = vunpack.i.l.bf16 %v1186_v21  ;;  %v849_v11 = vunpack.i.h.bf16 %v1186_v21 }
 0x129   :  { %682 = vmatpush1.bf16.msra.mxu0 %v649_v56  ;;  %v44_v20 = vmul.f32 %v1111_v52, %v27_v44  ;;  %v35_v21 = vrot.slane %v1198_v58, %v933_v3 }
 0x12a   :  { %v410_v28 = vsel %vm408_vm9, %v843_v24, %v844_v23  ;;  %v519_v57 = vsel %vm113_vm7, %v834_v48, %v848_v25 }
 0x12b   :  { %v852_v63 = vpop.permute.xlu0 %851  ;;  %v857_v29 = vpop.permute.xlu1 %856  ;;  %v646_v30 = vpack.c.bf16 %v410_v28, %v336_v27  ;;  %v652_v31 = vpack.c.bf16 %v519_v57, %v451_v22  ;;  %v46_v57 = vmul.f32 %v1038_v61, %v35_v21 }
 0x12c   :  { %v854_v35 = vunpack.i.h.bf16 %v852_v63  ;;  %v853_v36 = vunpack.i.l.bf16 %v852_v63  ;;  %v859_v37 = vunpack.i.h.bf16 %v857_v29  ;;  %v858_v38 = vunpack.i.l.bf16 %v857_v29 }
 0x12d   :  { %683 = vmatprep.subr.bf16.mxu0 %v646_v30  ;;  %722 = vmatprep.subr.bf16.mxu1 %v652_v31 }
 0x12e   :  { %723 = vmatpush1.bf16.msra.mxu1 %v651_v34  ;;  %v335_v40 = vsel %vm334_vm8, %v853_v36, %v838_v18  ;;  %v409_v41 = vsel %vm408_vm9, %v858_v38, %v843_v24  ;;  %v338_v42 = vsel %vm334_vm8, %v854_v35, %v1162_v33  ;;  %v412_v43 = vsel %vm408_vm9, %v859_v37, %v1160_v32 }
 0x12f   :  { %v862_v45 = vpop.permute.xlu0 %861  ;;  %v867_v46 = vpop.permute.xlu1 %866  ;;  %v645_v47 = vpack.c.bf16 %v409_v41, %v335_v40  ;;  %v648_v49 = vpack.c.bf16 %v412_v43, %v338_v42  ;;  %v337_v62 = vsel %vm334_vm8, %v839_v17, %v854_v35  ;;  %v411_v53 = vsel %vm408_vm9, %v844_v23, %v859_v37 }
 0x130   :  { %v863_v0 = vunpack.i.l.bf16 %v862_v45  ;;  %v869_v50 = vunpack.i.h.bf16 %v867_v46  ;;  %v868_v54 = vunpack.i.l.bf16 %v867_v46  ;;  %v647_v6 = vpack.c.bf16 %v411_v53, %v337_v62 }
 0x131   :  { %684 = vmatpush1.bf16.msra.mxu0 %v645_v47  ;;  %724 = vmatprep.subr.bf16.mxu1 %v648_v49  ;;  %v864_v33 = vunpack.i.h.bf16 %v862_v45 }
 0x132   :  { %v189_v7 = vsel %vm187_vm5, %v829_v5, %v863_v0  ;;  %v262_v32 = vsel %vm232_vm4, %v868_v54, %v869_v50  ;;  %725 = vmatpush1.bf16.msra.mxu1 %v647_v6 }
 0x133   :  { %v872_v8 = vpop.permute.xlu0 %871  ;;  %v877_v9 = vpop.permute.xlu1 %876  ;;  %v642_v55 = vpack.c.bf16 %v262_v32, %v189_v7  ;;  %v188_v51 = vsel %vm187_vm5, %v864_v33, %v829_v5 }
 0x134   :  { %v873_v12 = vunpack.i.l.bf16 %v872_v8  ;;  %v879_v14 = vunpack.i.h.bf16 %v877_v9  ;;  %v878_v15 = vunpack.i.l.bf16 %v877_v9  ;;  %v874_v48 = vunpack.i.h.bf16 %v872_v8 }
 0x135   :  { %685 = vmatprep.subr.bf16.mxu0 %v642_v55 }
 0x136   :  { %v261_v16 = vsel %vm232_vm4, %v873_v12, %v868_v54  ;;  %v115_v17 = vsel %vm113_vm7, %v849_v11, %v878_v15  ;;  %v114_v13 = vsel %vm113_vm7, %v879_v14, %v849_v11  ;;  %v263_v26 = vsel %vm232_vm4, %v869_v50, %v874_v48 }
 0x137   :  { %v882_v1 = vpop.permute.xlu0 %881  ;;  %v260_v18 = vpop.permute.xlu1 %259  ;;  %v641_v19 = vpack.c.bf16 %v261_v16, %v188_v51  ;;  %v638_v4 = vpack.c.bf16 %v115_v17, %v45_v10  ;;  %v637_v28 = vpack.c.bf16 %v114_v13, %v44_v20 }
 0x138   :  { %v884_v56 = vunpack.i.h.bf16 %v882_v1  ;;  %v883_v22 = vunpack.i.l.bf16 %v882_v1  ;;  %v264_v24 = vsel %vm232_vm4, %v874_v48, %v260_v18 }
 0x139   :  { %686 = vmatpush1.bf16.msra.mxu0 %v641_v19 }
 0x13a   :  { %v191_v23 = vsel %vm187_vm5, %v883_v22, %v884_v56  ;;  %687 = vmatprep.subr.bf16.mxu0 %v638_v4  ;;  %v190_v25 = vsel %vm187_vm5, %v863_v0, %v883_v22 }
 0x13b   :  { %v644_v52 = vpack.c.bf16 %v264_v24, %v191_v23  ;;  %v887_v27 = vpop.permute.xlu0 %886  ;;  %v643_v3 = vpack.c.bf16 %v263_v26, %v190_v25 }
 0x13c   :  { %v889_v58 = vunpack.i.h.bf16 %v887_v27  ;;  %v888_v63 = vunpack.i.l.bf16 %v887_v27 }
 0x13d   :  { %688 = vmatpush1.bf16.msra.mxu0 %v637_v28  ;;  %726 = vmatprep.subr.bf16.mxu1 %v644_v52 }
 0x13e   :  { %727 = vmatpush1.bf16.msra.mxu1 %v643_v3  ;;  %v117_v29 = vsel %vm113_vm7, %v888_v63, %v889_v58  ;;  %v116_v30 = vsel %vm113_vm7, %v878_v15, %v888_v63 }
 0x13f   :  { %v640_v31 = vpack.c.bf16 %v117_v29, %v47_v59  ;;  %v639_v34 = vpack.c.bf16 %v116_v30, %v46_v57 }
 0x140   :  { %797 = vmatmul.mubr.msk.bf16.vlgmr.msra.gmra.mxu0 %vm379_vm3, %v600_v2 }
 0x141   :  { %728 = vmatprep.subr.bf16.mxu1 %v640_v31 }
 0x142   :  { %729 = vmatpush1.bf16.msra.mxu1 %v639_v34 }
 0x145   :  { %799 = vmatmul.mubr.msk.bf16.vlgmr.msra.gmra.mxu1 %vm379_vm3, %v600_v2 }
 0x200   :  { %v707_v61 = vpop.f32.mrf.mxu0 }
 0x201   :  { %v762_v35 = vmul.f32 %v707_v61, %v707_v61  ;;  %772 = vst [vmem:[%s1260_s3] sm:$0xff] %v707_v61 }
 0x202   :  { %v709_v36 = vpop.f32.mrf.mxu0 }
 0x203   :  { %v755_v37 = vadd.f32 %v709_v36, %v707_v61  ;;  %v763_v38 = vmul.f32 %v709_v36, %v709_v36  ;;  %773 = vst [vmem:[%s1260_s3 + $0x8] sm:$0xff] %v709_v36 }
 0x204   :  { %v711_v39 = vpop.f32.mrf.mxu0 }
 0x205   :  { %v748_v40 = vpop.f32.mrf.mxu1  ;;  %v766_v41 = vadd.f32 %v763_v38, %v762_v35 }
 0x206   :  { %v764_v42 = vmul.f32 %v748_v40, %v748_v40  ;;  %774 = vst [vmem:[%s1260_s3 + $0x10] sm:$0xff] %v748_v40  ;;  %v712_v43 = vpop.f32.mrf.mxu0  ;;  %v756_v45 = vadd.f32 %v755_v37, %v748_v40 }
 0x207   :  { %v750_v46 = vpop.f32.mrf.mxu1 }
 0x208   :  { %775 = vst [vmem:[%s1260_s3 + $0x18] sm:$0xff] %v750_v46  ;;  %v757_v47 = vadd.f32 %v756_v45, %v750_v46  ;;  %v765_v49 = vmul.f32 %v750_v46, %v750_v46  ;;  %v767_v62 = vadd.f32 %v766_v41, %v764_v42 }
 0x209   :  { %v752_v53 = vpop.f32.mrf.mxu1 }
 0x20a   :  { %758 = vadd.xlane.f32.xlu1 %v757_v47  ;;  %v768_v5 = vadd.f32 %v767_v62, %v765_v49 }
 0x20b   :  { %v753_v0 = vpop.f32.mrf.mxu1 }
 0x20c   :  { %769 = vadd.xlane.f32.xlu0 %v768_v5 }
 0x293   :  { %v759_v50 = vpop.xlane.xlu1 %758 }
 0x294   :  { %761 = vst.msk [vmem:[%s1261_s4] sm:$0xff] %vm760_vm10, %v759_v50 }
 0x295   :  { %v770_v54 = vpop.xlane.xlu0 %769 }
 0x296   :  { %771 = vst.msk [vmem:[%s1262_s5] sm:$0xff] %vm760_vm10, %v770_v54 }

// kernel: drnet_forward.67
= control target key start
LH: loop header
LB: loop body
LE: loop exit
PB: predicated region body
PF: predicated region fallthrough
CT: control target
= control target key end

     0   :  { %vm28_vm0 = vcmask 1043456   ;;  %v176_v3 = vmov 0   ;;  %vm24_vm1 = vcmask 64512   ;;  %vm141_vm2 = vcmask 7168   ;;  %s239_s1 = inlined_call_operand.vmem [shape: f32[8,512], index: 1, kind: input, shape index: {}]   ;;  %s240_s0 = inlined_call_operand.vmem [shape: bf16[8,8], index: 0, kind: input, shape index: {}]   ;;  %s241_s2 = inlined_call_operand.vmem [shape: f32[8,512], index: 2, kind: output, shape index: {0}]   ;;  %s242_s3 = inlined_call_operand.vmem [shape: f32[8,1], index: 3, kind: output, shape index: {1}]   ;;  %s243_s4 = inlined_call_operand.vmem [shape: f32[8,1], index: 4, kind: output, shape index: {2}]  }
   0x1   :  { %v17_v0 = vld [vmem:[%s239_s1 + $0x8] sm:$0xff]  ;;  %v19_v1 = vld [vmem:[%s239_s1 + $0x18] sm:$0xff]  ;;  %v16_v2 = vld [vmem:[%s239_s1] sm:$0xff]  ;;  %73 = vmatprep.mubr.bf16.mxu0 %v176_v3  ;;  %114 = vmatprep.mubr.bf16.mxu1 %v176_v3 }
   0x2   :  { %v21_v4 = vpack.c.bf16 %v17_v0, %v17_v0  ;;  %v23_v5 = vpack.c.bf16 %v19_v1, %v19_v1  ;;  %v20_v6 = vpack.c.bf16 %v16_v2, %v16_v2  ;;  %v18_v7 = vld [vmem:[%s239_s1 + $0x10] sm:$0xff]  ;;  %v15_v11 = vld [vmem:[%s240_s0] sm:$0xf] }
   0x3   :  { %v22_v8 = vpack.c.bf16 %v18_v7, %v18_v7 }
   0x4   :  { %171 = vmatprep.subr.msk.bf16.mxu0 %vm28_vm0, %v21_v4  ;;  %173 = vmatprep.subr.msk.bf16.mxu1 %vm28_vm0, %v23_v5  ;;  %v30_v9 = vsel %vm28_vm0, %v20_v6, 0 }
   0x5   :  { %56 = vmatpush1.bf16.msra.mxu0 %v30_v9  ;;  %v36_v10 = vsel %vm28_vm0, %v22_v8, 0 }
   0x6   :  { %97 = vmatpush1.bf16.msra.mxu1 %v36_v10 }
   0x8   :  { %172 = vmatmul.mubr.msk.bf16.vlgmr.msra.gmra.mxu0 %vm24_vm1, %v15_v11 }
   0x9   :  { %174 = vmatmul.mubr.msk.bf16.vlgmr.msra.gmra.mxu1 %vm24_vm1, %v15_v11 }
  0xc8   :  { %v75_v12 = vpop.f32.mrf.mxu0 }
  0xc9   :  { %155 = vst [vmem:[%s241_s2] sm:$0xff] %v75_v12  ;;  %v116_v13 = vpop.f32.mrf.mxu1  ;;  %v128_v15 = vmul.f32 %v75_v12, %v75_v12 }
  0xca   :  { %157 = vst [vmem:[%s241_s2 + $0x10] sm:$0xff] %v116_v13  ;;  %v77_v14 = vpop.f32.mrf.mxu0  ;;  %v130_v16 = vmul.f32 %v116_v13, %v116_v13 }
  0xcb   :  { %v123_v17 = vadd.f32 %v77_v14, %v75_v12  ;;  %v129_v18 = vmul.f32 %v77_v14, %v77_v14  ;;  %156 = vst [vmem:[%s241_s2 + $0x8] sm:$0xff] %v77_v14  ;;  %v118_v19 = vpop.f32.mrf.mxu1 }
  0xcc   :  { %158 = vst [vmem:[%s241_s2 + $0x18] sm:$0xff] %v118_v19  ;;  %v79_v20 = vpop.f32.mrf.mxu0  ;;  %v131_v28 = vmul.f32 %v118_v19, %v118_v19 }
  0xcd   :  { %v120_v21 = vpop.f32.mrf.mxu1  ;;  %v124_v22 = vadd.f32 %v123_v17, %v116_v13  ;;  %v132_v23 = vadd.f32 %v129_v18, %v128_v15 }
  0xce   :  { %v80_v24 = vpop.f32.mrf.mxu0 }
  0xcf   :  { %v121_v25 = vpop.f32.mrf.mxu1  ;;  %v125_v26 = vadd.f32 %v124_v22, %v118_v19  ;;  %v133_v27 = vadd.f32 %v132_v23, %v130_v16 }
  0xd1   :  { %126 = vadd.xlane.f32.xlu0 %v125_v26  ;;  %v134_v29 = vadd.f32 %v133_v27, %v131_v28 }
  0xd5   :  { %135 = vadd.xlane.f32.xlu0 %v134_v29 }
 0x15a   :  { %v127_v30 = vpop.xlane.xlu0 %126 }
 0x15b   :  { %142 = vst.msk [vmem:[%s242_s3] sm:$0xff] %vm141_vm2, %v127_v30 }
 0x15e   :  { %v136_v31 = vpop.xlane.xlu0 %135 }
 0x15f   :  { %143 = vst.msk [vmem:[%s243_s4] sm:$0xff] %vm141_vm2, %v136_v31 }

// kernel: drnet_forward.65
= control target key start
LH: loop header
LB: loop body
LE: loop exit
PB: predicated region body
PF: predicated region fallthrough
CT: control target
= control target key end

     0   :  { %v24_v0 = vlaneseq  ;;  %s834_s22 = smov 16   ;;  %s835_s23 = smov 8   ;;  %vm158_vm0 = vcmask 130048   ;;  %vm84_vm1 = vcmask 64512   ;;  %vm187_vm2 = vcmask 916480   ;;  %s1166_s2 = inlined_call_operand.vmem [shape: f32[9,512], index: 2, kind: input, shape index: {}]   ;;  %s1167_s1 = inlined_call_operand.vmem [shape: f32[8,784], index: 1, kind: input, shape index: {}]   ;;  %s1168_s0 = inlined_call_operand.vmem [shape: bf16[8,72], index: 0, kind: input, shape index: {}]   ;;  %s1169_s3 = inlined_call_operand.vmem [shape: f32[8,512], index: 3, kind: output, shape index: {0}]   ;;  %s1170_s4 = inlined_call_operand.vmem [shape: f32[8,1], index: 4, kind: output, shape index: {1}]   ;;  %s1171_s5 = inlined_call_operand.vmem [shape: f32[8,1], index: 5, kind: output, shape index: {2}]  }
   0x1   :  { %v754_v2 = vld [vmem:[%s1166_s2 + $0x20] ss:$8 sm:$0xf]  ;;  %v753_v6 = vld [vmem:[%s1166_s2 + $0x7] ss:$8 sm:$0xf] }
   0x2   :  { %v25_v1 = vshrl.u32 %v24_v0, 7  ;;  %v750_v14 = vld [vmem:[%s1166_s2 + $0x4] ss:$8 sm:$0xf]  ;;  %s836_s13 = smov 112   ;;  %s837_s14 = smov 120  }
   0x3   :  { %v751_v19 = vld [vmem:[%s1166_s2 + $0x5] ss:$8 sm:$0xf]  ;;  %v748_v24 = vld [vmem:[%s1166_s2 + $0x2] ss:$8 sm:$0xf] }
   0x4   :  { %v872_v3 = vsub.s32 2, %v25_v1  ;;  %v874_v4 = vsub.s32 0, %v25_v1  ;;  %v876_v5 = vsub.s32 1, %v25_v1  ;;  %v891_v13 = vsub.s32 3, %v25_v1  ;;  %v946_v38 = vld [vmem:[%s1167_s1 + $0x10] sm:$0xff]  ;;  %v951_v39 = vld [vmem:[%s1167_s1 + $0x18] sm:$0xff] }
   0x5   :  { %v747_v29 = vld [vmem:[%s1166_s2 + $0x1] ss:$8 sm:$0xf]  ;;  %vm113_vm3 = vcmask 982016   ;;  %vm619_vm4 = vcmask 1043456   ;;  %vm615_vm5 = vcmask 588800  }
   0x6   :  { %v505_v7 = vrot.slane %v754_v2, %v872_v3  ;;  %v497_v8 = vrot.slane %v754_v2, %v874_v4  ;;  %v501_v9 = vrot.slane %v754_v2, %v876_v5  ;;  %v425_v10 = vrot.slane %v753_v6, %v874_v4  ;;  %v959_v48 = vld [vmem:[%s1167_s1 + $0x20] sm:$0xff]  ;;  %v973_v0 = vld [vmem:[%s1167_s1 + $0x8] sm:$0xff] }
   0x7   :  { %v429_v11 = vrot.slane %v753_v6, %v876_v5  ;;  %v433_v12 = vrot.slane %v753_v6, %v872_v3  ;;  %v509_v15 = vrot.slane %v754_v2, %v891_v13  ;;  %v246_v16 = vrot.slane %v750_v14, %v874_v4  ;;  %v979_v1 = vld [vmem:[%s1167_s1 + $0x28] sm:$0xff]  ;;  %v490_v2 = vld [vmem:[%s1167_s1 + $0x30] sm:$0xff] }
   0x8   :  { %514 = vrot.lane.b32.xlu1 %v505_v7, %s834_s22  ;;  %510 = vrot.lane.b32.xlu0 %v497_v8, %s834_s22  ;;  %v250_v17 = vrot.slane %v750_v14, %v876_v5  ;;  %v254_v18 = vrot.slane %v750_v14, %v872_v3  ;;  %v318_v20 = vrot.slane %v751_v19, %v874_v4  ;;  %vm719_vm6 = vcmask 7168  }
   0x9   :  { %v322_v21 = vrot.slane %v751_v19, %v876_v5  ;;  %v326_v22 = vrot.slane %v751_v19, %v872_v3  ;;  %v437_v23 = vrot.slane %v753_v6, %v891_v13  ;;  %v141_v25 = vrot.slane %v748_v24, %v876_v5 }
   0xa   :  { %v137_v26 = vrot.slane %v748_v24, %v874_v4  ;;  %v258_v27 = vrot.slane %v750_v14, %v891_v13  ;;  %v145_v28 = vrot.slane %v748_v24, %v872_v3  ;;  %v330_v30 = vrot.slane %v751_v19, %v891_v13 }
   0xb   :  { %v63_v31 = vrot.slane %v747_v29, %v874_v4  ;;  %v67_v32 = vrot.slane %v747_v29, %v876_v5  ;;  %v71_v33 = vrot.slane %v747_v29, %v872_v3  ;;  %v149_v34 = vrot.slane %v748_v24, %v891_v13 }
   0xc   :  { %512 = vrot.lane.b32.xlu0 %v501_v9, %s834_s22  ;;  %438 = vrot.lane.b32.xlu1 %v425_v10, %s835_s23  ;;  %v75_v35 = vrot.slane %v747_v29, %v891_v13 }
  0x10   :  { %440 = vrot.lane.b32.xlu0 %v429_v11, %s835_s23  ;;  %442 = vrot.lane.b32.xlu1 %v433_v12, %s835_s23 }
  0x14   :  { %516 = vrot.lane.b32.xlu0 %v509_v15, %s834_s22  ;;  %259 = vrot.lane.b32.xlu1 %v246_v16, %s835_s23 }
  0x18   :  { %261 = vrot.lane.b32.xlu0 %v250_v17, %s835_s23  ;;  %263 = vrot.lane.b32.xlu1 %v254_v18, %s835_s23 }
  0x1c   :  { %331 = vrot.lane.b32.xlu0 %v318_v20, %s834_s22  ;;  %333 = vrot.lane.b32.xlu1 %v322_v21, %s834_s22 }
  0x20   :  { %335 = vrot.lane.b32.xlu0 %v326_v22, %s834_s22  ;;  %444 = vrot.lane.b32.xlu1 %v437_v23, %s835_s23 }
  0x24   :  { %152 = vrot.lane.b32.xlu1 %v141_v25, %s834_s22  ;;  %150 = vrot.lane.b32.xlu0 %v137_v26, %s834_s22 }
  0x28   :  { %265 = vrot.lane.b32.xlu1 %v258_v27, %s835_s23  ;;  %154 = vrot.lane.b32.xlu0 %v145_v28, %s834_s22 }
  0x2c   :  { %337 = vrot.lane.b32.xlu0 %v330_v30, %s834_s22  ;;  %76 = vrot.lane.b32.xlu1 %v63_v31, %s835_s23 }
  0x30   :  { %78 = vrot.lane.b32.xlu0 %v67_v32, %s835_s23  ;;  %80 = vrot.lane.b32.xlu1 %v71_v33, %s835_s23 }
  0x34   :  { %156 = vrot.lane.b32.xlu0 %v149_v34, %s834_s22  ;;  %82 = vrot.lane.b32.xlu1 %v75_v35, %s835_s23 }
  0x7a   :  { %v515_v36 = vpop.permute.xlu1 %514  ;;  %v511_v37 = vpop.permute.xlu0 %510 }
  0x7b   :  { %v526_v43 = vmul.f32 %v511_v37, %v946_v38 }
  0x7e   :  { %v513_v40 = vpop.permute.xlu0 %512  ;;  %v439_v41 = vpop.permute.xlu1 %438 }
  0x7f   :  { %v518_v42 = vsel %vm158_vm0, %v511_v37, %v513_v40  ;;  %v454_v59 = vmul.f32 %v946_v38, %v439_v41  ;;  %v519_v12 = vsel %vm158_vm0, %v513_v40, %v515_v36 }
  0x80   :  { %v527_v44 = vmul.f32 %v518_v42, %v951_v39  ;;  %v528_v22 = vmul.f32 %v519_v12, %v959_v48 }
  0x82   :  { %v441_v45 = vpop.permute.xlu0 %440  ;;  %v443_v46 = vpop.permute.xlu1 %442  ;;  %v769_v47 = vpack.i.bf16 %v527_v44, %v526_v43 }
  0x83   :  { %v446_v49 = vsel %vm84_vm1, %v439_v41, %v441_v45  ;;  %v447_v50 = vsel %vm84_vm1, %v441_v45, %v443_v46 }
  0x84   :  { %v455_v51 = vmul.f32 %v951_v39, %v446_v49  ;;  %v456_v52 = vmul.f32 %v959_v48, %v447_v50  ;;  %770 = vrot.lane.b32.xlu0 %v769_v47, %s836_s13 }
  0x86   :  { %v517_v53 = vpop.permute.xlu0 %516  ;;  %v260_v54 = vpop.permute.xlu1 %259  ;;  %v779_v55 = vpack.i.bf16 %v456_v52, %v455_v51 }
  0x87   :  { %v520_v6 = vsel %vm158_vm0, %v515_v36, %v517_v53  ;;  %v275_v9 = vmul.f32 %v260_v54, %v973_v0  ;;  %v530_v29 = vmul.f32 %v517_v53, %v490_v2 }
  0x88   :  { %780 = vrot.lane.b32.xlu0 %v779_v55, %s837_s14  ;;  %v529_v16 = vmul.f32 %v520_v6, %v979_v1  ;;  %v1019_v55 = vld [vmem:[%s1167_s1] sm:$0xff] }
  0x8a   :  { %v262_v56 = vpop.permute.xlu0 %261  ;;  %v264_v57 = vpop.permute.xlu1 %263  ;;  %v774_v25 = vpack.i.bf16 %v529_v16, %v528_v22 }
  0x8b   :  { %v267_v58 = vsel %vm84_vm1, %v260_v54, %v262_v56  ;;  %v268_v31 = vsel %vm84_vm1, %v262_v56, %v264_v57 }
  0x8c   :  { %v276_v60 = vmul.f32 %v946_v38, %v267_v58  ;;  %v277_v42 = vmul.f32 %v951_v39, %v268_v31 }
  0x8e   :  { %v332_v61 = vpop.permute.xlu0 %331  ;;  %v334_v62 = vpop.permute.xlu1 %333  ;;  %v789_v63 = vpack.i.bf16 %v276_v60, %v454_v59 }
  0x8f   :  { %v347_v14 = vmul.f32 %v332_v61, %v973_v0  ;;  %v339_v18 = vsel %vm158_vm0, %v332_v61, %v334_v62 }
  0x90   :  { %790 = vrot.lane.b32.xlu0 %v789_v63, %s837_s14  ;;  %v348_v23 = vmul.f32 %v946_v38, %v339_v18 }
  0x92   :  { %v336_v7 = vpop.permute.xlu0 %335  ;;  %v445_v8 = vpop.permute.xlu1 %444  ;;  %v784_v35 = vpack.i.bf16 %v348_v23, %v530_v29 }
  0x93   :  { %v340_v10 = vsel %vm158_vm0, %v334_v62, %v336_v7  ;;  %v458_v11 = vmul.f32 %v490_v2, %v445_v8  ;;  %v448_v26 = vsel %vm84_vm1, %v443_v46, %v445_v8 }
  0x94   :  { %v349_v15 = vmul.f32 %v951_v39, %v340_v10  ;;  %v457_v34 = vmul.f32 %v979_v1, %v448_v26 }
  0x95   :  { %v764_v17 = vpack.i.bf16 %v275_v9, %v458_v11  ;;  %v838_v9 = vmov 0  }
  0x96   :  { %v153_v19 = vpop.permute.xlu1 %152  ;;  %v151_v20 = vpop.permute.xlu0 %150  ;;  %v799_v21 = vpack.i.bf16 %v347_v14, %v349_v15  ;;  %v794_v49 = vpack.i.bf16 %v457_v34, %v277_v42  ;;  %664 = vmatprep.mubr.bf16.mxu0 %v838_v9  ;;  %705 = vmatprep.mubr.bf16.mxu1 %v838_v9 }
  0x97   :  { %765 = vrot.lane.b32.xlu1 %v764_v17, %s837_s14  ;;  %v159_v24 = vsel %vm158_vm0, %v151_v20, %v153_v19  ;;  %v167_v62 = vmul.f32 %v151_v20, %v1019_v55  ;;  %v1046_v20 = vld [vmem:[%s1166_s2 + $0x3] ss:$8 sm:$0xf] }
  0x98   :  { %800 = vrot.lane.b32.xlu0 %v799_v21, %s836_s13  ;;  %v168_v32 = vmul.f32 %v973_v0, %v159_v24 }
  0x9a   :  { %v266_v27 = vpop.permute.xlu1 %265  ;;  %v155_v28 = vpop.permute.xlu0 %154 }
  0x9b   :  { %v160_v30 = vsel %vm158_vm0, %v153_v19, %v155_v28  ;;  %775 = vrot.lane.b32.xlu1 %v774_v25, %s836_s13  ;;  %v269_v36 = vsel %vm84_vm1, %v264_v57, %v266_v27  ;;  %v279_v47 = vmul.f32 %v979_v1, %v266_v27  ;;  %v752_v19 = vld [vmem:[%s1166_s2 + $0x6] ss:$8 sm:$0xf]  ;;  %v214_v25 = vrot.slane %v1046_v20, %v876_v5 }
  0x9c   :  { %v169_v33 = vmul.f32 %v946_v38, %v160_v30  ;;  %v278_v46 = vmul.f32 %v959_v48, %v269_v36  ;;  %v393_v23 = vrot.slane %v752_v19, %v876_v5  ;;  %v389_v24 = vrot.slane %v752_v19, %v874_v4  ;;  %v1067_v36 = vld [vmem:[%s1166_s2] ss:$8 sm:$0xf] }
  0x9d   :  { %v401_v29 = vrot.slane %v752_v19, %v891_v13  ;;  %v1072_v42 = vmul.f32 %v946_v38, %v214_v25 }
  0x9e   :  { %v338_v37 = vpop.permute.xlu0 %337  ;;  %v77_v40 = vpop.permute.xlu1 %76  ;;  %v804_v41 = vpack.i.bf16 %v169_v33, %v168_v32  ;;  %v809_v58 = vpack.i.bf16 %v279_v47, %v278_v46  ;;  %v397_v32 = vrot.slane %v752_v19, %v872_v3 }
  0x9f   :  { %v341_v43 = vsel %vm158_vm0, %v336_v7, %v338_v37  ;;  %v351_v44 = vmul.f32 %v979_v1, %v338_v37  ;;  %785 = vrot.lane.b32.xlu1 %v784_v35, %s836_s13  ;;  %v93_v6 = vmul.f32 %v1019_v55, %v77_v40  ;;  %v409_v46 = vmul.f32 %v979_v1, %v401_v29 }
  0xa0   :  { %v350_v45 = vmul.f32 %v959_v48, %v341_v43  ;;  %805 = vrot.lane.b32.xlu0 %v804_v41, %s836_s13  ;;  %v406_v41 = vmul.f32 %v946_v38, %v389_v24 }
  0xa2   :  { %v814_v50 = vpack.i.bf16 %v351_v44, %v350_v45  ;;  %v79_v51 = vpop.permute.xlu0 %78  ;;  %v81_v52 = vpop.permute.xlu1 %80 }
  0xa3   :  { %v85_v53 = vsel %vm84_vm1, %v77_v40, %v79_v51  ;;  %v86_v54 = vsel %vm84_vm1, %v79_v51, %v81_v52  ;;  %795 = vrot.lane.b32.xlu1 %v794_v49, %s837_s14  ;;  %v407_v40 = vmul.f32 %v951_v39, %v393_v23  ;;  %v408_v51 = vmul.f32 %v959_v48, %v397_v32 }
  0xa4   :  { %v94_v56 = vmul.f32 %v973_v0, %v85_v53  ;;  %v95_v57 = vmul.f32 %v946_v38, %v86_v54  ;;  %815 = vrot.lane.b32.xlu0 %v814_v50, %s836_s13 }
  0xa6   :  { %v157_v59 = vpop.permute.xlu0 %156  ;;  %v83_v60 = vpop.permute.xlu1 %82  ;;  %v824_v61 = vpack.i.bf16 %v95_v57, %v94_v56 }
  0xa7   :  { %v161_v63 = vsel %vm158_vm0, %v155_v28, %v157_v59  ;;  %v87_v2 = vsel %vm84_vm1, %v81_v52, %v83_v60  ;;  %810 = vrot.lane.b32.xlu1 %v809_v58, %s837_s14  ;;  %v171_v12 = vmul.f32 %v959_v48, %v157_v59  ;;  %v97_v14 = vmul.f32 %v959_v48, %v83_v60 }
  0xa8   :  { %v170_v7 = vmul.f32 %v951_v39, %v161_v63  ;;  %v96_v8 = vmul.f32 %v951_v39, %v87_v2  ;;  %825 = vrot.lane.b32.xlu0 %v824_v61, %s837_s14  ;;  %v31_v52 = vrot.slane %v1067_v36, %v876_v5  ;;  %v210_v58 = vrot.slane %v1046_v20, %v874_v4 }
  0xaa   :  { %v819_v10 = vpack.i.bf16 %v170_v7, %v167_v62  ;;  %v829_v11 = vpack.i.bf16 %v96_v8, %v93_v6 }
  0xac   :  { %820 = vrot.lane.b32.xlu1 %v819_v10, %s836_s13  ;;  %830 = vrot.lane.b32.xlu0 %v829_v11, %s837_s14 }
  0xb0   :  { %185 = vrot.lane.b32.xlu1 %v171_v12, %s836_s13 }
  0xb4   :  { %111 = vrot.lane.b32.xlu1 %v97_v14, %s837_s14 }
  0xf6   :  { %v771_v15 = vpop.permute.xlu0 %770 }
  0xf7   :  { %v773_v17 = vunpack.i.h.bf16 %v771_v15  ;;  %v772_v18 = vunpack.i.l.bf16 %v771_v15 }
  0xf9   :  { %v546_v28 = vsel %vm187_vm2, %v772_v18, %v773_v17 }
  0xfa   :  { %v1038_v16 = vpop.permute.xlu0 %780  ;;  %v611_v37 = vpack.c.bf16 %v546_v28, %v546_v28 }
  0xfb   :  { %v783_v26 = vunpack.i.h.bf16 %v1038_v16  ;;  %v782_v27 = vunpack.i.l.bf16 %v1038_v16 }
  0xfc   :  { %v621_v60 = vsel %vm619_vm4, %v611_v37, 0  ;;  %v222_v37 = vrot.slane %v1046_v20, %v891_v13 }
  0xfd   :  { %v475_v44 = vsel %vm113_vm3, %v782_v27, %v783_v26 }
  0xfe   :  { %v608_v61 = vpack.c.bf16 %v475_v44, %v407_v40 }
 0x102   :  { %v1050_v22 = vpop.permute.xlu0 %790 }
 0x103   :  { %v792_v30 = vunpack.i.l.bf16 %v1050_v22  ;;  %v793_v62 = vunpack.i.h.bf16 %v1050_v22 }
 0x105   :  { %v474_v50 = vsel %vm113_vm3, %v792_v30, %v782_v27 }
 0x106   :  { %v607_v6 = vpack.c.bf16 %v474_v50, %v406_v41  ;;  %v218_v50 = vrot.slane %v1046_v20, %v872_v3 }
 0x109   :  { %v1048_v21 = vpop.permute.xlu1 %765 }
 0x10a   :  { %v1062_v33 = vpop.permute.xlu0 %800  ;;  %v768_v7 = vunpack.i.h.bf16 %v1048_v21  ;;  %v767_v8 = vunpack.i.l.bf16 %v1048_v21 }
 0x10b   :  { %v802_v63 = vunpack.i.l.bf16 %v1062_v33  ;;  %v803_v9 = vunpack.i.h.bf16 %v1062_v33 }
 0x10c   :  { %v295_v30 = vsel %vm113_vm3, %v768_v7, %v793_v62 }
 0x10d   :  { %v776_v31 = vpop.permute.xlu1 %775 }
 0x10e   :  { %v778_v34 = vunpack.i.h.bf16 %v776_v31  ;;  %v777_v35 = vunpack.i.l.bf16 %v776_v31 }
 0x110   :  { %v547_v43 = vsel %vm187_vm2, %v773_v17, %v777_v35  ;;  %v548_v45 = vsel %vm187_vm2, %v777_v35, %v778_v34 }
 0x111   :  { %v786_v47 = vpop.permute.xlu1 %785  ;;  %v612_v49 = vpack.c.bf16 %v547_v43, %v547_v43  ;;  %v613_v57 = vpack.c.bf16 %v548_v45, %v548_v45 }
 0x112   :  { %v788_v53 = vunpack.i.h.bf16 %v786_v47  ;;  %v787_v54 = vunpack.i.l.bf16 %v786_v47  ;;  %v1082_v56 = vpop.permute.xlu0 %805 }
 0x113   :  { %v808_v59 = vunpack.i.h.bf16 %v1082_v56  ;;  %v807_v1 = vunpack.i.l.bf16 %v1082_v56  ;;  %755 = vmatprep.subr.msk.bf16.mxu0 %vm619_vm4, %v612_v49  ;;  %v627_v16 = vsel %vm619_vm4, %v613_v57, 0 }
 0x114   :  { %639 = vmatpush1.bf16.msra.mxu0 %v621_v60  ;;  %v549_v2 = vsel %vm187_vm2, %v778_v34, %v787_v54  ;;  %v368_v17 = vsel %vm187_vm2, %v788_v53, %v802_v63  ;;  %v367_v22 = vsel %vm187_vm2, %v803_v9, %v788_v53  ;;  %v227_v53 = vmul.f32 %v973_v0, %v210_v58 }
 0x115   :  { %v796_v10 = vpop.permute.xlu1 %795  ;;  %640 = vmatprep.subr.bf16.mxu0 %v608_v61  ;;  %v614_v11 = vpack.c.bf16 %v549_v2, %v549_v2  ;;  %v189_v21 = vsel %vm187_vm2, %v807_v1, %v808_v59  ;;  %v603_v35 = vpack.c.bf16 %v367_v22, %v295_v30  ;;  %v27_v54 = vrot.slane %v1067_v36, %v874_v4 }
 0x116   :  { %v798_v12 = vunpack.i.h.bf16 %v796_v10  ;;  %v797_v14 = vunpack.i.l.bf16 %v796_v10  ;;  %v816_v15 = vpop.permute.xlu0 %815  ;;  %v600_v40 = vpack.c.bf16 %v1072_v42, %v189_v21  ;;  %v39_v58 = vrot.slane %v1067_v36, %v891_v13 }
 0x117   :  { %v818_v18 = vunpack.i.h.bf16 %v816_v15  ;;  %v817_v19 = vunpack.i.l.bf16 %v816_v15  ;;  %757 = vmatprep.subr.msk.bf16.mxu1 %vm619_vm4, %v614_v11  ;;  %v229_v2 = vmul.f32 %v951_v39, %v218_v50 }
 0x118   :  { %641 = vmatpush1.bf16.msra.mxu0 %v607_v6  ;;  %680 = vmatpush1.bf16.msra.mxu1 %v627_v16  ;;  %v296_v23 = vsel %vm113_vm3, %v793_v62, %v797_v14  ;;  %v477_v24 = vsel %vm113_vm3, %v798_v12, %v767_v8  ;;  %v476_v25 = vsel %vm113_vm3, %v783_v26, %v798_v12 }
 0x119   :  { %v811_v27 = vpop.permute.xlu1 %810  ;;  %v604_v28 = vpack.c.bf16 %v368_v17, %v296_v23  ;;  %v610_v29 = vpack.c.bf16 %v477_v24, %v409_v46  ;;  %v609_v31 = vpack.c.bf16 %v476_v25, %v408_v51  ;;  %v370_v41 = vsel %vm187_vm2, %v817_v19, %v818_v18 }
 0x11a   :  { %v813_v32 = vunpack.i.h.bf16 %v811_v27  ;;  %v812_v33 = vunpack.i.l.bf16 %v811_v27  ;;  %v826_v34 = vpop.permute.xlu0 %825  ;;  %v369_v26 = vsel %vm187_vm2, %v802_v63, %v817_v19  ;;  %v45_v62 = vmul.f32 %v973_v0, %v31_v52 }
 0x11b   :  { %642 = vmatprep.subr.bf16.mxu0 %v604_v28  ;;  %681 = vmatprep.subr.bf16.mxu1 %v610_v29  ;;  %v828_v43 = vunpack.i.h.bf16 %v826_v34  ;;  %v827_v44 = vunpack.i.l.bf16 %v826_v34  ;;  %v230_v63 = vmul.f32 %v959_v48, %v222_v37  ;;  %v35_v6 = vrot.slane %v1067_v36, %v872_v3 }
 0x11c   :  { %643 = vmatpush1.bf16.msra.mxu0 %v603_v35  ;;  %682 = vmatpush1.bf16.msra.mxu1 %v609_v31  ;;  %v298_v45 = vsel %vm113_vm3, %v812_v33, %v813_v32  ;;  %v297_v46 = vsel %vm113_vm3, %v797_v14, %v812_v33  ;;  %v44_v52 = vmul.f32 %v1019_v55, %v27_v54  ;;  %v558_v14 = vld [vmem:[%s1168_s0] sm:$0xf] }
 0x11d   :  { %644 = vmatprep.subr.bf16.mxu0 %v600_v40  ;;  %v606_v47 = vpack.c.bf16 %v370_v41, %v298_v45  ;;  %v605_v49 = vpack.c.bf16 %v369_v26, %v297_v46  ;;  %v115_v20 = vsel %vm113_vm3, %v827_v44, %v828_v43  ;;  %v47_v10 = vmul.f32 %v951_v39, %v39_v58 }
 0x11e   :  { %v821_v51 = vpop.permute.xlu1 %820  ;;  %v831_v42 = vpop.permute.xlu0 %830  ;;  %v596_v8 = vpack.c.bf16 %v115_v20, %v45_v62  ;;  %v46_v36 = vmul.f32 %v946_v38, %v35_v6 }
 0x11f   :  { %v823_v57 = vunpack.i.h.bf16 %v821_v51  ;;  %v822_v60 = vunpack.i.l.bf16 %v821_v51  ;;  %v832_v61 = vunpack.i.l.bf16 %v831_v42  ;;  %683 = vmatprep.subr.bf16.mxu1 %v606_v47  ;;  %v833_v5 = vunpack.i.h.bf16 %v831_v42 }
 0x120   :  { %684 = vmatpush1.bf16.msra.mxu1 %v605_v49 }
 0x121   :  { %v188_v4 = vsel %vm187_vm2, %v822_v60, %v807_v1  ;;  %v190_v48 = vsel %vm187_vm2, %v808_v59, %v823_v57  ;;  %v114_v9 = vsel %vm113_vm3, %v832_v61, %v827_v44  ;;  %v116_v59 = vsel %vm113_vm3, %v828_v43, %v833_v5 }
 0x122   :  { %v186_v7 = vpop.permute.xlu1 %185  ;;  %v599_v0 = vpack.c.bf16 %v227_v53, %v188_v4  ;;  %v601_v3 = vpack.c.bf16 %v229_v2, %v190_v48  ;;  %v595_v56 = vpack.c.bf16 %v114_v9, %v44_v52  ;;  %v597_v39 = vpack.c.bf16 %v116_v59, %v46_v36 }
 0x123   :  { %v191_v13 = vsel %vm187_vm2, %v823_v57, %v186_v7 }
 0x124   :  { %v602_v1 = vpack.c.bf16 %v230_v63, %v191_v13  ;;  %645 = vmatpush1.bf16.msra.mxu0 %v599_v0 }
 0x125   :  { %646 = vmatprep.subr.bf16.mxu0 %v596_v8 }
 0x126   :  { %685 = vmatprep.subr.bf16.mxu1 %v602_v1  ;;  %v112_v11 = vpop.permute.xlu1 %111 }
 0x127   :  { %v117_v55 = vsel %vm113_vm3, %v833_v5, %v112_v11  ;;  %686 = vmatpush1.bf16.msra.mxu1 %v601_v3 }
 0x128   :  { %v598_v12 = vpack.c.bf16 %v117_v55, %v47_v10  ;;  %647 = vmatpush1.bf16.msra.mxu0 %v595_v56 }
 0x12a   :  { %687 = vmatprep.subr.bf16.mxu1 %v598_v12 }
 0x12b   :  { %756 = vmatmul.mubr.msk.bf16.vlgmr.msra.gmra.mxu0 %vm615_vm5, %v558_v14  ;;  %688 = vmatpush1.bf16.msra.mxu1 %v597_v39 }
 0x12e   :  { %758 = vmatmul.mubr.msk.bf16.vlgmr.msra.gmra.mxu1 %vm615_vm5, %v558_v14 }
 0x1eb   :  { %v666_v38 = vpop.f32.mrf.mxu0 }
 0x1ec   :  { %731 = vst [vmem:[%s1169_s3] sm:$0xff] %v666_v38  ;;  %v721_v16 = vmul.f32 %v666_v38, %v666_v38 }
 0x1ed   :  { %v668_v15 = vpop.f32.mrf.mxu0 }
 0x1ee   :  { %v714_v17 = vadd.f32 %v668_v15, %v666_v38  ;;  %v722_v18 = vmul.f32 %v668_v15, %v668_v15  ;;  %732 = vst [vmem:[%s1169_s3 + $0x8] sm:$0xff] %v668_v15  ;;  %v707_v19 = vpop.f32.mrf.mxu1 }
 0x1ef   :  { %v723_v22 = vmul.f32 %v707_v19, %v707_v19  ;;  %733 = vst [vmem:[%s1169_s3 + $0x10] sm:$0xff] %v707_v19  ;;  %v670_v21 = vpop.f32.mrf.mxu0 }
 0x1f0   :  { %v709_v23 = vpop.f32.mrf.mxu1  ;;  %v715_v24 = vadd.f32 %v714_v17, %v707_v19  ;;  %v725_v25 = vadd.f32 %v722_v18, %v721_v16 }
 0x1f1   :  { %734 = vst [vmem:[%s1169_s3 + $0x18] sm:$0xff] %v709_v23  ;;  %v671_v27 = vpop.f32.mrf.mxu0  ;;  %v724_v28 = vmul.f32 %v709_v23, %v709_v23 }
 0x1f2   :  { %v711_v29 = vpop.f32.mrf.mxu1  ;;  %v716_v30 = vadd.f32 %v715_v24, %v709_v23  ;;  %v726_v31 = vadd.f32 %v725_v25, %v723_v22 }
 0x1f4   :  { %v712_v32 = vpop.f32.mrf.mxu1  ;;  %717 = vadd.xlane.f32.xlu0 %v716_v30  ;;  %v727_v33 = vadd.f32 %v726_v31, %v724_v28 }
 0x1f6   :  { %728 = vadd.xlane.f32.xlu1 %v727_v33 }
 0x27d   :  { %v718_v34 = vpop.xlane.xlu0 %717 }
 0x27e   :  { %720 = vst.msk [vmem:[%s1170_s4] sm:$0xff] %vm719_vm6, %v718_v34 }
 0x27f   :  { %v729_v35 = vpop.xlane.xlu1 %728 }
 0x280   :  { %730 = vst.msk [vmem:[%s1171_s5] sm:$0xff] %vm719_vm6, %v729_v35 }

// kernel: drnet_forward.73
= control target key start
LH: loop header
LB: loop body
LE: loop exit
PB: predicated region body
PF: predicated region fallthrough
CT: control target
= control target key end

     0   :  { %vm34_vm0 = vcmask 1043456   ;;  %v149_v3 = vmov 0   ;;  %vm30_vm1 = vcmask 64512   ;;  %s198_s1 = inlined_call_operand.vmem [shape: f32[8,512], index: 1, kind: input, shape index: {}]   ;;  %s199_s2 = inlined_call_operand.vmem [shape: f32[3,1], index: 2, kind: input, shape index: {}]   ;;  %s200_s0 = inlined_call_operand.vmem [shape: bf16[3,8], index: 0, kind: input, shape index: {}]   ;;  %s201_s3 = inlined_call_operand.vmem [shape: f32[3,512], index: 3, kind: output, shape index: {}]  }
   0x1   :  { %v17_v0 = vld [vmem:[%s198_s1 + $0x8] sm:$0xff]  ;;  %v19_v1 = vld [vmem:[%s198_s1 + $0x18] sm:$0xff]  ;;  %v16_v2 = vld [vmem:[%s198_s1] sm:$0xff]  ;;  %79 = vmatprep.mubr.bf16.mxu0 %v149_v3  ;;  %120 = vmatprep.mubr.bf16.mxu1 %v149_v3 }
   0x2   :  { %v21_v4 = vpack.c.bf16 %v17_v0, %v17_v0  ;;  %v23_v5 = vpack.c.bf16 %v19_v1, %v19_v1  ;;  %v20_v6 = vpack.c.bf16 %v16_v2, %v16_v2  ;;  %v18_v7 = vld [vmem:[%s198_s1 + $0x10] sm:$0xff]  ;;  %148 = vset.pattern.permute.xlu0 %v149_v3  ;;  %v24_v8 = vld [vmem:[%s199_s2] sm:$0x7] }
   0x3   :  { %v22_v9 = vpack.c.bf16 %v18_v7, %v18_v7  ;;  %27 = vperm.xlu0 %148, %v24_v8   ;;  %v15_v12 = vld [vmem:[%s200_s0] sm:$0x3] }
   0x4   :  { %143 = vmatprep.subr.msk.bf16.mxu0 %vm34_vm0, %v21_v4  ;;  %145 = vmatprep.subr.msk.bf16.mxu1 %vm34_vm0, %v23_v5  ;;  %v36_v10 = vsel %vm34_vm0, %v20_v6, 0 }
   0x5   :  { %62 = vmatpush1.bf16.msra.mxu0 %v36_v10  ;;  %v42_v11 = vsel %vm34_vm0, %v22_v9, 0 }
   0x6   :  { %103 = vmatpush1.bf16.msra.mxu1 %v42_v11 }
   0x8   :  { %144 = vmatmul.mubr.msk.bf16.vlgmr.msra.gmra.mxu0 %vm30_vm1, %v15_v12 }
   0x9   :  { %146 = vmatmul.mubr.msk.bf16.vlgmr.msra.gmra.mxu1 %vm30_vm1, %v15_v12 }
  0x7e   :  { %v28_v13 = vpop.permute.xlu0 %27 }
  0xc8   :  { %v81_v14 = vpop.f32.mrf.mxu0 }
  0xc9   :  { %v122_v15 = vpop.f32.mrf.mxu1  ;;  %v82_v17 = vadd.f32 %v81_v14, %v28_v13 }
  0xca   :  { %v83_v16 = vpop.f32.mrf.mxu0  ;;  %v123_v20 = vadd.f32 %v122_v15, %v28_v13 }
  0xcb   :  { %v84_v18 = vadd.f32 %v83_v16, %v28_v13  ;;  %v124_v19 = vpop.f32.mrf.mxu1 }
  0xcc   :  { %v125_v21 = vadd.f32 %v124_v19, %v28_v13  ;;  %v85_v22 = vpop.f32.mrf.mxu0 }
  0xcd   :  { %v133_v23 = vcombine.low %v82_v17, %v84_v18  ;;  %v126_v24 = vpop.f32.mrf.mxu1 }
  0xce   :  { %v134_v25 = vcombine.low %v123_v20, %v125_v21  ;;  %v86_v26 = vpop.f32.mrf.mxu0 }
  0xcf   :  { %137 = vst [vmem:[%s201_s3] sm:$0x77] %v133_v23  ;;  %v127_v27 = vpop.f32.mrf.mxu1 }
  0xd0   :  { %138 = vst [vmem:[%s201_s3 + $0x8] sm:$0x77] %v134_v25 }

</bundles_post_ra>
